<compile_context>
chip_gen: v6e
topology: v6e:2x2x1
jax: 0.10.0
libtpu: 0.0.40
codegen_flags: <defaults>
</compile_context>

<pallas_src>
import functools

import numpy as np
import jax
import jax.numpy as jnp
from jax.experimental import pallas as pl
from jax.experimental.pallas import tpu as pltpu


LOGITS_PAD = 128  # lane-dense logits / hidden width inside the kernel

# (H, W, Cin, Cout) of each conv layer's *input*.
_CONV_GEOM = {"conv1": (32, 32, 3, 6), "conv2": (16, 16, 6, 16),
              "conv3": (8, 8, 16, 32), "conv4": (4, 4, 32, 64),
              "conv5": (2, 2, 64, 128)}

# (C, H_out, W_out) of the pooled activation feeding each head; W_out*C == 128.
_HEAD_GEOM = {"exit1": (16, 8, 8), "exit2": (32, 4, 4),
              "exit3": (64, 2, 2), "fc": (128, 1, 1)}


# ----------------------------- in-kernel helpers ----------------------------

def _zero_halo(p, Bblk, H, W, C):
    """Zero only the 1-px halo strips of a padded (Bblk, H+2, (W+2)*C) buffer;
    the interior is fully overwritten every grid step."""
    Hp, Wp = H + 2, W + 2
    row = jnp.zeros((Bblk, 1, Wp * C), jnp.bfloat16)
    col = jnp.zeros((Bblk, Hp, C), jnp.bfloat16)
    p[:, 0:1, :] = row
    p[:, Hp - 1:Hp, :] = row
    p[:, :, 0:C] = col
    p[:, :, (Wp - 1) * C:] = col


def _conv_relu_pool(pin, wb, bt, Bblk, H, W, Cin, Cout):
    """Conv3x3 (stride 1, pad 1) + bias + ReLU + MaxPool2x2 for Bblk images.

    pin : VMEM ref (Bblk, H+2, (W+2)*Cin) bf16 -- lane-fused padded input
    wb  : ref (3*(W+2)*Cin, W*Cout) bf16 -- banded conv weight, even output
          pixels in lanes [0, W/2*Cout), odd pixels in [W/2*Cout, W*Cout)
    bt  : ref (1, W*Cout) f32 -- bias tiled over the W output pixels
    returns pooled activation (Bblk, H//2, (W//2)*Cout) bf16, lane-dense.
    """
    Hp, Wp = H + 2, W + 2
    H2, W2 = H // 2, W // 2
    half = W2 * Cout
    # LHS: three vertically-shifted padded row slabs, concatenated on lanes.
    lhs = jnp.concatenate([pin[:, kh:kh + H, :] for kh in range(3)], axis=-1)
    lhs = lhs.reshape(Bblk * H, 3 * Wp * Cin)
    # One MXU matmul for the whole layer: M=Bblk*H, K=3*(W+2)*Cin, N=W*Cout.
    acc = jnp.dot(lhs, wb[...], preferred_element_type=jnp.float32)
    acc = jnp.maximum(acc + bt[...], 0.0)
    # 2x2 stride-2 max pool: horizontal half is a single lane-aligned VPU max
    # (even/odd pixel halves), vertical half is a sublane-pair max.
    hp = jnp.maximum(acc[:, :half], acc[:, half:])
    z = jnp.max(hp.reshape(Bblk * H2, 2, half), axis=1)
    return z.astype(jnp.bfloat16).reshape(Bblk, H2, half)


def _flatten_hwc(z):
    """(Bblk, S, 128) bf16 -> (Bblk, S*128): per-image HWC flatten via
    lane-aligned concatenation (no minor-dim reshape)."""
    S = z.shape[1]
    if S == 1:
        return z[:, 0, :]
    return jnp.concatenate([z[:, s, :] for s in range(S)], axis=-1)


def _head(xin, w1, b1, w2, b2, w3, b3):
    """3-layer MLP head; xin (Bblk, K1) bf16, weights bf16 padded to 128
    output lanes, biases (1, 128) f32.  One K=K1 matmul for layer 1."""
    h = jnp.dot(xin, w1[...], preferred_element_type=jnp.float32) + b1[...]
    h = jnp.maximum(h, 0.0).astype(jnp.bfloat16)
    h = jnp.dot(h, w2[...], preferred_element_type=jnp.float32) + b2[...]
    h = jnp.maximum(h, 0.0).astype(jnp.bfloat16)
    return jnp.dot(h, w3[...], preferred_element_type=jnp.float32) + b3[...]


def _alexnet_kernel(x_ref,
                    c1w, c1b, c2w, c2b, c3w, c3b, c4w, c4b, c5w, c5b,
                    e1w1, e1b1, e1w2, e1b2, e1w3, e1b3,
                    e2w1, e2b1, e2w2, e2b2, e2w3, e2b3,
                    e3w1, e3b1, e3w2, e3b2, e3w3, e3b3,
                    fw1, fb1, fw2, fb2, fw3, fb3,
                    o1, o2, o3, o4,
                    p0, p1, p2, p3, p4):
    Bblk = x_ref.shape[0]
    # Zero only the halo strips (done every step: with "parallel" semantics on
    # v7x each TensorCore has its own scratch, so we cannot gate on step 0).
    _zero_halo(p0, Bblk, 32, 32, 3)
    _zero_halo(p1, Bblk, 16, 16, 6)
    _zero_halo(p2, Bblk, 8, 8, 16)
    _zero_halo(p3, Bblk, 4, 4, 32)
    _zero_halo(p4, Bblk, 2, 2, 64)

    p0[:, 1:33, 3:99] = x_ref[...]

    z1 = _conv_relu_pool(p0, c1w, c1b, Bblk, 32, 32, 3, 6)      # (B, 16, 96)
    p1[:, 1:17, 6:102] = z1

    z2 = _conv_relu_pool(p1, c2w, c2b, Bblk, 16, 16, 6, 16)     # (B, 8, 128)
    p2[:, 1:9, 16:144] = z2
    o1[...] = _head(_flatten_hwc(z2), e1w1, e1b1, e1w2, e1b2, e1w3, e1b3)

    z3 = _conv_relu_pool(p2, c3w, c3b, Bblk, 8, 8, 16, 32)      # (B, 4, 128)
    p3[:, 1:5, 32:160] = z3
    o2[...] = _head(_flatten_hwc(z3), e2w1, e2b1, e2w2, e2b2, e2w3, e2b3)

    z4 = _conv_relu_pool(p3, c4w, c4b, Bblk, 4, 4, 32, 64)      # (B, 2, 128)
    p4[:, 1:3, 64:192] = z4
    o3[...] = _head(_flatten_hwc(z4), e3w1, e3b1, e3w2, e3b2, e3w3, e3b3)

    z5 = _conv_relu_pool(p4, c5w, c5b, Bblk, 2, 2, 64, 128)     # (B, 1, 128)
    o4[...] = _head(_flatten_hwc(z5), fw1, fb1, fw2, fb2, fw3, fb3)


# ----------------------------- pallas_call wrapper ---------------------------

def _zero_index_map(ndim):
    return lambda bi: (0,) * ndim


def alexnet_pallas(flat, x_nhwc, block_b=8):
    """Runs the fused kernel.  Returns 4 padded (B, 128) logits arrays
    (exit1, exit2, exit3, fc)."""
    B, H, W, C = x_nhwc.shape
    assert (H, W, C) == (32, 32, 3), "AlexNet variant expects 3x32x32 inputs"

    Bblk = min(B, block_b)
    nsteps = -(-B // Bblk)
    Bpad = nsteps * Bblk
    x = x_nhwc
    if Bpad != B:
        x = jnp.pad(x, ((0, Bpad - B), (0, 0), (0, 0), (0, 0)))
    # Fuse (W, C) onto the lane dim and cast to bf16 outside the kernel.
    x = x.reshape(Bpad, 32, 96).astype(jnp.bfloat16)

    in_specs = [pl.BlockSpec((Bblk, 32, 96), lambda bi: (bi, 0, 0))]
    in_specs += [pl.BlockSpec(a.shape, _zero_index_map(a.ndim)) for a in flat]

    out_shape = tuple(jax.ShapeDtypeStruct((Bpad, LOGITS_PAD), jnp.float32)
                      for _ in range(4))
    out_specs = tuple(pl.BlockSpec((Bblk, LOGITS_PAD), lambda bi: (bi, 0))
                      for _ in range(4))

    scratch = [
        pltpu.VMEM((Bblk, 34, 34 * 3), jnp.bfloat16),    # padded input
        pltpu.VMEM((Bblk, 18, 18 * 6), jnp.bfloat16),    # padded conv1 out
        pltpu.VMEM((Bblk, 10, 10 * 16), jnp.bfloat16),   # padded conv2 out
        pltpu.VMEM((Bblk, 6, 6 * 32), jnp.bfloat16),     # padded conv3 out
        pltpu.VMEM((Bblk, 4, 4 * 64), jnp.bfloat16),     # padded conv4 out
    ]

    outs = pl.pallas_call(
        _alexnet_kernel,
        out_shape=out_shape,
        grid=(nsteps,),
        in_specs=in_specs,
        out_specs=out_specs,
        scratch_shapes=scratch,
        compiler_params=pltpu.CompilerParams(
            dimension_semantics=("parallel",)),
    )(x, *flat)
    if Bpad != B:
        outs = tuple(o[:B] for o in outs)
    return outs


# ------------------------------- parameters ---------------------------------

def init_params(key, num_classes=10):
    """Parameters in the PyTorch module's conventions: conv w (3,3,Cin,Cout),
    b (Cout,); linear w (Fin, Fout) with Fin in NCHW-flatten (C*H*W) order."""
    def conv_p(k, cin, cout):
        k1, k2 = jax.random.split(k)
        s = 1.0 / np.sqrt(cin * 9)
        return (jax.random.uniform(k1, (3, 3, cin, cout), jnp.float32, -s, s),
                jax.random.uniform(k2, (cout,), jnp.float32, -s, s))

    def lin_p(k, fin, fout):
        k1, k2 = jax.random.split(k)
        s = 1.0 / np.sqrt(fin)
        return (jax.random.uniform(k1, (fin, fout), jnp.float32, -s, s),
                jax.random.uniform(k2, (fout,), jnp.float32, -s, s))

    def head_p(k, fin):
        k1, k2, k3 = jax.random.split(k, 3)
        return (lin_p(k1, fin, 120), lin_p(k2, 120, 84),
                lin_p(k3, 84, num_classes))

    ks = jax.random.split(key, 9)
    return {
        "conv1": conv_p(ks[0], 3, 6),
        "conv2": conv_p(ks[1], 6, 16),
        "conv3": conv_p(ks[2], 16, 32),
        "conv4": conv_p(ks[3], 32, 64),
        "conv5": conv_p(ks[4], 64, 128),
        "exit1": head_p(ks[5], 8 * 8 * 16),
        "exit2": head_p(ks[6], 4 * 4 * 32),
        "exit3": head_p(ks[7], 2 * 2 * 64),
        "fc":    head_p(ks[8], 128),
    }


def _pad2(w, rows, cols):
    out = jnp.zeros((rows, cols), w.dtype)
    return out.at[:w.shape[0], :w.shape[1]].set(w)


def _banded_conv_weight(w, H, W, Cin, Cout):
    """(3,3,Cin,Cout) HWIO conv kernel -> (3*(W+2)*Cin, W*Cout) banded matrix
    so that conv3x3(pad=1) over one lane-fused padded row-triple is a single
    matmul.  Output columns are ordered even-pixels-first / odd-pixels-second
    so the horizontal half of the 2x2 max-pool is one lane-aligned max."""
    w = np.asarray(w, np.float32)
    Wp, W2 = W + 2, W // 2
    wb = np.zeros((3 * Wp * Cin, W * Cout), np.float32)
    for wo in range(W):
        q, j = wo // 2, wo % 2
        col = j * (W2 * Cout) + q * Cout
        for kh in range(3):
            for kw in range(3):
                row = kh * (Wp * Cin) + (wo + kw) * Cin
                wb[row:row + Cin, col:col + Cout] = w[kh, kw]
    return jnp.asarray(wb)


def prepare_params(params):
    """Convert PyTorch-convention params into the fused-kernel layout:
       * conv weights -> banded (3*(W+2)*Cin, W*Cout) bf16 matrices with
         even/odd output-pixel column ordering; biases tiled to (1, W*Cout) f32
       * head first-layer rows permuted from NCHW-flatten (c,h,w) order to the
         kernel's NHWC-flatten (h,w,c) order, kept as one (H2*W2*C, 128) matrix
       * all head weights zero-padded to 128 output lanes and cast to bf16,
         biases padded to (1, 128) f32."""
    flat = []
    for name in ("conv1", "conv2", "conv3", "conv4", "conv5"):
        w, b = params[name]
        H, W, Cin, Cout = _CONV_GEOM[name]
        flat += [
            _banded_conv_weight(w, H, W, Cin, Cout).astype(jnp.bfloat16),
            jnp.tile(jnp.asarray(b, jnp.float32).reshape(1, Cout), (1, W)),
        ]

    for name in ("exit1", "exit2", "exit3", "fc"):
        (w1, b1), (w2, b2), (w3, b3) = params[name]
        C, H2, W2 = _HEAD_GEOM[name]
        w1p = w1.reshape(C, H2, W2, -1).transpose(1, 2, 0, 3)   # (H2,W2,C,120)
        w1p = w1p.reshape(H2 * W2 * C, -1)                      # HWC row order
        flat += [
            _pad2(w1p, H2 * W2 * C, LOGITS_PAD).astype(jnp.bfloat16),
            _pad2(b1.reshape(1, -1), 1, LOGITS_PAD).astype(jnp.float32),
            _pad2(w2, LOGITS_PAD, LOGITS_PAD).astype(jnp.bfloat16),
            _pad2(b2.reshape(1, -1), 1, LOGITS_PAD).astype(jnp.float32),
            _pad2(w3, LOGITS_PAD, LOGITS_PAD).astype(jnp.bfloat16),
            _pad2(b3.reshape(1, -1), 1, LOGITS_PAD).astype(jnp.float32),
        ]
    return tuple(flat)


# ------------------------------ forward pass ---------------------------------

def _entropy10(logits_row):
    # entropy of softmax(logits), normalized by log(10); NaN-safe (log_softmax).
    lp = jax.nn.log_softmax(logits_row, axis=-1)
    return -jnp.sum(jnp.exp(lp) * lp) / jnp.log(10.0)


@functools.partial(jax.jit, static_argnames=("num_classes",))
def alexnet_forward(flat, x_nchw, location, thresholds, num_classes=10):
    """Multi-exit forward.  Matches AlexNet.forward: returns the first exit
    whose sample-0 softmax entropy is below its threshold (or the exit selected
    by `location`), else the final fc logits.  All four heads are computed in
    one fused Pallas kernel and the result is selected in-graph."""
    x = jnp.transpose(x_nchw, (0, 2, 3, 1)).astype(jnp.float32)   # NCHW->NHWC
    l1p, l2p, l3p, l4p = alexnet_pallas(flat, x)
    l1, l2, l3, l4 = [l[:, :num_classes] for l in (l1p, l2p, l3p, l4p)]

    take1 = (_entropy10(l1[0]) < thresholds[0]) | (location == 1)
    take2 = (_entropy10(l2[0]) < thresholds[1]) | (location == 2)
    take3 = (_entropy10(l3[0]) < thresholds[2]) | (location == 3)
    out = jnp.where(take3, l3, l4)
    out = jnp.where(take2, l2, out)
    return jnp.where(take1, l1, out)


# ------------------------- pure-JAX reference (check) ------------------------

@jax.jit
def reference_forward(params, x_nchw, location, thresholds):
    x = x_nchw.astype(jnp.float32)

    def conv_block(x, w, b):
        y = jax.lax.conv_general_dilated(
            x, w, window_strides=(1, 1), padding=((1, 1), (1, 1)),
            dimension_numbers=("NCHW", "HWIO", "NCHW"))
        y = jax.nn.relu(y + b[None, :, None, None])
        return jax.lax.reduce_window(y, -jnp.inf, jax.lax.max,
                                     (1, 1, 2, 2), (1, 1, 2, 2), "VALID")

    def head(v, hp):
        (w1, b1), (w2, b2), (w3, b3) = hp
        v = jax.nn.relu(v @ w1 + b1)
        v = jax.nn.relu(v @ w2 + b2)
        return v @ w3 + b3

    x = conv_block(x, *params["conv1"])
    x = conv_block(x, *params["conv2"])
    l1 = head(x.reshape(x.shape[0], -1), params["exit1"])
    x = conv_block(x, *params["conv3"])
    l2 = head(x.reshape(x.shape[0], -1), params["exit2"])
    x = conv_block(x, *params["conv4"])
    l3 = head(x.reshape(x.shape[0], -1), params["exit3"])
    x = conv_block(x, *params["conv5"])
    l4 = head(x.reshape(x.shape[0], -1), params["fc"])

    t1 = (_entropy10(l1[0]) < thresholds[0]) | (location == 1)
    t2 = (_entropy10(l2[0]) < thresholds[1]) | (location == 2)
    t3 = (_entropy10(l3[0]) < thresholds[2]) | (location == 3)
    out = jnp.where(t3, l3, l4)
    out = jnp.where(t2, l2, out)
    return jnp.where(t1, l1, out)


# --------------------------------- driver ------------------------------------

if __name__ == "__main__":
    key = jax.random.PRNGKey(0)
    pkey, xkey = jax.random.split(key)
    params = init_params(pkey, num_classes=10)
    flat = prepare_params(params)
    # CIFAR-style input implied by the exit FC sizes (8*8*16 after conv2).
    x = jax.random.normal(xkey, (2, 3, 32, 32), dtype=jnp.float32)
    thresholds = (0.1, 0.1, 0.1)

    for loc in range(4):   # location=0 (run to fc) and forced exits 1..3
        out = alexnet_forward(flat, x, loc, thresholds)
        out = np.asarray(jax.block_until_ready(out))
        ref = np.asarray(reference_forward(params, x, loc, thresholds))
        assert out.shape == (2, 10) and out.dtype == np.float32
        assert np.isfinite(out).all()
        err = np.max(np.abs(out - ref)) / (np.max(np.abs(ref)) + 1e-6)
        assert err < 0.1, f"mismatch at location={loc}: rel-max err {err}"

    print("KERNEL_OK")
</pallas_src>

<mosaic_0001>
module attributes {stable_mosaic.version = 11 : i64} {
  func.func @_alexnet_kernel(%arg0: i32, %arg1: memref<2x32x96xbf16, #tpu.memory_space<vmem>>, %arg2: memref<306x192xbf16, #tpu.memory_space<vmem>>, %arg3: memref<1x192xf32, #tpu.memory_space<vmem>>, %arg4: memref<324x256xbf16, #tpu.memory_space<vmem>>, %arg5: memref<1x256xf32, #tpu.memory_space<vmem>>, %arg6: memref<480x256xbf16, #tpu.memory_space<vmem>>, %arg7: memref<1x256xf32, #tpu.memory_space<vmem>>, %arg8: memref<576x256xbf16, #tpu.memory_space<vmem>>, %arg9: memref<1x256xf32, #tpu.memory_space<vmem>>, %arg10: memref<768x256xbf16, #tpu.memory_space<vmem>>, %arg11: memref<1x256xf32, #tpu.memory_space<vmem>>, %arg12: memref<1024x128xbf16, #tpu.memory_space<vmem>>, %arg13: memref<1x128xf32, #tpu.memory_space<vmem>>, %arg14: memref<128x128xbf16, #tpu.memory_space<vmem>>, %arg15: memref<1x128xf32, #tpu.memory_space<vmem>>, %arg16: memref<128x128xbf16, #tpu.memory_space<vmem>>, %arg17: memref<1x128xf32, #tpu.memory_space<vmem>>, %arg18: memref<512x128xbf16, #tpu.memory_space<vmem>>, %arg19: memref<1x128xf32, #tpu.memory_space<vmem>>, %arg20: memref<128x128xbf16, #tpu.memory_space<vmem>>, %arg21: memref<1x128xf32, #tpu.memory_space<vmem>>, %arg22: memref<128x128xbf16, #tpu.memory_space<vmem>>, %arg23: memref<1x128xf32, #tpu.memory_space<vmem>>, %arg24: memref<256x128xbf16, #tpu.memory_space<vmem>>, %arg25: memref<1x128xf32, #tpu.memory_space<vmem>>, %arg26: memref<128x128xbf16, #tpu.memory_space<vmem>>, %arg27: memref<1x128xf32, #tpu.memory_space<vmem>>, %arg28: memref<128x128xbf16, #tpu.memory_space<vmem>>, %arg29: memref<1x128xf32, #tpu.memory_space<vmem>>, %arg30: memref<128x128xbf16, #tpu.memory_space<vmem>>, %arg31: memref<1x128xf32, #tpu.memory_space<vmem>>, %arg32: memref<128x128xbf16, #tpu.memory_space<vmem>>, %arg33: memref<1x128xf32, #tpu.memory_space<vmem>>, %arg34: memref<128x128xbf16, #tpu.memory_space<vmem>>, %arg35: memref<1x128xf32, #tpu.memory_space<vmem>>, %arg36: memref<2x128xf32, #tpu.memory_space<vmem>>, %arg37: memref<2x128xf32, #tpu.memory_space<vmem>>, %arg38: memref<2x128xf32, #tpu.memory_space<vmem>>, %arg39: memref<2x128xf32, #tpu.memory_space<vmem>>, %arg40: memref<2x34x102xbf16, #tpu.memory_space<vmem>>, %arg41: memref<2x18x108xbf16, #tpu.memory_space<vmem>>, %arg42: memref<2x10x160xbf16, #tpu.memory_space<vmem>>, %arg43: memref<2x6x192xbf16, #tpu.memory_space<vmem>>, %arg44: memref<2x4x256xbf16, #tpu.memory_space<vmem>>) attributes {dimension_semantics = [#tpu.dimension_semantics<parallel>], iteration_bounds = array<i64: 1>, scalar_prefetch = 0 : i64, scratch_operands = 5 : i64, tpu.core_type = #tpu.core_type<tc>, window_params = [{transform_indices = @transform_0, window_bounds = array<i64: 2, 32, 96>}, {pipeline_mode = #tpu.pipeline_mode<synchronous>, transform_indices = @transform_1, window_bounds = array<i64: 306, 192>}, {pipeline_mode = #tpu.pipeline_mode<synchronous>, transform_indices = @transform_2, window_bounds = array<i64: 1, 192>}, {pipeline_mode = #tpu.pipeline_mode<synchronous>, transform_indices = @transform_3, window_bounds = array<i64: 324, 256>}, {pipeline_mode = #tpu.pipeline_mode<synchronous>, transform_indices = @transform_4, window_bounds = array<i64: 1, 256>}, {pipeline_mode = #tpu.pipeline_mode<synchronous>, transform_indices = @transform_5, window_bounds = array<i64: 480, 256>}, {pipeline_mode = #tpu.pipeline_mode<synchronous>, transform_indices = @transform_6, window_bounds = array<i64: 1, 256>}, {pipeline_mode = #tpu.pipeline_mode<synchronous>, transform_indices = @transform_7, window_bounds = array<i64: 576, 256>}, {pipeline_mode = #tpu.pipeline_mode<synchronous>, transform_indices = @transform_8, window_bounds = array<i64: 1, 256>}, {pipeline_mode = #tpu.pipeline_mode<synchronous>, transform_indices = @transform_9, window_bounds = array<i64: 768, 256>}, {pipeline_mode = #tpu.pipeline_mode<synchronous>, transform_indices = @transform_10, window_bounds = array<i64: 1, 256>}, {pipeline_mode = #tpu.pipeline_mode<synchronous>, transform_indices = @transform_11, window_bounds = array<i64: 1024, 128>}, {pipeline_mode = #tpu.pipeline_mode<synchronous>, transform_indices = @transform_12, window_bounds = array<i64: 1, 128>}, {pipeline_mode = #tpu.pipeline_mode<synchronous>, transform_indices = @transform_13, window_bounds = array<i64: 128, 128>}, {pipeline_mode = #tpu.pipeline_mode<synchronous>, transform_indices = @transform_14, window_bounds = array<i64: 1, 128>}, {pipeline_mode = #tpu.pipeline_mode<synchronous>, transform_indices = @transform_15, window_bounds = array<i64: 128, 128>}, {pipeline_mode = #tpu.pipeline_mode<synchronous>, transform_indices = @transform_16, window_bounds = array<i64: 1, 128>}, {pipeline_mode = #tpu.pipeline_mode<synchronous>, transform_indices = @transform_17, window_bounds = array<i64: 512, 128>}, {pipeline_mode = #tpu.pipeline_mode<synchronous>, transform_indices = @transform_18, window_bounds = array<i64: 1, 128>}, {pipeline_mode = #tpu.pipeline_mode<synchronous>, transform_indices = @transform_19, window_bounds = array<i64: 128, 128>}, {pipeline_mode = #tpu.pipeline_mode<synchronous>, transform_indices = @transform_20, window_bounds = array<i64: 1, 128>}, {pipeline_mode = #tpu.pipeline_mode<synchronous>, transform_indices = @transform_21, window_bounds = array<i64: 128, 128>}, {pipeline_mode = #tpu.pipeline_mode<synchronous>, transform_indices = @transform_22, window_bounds = array<i64: 1, 128>}, {pipeline_mode = #tpu.pipeline_mode<synchronous>, transform_indices = @transform_23, window_bounds = array<i64: 256, 128>}, {pipeline_mode = #tpu.pipeline_mode<synchronous>, transform_indices = @transform_24, window_bounds = array<i64: 1, 128>}, {pipeline_mode = #tpu.pipeline_mode<synchronous>, transform_indices = @transform_25, window_bounds = array<i64: 128, 128>}, {pipeline_mode = #tpu.pipeline_mode<synchronous>, transform_indices = @transform_26, window_bounds = array<i64: 1, 128>}, {pipeline_mode = #tpu.pipeline_mode<synchronous>, transform_indices = @transform_27, window_bounds = array<i64: 128, 128>}, {pipeline_mode = #tpu.pipeline_mode<synchronous>, transform_indices = @transform_28, window_bounds = array<i64: 1, 128>}, {pipeline_mode = #tpu.pipeline_mode<synchronous>, transform_indices = @transform_29, window_bounds = array<i64: 128, 128>}, {pipeline_mode = #tpu.pipeline_mode<synchronous>, transform_indices = @transform_30, window_bounds = array<i64: 1, 128>}, {pipeline_mode = #tpu.pipeline_mode<synchronous>, transform_indices = @transform_31, window_bounds = array<i64: 128, 128>}, {pipeline_mode = #tpu.pipeline_mode<synchronous>, transform_indices = @transform_32, window_bounds = array<i64: 1, 128>}, {pipeline_mode = #tpu.pipeline_mode<synchronous>, transform_indices = @transform_33, window_bounds = array<i64: 128, 128>}, {pipeline_mode = #tpu.pipeline_mode<synchronous>, transform_indices = @transform_34, window_bounds = array<i64: 1, 128>}, {transform_indices = @transform_35, window_bounds = array<i64: 2, 128>}, {transform_indices = @transform_36, window_bounds = array<i64: 2, 128>}, {transform_indices = @transform_37, window_bounds = array<i64: 2, 128>}, {transform_indices = @transform_38, window_bounds = array<i64: 2, 128>}]} {
    %cst = arith.constant 0.000000e+00 : bf16
    %0 = vector.broadcast %cst : bf16 to vector<2x1x102xbf16>
    %cst_0 = arith.constant 0.000000e+00 : bf16
    %1 = vector.broadcast %cst_0 : bf16 to vector<2x34x3xbf16>
    %c0 = arith.constant 0 : index
    %c0_1 = arith.constant 0 : index
    %c0_2 = arith.constant 0 : index
    %2 = vector.load %arg40[%c0, %c0_1, %c0_2] : memref<2x34x102xbf16, #tpu.memory_space<vmem>>, vector<2x1x102xbf16>
    tpu.vector_store %arg40[%c0, %c0_1, %c0_2], %0 {strides = array<i32>} : memref<2x34x102xbf16, #tpu.memory_space<vmem>>, vector<2x1x102xbf16>,
    %c0_3 = arith.constant 0 : index
    %c33 = arith.constant 33 : index
    %c0_4 = arith.constant 0 : index
    %3 = vector.load %arg40[%c0_3, %c33, %c0_4] : memref<2x34x102xbf16, #tpu.memory_space<vmem>>, vector<2x1x102xbf16>
    tpu.vector_store %arg40[%c0_3, %c33, %c0_4], %0 {strides = array<i32>} : memref<2x34x102xbf16, #tpu.memory_space<vmem>>, vector<2x1x102xbf16>,
    %c0_5 = arith.constant 0 : index
    %c0_6 = arith.constant 0 : index
    %c0_7 = arith.constant 0 : index
    %4 = vector.load %arg40[%c0_5, %c0_6, %c0_7] : memref<2x34x102xbf16, #tpu.memory_space<vmem>>, vector<2x34x3xbf16>
    tpu.vector_store %arg40[%c0_5, %c0_6, %c0_7], %1 {strides = array<i32>} : memref<2x34x102xbf16, #tpu.memory_space<vmem>>, vector<2x34x3xbf16>,
    %c0_8 = arith.constant 0 : index
    %c0_9 = arith.constant 0 : index
    %c99 = arith.constant 99 : index
    %5 = vector.load %arg40[%c0_8, %c0_9, %c99] : memref<2x34x102xbf16, #tpu.memory_space<vmem>>, vector<2x34x3xbf16>
    tpu.vector_store %arg40[%c0_8, %c0_9, %c99], %1 {strides = array<i32>} : memref<2x34x102xbf16, #tpu.memory_space<vmem>>, vector<2x34x3xbf16>,
    %cst_10 = arith.constant 0.000000e+00 : bf16
    %6 = vector.broadcast %cst_10 : bf16 to vector<2x1x108xbf16>
    %cst_11 = arith.constant 0.000000e+00 : bf16
    %7 = vector.broadcast %cst_11 : bf16 to vector<2x18x6xbf16>
    %c0_12 = arith.constant 0 : index
    %c0_13 = arith.constant 0 : index
    %c0_14 = arith.constant 0 : index
    %8 = vector.load %arg41[%c0_12, %c0_13, %c0_14] : memref<2x18x108xbf16, #tpu.memory_space<vmem>>, vector<2x1x108xbf16>
    tpu.vector_store %arg41[%c0_12, %c0_13, %c0_14], %6 {strides = array<i32>} : memref<2x18x108xbf16, #tpu.memory_space<vmem>>, vector<2x1x108xbf16>,
    %c0_15 = arith.constant 0 : index
    %c17 = arith.constant 17 : index
    %c0_16 = arith.constant 0 : index
    %9 = vector.load %arg41[%c0_15, %c17, %c0_16] : memref<2x18x108xbf16, #tpu.memory_space<vmem>>, vector<2x1x108xbf16>
    tpu.vector_store %arg41[%c0_15, %c17, %c0_16], %6 {strides = array<i32>} : memref<2x18x108xbf16, #tpu.memory_space<vmem>>, vector<2x1x108xbf16>,
    %c0_17 = arith.constant 0 : index
    %c0_18 = arith.constant 0 : index
    %c0_19 = arith.constant 0 : index
    %10 = vector.load %arg41[%c0_17, %c0_18, %c0_19] : memref<2x18x108xbf16, #tpu.memory_space<vmem>>, vector<2x18x6xbf16>
    tpu.vector_store %arg41[%c0_17, %c0_18, %c0_19], %7 {strides = array<i32>} : memref<2x18x108xbf16, #tpu.memory_space<vmem>>, vector<2x18x6xbf16>,
    %c0_20 = arith.constant 0 : index
    %c0_21 = arith.constant 0 : index
    %c102 = arith.constant 102 : index
    %11 = vector.load %arg41[%c0_20, %c0_21, %c102] : memref<2x18x108xbf16, #tpu.memory_space<vmem>>, vector<2x18x6xbf16>
    tpu.vector_store %arg41[%c0_20, %c0_21, %c102], %7 {strides = array<i32>} : memref<2x18x108xbf16, #tpu.memory_space<vmem>>, vector<2x18x6xbf16>,
    %cst_22 = arith.constant 0.000000e+00 : bf16
    %12 = vector.broadcast %cst_22 : bf16 to vector<2x1x160xbf16>
    %cst_23 = arith.constant 0.000000e+00 : bf16
    %13 = vector.broadcast %cst_23 : bf16 to vector<2x10x16xbf16>
    %c0_24 = arith.constant 0 : index
    %c0_25 = arith.constant 0 : index
    %c0_26 = arith.constant 0 : index
    %14 = vector.load %arg42[%c0_24, %c0_25, %c0_26] : memref<2x10x160xbf16, #tpu.memory_space<vmem>>, vector<2x1x160xbf16>
    tpu.vector_store %arg42[%c0_24, %c0_25, %c0_26], %12 {strides = array<i32>} : memref<2x10x160xbf16, #tpu.memory_space<vmem>>, vector<2x1x160xbf16>,
    %c0_27 = arith.constant 0 : index
    %c9 = arith.constant 9 : index
    %c0_28 = arith.constant 0 : index
    %15 = vector.load %arg42[%c0_27, %c9, %c0_28] : memref<2x10x160xbf16, #tpu.memory_space<vmem>>, vector<2x1x160xbf16>
    tpu.vector_store %arg42[%c0_27, %c9, %c0_28], %12 {strides = array<i32>} : memref<2x10x160xbf16, #tpu.memory_space<vmem>>, vector<2x1x160xbf16>,
    %c0_29 = arith.constant 0 : index
    %c0_30 = arith.constant 0 : index
    %c0_31 = arith.constant 0 : index
    %16 = vector.load %arg42[%c0_29, %c0_30, %c0_31] : memref<2x10x160xbf16, #tpu.memory_space<vmem>>, vector<2x10x16xbf16>
    tpu.vector_store %arg42[%c0_29, %c0_30, %c0_31], %13 {strides = array<i32>} : memref<2x10x160xbf16, #tpu.memory_space<vmem>>, vector<2x10x16xbf16>,
    %c0_32 = arith.constant 0 : index
    %c0_33 = arith.constant 0 : index
    %c144 = arith.constant 144 : index
    %17 = vector.load %arg42[%c0_32, %c0_33, %c144] : memref<2x10x160xbf16, #tpu.memory_space<vmem>>, vector<2x10x16xbf16>
    tpu.vector_store %arg42[%c0_32, %c0_33, %c144], %13 {strides = array<i32>} : memref<2x10x160xbf16, #tpu.memory_space<vmem>>, vector<2x10x16xbf16>,
    %cst_34 = arith.constant 0.000000e+00 : bf16
    %18 = vector.broadcast %cst_34 : bf16 to vector<2x1x192xbf16>
    %cst_35 = arith.constant 0.000000e+00 : bf16
    %19 = vector.broadcast %cst_35 : bf16 to vector<2x6x32xbf16>
    %c0_36 = arith.constant 0 : index
    %c0_37 = arith.constant 0 : index
    %c0_38 = arith.constant 0 : index
    %20 = vector.load %arg43[%c0_36, %c0_37, %c0_38] : memref<2x6x192xbf16, #tpu.memory_space<vmem>>, vector<2x1x192xbf16>
    tpu.vector_store %arg43[%c0_36, %c0_37, %c0_38], %18 {strides = array<i32>} : memref<2x6x192xbf16, #tpu.memory_space<vmem>>, vector<2x1x192xbf16>,
    %c0_39 = arith.constant 0 : index
    %c5 = arith.constant 5 : index
    %c0_40 = arith.constant 0 : index
    %21 = vector.load %arg43[%c0_39, %c5, %c0_40] : memref<2x6x192xbf16, #tpu.memory_space<vmem>>, vector<2x1x192xbf16>
    tpu.vector_store %arg43[%c0_39, %c5, %c0_40], %18 {strides = array<i32>} : memref<2x6x192xbf16, #tpu.memory_space<vmem>>, vector<2x1x192xbf16>,
    %c0_41 = arith.constant 0 : index
    %c0_42 = arith.constant 0 : index
    %c0_43 = arith.constant 0 : index
    %22 = vector.load %arg43[%c0_41, %c0_42, %c0_43] : memref<2x6x192xbf16, #tpu.memory_space<vmem>>, vector<2x6x32xbf16>
    tpu.vector_store %arg43[%c0_41, %c0_42, %c0_43], %19 {strides = array<i32>} : memref<2x6x192xbf16, #tpu.memory_space<vmem>>, vector<2x6x32xbf16>,
    %c0_44 = arith.constant 0 : index
    %c0_45 = arith.constant 0 : index
    %c160 = arith.constant 160 : index
    %23 = vector.load %arg43[%c0_44, %c0_45, %c160] : memref<2x6x192xbf16, #tpu.memory_space<vmem>>, vector<2x6x32xbf16>
    tpu.vector_store %arg43[%c0_44, %c0_45, %c160], %19 {strides = array<i32>} : memref<2x6x192xbf16, #tpu.memory_space<vmem>>, vector<2x6x32xbf16>,
    %cst_46 = arith.constant 0.000000e+00 : bf16
    %24 = vector.broadcast %cst_46 : bf16 to vector<2x1x256xbf16>
    %cst_47 = arith.constant 0.000000e+00 : bf16
    %25 = vector.broadcast %cst_47 : bf16 to vector<2x4x64xbf16>
    %c0_48 = arith.constant 0 : index
    %c0_49 = arith.constant 0 : index
    %c0_50 = arith.constant 0 : index
    %26 = vector.load %arg44[%c0_48, %c0_49, %c0_50] : memref<2x4x256xbf16, #tpu.memory_space<vmem>>, vector<2x1x256xbf16>
    tpu.vector_store %arg44[%c0_48, %c0_49, %c0_50], %24 {strides = array<i32>} : memref<2x4x256xbf16, #tpu.memory_space<vmem>>, vector<2x1x256xbf16>,
    %c0_51 = arith.constant 0 : index
    %c3 = arith.constant 3 : index
    %c0_52 = arith.constant 0 : index
    %27 = vector.load %arg44[%c0_51, %c3, %c0_52] : memref<2x4x256xbf16, #tpu.memory_space<vmem>>, vector<2x1x256xbf16>
    tpu.vector_store %arg44[%c0_51, %c3, %c0_52], %24 {strides = array<i32>} : memref<2x4x256xbf16, #tpu.memory_space<vmem>>, vector<2x1x256xbf16>,
    %c0_53 = arith.constant 0 : index
    %c0_54 = arith.constant 0 : index
    %c0_55 = arith.constant 0 : index
    %28 = vector.load %arg44[%c0_53, %c0_54, %c0_55] : memref<2x4x256xbf16, #tpu.memory_space<vmem>>, vector<2x4x64xbf16>
    tpu.vector_store %arg44[%c0_53, %c0_54, %c0_55], %25 {strides = array<i32>} : memref<2x4x256xbf16, #tpu.memory_space<vmem>>, vector<2x4x64xbf16>,
    %c0_56 = arith.constant 0 : index
    %c0_57 = arith.constant 0 : index
    %c192 = arith.constant 192 : index
    %29 = vector.load %arg44[%c0_56, %c0_57, %c192] : memref<2x4x256xbf16, #tpu.memory_space<vmem>>, vector<2x4x64xbf16>
    tpu.vector_store %arg44[%c0_56, %c0_57, %c192], %25 {strides = array<i32>} : memref<2x4x256xbf16, #tpu.memory_space<vmem>>, vector<2x4x64xbf16>,
    %c0_58 = arith.constant 0 : index
    %c0_59 = arith.constant 0 : index
    %c0_60 = arith.constant 0 : index
    %30 = vector.load %arg1[%c0_58, %c0_59, %c0_60] : memref<2x32x96xbf16, #tpu.memory_space<vmem>>, vector<2x32x96xbf16>
    %c0_61 = arith.constant 0 : index
    %c1 = arith.constant 1 : index
    %c3_62 = arith.constant 3 : index
    %31 = vector.load %arg40[%c0_61, %c1, %c3_62] : memref<2x34x102xbf16, #tpu.memory_space<vmem>>, vector<2x32x96xbf16>
    tpu.vector_store %arg40[%c0_61, %c1, %c3_62], %30 {strides = array<i32>} : memref<2x34x102xbf16, #tpu.memory_space<vmem>>, vector<2x32x96xbf16>,
    %c0_63 = arith.constant 0 : index
    %c0_64 = arith.constant 0 : index
    %c0_65 = arith.constant 0 : index
    %32 = vector.load %arg40[%c0_63, %c0_64, %c0_65] : memref<2x34x102xbf16, #tpu.memory_space<vmem>>, vector<2x32x102xbf16>
    %c0_66 = arith.constant 0 : index
    %c1_67 = arith.constant 1 : index
    %c0_68 = arith.constant 0 : index
    %33 = vector.load %arg40[%c0_66, %c1_67, %c0_68] : memref<2x34x102xbf16, #tpu.memory_space<vmem>>, vector<2x32x102xbf16>
    %c0_69 = arith.constant 0 : index
    %c2 = arith.constant 2 : index
    %c0_70 = arith.constant 0 : index
    %34 = vector.load %arg40[%c0_69, %c2, %c0_70] : memref<2x34x102xbf16, #tpu.memory_space<vmem>>, vector<2x32x102xbf16>
    %35 = tpu.concatenate %32, %33, %34 in 2 : vector<2x32x102xbf16>, vector<2x32x102xbf16>, vector<2x32x102xbf16> -> vector<2x32x306xbf16>
    %36 = vector.shape_cast %35 : vector<2x32x306xbf16> to vector<64x306xbf16>
    %c0_71 = arith.constant 0 : index
    %c0_72 = arith.constant 0 : index
    %37 = vector.load %arg2[%c0_71, %c0_72] : memref<306x192xbf16, #tpu.memory_space<vmem>>, vector<306x192xbf16>
    %cst_73 = arith.constant dense<0.000000e+00> : vector<64x192xf32>
    %38 = tpu.matmul %36, %37, %cst_73 {dimension_numbers = #tpu.dot_dimension_numbers<[1], [0], [0], [1], [0, 0, 1, 1], [], []>} : vector<64x306xbf16>, vector<306x192xbf16>, vector<64x192xf32> -> vector<64x192xf32>
    %c0_74 = arith.constant 0 : index
    %c0_75 = arith.constant 0 : index
    %39 = vector.load %arg3[%c0_74, %c0_75] : memref<1x192xf32, #tpu.memory_space<vmem>>, vector<1x192xf32>
    %40 = vector.broadcast %39 : vector<1x192xf32> to vector<64x192xf32>
    %41 = arith.addf %38, %40 : vector<64x192xf32>
    %cst_76 = arith.constant 0.000000e+00 : f32
    %42 = vector.broadcast %cst_76 : f32 to vector<64x192xf32>
    %43 = arith.maximumf %41, %42 : vector<64x192xf32>
    %44 = vector.extract_strided_slice %43 {offsets = [0, 0], sizes = [64, 96], strides = [1, 1]} : vector<64x192xf32> to vector<64x96xf32>
    %45 = vector.extract_strided_slice %43 {offsets = [0, 96], sizes = [64, 96], strides = [1, 1]} : vector<64x192xf32> to vector<64x96xf32>
    %46 = arith.maximumf %44, %45 : vector<64x96xf32>
    %47 = vector.shape_cast %46 : vector<64x96xf32> to vector<32x2x96xf32>
    %cst_77 = arith.constant dense<0xFF800000> : vector<32x96xf32>
    %48 = vector.multi_reduction <maximumf>, %47, %cst_77 [1] : vector<32x2x96xf32> to vector<32x96xf32>
    %49 = arith.truncf %48 : vector<32x96xf32> to vector<32x96xbf16>
    %50 = vector.shape_cast %49 : vector<32x96xbf16> to vector<2x16x96xbf16>
    %c0_78 = arith.constant 0 : index
    %c1_79 = arith.constant 1 : index
    %c6 = arith.constant 6 : index
    %51 = vector.load %arg41[%c0_78, %c1_79, %c6] : memref<2x18x108xbf16, #tpu.memory_space<vmem>>, vector<2x16x96xbf16>
    tpu.vector_store %arg41[%c0_78, %c1_79, %c6], %50 {strides = array<i32>} : memref<2x18x108xbf16, #tpu.memory_space<vmem>>, vector<2x16x96xbf16>,
    %c0_80 = arith.constant 0 : index
    %c0_81 = arith.constant 0 : index
    %c0_82 = arith.constant 0 : index
    %52 = vector.load %arg41[%c0_80, %c0_81, %c0_82] : memref<2x18x108xbf16, #tpu.memory_space<vmem>>, vector<2x16x108xbf16>
    %c0_83 = arith.constant 0 : index
    %c1_84 = arith.constant 1 : index
    %c0_85 = arith.constant 0 : index
    %53 = vector.load %arg41[%c0_83, %c1_84, %c0_85] : memref<2x18x108xbf16, #tpu.memory_space<vmem>>, vector<2x16x108xbf16>
    %c0_86 = arith.constant 0 : index
    %c2_87 = arith.constant 2 : index
    %c0_88 = arith.constant 0 : index
    %54 = vector.load %arg41[%c0_86, %c2_87, %c0_88] : memref<2x18x108xbf16, #tpu.memory_space<vmem>>, vector<2x16x108xbf16>
    %55 = tpu.concatenate %52, %53, %54 in 2 : vector<2x16x108xbf16>, vector<2x16x108xbf16>, vector<2x16x108xbf16> -> vector<2x16x324xbf16>
    %56 = vector.shape_cast %55 : vector<2x16x324xbf16> to vector<32x324xbf16>
    %c0_89 = arith.constant 0 : index
    %c0_90 = arith.constant 0 : index
    %57 = vector.load %arg4[%c0_89, %c0_90] : memref<324x256xbf16, #tpu.memory_space<vmem>>, vector<324x256xbf16>
    %cst_91 = arith.constant dense<0.000000e+00> : vector<32x256xf32>
    %58 = tpu.matmul %56, %57, %cst_91 {dimension_numbers = #tpu.dot_dimension_numbers<[1], [0], [0], [1], [0, 0, 1, 1], [], []>} : vector<32x324xbf16>, vector<324x256xbf16>, vector<32x256xf32> -> vector<32x256xf32>
    %c0_92 = arith.constant 0 : index
    %c0_93 = arith.constant 0 : index
    %59 = vector.load %arg5[%c0_92, %c0_93] : memref<1x256xf32, #tpu.memory_space<vmem>>, vector<1x256xf32>
    %60 = vector.broadcast %59 : vector<1x256xf32> to vector<32x256xf32>
    %61 = arith.addf %58, %60 : vector<32x256xf32>
    %cst_94 = arith.constant 0.000000e+00 : f32
    %62 = vector.broadcast %cst_94 : f32 to vector<32x256xf32>
    %63 = arith.maximumf %61, %62 : vector<32x256xf32>
    %64 = vector.extract_strided_slice %63 {offsets = [0, 0], sizes = [32, 128], strides = [1, 1]} : vector<32x256xf32> to vector<32x128xf32>
    %65 = vector.extract_strided_slice %63 {offsets = [0, 128], sizes = [32, 128], strides = [1, 1]} : vector<32x256xf32> to vector<32x128xf32>
    %66 = arith.maximumf %64, %65 : vector<32x128xf32>
    %67 = vector.shape_cast %66 : vector<32x128xf32> to vector<16x2x128xf32>
    %cst_95 = arith.constant dense<0xFF800000> : vector<16x128xf32>
    %68 = vector.multi_reduction <maximumf>, %67, %cst_95 [1] : vector<16x2x128xf32> to vector<16x128xf32>
    %69 = arith.truncf %68 : vector<16x128xf32> to vector<16x128xbf16>
    %70 = vector.shape_cast %69 : vector<16x128xbf16> to vector<2x8x128xbf16>
    %c0_96 = arith.constant 0 : index
    %c1_97 = arith.constant 1 : index
    %c16 = arith.constant 16 : index
    %71 = vector.load %arg42[%c0_96, %c1_97, %c16] : memref<2x10x160xbf16, #tpu.memory_space<vmem>>, vector<2x8x128xbf16>
    tpu.vector_store %arg42[%c0_96, %c1_97, %c16], %70 {strides = array<i32>} : memref<2x10x160xbf16, #tpu.memory_space<vmem>>, vector<2x8x128xbf16>,
    %72 = vector.extract_strided_slice %70 {offsets = [0, 0, 0], sizes = [2, 1, 128], strides = [1, 1, 1]} : vector<2x8x128xbf16> to vector<2x1x128xbf16>
    %73 = vector.shape_cast %72 : vector<2x1x128xbf16> to vector<2x128xbf16>
    %74 = vector.extract_strided_slice %70 {offsets = [0, 1, 0], sizes = [2, 1, 128], strides = [1, 1, 1]} : vector<2x8x128xbf16> to vector<2x1x128xbf16>
    %75 = vector.shape_cast %74 : vector<2x1x128xbf16> to vector<2x128xbf16>
    %76 = vector.extract_strided_slice %70 {offsets = [0, 2, 0], sizes = [2, 1, 128], strides = [1, 1, 1]} : vector<2x8x128xbf16> to vector<2x1x128xbf16>
    %77 = vector.shape_cast %76 : vector<2x1x128xbf16> to vector<2x128xbf16>
    %78 = vector.extract_strided_slice %70 {offsets = [0, 3, 0], sizes = [2, 1, 128], strides = [1, 1, 1]} : vector<2x8x128xbf16> to vector<2x1x128xbf16>
    %79 = vector.shape_cast %78 : vector<2x1x128xbf16> to vector<2x128xbf16>
    %80 = vector.extract_strided_slice %70 {offsets = [0, 4, 0], sizes = [2, 1, 128], strides = [1, 1, 1]} : vector<2x8x128xbf16> to vector<2x1x128xbf16>
    %81 = vector.shape_cast %80 : vector<2x1x128xbf16> to vector<2x128xbf16>
    %82 = vector.extract_strided_slice %70 {offsets = [0, 5, 0], sizes = [2, 1, 128], strides = [1, 1, 1]} : vector<2x8x128xbf16> to vector<2x1x128xbf16>
    %83 = vector.shape_cast %82 : vector<2x1x128xbf16> to vector<2x128xbf16>
    %84 = vector.extract_strided_slice %70 {offsets = [0, 6, 0], sizes = [2, 1, 128], strides = [1, 1, 1]} : vector<2x8x128xbf16> to vector<2x1x128xbf16>
    %85 = vector.shape_cast %84 : vector<2x1x128xbf16> to vector<2x128xbf16>
    %86 = vector.extract_strided_slice %70 {offsets = [0, 7, 0], sizes = [2, 1, 128], strides = [1, 1, 1]} : vector<2x8x128xbf16> to vector<2x1x128xbf16>
    %87 = vector.shape_cast %86 : vector<2x1x128xbf16> to vector<2x128xbf16>
    %88 = tpu.concatenate %73, %75, %77, %79, %81, %83, %85, %87 in 1 : vector<2x128xbf16>, vector<2x128xbf16>, vector<2x128xbf16>, vector<2x128xbf16>, vector<2x128xbf16>, vector<2x128xbf16>, vector<2x128xbf16>, vector<2x128xbf16> -> vector<2x1024xbf16>
    %c0_98 = arith.constant 0 : index
    %c0_99 = arith.constant 0 : index
    %89 = vector.load %arg12[%c0_98, %c0_99] : memref<1024x128xbf16, #tpu.memory_space<vmem>>, vector<1024x128xbf16>
    %cst_100 = arith.constant dense<0.000000e+00> : vector<2x128xf32>
    %90 = tpu.matmul %88, %89, %cst_100 {dimension_numbers = #tpu.dot_dimension_numbers<[1], [0], [0], [1], [0, 0, 1, 1], [], []>} : vector<2x1024xbf16>, vector<1024x128xbf16>, vector<2x128xf32> -> vector<2x128xf32>
    %c0_101 = arith.constant 0 : index
    %c0_102 = arith.constant 0 : index
    %91 = vector.load %arg13[%c0_101, %c0_102] : memref<1x128xf32, #tpu.memory_space<vmem>>, vector<1x128xf32>
    %92 = vector.broadcast %91 : vector<1x128xf32> to vector<2x128xf32>
    %93 = arith.addf %90, %92 : vector<2x128xf32>
    %cst_103 = arith.constant 0.000000e+00 : f32
    %94 = vector.broadcast %cst_103 : f32 to vector<2x128xf32>
    %95 = arith.maximumf %93, %94 : vector<2x128xf32>
    %96 = arith.truncf %95 : vector<2x128xf32> to vector<2x128xbf16>
    %c0_104 = arith.constant 0 : index
    %c0_105 = arith.constant 0 : index
    %97 = vector.load %arg14[%c0_104, %c0_105] : memref<128x128xbf16, #tpu.memory_space<vmem>>, vector<128x128xbf16>
    %cst_106 = arith.constant dense<0.000000e+00> : vector<2x128xf32>
    %98 = tpu.matmul %96, %97, %cst_106 {dimension_numbers = #tpu.dot_dimension_numbers<[1], [0], [0], [1], [0, 0, 1, 1], [], []>} : vector<2x128xbf16>, vector<128x128xbf16>, vector<2x128xf32> -> vector<2x128xf32>
    %c0_107 = arith.constant 0 : index
    %c0_108 = arith.constant 0 : index
    %99 = vector.load %arg15[%c0_107, %c0_108] : memref<1x128xf32, #tpu.memory_space<vmem>>, vector<1x128xf32>
    %100 = vector.broadcast %99 : vector<1x128xf32> to vector<2x128xf32>
    %101 = arith.addf %98, %100 : vector<2x128xf32>
    %cst_109 = arith.constant 0.000000e+00 : f32
    %102 = vector.broadcast %cst_109 : f32 to vector<2x128xf32>
    %103 = arith.maximumf %101, %102 : vector<2x128xf32>
    %104 = arith.truncf %103 : vector<2x128xf32> to vector<2x128xbf16>
    %c0_110 = arith.constant 0 : index
    %c0_111 = arith.constant 0 : index
    %105 = vector.load %arg16[%c0_110, %c0_111] : memref<128x128xbf16, #tpu.memory_space<vmem>>, vector<128x128xbf16>
    %cst_112 = arith.constant dense<0.000000e+00> : vector<2x128xf32>
    %106 = tpu.matmul %104, %105, %cst_112 {dimension_numbers = #tpu.dot_dimension_numbers<[1], [0], [0], [1], [0, 0, 1, 1], [], []>} : vector<2x128xbf16>, vector<128x128xbf16>, vector<2x128xf32> -> vector<2x128xf32>
    %c0_113 = arith.constant 0 : index
    %c0_114 = arith.constant 0 : index
    %107 = vector.load %arg17[%c0_113, %c0_114] : memref<1x128xf32, #tpu.memory_space<vmem>>, vector<1x128xf32>
    %108 = vector.broadcast %107 : vector<1x128xf32> to vector<2x128xf32>
    %109 = arith.addf %106, %108 : vector<2x128xf32>
    %c0_115 = arith.constant 0 : index
    %c0_116 = arith.constant 0 : index
    %110 = vector.load %arg36[%c0_115, %c0_116] : memref<2x128xf32, #tpu.memory_space<vmem>>, vector<2x128xf32>
    tpu.vector_store %arg36[%c0_115, %c0_116], %109 {strides = array<i32>} : memref<2x128xf32, #tpu.memory_space<vmem>>, vector<2x128xf32>,
    %c0_117 = arith.constant 0 : index
    %c0_118 = arith.constant 0 : index
    %c0_119 = arith.constant 0 : index
    %111 = vector.load %arg42[%c0_117, %c0_118, %c0_119] : memref<2x10x160xbf16, #tpu.memory_space<vmem>>, vector<2x8x160xbf16>
    %c0_120 = arith.constant 0 : index
    %c1_121 = arith.constant 1 : index
    %c0_122 = arith.constant 0 : index
    %112 = vector.load %arg42[%c0_120, %c1_121, %c0_122] : memref<2x10x160xbf16, #tpu.memory_space<vmem>>, vector<2x8x160xbf16>
    %c0_123 = arith.constant 0 : index
    %c2_124 = arith.constant 2 : index
    %c0_125 = arith.constant 0 : index
    %113 = vector.load %arg42[%c0_123, %c2_124, %c0_125] : memref<2x10x160xbf16, #tpu.memory_space<vmem>>, vector<2x8x160xbf16>
    %114 = tpu.concatenate %111, %112, %113 in 2 : vector<2x8x160xbf16>, vector<2x8x160xbf16>, vector<2x8x160xbf16> -> vector<2x8x480xbf16>
    %115 = vector.shape_cast %114 : vector<2x8x480xbf16> to vector<16x480xbf16>
    %c0_126 = arith.constant 0 : index
    %c0_127 = arith.constant 0 : index
    %116 = vector.load %arg6[%c0_126, %c0_127] : memref<480x256xbf16, #tpu.memory_space<vmem>>, vector<480x256xbf16>
    %cst_128 = arith.constant dense<0.000000e+00> : vector<16x256xf32>
    %117 = tpu.matmul %115, %116, %cst_128 {dimension_numbers = #tpu.dot_dimension_numbers<[1], [0], [0], [1], [0, 0, 1, 1], [], []>} : vector<16x480xbf16>, vector<480x256xbf16>, vector<16x256xf32> -> vector<16x256xf32>
    %c0_129 = arith.constant 0 : index
    %c0_130 = arith.constant 0 : index
    %118 = vector.load %arg7[%c0_129, %c0_130] : memref<1x256xf32, #tpu.memory_space<vmem>>, vector<1x256xf32>
    %119 = vector.broadcast %118 : vector<1x256xf32> to vector<16x256xf32>
    %120 = arith.addf %117, %119 : vector<16x256xf32>
    %cst_131 = arith.constant 0.000000e+00 : f32
    %121 = vector.broadcast %cst_131 : f32 to vector<16x256xf32>
    %122 = arith.maximumf %120, %121 : vector<16x256xf32>
    %123 = vector.extract_strided_slice %122 {offsets = [0, 0], sizes = [16, 128], strides = [1, 1]} : vector<16x256xf32> to vector<16x128xf32>
    %124 = vector.extract_strided_slice %122 {offsets = [0, 128], sizes = [16, 128], strides = [1, 1]} : vector<16x256xf32> to vector<16x128xf32>
    %125 = arith.maximumf %123, %124 : vector<16x128xf32>
    %126 = vector.shape_cast %125 : vector<16x128xf32> to vector<8x2x128xf32>
    %cst_132 = arith.constant dense<0xFF800000> : vector<8x128xf32>
    %127 = vector.multi_reduction <maximumf>, %126, %cst_132 [1] : vector<8x2x128xf32> to vector<8x128xf32>
    %128 = arith.truncf %127 : vector<8x128xf32> to vector<8x128xbf16>
    %129 = vector.shape_cast %128 : vector<8x128xbf16> to vector<2x4x128xbf16>
    %c0_133 = arith.constant 0 : index
    %c1_134 = arith.constant 1 : index
    %c32 = arith.constant 32 : index
    %130 = vector.load %arg43[%c0_133, %c1_134, %c32] : memref<2x6x192xbf16, #tpu.memory_space<vmem>>, vector<2x4x128xbf16>
    tpu.vector_store %arg43[%c0_133, %c1_134, %c32], %129 {strides = array<i32>} : memref<2x6x192xbf16, #tpu.memory_space<vmem>>, vector<2x4x128xbf16>,
    %131 = vector.extract_strided_slice %129 {offsets = [0, 0, 0], sizes = [2, 1, 128], strides = [1, 1, 1]} : vector<2x4x128xbf16> to vector<2x1x128xbf16>
    %132 = vector.shape_cast %131 : vector<2x1x128xbf16> to vector<2x128xbf16>
    %133 = vector.extract_strided_slice %129 {offsets = [0, 1, 0], sizes = [2, 1, 128], strides = [1, 1, 1]} : vector<2x4x128xbf16> to vector<2x1x128xbf16>
    %134 = vector.shape_cast %133 : vector<2x1x128xbf16> to vector<2x128xbf16>
    %135 = vector.extract_strided_slice %129 {offsets = [0, 2, 0], sizes = [2, 1, 128], strides = [1, 1, 1]} : vector<2x4x128xbf16> to vector<2x1x128xbf16>
    %136 = vector.shape_cast %135 : vector<2x1x128xbf16> to vector<2x128xbf16>
    %137 = vector.extract_strided_slice %129 {offsets = [0, 3, 0], sizes = [2, 1, 128], strides = [1, 1, 1]} : vector<2x4x128xbf16> to vector<2x1x128xbf16>
    %138 = vector.shape_cast %137 : vector<2x1x128xbf16> to vector<2x128xbf16>
    %139 = tpu.concatenate %132, %134, %136, %138 in 1 : vector<2x128xbf16>, vector<2x128xbf16>, vector<2x128xbf16>, vector<2x128xbf16> -> vector<2x512xbf16>
    %c0_135 = arith.constant 0 : index
    %c0_136 = arith.constant 0 : index
    %140 = vector.load %arg18[%c0_135, %c0_136] : memref<512x128xbf16, #tpu.memory_space<vmem>>, vector<512x128xbf16>
    %cst_137 = arith.constant dense<0.000000e+00> : vector<2x128xf32>
    %141 = tpu.matmul %139, %140, %cst_137 {dimension_numbers = #tpu.dot_dimension_numbers<[1], [0], [0], [1], [0, 0, 1, 1], [], []>} : vector<2x512xbf16>, vector<512x128xbf16>, vector<2x128xf32> -> vector<2x128xf32>
    %c0_138 = arith.constant 0 : index
    %c0_139 = arith.constant 0 : index
    %142 = vector.load %arg19[%c0_138, %c0_139] : memref<1x128xf32, #tpu.memory_space<vmem>>, vector<1x128xf32>
    %143 = vector.broadcast %142 : vector<1x128xf32> to vector<2x128xf32>
    %144 = arith.addf %141, %143 : vector<2x128xf32>
    %cst_140 = arith.constant 0.000000e+00 : f32
    %145 = vector.broadcast %cst_140 : f32 to vector<2x128xf32>
    %146 = arith.maximumf %144, %145 : vector<2x128xf32>
    %147 = arith.truncf %146 : vector<2x128xf32> to vector<2x128xbf16>
    %c0_141 = arith.constant 0 : index
    %c0_142 = arith.constant 0 : index
    %148 = vector.load %arg20[%c0_141, %c0_142] : memref<128x128xbf16, #tpu.memory_space<vmem>>, vector<128x128xbf16>
    %cst_143 = arith.constant dense<0.000000e+00> : vector<2x128xf32>
    %149 = tpu.matmul %147, %148, %cst_143 {dimension_numbers = #tpu.dot_dimension_numbers<[1], [0], [0], [1], [0, 0, 1, 1], [], []>} : vector<2x128xbf16>, vector<128x128xbf16>, vector<2x128xf32> -> vector<2x128xf32>
    %c0_144 = arith.constant 0 : index
    %c0_145 = arith.constant 0 : index
    %150 = vector.load %arg21[%c0_144, %c0_145] : memref<1x128xf32, #tpu.memory_space<vmem>>, vector<1x128xf32>
    %151 = vector.broadcast %150 : vector<1x128xf32> to vector<2x128xf32>
    %152 = arith.addf %149, %151 : vector<2x128xf32>
    %cst_146 = arith.constant 0.000000e+00 : f32
    %153 = vector.broadcast %cst_146 : f32 to vector<2x128xf32>
    %154 = arith.maximumf %152, %153 : vector<2x128xf32>
    %155 = arith.truncf %154 : vector<2x128xf32> to vector<2x128xbf16>
    %c0_147 = arith.constant 0 : index
    %c0_148 = arith.constant 0 : index
    %156 = vector.load %arg22[%c0_147, %c0_148] : memref<128x128xbf16, #tpu.memory_space<vmem>>, vector<128x128xbf16>
    %cst_149 = arith.constant dense<0.000000e+00> : vector<2x128xf32>
    %157 = tpu.matmul %155, %156, %cst_149 {dimension_numbers = #tpu.dot_dimension_numbers<[1], [0], [0], [1], [0, 0, 1, 1], [], []>} : vector<2x128xbf16>, vector<128x128xbf16>, vector<2x128xf32> -> vector<2x128xf32>
    %c0_150 = arith.constant 0 : index
    %c0_151 = arith.constant 0 : index
    %158 = vector.load %arg23[%c0_150, %c0_151] : memref<1x128xf32, #tpu.memory_space<vmem>>, vector<1x128xf32>
    %159 = vector.broadcast %158 : vector<1x128xf32> to vector<2x128xf32>
    %160 = arith.addf %157, %159 : vector<2x128xf32>
    %c0_152 = arith.constant 0 : index
    %c0_153 = arith.constant 0 : index
    %161 = vector.load %arg37[%c0_152, %c0_153] : memref<2x128xf32, #tpu.memory_space<vmem>>, vector<2x128xf32>
    tpu.vector_store %arg37[%c0_152, %c0_153], %160 {strides = array<i32>} : memref<2x128xf32, #tpu.memory_space<vmem>>, vector<2x128xf32>,
    %c0_154 = arith.constant 0 : index
    %c0_155 = arith.constant 0 : index
    %c0_156 = arith.constant 0 : index
    %162 = vector.load %arg43[%c0_154, %c0_155, %c0_156] : memref<2x6x192xbf16, #tpu.memory_space<vmem>>, vector<2x4x192xbf16>
    %c0_157 = arith.constant 0 : index
    %c1_158 = arith.constant 1 : index
    %c0_159 = arith.constant 0 : index
    %163 = vector.load %arg43[%c0_157, %c1_158, %c0_159] : memref<2x6x192xbf16, #tpu.memory_space<vmem>>, vector<2x4x192xbf16>
    %c0_160 = arith.constant 0 : index
    %c2_161 = arith.constant 2 : index
    %c0_162 = arith.constant 0 : index
    %164 = vector.load %arg43[%c0_160, %c2_161, %c0_162] : memref<2x6x192xbf16, #tpu.memory_space<vmem>>, vector<2x4x192xbf16>
    %165 = tpu.concatenate %162, %163, %164 in 2 : vector<2x4x192xbf16>, vector<2x4x192xbf16>, vector<2x4x192xbf16> -> vector<2x4x576xbf16>
    %166 = vector.shape_cast %165 : vector<2x4x576xbf16> to vector<8x576xbf16>
    %c0_163 = arith.constant 0 : index
    %c0_164 = arith.constant 0 : index
    %167 = vector.load %arg8[%c0_163, %c0_164] : memref<576x256xbf16, #tpu.memory_space<vmem>>, vector<576x256xbf16>
    %cst_165 = arith.constant dense<0.000000e+00> : vector<8x256xf32>
    %168 = tpu.matmul %166, %167, %cst_165 {dimension_numbers = #tpu.dot_dimension_numbers<[1], [0], [0], [1], [0, 0, 1, 1], [], []>} : vector<8x576xbf16>, vector<576x256xbf16>, vector<8x256xf32> -> vector<8x256xf32>
    %c0_166 = arith.constant 0 : index
    %c0_167 = arith.constant 0 : index
    %169 = vector.load %arg9[%c0_166, %c0_167] : memref<1x256xf32, #tpu.memory_space<vmem>>, vector<1x256xf32>
    %170 = vector.broadcast %169 : vector<1x256xf32> to vector<8x256xf32>
    %171 = arith.addf %168, %170 : vector<8x256xf32>
    %cst_168 = arith.constant 0.000000e+00 : f32
    %172 = vector.broadcast %cst_168 : f32 to vector<8x256xf32>
    %173 = arith.maximumf %171, %172 : vector<8x256xf32>
    %174 = vector.extract_strided_slice %173 {offsets = [0, 0], sizes = [8, 128], strides = [1, 1]} : vector<8x256xf32> to vector<8x128xf32>
    %175 = vector.extract_strided_slice %173 {offsets = [0, 128], sizes = [8, 128], strides = [1, 1]} : vector<8x256xf32> to vector<8x128xf32>
    %176 = arith.maximumf %174, %175 : vector<8x128xf32>
    %177 = vector.shape_cast %176 : vector<8x128xf32> to vector<4x2x128xf32>
    %cst_169 = arith.constant dense<0xFF800000> : vector<4x128xf32>
    %178 = vector.multi_reduction <maximumf>, %177, %cst_169 [1] : vector<4x2x128xf32> to vector<4x128xf32>
    %179 = arith.truncf %178 : vector<4x128xf32> to vector<4x128xbf16>
    %180 = vector.shape_cast %179 : vector<4x128xbf16> to vector<2x2x128xbf16>
    %c0_170 = arith.constant 0 : index
    %c1_171 = arith.constant 1 : index
    %c64 = arith.constant 64 : index
    %181 = vector.load %arg44[%c0_170, %c1_171, %c64] : memref<2x4x256xbf16, #tpu.memory_space<vmem>>, vector<2x2x128xbf16>
    tpu.vector_store %arg44[%c0_170, %c1_171, %c64], %180 {strides = array<i32>} : memref<2x4x256xbf16, #tpu.memory_space<vmem>>, vector<2x2x128xbf16>,
    %182 = vector.extract_strided_slice %180 {offsets = [0, 0, 0], sizes = [2, 1, 128], strides = [1, 1, 1]} : vector<2x2x128xbf16> to vector<2x1x128xbf16>
    %183 = vector.shape_cast %182 : vector<2x1x128xbf16> to vector<2x128xbf16>
    %184 = vector.extract_strided_slice %180 {offsets = [0, 1, 0], sizes = [2, 1, 128], strides = [1, 1, 1]} : vector<2x2x128xbf16> to vector<2x1x128xbf16>
    %185 = vector.shape_cast %184 : vector<2x1x128xbf16> to vector<2x128xbf16>
    %186 = tpu.concatenate %183, %185 in 1 : vector<2x128xbf16>, vector<2x128xbf16> -> vector<2x256xbf16>
    %c0_172 = arith.constant 0 : index
    %c0_173 = arith.constant 0 : index
    %187 = vector.load %arg24[%c0_172, %c0_173] : memref<256x128xbf16, #tpu.memory_space<vmem>>, vector<256x128xbf16>
    %cst_174 = arith.constant dense<0.000000e+00> : vector<2x128xf32>
    %188 = tpu.matmul %186, %187, %cst_174 {dimension_numbers = #tpu.dot_dimension_numbers<[1], [0], [0], [1], [0, 0, 1, 1], [], []>} : vector<2x256xbf16>, vector<256x128xbf16>, vector<2x128xf32> -> vector<2x128xf32>
    %c0_175 = arith.constant 0 : index
    %c0_176 = arith.constant 0 : index
    %189 = vector.load %arg25[%c0_175, %c0_176] : memref<1x128xf32, #tpu.memory_space<vmem>>, vector<1x128xf32>
    %190 = vector.broadcast %189 : vector<1x128xf32> to vector<2x128xf32>
    %191 = arith.addf %188, %190 : vector<2x128xf32>
    %cst_177 = arith.constant 0.000000e+00 : f32
    %192 = vector.broadcast %cst_177 : f32 to vector<2x128xf32>
    %193 = arith.maximumf %191, %192 : vector<2x128xf32>
    %194 = arith.truncf %193 : vector<2x128xf32> to vector<2x128xbf16>
    %c0_178 = arith.constant 0 : index
    %c0_179 = arith.constant 0 : index
    %195 = vector.load %arg26[%c0_178, %c0_179] : memref<128x128xbf16, #tpu.memory_space<vmem>>, vector<128x128xbf16>
    %cst_180 = arith.constant dense<0.000000e+00> : vector<2x128xf32>
    %196 = tpu.matmul %194, %195, %cst_180 {dimension_numbers = #tpu.dot_dimension_numbers<[1], [0], [0], [1], [0, 0, 1, 1], [], []>} : vector<2x128xbf16>, vector<128x128xbf16>, vector<2x128xf32> -> vector<2x128xf32>
    %c0_181 = arith.constant 0 : index
    %c0_182 = arith.constant 0 : index
    %197 = vector.load %arg27[%c0_181, %c0_182] : memref<1x128xf32, #tpu.memory_space<vmem>>, vector<1x128xf32>
    %198 = vector.broadcast %197 : vector<1x128xf32> to vector<2x128xf32>
    %199 = arith.addf %196, %198 : vector<2x128xf32>
    %cst_183 = arith.constant 0.000000e+00 : f32
    %200 = vector.broadcast %cst_183 : f32 to vector<2x128xf32>
    %201 = arith.maximumf %199, %200 : vector<2x128xf32>
    %202 = arith.truncf %201 : vector<2x128xf32> to vector<2x128xbf16>
    %c0_184 = arith.constant 0 : index
    %c0_185 = arith.constant 0 : index
    %203 = vector.load %arg28[%c0_184, %c0_185] : memref<128x128xbf16, #tpu.memory_space<vmem>>, vector<128x128xbf16>
    %cst_186 = arith.constant dense<0.000000e+00> : vector<2x128xf32>
    %204 = tpu.matmul %202, %203, %cst_186 {dimension_numbers = #tpu.dot_dimension_numbers<[1], [0], [0], [1], [0, 0, 1, 1], [], []>} : vector<2x128xbf16>, vector<128x128xbf16>, vector<2x128xf32> -> vector<2x128xf32>
    %c0_187 = arith.constant 0 : index
    %c0_188 = arith.constant 0 : index
    %205 = vector.load %arg29[%c0_187, %c0_188] : memref<1x128xf32, #tpu.memory_space<vmem>>, vector<1x128xf32>
    %206 = vector.broadcast %205 : vector<1x128xf32> to vector<2x128xf32>
    %207 = arith.addf %204, %206 : vector<2x128xf32>
    %c0_189 = arith.constant 0 : index
    %c0_190 = arith.constant 0 : index
    %208 = vector.load %arg38[%c0_189, %c0_190] : memref<2x128xf32, #tpu.memory_space<vmem>>, vector<2x128xf32>
    tpu.vector_store %arg38[%c0_189, %c0_190], %207 {strides = array<i32>} : memref<2x128xf32, #tpu.memory_space<vmem>>, vector<2x128xf32>,
    %c0_191 = arith.constant 0 : index
    %c0_192 = arith.constant 0 : index
    %c0_193 = arith.constant 0 : index
    %209 = vector.load %arg44[%c0_191, %c0_192, %c0_193] : memref<2x4x256xbf16, #tpu.memory_space<vmem>>, vector<2x2x256xbf16>
    %c0_194 = arith.constant 0 : index
    %c1_195 = arith.constant 1 : index
    %c0_196 = arith.constant 0 : index
    %210 = vector.load %arg44[%c0_194, %c1_195, %c0_196] : memref<2x4x256xbf16, #tpu.memory_space<vmem>>, vector<2x2x256xbf16>
    %c0_197 = arith.constant 0 : index
    %c2_198 = arith.constant 2 : index
    %c0_199 = arith.constant 0 : index
    %211 = vector.load %arg44[%c0_197, %c2_198, %c0_199] : memref<2x4x256xbf16, #tpu.memory_space<vmem>>, vector<2x2x256xbf16>
    %212 = tpu.concatenate %209, %210, %211 in 2 : vector<2x2x256xbf16>, vector<2x2x256xbf16>, vector<2x2x256xbf16> -> vector<2x2x768xbf16>
    %213 = vector.shape_cast %212 : vector<2x2x768xbf16> to vector<4x768xbf16>
    %c0_200 = arith.constant 0 : index
    %c0_201 = arith.constant 0 : index
    %214 = vector.load %arg10[%c0_200, %c0_201] : memref<768x256xbf16, #tpu.memory_space<vmem>>, vector<768x256xbf16>
    %cst_202 = arith.constant dense<0.000000e+00> : vector<4x256xf32>
    %215 = tpu.matmul %213, %214, %cst_202 {dimension_numbers = #tpu.dot_dimension_numbers<[1], [0], [0], [1], [0, 0, 1, 1], [], []>} : vector<4x768xbf16>, vector<768x256xbf16>, vector<4x256xf32> -> vector<4x256xf32>
    %c0_203 = arith.constant 0 : index
    %c0_204 = arith.constant 0 : index
    %216 = vector.load %arg11[%c0_203, %c0_204] : memref<1x256xf32, #tpu.memory_space<vmem>>, vector<1x256xf32>
    %217 = vector.broadcast %216 : vector<1x256xf32> to vector<4x256xf32>
    %218 = arith.addf %215, %217 : vector<4x256xf32>
    %cst_205 = arith.constant 0.000000e+00 : f32
    %219 = vector.broadcast %cst_205 : f32 to vector<4x256xf32>
    %220 = arith.maximumf %218, %219 : vector<4x256xf32>
    %221 = vector.extract_strided_slice %220 {offsets = [0, 0], sizes = [4, 128], strides = [1, 1]} : vector<4x256xf32> to vector<4x128xf32>
    %222 = vector.extract_strided_slice %220 {offsets = [0, 128], sizes = [4, 128], strides = [1, 1]} : vector<4x256xf32> to vector<4x128xf32>
    %223 = arith.maximumf %221, %222 : vector<4x128xf32>
    %224 = vector.shape_cast %223 : vector<4x128xf32> to vector<2x2x128xf32>
    %cst_206 = arith.constant dense<0xFF800000> : vector<2x128xf32>
    %225 = vector.multi_reduction <maximumf>, %224, %cst_206 [1] : vector<2x2x128xf32> to vector<2x128xf32>
    %226 = arith.truncf %225 : vector<2x128xf32> to vector<2x128xbf16>
    %227 = vector.shape_cast %226 : vector<2x128xbf16> to vector<2x1x128xbf16>
    %228 = vector.shape_cast %227 : vector<2x1x128xbf16> to vector<2x128xbf16>
    %c0_207 = arith.constant 0 : index
    %c0_208 = arith.constant 0 : index
    %229 = vector.load %arg30[%c0_207, %c0_208] : memref<128x128xbf16, #tpu.memory_space<vmem>>, vector<128x128xbf16>
    %cst_209 = arith.constant dense<0.000000e+00> : vector<2x128xf32>
    %230 = tpu.matmul %228, %229, %cst_209 {dimension_numbers = #tpu.dot_dimension_numbers<[1], [0], [0], [1], [0, 0, 1, 1], [], []>} : vector<2x128xbf16>, vector<128x128xbf16>, vector<2x128xf32> -> vector<2x128xf32>
    %c0_210 = arith.constant 0 : index
    %c0_211 = arith.constant 0 : index
    %231 = vector.load %arg31[%c0_210, %c0_211] : memref<1x128xf32, #tpu.memory_space<vmem>>, vector<1x128xf32>
    %232 = vector.broadcast %231 : vector<1x128xf32> to vector<2x128xf32>
    %233 = arith.addf %230, %232 : vector<2x128xf32>
    %cst_212 = arith.constant 0.000000e+00 : f32
    %234 = vector.broadcast %cst_212 : f32 to vector<2x128xf32>
    %235 = arith.maximumf %233, %234 : vector<2x128xf32>
    %236 = arith.truncf %235 : vector<2x128xf32> to vector<2x128xbf16>
    %c0_213 = arith.constant 0 : index
    %c0_214 = arith.constant 0 : index
    %237 = vector.load %arg32[%c0_213, %c0_214] : memref<128x128xbf16, #tpu.memory_space<vmem>>, vector<128x128xbf16>
    %cst_215 = arith.constant dense<0.000000e+00> : vector<2x128xf32>
    %238 = tpu.matmul %236, %237, %cst_215 {dimension_numbers = #tpu.dot_dimension_numbers<[1], [0], [0], [1], [0, 0, 1, 1], [], []>} : vector<2x128xbf16>, vector<128x128xbf16>, vector<2x128xf32> -> vector<2x128xf32>
    %c0_216 = arith.constant 0 : index
    %c0_217 = arith.constant 0 : index
    %239 = vector.load %arg33[%c0_216, %c0_217] : memref<1x128xf32, #tpu.memory_space<vmem>>, vector<1x128xf32>
    %240 = vector.broadcast %239 : vector<1x128xf32> to vector<2x128xf32>
    %241 = arith.addf %238, %240 : vector<2x128xf32>
    %cst_218 = arith.constant 0.000000e+00 : f32
    %242 = vector.broadcast %cst_218 : f32 to vector<2x128xf32>
    %243 = arith.maximumf %241, %242 : vector<2x128xf32>
    %244 = arith.truncf %243 : vector<2x128xf32> to vector<2x128xbf16>
    %c0_219 = arith.constant 0 : index
    %c0_220 = arith.constant 0 : index
    %245 = vector.load %arg34[%c0_219, %c0_220] : memref<128x128xbf16, #tpu.memory_space<vmem>>, vector<128x128xbf16>
    %cst_221 = arith.constant dense<0.000000e+00> : vector<2x128xf32>
    %246 = tpu.matmul %244, %245, %cst_221 {dimension_numbers = #tpu.dot_dimension_numbers<[1], [0], [0], [1], [0, 0, 1, 1], [], []>} : vector<2x128xbf16>, vector<128x128xbf16>, vector<2x128xf32> -> vector<2x128xf32>
    %c0_222 = arith.constant 0 : index
    %c0_223 = arith.constant 0 : index
    %247 = vector.load %arg35[%c0_222, %c0_223] : memref<1x128xf32, #tpu.memory_space<vmem>>, vector<1x128xf32>
    %248 = vector.broadcast %247 : vector<1x128xf32> to vector<2x128xf32>
    %249 = arith.addf %246, %248 : vector<2x128xf32>
    %c0_224 = arith.constant 0 : index
    %c0_225 = arith.constant 0 : index
    %250 = vector.load %arg39[%c0_224, %c0_225] : memref<2x128xf32, #tpu.memory_space<vmem>>, vector<2x128xf32>
    tpu.vector_store %arg39[%c0_224, %c0_225], %249 {strides = array<i32>} : memref<2x128xf32, #tpu.memory_space<vmem>>, vector<2x128xf32>,
    return
  }
  func.func @transform_0(%arg0: i32) -> (i32, i32, i32) {
    %c0_i32 = arith.constant 0 : i32
    %c0_i32_0 = arith.constant 0 : i32
    %c0_i32_1 = arith.constant 0 : i32
    return %arg0, %c0_i32, %c0_i32_0 : i32, i32, i32
  }
  func.func @transform_1(%arg0: i32) -> (i32, i32) {
    %c0_i32 = arith.constant 0 : i32
    %c0_i32_0 = arith.constant 0 : i32
    %c0_i32_1 = arith.constant 0 : i32
    return %c0_i32, %c0_i32_0 : i32, i32
  }
  func.func @transform_2(%arg0: i32) -> (i32, i32) {
    %c0_i32 = arith.constant 0 : i32
    %c0_i32_0 = arith.constant 0 : i32
    %c0_i32_1 = arith.constant 0 : i32
    return %c0_i32, %c0_i32_0 : i32, i32
  }
  func.func @transform_3(%arg0: i32) -> (i32, i32) {
    %c0_i32 = arith.constant 0 : i32
    %c0_i32_0 = arith.constant 0 : i32
    %c0_i32_1 = arith.constant 0 : i32
    return %c0_i32, %c0_i32_0 : i32, i32
  }
  func.func @transform_4(%arg0: i32) -> (i32, i32) {
    %c0_i32 = arith.constant 0 : i32
    %c0_i32_0 = arith.constant 0 : i32
    %c0_i32_1 = arith.constant 0 : i32
    return %c0_i32, %c0_i32_0 : i32, i32
  }
  func.func @transform_5(%arg0: i32) -> (i32, i32) {
    %c0_i32 = arith.constant 0 : i32
    %c0_i32_0 = arith.constant 0 : i32
    %c0_i32_1 = arith.constant 0 : i32
    return %c0_i32, %c0_i32_0 : i32, i32
  }
  func.func @transform_6(%arg0: i32) -> (i32, i32) {
    %c0_i32 = arith.constant 0 : i32
    %c0_i32_0 = arith.constant 0 : i32
    %c0_i32_1 = arith.constant 0 : i32
    return %c0_i32, %c0_i32_0 : i32, i32
  }
  func.func @transform_7(%arg0: i32) -> (i32, i32) {
    %c0_i32 = arith.constant 0 : i32
    %c0_i32_0 = arith.constant 0 : i32
    %c0_i32_1 = arith.constant 0 : i32
    return %c0_i32, %c0_i32_0 : i32, i32
  }
  func.func @transform_8(%arg0: i32) -> (i32, i32) {
    %c0_i32 = arith.constant 0 : i32
    %c0_i32_0 = arith.constant 0 : i32
    %c0_i32_1 = arith.constant 0 : i32
    return %c0_i32, %c0_i32_0 : i32, i32
  }
  func.func @transform_9(%arg0: i32) -> (i32, i32) {
    %c0_i32 = arith.constant 0 : i32
    %c0_i32_0 = arith.constant 0 : i32
    %c0_i32_1 = arith.constant 0 : i32
    return %c0_i32, %c0_i32_0 : i32, i32
  }
  func.func @transform_10(%arg0: i32) -> (i32, i32) {
    %c0_i32 = arith.constant 0 : i32
    %c0_i32_0 = arith.constant 0 : i32
    %c0_i32_1 = arith.constant 0 : i32
    return %c0_i32, %c0_i32_0 : i32, i32
  }
  func.func @transform_11(%arg0: i32) -> (i32, i32) {
    %c0_i32 = arith.constant 0 : i32
    %c0_i32_0 = arith.constant 0 : i32
    %c0_i32_1 = arith.constant 0 : i32
    return %c0_i32, %c0_i32_0 : i32, i32
  }
  func.func @transform_12(%arg0: i32) -> (i32, i32) {
    %c0_i32 = arith.constant 0 : i32
    %c0_i32_0 = arith.constant 0 : i32
    %c0_i32_1 = arith.constant 0 : i32
    return %c0_i32, %c0_i32_0 : i32, i32
  }
  func.func @transform_13(%arg0: i32) -> (i32, i32) {
    %c0_i32 = arith.constant 0 : i32
    %c0_i32_0 = arith.constant 0 : i32
    %c0_i32_1 = arith.constant 0 : i32
    return %c0_i32, %c0_i32_0 : i32, i32
  }
  func.func @transform_14(%arg0: i32) -> (i32, i32) {
    %c0_i32 = arith.constant 0 : i32
    %c0_i32_0 = arith.constant 0 : i32
    %c0_i32_1 = arith.constant 0 : i32
    return %c0_i32, %c0_i32_0 : i32, i32
  }
  func.func @transform_15(%arg0: i32) -> (i32, i32) {
    %c0_i32 = arith.constant 0 : i32
    %c0_i32_0 = arith.constant 0 : i32
    %c0_i32_1 = arith.constant 0 : i32
    return %c0_i32, %c0_i32_0 : i32, i32
  }
  func.func @transform_16(%arg0: i32) -> (i32, i32) {
    %c0_i32 = arith.constant 0 : i32
    %c0_i32_0 = arith.constant 0 : i32
    %c0_i32_1 = arith.constant 0 : i32
    return %c0_i32, %c0_i32_0 : i32, i32
  }
  func.func @transform_17(%arg0: i32) -> (i32, i32) {
    %c0_i32 = arith.constant 0 : i32
    %c0_i32_0 = arith.constant 0 : i32
    %c0_i32_1 = arith.constant 0 : i32
    return %c0_i32, %c0_i32_0 : i32, i32
  }
  func.func @transform_18(%arg0: i32) -> (i32, i32) {
    %c0_i32 = arith.constant 0 : i32
    %c0_i32_0 = arith.constant 0 : i32
    %c0_i32_1 = arith.constant 0 : i32
    return %c0_i32, %c0_i32_0 : i32, i32
  }
  func.func @transform_19(%arg0: i32) -> (i32, i32) {
    %c0_i32 = arith.constant 0 : i32
    %c0_i32_0 = arith.constant 0 : i32
    %c0_i32_1 = arith.constant 0 : i32
    return %c0_i32, %c0_i32_0 : i32, i32
  }
  func.func @transform_20(%arg0: i32) -> (i32, i32) {
    %c0_i32 = arith.constant 0 : i32
    %c0_i32_0 = arith.constant 0 : i32
    %c0_i32_1 = arith.constant 0 : i32
    return %c0_i32, %c0_i32_0 : i32, i32
  }
  func.func @transform_21(%arg0: i32) -> (i32, i32) {
    %c0_i32 = arith.constant 0 : i32
    %c0_i32_0 = arith.constant 0 : i32
    %c0_i32_1 = arith.constant 0 : i32
    return %c0_i32, %c0_i32_0 : i32, i32
  }
  func.func @transform_22(%arg0: i32) -> (i32, i32) {
    %c0_i32 = arith.constant 0 : i32
    %c0_i32_0 = arith.constant 0 : i32
    %c0_i32_1 = arith.constant 0 : i32
    return %c0_i32, %c0_i32_0 : i32, i32
  }
  func.func @transform_23(%arg0: i32) -> (i32, i32) {
    %c0_i32 = arith.constant 0 : i32
    %c0_i32_0 = arith.constant 0 : i32
    %c0_i32_1 = arith.constant 0 : i32
    return %c0_i32, %c0_i32_0 : i32, i32
  }
  func.func @transform_24(%arg0: i32) -> (i32, i32) {
    %c0_i32 = arith.constant 0 : i32
    %c0_i32_0 = arith.constant 0 : i32
    %c0_i32_1 = arith.constant 0 : i32
    return %c0_i32, %c0_i32_0 : i32, i32
  }
  func.func @transform_25(%arg0: i32) -> (i32, i32) {
    %c0_i32 = arith.constant 0 : i32
    %c0_i32_0 = arith.constant 0 : i32
    %c0_i32_1 = arith.constant 0 : i32
    return %c0_i32, %c0_i32_0 : i32, i32
  }
  func.func @transform_26(%arg0: i32) -> (i32, i32) {
    %c0_i32 = arith.constant 0 : i32
    %c0_i32_0 = arith.constant 0 : i32
    %c0_i32_1 = arith.constant 0 : i32
    return %c0_i32, %c0_i32_0 : i32, i32
  }
  func.func @transform_27(%arg0: i32) -> (i32, i32) {
    %c0_i32 = arith.constant 0 : i32
    %c0_i32_0 = arith.constant 0 : i32
    %c0_i32_1 = arith.constant 0 : i32
    return %c0_i32, %c0_i32_0 : i32, i32
  }
  func.func @transform_28(%arg0: i32) -> (i32, i32) {
    %c0_i32 = arith.constant 0 : i32
    %c0_i32_0 = arith.constant 0 : i32
    %c0_i32_1 = arith.constant 0 : i32
    return %c0_i32, %c0_i32_0 : i32, i32
  }
  func.func @transform_29(%arg0: i32) -> (i32, i32) {
    %c0_i32 = arith.constant 0 : i32
    %c0_i32_0 = arith.constant 0 : i32
    %c0_i32_1 = arith.constant 0 : i32
    return %c0_i32, %c0_i32_0 : i32, i32
  }
  func.func @transform_30(%arg0: i32) -> (i32, i32) {
    %c0_i32 = arith.constant 0 : i32
    %c0_i32_0 = arith.constant 0 : i32
    %c0_i32_1 = arith.constant 0 : i32
    return %c0_i32, %c0_i32_0 : i32, i32
  }
  func.func @transform_31(%arg0: i32) -> (i32, i32) {
    %c0_i32 = arith.constant 0 : i32
    %c0_i32_0 = arith.constant 0 : i32
    %c0_i32_1 = arith.constant 0 : i32
    return %c0_i32, %c0_i32_0 : i32, i32
  }
  func.func @transform_32(%arg0: i32) -> (i32, i32) {
    %c0_i32 = arith.constant 0 : i32
    %c0_i32_0 = arith.constant 0 : i32
    %c0_i32_1 = arith.constant 0 : i32
    return %c0_i32, %c0_i32_0 : i32, i32
  }
  func.func @transform_33(%arg0: i32) -> (i32, i32) {
    %c0_i32 = arith.constant 0 : i32
    %c0_i32_0 = arith.constant 0 : i32
    %c0_i32_1 = arith.constant 0 : i32
    return %c0_i32, %c0_i32_0 : i32, i32
  }
  func.func @transform_34(%arg0: i32) -> (i32, i32) {
    %c0_i32 = arith.constant 0 : i32
    %c0_i32_0 = arith.constant 0 : i32
    %c0_i32_1 = arith.constant 0 : i32
    return %c0_i32, %c0_i32_0 : i32, i32
  }
  func.func @transform_35(%arg0: i32) -> (i32, i32) {
    %c0_i32 = arith.constant 0 : i32
    %c0_i32_0 = arith.constant 0 : i32
    return %arg0, %c0_i32 : i32, i32
  }
  func.func @transform_36(%arg0: i32) -> (i32, i32) {
    %c0_i32 = arith.constant 0 : i32
    %c0_i32_0 = arith.constant 0 : i32
    return %arg0, %c0_i32 : i32, i32
  }
  func.func @transform_37(%arg0: i32) -> (i32, i32) {
    %c0_i32 = arith.constant 0 : i32
    %c0_i32_0 = arith.constant 0 : i32
    return %arg0, %c0_i32 : i32, i32
  }
  func.func @transform_38(%arg0: i32) -> (i32, i32) {
    %c0_i32 = arith.constant 0 : i32
    %c0_i32_0 = arith.constant 0 : i32
    return %arg0, %c0_i32 : i32, i32
  }
}

</mosaic_0001>

<bundles_post_ra>
// kernel: alexnet_forward.1
= control target key start
LH: loop header
LB: loop body
LE: loop exit
PB: predicated region body
PF: predicated region fallthrough
CT: control target
= control target key end

     0   :  { %s10090_s6 = smov 1   ;;  %s10091_s10 = smov 2   ;;  %s11684_s0 = inlined_call_operand.smem [shape: u32[39], index: -1, kind: input, shape index: {}] }
   0x1   :  { %s10175_s5 = sld [smem:[%s11684_s0]]   ;;  %s10092_s14 = smov 3  }
   0x2   :  { %s10180_s9 = sld [smem:[%s11684_s0 + %s10090_s6]]   ;;  %s10093_s18 = smov 4  }
   0x3   :  { %s10185_s13 = sld [smem:[%s11684_s0 + %s10091_s10]]   ;;  %s10094_s22 = smov 5  }
   0x4   :  { %s10190_s17 = sld [smem:[%s11684_s0 + %s10092_s14]]   ;;  %s10095_s26 = smov 6  }
   0x5   :  { %s10195_s21 = sld [smem:[%s11684_s0 + %s10093_s18]]   ;;  %s10096_s30 = smov 7  }
   0x6   :  { %s10200_s25 = sld [smem:[%s11684_s0 + %s10094_s22]]   ;;  %s10097_s4 = smov 8  }
   0x7   :  { %11699 = sst [smem:[#allocation53_spill]] %s10175_s5  ;;  %s10098_s10 = smov 9  }
   0x8   :  { %11700 = sst [smem:[#allocation54_spill]] %s10180_s9  ;;  %s10099_s15 = smov 10  }
   0x9   :  { %11701 = sst [smem:[#allocation55_spill]] %s10185_s13  ;;  %s10100_s20 = smov 11  }
   0xa   :  { %s10205_s29 = sld [smem:[%s11684_s0 + %s10095_s26]]   ;;  %s10101_s26 = smov 12  }
   0xb   :  { %11702 = sst [smem:[#allocation56_spill]] %s10195_s21  ;;  %s10102_s1 = smov 13  }
   0xc   :  { %11703 = sst [smem:[#allocation57_spill]] %s10200_s25  ;;  %s10103_s7 = smov 14  }
   0xd   :  { %s10210_s3 = sld [smem:[%s11684_s0 + %s10096_s30]]   ;;  %s10105_s22 = smov 16  }
   0xe   :  { %s10215_s8 = sld [smem:[%s11684_s0 + %s10097_s4]]   ;;  %s10106_s28 = smov 17  }
   0xf   :  { %s10220_s14 = sld [smem:[%s11684_s0 + %s10098_s10]]  }
  0x10   :  { %11704 = sst [smem:[#allocation58_spill]] %s10205_s29 }
  0x11   :  { %s10225_s19 = sld [smem:[%s11684_s0 + %s10099_s15]]   ;;  %s10104_s15 = smov 15  }
  0x12   :  { %s10230_s24 = sld [smem:[%s11684_s0 + %s10100_s20]]  }
  0x13   :  { %s10235_s30 = sld [smem:[%s11684_s0 + %s10101_s26]]  }
  0x14   :  { %11705 = sst [smem:[#allocation59_spill]] %s10215_s8 }
  0x15   :  { %11706 = sst [smem:[#allocation60_spill]] %s10220_s14 }
  0x16   :  { %s10240_s6 = sld [smem:[%s11684_s0 + %s10102_s1]]  }
  0x17   :  { %11707 = sst [smem:[#allocation61_spill]] %s10225_s19 }
  0x18   :  { %s10245_s12 = sld [smem:[%s11684_s0 + %s10103_s7]]   ;;  %s10107_s7 = smov 18  }
  0x19   :  { %11708 = sst [smem:[#allocation62_spill]] %s10235_s30 }
  0x1a   :  { %s10250_s20 = sld [smem:[%s11684_s0 + %s10104_s15]]   ;;  %s10108_s15 = smov 19  }
  0x1b   :  { %s10255_s27 = sld [smem:[%s11684_s0 + %s10105_s22]]   ;;  %s10109_s22 = smov 20  }
  0x1c   :  { %s10260_s4 = sld [smem:[%s11684_s0 + %s10106_s28]]   ;;  %s10110_s28 = smov 21  }
  0x1d   :  { %s10265_s19 = sld [smem:[%s11684_s0 + %s10107_s7]]   ;;  %s10111_s7 = smov 22  }
  0x1e   :  { %11709 = sst [smem:[#allocation63_spill]] %s10245_s12 }
  0x1f   :  { %s10270_s14 = sld [smem:[%s11684_s0 + %s10108_s15]]   ;;  %s10112_s15 = smov 23  }
  0x20   :  { %s10275_s8 = sld [smem:[%s11684_s0 + %s10109_s22]]   ;;  %s10113_s22 = smov 24  }
  0x21   :  { %11710 = sst [smem:[#allocation64_spill]] %s10255_s27 }
  0x22   :  { %s10280_s29 = sld [smem:[%s11684_s0 + %s10110_s28]]   ;;  %s10114_s28 = smov 25  }
  0x23   :  { %11711 = sst [smem:[#allocation65_spill]] %s10265_s19 }
  0x24   :  { %s10285_s19 = sld [smem:[%s11684_s0 + %s10111_s7]]   ;;  %s10115_s7 = smov 26  }
  0x25   :  { %s10290_s27 = sld [smem:[%s11684_s0 + %s10112_s15]]   ;;  %s10116_s15 = smov 27  }
  0x26   :  { %s10295_s12 = sld [smem:[%s11684_s0 + %s10113_s22]]   ;;  %s10117_s22 = smov 28  }
  0x27   :  { %s10300_s30 = sld [smem:[%s11684_s0 + %s10114_s28]]   ;;  %s10118_s28 = smov 29  }
  0x28   :  { %11712 = sst [smem:[#allocation66_spill]] %s10280_s29 }
  0x29   :  { %s10305_s25 = sld [smem:[%s11684_s0 + %s10115_s7]]   ;;  %s10119_s7 = smov 30  }
  0x2a   :  { %s10310_s21 = sld [smem:[%s11684_s0 + %s10116_s15]]   ;;  %s10120_s15 = smov 31  }
  0x2b   :  { %11713 = sst [smem:[#allocation67_spill]] %s10290_s27 }
  0x2c   :  { %s10315_s13 = sld [smem:[%s11684_s0 + %s10117_s22]]   ;;  %s10121_s22 = smov 32  }
  0x2d   :  { %11714 = sst [smem:[#allocation68_spill]] %s10300_s30 }
  0x2e   :  { %s10320_s9 = sld [smem:[%s11684_s0 + %s10118_s28]]   ;;  %s10122_s28 = smov 33  }
  0x2f   :  { %s10325_s5 = sld [smem:[%s11684_s0 + %s10119_s7]]   ;;  %s10123_s7 = smov 34  }
  0x30   :  { %11715 = sst [smem:[#allocation69_spill]] %s10310_s21 }
  0x31   :  { %s10330_s21 = sld [smem:[%s11684_s0 + %s10120_s15]]   ;;  %s10124_s15 = smov 35  }
  0x32   :  { %s10335_s30 = sld [smem:[%s11684_s0 + %s10121_s22]]   ;;  %s10125_s22 = smov 36  }
  0x33   :  { %s10345_s27 = sld [smem:[%s11684_s0 + %s10123_s7]]   ;;  %s10127_s7 = smov 38  }
  0x34   :  { %11716 = sst [smem:[#allocation70_spill]] %s10320_s9 }
  0x35   :  { %s10340_s9 = sld [smem:[%s11684_s0 + %s10122_s28]]   ;;  %s10126_s28 = smov 37  }
  0x36   :  { %s10355_s29 = sld [smem:[%s11684_s0 + %s10125_s22]]  }
  0x37   :  { %11717 = sst [smem:[#allocation71_spill]] %s10330_s21 }
  0x38   :  { %s10350_s21 = sld [smem:[%s11684_s0 + %s10124_s15]]  }
  0x39   :  { %11719 = sst [smem:[#allocation73_spill]] %s10345_s27 }
  0x3a   :  { %s10365_s27 = sld [smem:[%s11684_s0 + %s10127_s7]]  }
  0x3b   :  { %11718 = sst [smem:[#allocation72_spill]] %s10340_s9 }
  0x3c   :  { %s10360_s9 = sld [smem:[%s11684_s0 + %s10126_s28]]  }
  0x3d   :  { %83 = vsyncpa [#allocation8], 0 }
  0x3e   :  { %84 = vsyncpa [#allocation10], 0 }
  0x3f   :  { %85 = vsyncpa [#allocation13], 0 }
  0x40   :  { %86 = vsyncpa [#allocation16], 0 }
  0x41   :  { %87 = vsyncpa [#allocation19], 0 }
  0x42   :  { %88 = vsyncpa [#allocation22], 0 }
  0x43   :  { %89 = vsyncpa [#allocation25], 0 }
  0x44   :  { %90 = vsyncpa [#allocation28], 0 }
  0x45   :  { %91 = vsyncpa [#allocation31], 0 }
  0x46   :  { %92 = vsyncpa [#allocation34], 0 }
  0x47   :  { %93 = vsyncpa [#allocation37], 0 }
  0x48   :  { %94 = vsyncpa [#allocation40], 0  ;;  %s10128_s15 = smov [#allocation9]  }
  0x49   :  { %s124_s16 = sshll.u32 %s10128_s15, 4  ;;  %s125_s16 = int_to_ptr.vmem [resolvable:$true] %s124_s16 }
  0x4a   :  { %s9634_s18 = scalar_lea.vmem %s125_s16, 9216  ;;  %p9639_p1 = scmp.lt.s32.totalorder %s125_s16, %s125_s16 }
  0x4b   :  { %p9635_p0 = scmp.ne.s32.totalorder %s125_s16, %s9634_s18  ;;  %p9640_p2 = scmp.lt.s32.totalorder %s9634_s18, %s9634_s18 }
  0x4d   :  { %p9641_p3 = por %p9640_p2, %p9639_p1 }
  0x4f   :  { %p9642_p4 = pnand %p9641_p3, %p9635_p0 }
  0x51   :  { %9645 = shalt.err (!%p9642_p4)
}
  0x52   :  { %s10129_s0 = smov 128   ;;  %s10130_s22 = smov 8  }
  0x53   :  { %130 = dma.hbm_to_vmem [thread:$0]  %s10210_s3, 9216, %s125_s16, [#allocation10], %s10129_s0, %s10129_s0, %s10130_s22  }
  0x54   :  { %s10131_s23 = smov [#allocation12]   ;;  %s10132_s28 = smov [#allocation15]  }
  0x55   :  { %s156_s26 = sshll.u32 %s10131_s23, 4  ;;  %s184_s1 = sshll.u32 %s10132_s28, 4  ;;  %s157_s26 = int_to_ptr.vmem [resolvable:$true] %s156_s26  ;;  %s185_s1 = int_to_ptr.vmem [resolvable:$true] %s184_s1 }
  0x56   :  { %s9654_s2 = scalar_lea.vmem %s157_s26, 1024  ;;  %p9659_p6 = scmp.lt.s32.totalorder %s157_s26, %s157_s26 }
  0x57   :  { %p9655_p5 = scmp.ne.s32.totalorder %s157_s26, %s9654_s2  ;;  %p9660_p7 = scmp.lt.s32.totalorder %s9654_s2, %s9654_s2 }
  0x59   :  { %p9661_p8 = por %p9660_p7, %p9659_p6 }
  0x5b   :  { %p9662_p9 = pnand %p9661_p8, %p9655_p5 }
  0x5d   :  { %9665 = shalt.err (!%p9662_p9)
}
  0x5e   :  { %s10133_s7 = smov 64   ;;  %s10134_s10 = smov 4  }
  0x5f   :  { %162 = dma.hbm_to_vmem [thread:$0]  %s10240_s6, 1024, %s157_s26, [#allocation13], %s10133_s7, %s10133_s7, %s10134_s10  }
  0x60   :  { %s9674_s3 = scalar_lea.vmem %s185_s1, 4096  ;;  %p9679_p11 = scmp.lt.s32.totalorder %s185_s1, %s185_s1 }
  0x61   :  { %p9675_p10 = scmp.ne.s32.totalorder %s185_s1, %s9674_s3  ;;  %p9680_p12 = scmp.lt.s32.totalorder %s9674_s3, %s9674_s3 }
  0x63   :  { %p9681_p13 = por %p9680_p12, %p9679_p11 }
  0x65   :  { %p9682_p0 = pnand %p9681_p13, %p9675_p10 }
  0x67   :  { %9685 = shalt.err (!%p9682_p0)
}
  0x68   :  { %190 = dma.hbm_to_vmem [thread:$0]  %s10260_s4, 4096, %s185_s1, [#allocation16], %s10133_s7, %s10133_s7, %s10134_s10  }
  0x69   :  { %s10135_s11 = smov [#allocation18]   ;;  %s10136_s16 = smov [#allocation21]  }
  0x6a   :  { %s211_s15 = sshll.u32 %s10135_s11, 4  ;;  %s233_s18 = sshll.u32 %s10136_s16, 4  ;;  %s212_s15 = int_to_ptr.vmem [resolvable:$true] %s211_s15  ;;  %s234_s18 = int_to_ptr.vmem [resolvable:$true] %s233_s18 }
  0x6b   :  { %s9694_s23 = scalar_lea.vmem %s212_s15, 16  ;;  %s9698_s6 = scalar_lea.vmem %s212_s15, 32 }
  0x6c   :  { %p9695_p1 = scmp.ne.s32.totalorder %s212_s15, %s9694_s23  ;;  %p9699_p2 = scmp.lt.s32.totalorder %s212_s15, %s212_s15 }
  0x6d   :  { %p9700_p3 = scmp.lt.s32.totalorder %s9698_s6, %s9694_s23 }
  0x6f   :  { %p9701_p4 = por %p9700_p3, %p9699_p2 }
  0x71   :  { %p9702_p5 = pnand %p9701_p4, %p9695_p1 }
  0x73   :  { %9705 = shalt.err (!%p9702_p5)
}
  0x74   :  { %214 = dma.hbm_to_vmem [thread:$0]  %s10275_s8, 16, %s212_s15, [#allocation19]  }
  0x75   :  { %s9714_s26 = scalar_lea.vmem %s234_s18, 16  ;;  %s9718_s28 = scalar_lea.vmem %s234_s18, 32 }
  0x76   :  { %p9715_p6 = scmp.ne.s32.totalorder %s234_s18, %s9714_s26  ;;  %p9719_p7 = scmp.lt.s32.totalorder %s234_s18, %s234_s18 }
  0x77   :  { %p9720_p8 = scmp.lt.s32.totalorder %s9718_s28, %s9714_s26 }
  0x79   :  { %p9721_p9 = por %p9720_p8, %p9719_p7 }
  0x7b   :  { %p9722_p10 = pnand %p9721_p9, %p9715_p6 }
  0x7d   :  { %9725 = shalt.err (!%p9722_p10)
}
  0x7e   :  { %236 = dma.hbm_to_vmem [thread:$0]  %s10285_s19, 16, %s234_s18, [#allocation22]  }
  0x7f   :  { %s10137_s4 = smov [#allocation24]   ;;  %s10138_s2 = smov [#allocation27]  }
  0x80   :  { %s255_s1 = sshll.u32 %s10137_s4, 4  ;;  %s277_s3 = sshll.u32 %s10138_s2, 4  ;;  %s256_s1 = int_to_ptr.vmem [resolvable:$true] %s255_s1  ;;  %s278_s3 = int_to_ptr.vmem [resolvable:$true] %s277_s3 }
  0x81   :  { %s9734_s11 = scalar_lea.vmem %s256_s1, 16  ;;  %s9738_s16 = scalar_lea.vmem %s256_s1, 32 }
  0x82   :  { %p9735_p11 = scmp.ne.s32.totalorder %s256_s1, %s9734_s11  ;;  %p9739_p12 = scmp.lt.s32.totalorder %s256_s1, %s256_s1 }
  0x83   :  { %p9740_p13 = scmp.lt.s32.totalorder %s9738_s16, %s9734_s11 }
  0x85   :  { %p9741_p0 = por %p9740_p13, %p9739_p12 }
  0x87   :  { %p9742_p1 = pnand %p9741_p0, %p9735_p11 }
  0x89   :  { %9745 = shalt.err (!%p9742_p1)
}
  0x8a   :  { %258 = dma.hbm_to_vmem [thread:$0]  %s10295_s12, 16, %s256_s1, [#allocation25]  }
  0x8b   :  { %s9754_s8 = scalar_lea.vmem %s278_s3, 16  ;;  %s9758_s15 = scalar_lea.vmem %s278_s3, 32 }
  0x8c   :  { %p9755_p2 = scmp.ne.s32.totalorder %s278_s3, %s9754_s8  ;;  %p9759_p3 = scmp.lt.s32.totalorder %s278_s3, %s278_s3 }
  0x8d   :  { %p9760_p4 = scmp.lt.s32.totalorder %s9758_s15, %s9754_s8 }
  0x8f   :  { %p9761_p5 = por %p9760_p4, %p9759_p3 }
  0x91   :  { %p9762_p6 = pnand %p9761_p5, %p9755_p2 }
  0x93   :  { %9765 = shalt.err (!%p9762_p6)
}
  0x94   :  { %280 = dma.hbm_to_vmem [thread:$0]  %s10305_s25, 16, %s278_s3, [#allocation28]  }
  0x95   :  { %s10139_s19 = smov [#allocation30]   ;;  %s10140_s23 = smov [#allocation33]  }
  0x96   :  { %s299_s18 = sshll.u32 %s10139_s19, 4  ;;  %s321_s6 = sshll.u32 %s10140_s23, 4  ;;  %s300_s18 = int_to_ptr.vmem [resolvable:$true] %s299_s18  ;;  %s322_s6 = int_to_ptr.vmem [resolvable:$true] %s321_s6 }
  0x97   :  { %s9774_s26 = scalar_lea.vmem %s300_s18, 16  ;;  %s9778_s28 = scalar_lea.vmem %s300_s18, 32 }
  0x98   :  { %p9775_p7 = scmp.ne.s32.totalorder %s300_s18, %s9774_s26  ;;  %p9779_p8 = scmp.lt.s32.totalorder %s300_s18, %s300_s18 }
  0x99   :  { %p9780_p9 = scmp.lt.s32.totalorder %s9778_s28, %s9774_s26 }
  0x9b   :  { %p9781_p10 = por %p9780_p9, %p9779_p8 }
  0x9d   :  { %p9782_p11 = pnand %p9781_p10, %p9775_p7 }
  0x9f   :  { %9785 = shalt.err (!%p9782_p11)
}
  0xa0   :  { %302 = dma.hbm_to_vmem [thread:$0]  %s10315_s13, 16, %s300_s18, [#allocation31]  }
  0xa1   :  { %s9794_s12 = scalar_lea.vmem %s322_s6, 16  ;;  %s9798_s4 = scalar_lea.vmem %s322_s6, 32 }
  0xa2   :  { %p9795_p12 = scmp.ne.s32.totalorder %s322_s6, %s9794_s12  ;;  %p9799_p13 = scmp.lt.s32.totalorder %s322_s6, %s322_s6 }
  0xa3   :  { %p9800_p0 = scmp.lt.s32.totalorder %s9798_s4, %s9794_s12 }
  0xa5   :  { %p9801_p1 = por %p9800_p0, %p9799_p13 }
  0xa7   :  { %p9802_p2 = pnand %p9801_p1, %p9795_p12 }
  0xa9   :  { %9805 = shalt.err (!%p9802_p2)
}
  0xaa   :  { %324 = dma.hbm_to_vmem [thread:$0]  %s10325_s5, 16, %s322_s6, [#allocation34]  }
  0xab   :  { %s10141_s25 = smov [#allocation36]   ;;  %s10142_s2 = smov [#allocation7]  }
  0xac   :  { %s343_s1 = sshll.u32 %s10141_s25, 4  ;;  %s106_s3 = sshll.u32 %s10142_s2, 4  ;;  %s344_s1 = int_to_ptr.vmem [resolvable:$true] %s343_s1  ;;  %s107_s3 = int_to_ptr.vmem [resolvable:$true] %s106_s3 }
  0xad   :  { %s9814_s11 = scalar_lea.vmem %s344_s1, 16  ;;  %s9818_s16 = scalar_lea.vmem %s344_s1, 32 }
  0xae   :  { %p9815_p3 = scmp.ne.s32.totalorder %s344_s1, %s9814_s11  ;;  %p9819_p4 = scmp.lt.s32.totalorder %s344_s1, %s344_s1 }
  0xaf   :  { %p9820_p5 = scmp.lt.s32.totalorder %s9818_s16, %s9814_s11 }
  0xb1   :  { %p9821_p6 = por %p9820_p5, %p9819_p4 }
  0xb3   :  { %p9822_p7 = pnand %p9821_p6, %p9815_p3 }
  0xb5   :  { %9825 = shalt.err (!%p9822_p7)
}
  0xb6   :  { %346 = dma.hbm_to_vmem [thread:$0]  %s10335_s30, 16, %s344_s1, [#allocation37]  }
  0xb7   :  { %s9834_s13 = scalar_lea.vmem %s107_s3, 5248  ;;  %p9839_p9 = scmp.lt.s32.totalorder %s107_s3, %s107_s3 }
  0xb8   :  { %p9835_p8 = scmp.ne.s32.totalorder %s107_s3, %s9834_s13  ;;  %p9840_p10 = scmp.lt.s32.totalorder %s9834_s13, %s9834_s13 }
  0xba   :  { %p9841_p11 = por %p9840_p10, %p9839_p9 }
  0xbc   :  { %p9842_p12 = pnand %p9841_p11, %p9835_p8 }
  0xbe   :  { %9845 = shalt.err (!%p9842_p12)
}
  0xbf   :  { %112 = dma.hbm_to_vmem [thread:$0]  %s10190_s17, 5248, %s107_s3, [#allocation8], %s10129_s0, %s10129_s0, %s10130_s22  }
  0xc0   :  { %s10143_s5 = smov [#allocation11]   ;;  %s10144_s15 = smov [#allocation14]  }
  0xc1   :  { %s142_s8 = sshll.u32 %s10143_s5, 4  ;;  %s170_s19 = sshll.u32 %s10144_s15, 4  ;;  %s143_s8 = int_to_ptr.vmem [resolvable:$true] %s142_s8  ;;  %s171_s19 = int_to_ptr.vmem [resolvable:$true] %s170_s19 }
  0xc2   :  { %s9854_s18 = scalar_lea.vmem %s143_s8, 8192  ;;  %p9859_p0 = scmp.lt.s32.totalorder %s143_s8, %s143_s8 }
  0xc3   :  { %p9855_p13 = scmp.ne.s32.totalorder %s143_s8, %s9854_s18  ;;  %p9860_p1 = scmp.lt.s32.totalorder %s9854_s18, %s9854_s18 }
  0xc5   :  { %p9861_p2 = por %p9860_p1, %p9859_p0 }
  0xc7   :  { %p9862_p3 = pnand %p9861_p2, %p9855_p13 }
  0xc9   :  { %9865 = shalt.err (!%p9862_p3)
}
  0xca   :  { %148 = dma.hbm_to_vmem [thread:$0]  %s10230_s24, 8192, %s143_s8, [#allocation10], %s10133_s7, %s10133_s7, %s10134_s10  }
  0xcb   :  { %s9874_s30 = scalar_lea.vmem %s171_s19, 1024  ;;  %p9879_p5 = scmp.lt.s32.totalorder %s171_s19, %s171_s19 }
  0xcc   :  { %p9875_p4 = scmp.ne.s32.totalorder %s171_s19, %s9874_s30  ;;  %p9880_p6 = scmp.lt.s32.totalorder %s9874_s30, %s9874_s30 }
  0xce   :  { %p9881_p7 = por %p9880_p6, %p9879_p5 }
  0xd0   :  { %p9882_p8 = pnand %p9881_p7, %p9875_p4 }
  0xd2   :  { %9885 = shalt.err (!%p9882_p8)
}
  0xd3   :  { %176 = dma.hbm_to_vmem [thread:$0]  %s10250_s20, 1024, %s171_s19, [#allocation13], %s10133_s7, %s10133_s7, %s10134_s10  }
  0xd4   :  { %s10145_s17 = smov [#allocation17]   ;;  %s10146_s22 = smov [#allocation20]  }
  0xd5   :  { %s198_s0 = sshll.u32 %s10145_s17, 4  ;;  %s220_s23 = sshll.u32 %s10146_s22, 4  ;;  %s199_s0 = int_to_ptr.vmem [resolvable:$true] %s198_s0  ;;  %s221_s23 = int_to_ptr.vmem [resolvable:$true] %s220_s23 }
  0xd6   :  { %s9894_s6 = scalar_lea.vmem %s199_s0, 1024  ;;  %p9899_p10 = scmp.lt.s32.totalorder %s199_s0, %s199_s0 }
  0xd7   :  { %p9895_p9 = scmp.ne.s32.totalorder %s199_s0, %s9894_s6  ;;  %p9900_p11 = scmp.lt.s32.totalorder %s9894_s6, %s9894_s6 }
  0xd9   :  { %p9901_p12 = por %p9900_p11, %p9899_p10 }
  0xdb   :  { %p9902_p13 = pnand %p9901_p12, %p9895_p9 }
  0xdd   :  { %9905 = shalt.err (!%p9902_p13)
}
  0xde   :  { %204 = dma.hbm_to_vmem [thread:$0]  %s10270_s14, 1024, %s199_s0, [#allocation16], %s10133_s7, %s10133_s7, %s10134_s10  }
  0xdf   :  { %s9914_s24 = scalar_lea.vmem %s221_s23, 1024  ;;  %p9919_p1 = scmp.lt.s32.totalorder %s221_s23, %s221_s23 }
  0xe0   :  { %p9915_p0 = scmp.ne.s32.totalorder %s221_s23, %s9914_s24  ;;  %p9920_p2 = scmp.lt.s32.totalorder %s9914_s24, %s9914_s24 }
  0xe2   :  { %p9921_p3 = por %p9920_p2, %p9919_p1 }
  0xe4   :  { %p9922_p4 = pnand %p9921_p3, %p9915_p0 }
  0xe6   :  { %9925 = shalt.err (!%p9922_p4)
}
  0xe7   :  { %s11720_s20 = sld [smem:[#allocation66_spill]]  ;;  %s10147_s26 = smov [#allocation23]  }
  0xe8   :  { %s242_s28 = sshll.u32 %s10147_s26, 4  ;;  %s10148_s12 = smov [#allocation26]   ;;  %s243_s28 = int_to_ptr.vmem [resolvable:$true] %s242_s28 }
  0xe9   :  { %s264_s4 = sshll.u32 %s10148_s12, 4  ;;  %s9934_s25 = scalar_lea.vmem %s243_s28, 2048  ;;  %s265_s4 = int_to_ptr.vmem [resolvable:$true] %s264_s4 }
  0xea   :  { %p9935_p5 = scmp.ne.s32.totalorder %s243_s28, %s9934_s25  ;;  %p9939_p6 = scmp.lt.s32.totalorder %s243_s28, %s243_s28 }
  0xeb   :  { %p9940_p7 = scmp.lt.s32.totalorder %s9934_s25, %s9934_s25 }
  0xed   :  { %226 = dma.hbm_to_vmem [thread:$0]  %s11720_s20, 1024, %s221_s23, [#allocation19], %s10133_s7, %s10133_s7, %s10134_s10  }
  0xee   :  { %p9941_p8 = por %p9940_p7, %p9939_p6 }
  0xf0   :  { %p9942_p9 = pnand %p9941_p8, %p9935_p5 }
  0xf2   :  { %9945 = shalt.err (!%p9942_p9)
}
  0xf3   :  { %s11721_s14 = sld [smem:[#allocation67_spill]]  ;;  %s9954_s1 = scalar_lea.vmem %s265_s4, 1024 }
  0xf4   :  { %p9955_p10 = scmp.ne.s32.totalorder %s265_s4, %s9954_s1  ;;  %p9959_p11 = scmp.lt.s32.totalorder %s265_s4, %s265_s4 }
  0xf5   :  { %p9960_p12 = scmp.lt.s32.totalorder %s9954_s1, %s9954_s1 }
  0xf7   :  { %p9961_p13 = por %p9960_p12, %p9959_p11 }
  0xf9   :  { %248 = dma.hbm_to_vmem [thread:$0]  %s11721_s14, 2048, %s243_s28, [#allocation22], %s10133_s7, %s10133_s7, %s10134_s10  }
  0xfa   :  { %p9962_p0 = pnand %p9961_p13, %p9955_p10 }
  0xfc   :  { %9965 = shalt.err (!%p9962_p0)
}
  0xfd   :  { %s11722_s2 = sld [smem:[#allocation68_spill]]  ;;  %s10149_s3 = smov [#allocation29]  }
  0xfe   :  { %s286_s11 = sshll.u32 %s10149_s3, 4  ;;  %s10150_s16 = smov [#allocation32]   ;;  %s287_s11 = int_to_ptr.vmem [resolvable:$true] %s286_s11 }
  0xff   :  { %s308_s13 = sshll.u32 %s10150_s16, 4  ;;  %s9974_s5 = scalar_lea.vmem %s287_s11, 1024  ;;  %s309_s13 = int_to_ptr.vmem [resolvable:$true] %s308_s13 }
 0x100   :  { %p9975_p1 = scmp.ne.s32.totalorder %s287_s11, %s9974_s5  ;;  %p9979_p2 = scmp.lt.s32.totalorder %s287_s11, %s287_s11 }
 0x101   :  { %p9980_p3 = scmp.lt.s32.totalorder %s9974_s5, %s9974_s5 }
 0x103   :  { %270 = dma.hbm_to_vmem [thread:$0]  %s11722_s2, 1024, %s265_s4, [#allocation25], %s10133_s7, %s10133_s7, %s10134_s10  }
 0x104   :  { %p9981_p4 = por %p9980_p3, %p9979_p2 }
 0x106   :  { %p9982_p5 = pnand %p9981_p4, %p9975_p1 }
 0x108   :  { %9985 = shalt.err (!%p9982_p5)
}
 0x109   :  { %s11723_s8 = sld [smem:[#allocation69_spill]]  ;;  %s9994_s15 = scalar_lea.vmem %s309_s13, 1024 }
 0x10a   :  { %p9995_p6 = scmp.ne.s32.totalorder %s309_s13, %s9994_s15  ;;  %p9999_p7 = scmp.lt.s32.totalorder %s309_s13, %s309_s13 }
 0x10b   :  { %p10000_p8 = scmp.lt.s32.totalorder %s9994_s15, %s9994_s15 }
 0x10d   :  { %p10001_p9 = por %p10000_p8, %p9999_p7 }
 0x10f   :  { %292 = dma.hbm_to_vmem [thread:$0]  %s11723_s8, 1024, %s287_s11, [#allocation28], %s10133_s7, %s10133_s7, %s10134_s10  }
 0x110   :  { %p10002_p10 = pnand %p10001_p9, %p9995_p6 }
 0x112   :  { %10005 = shalt.err (!%p10002_p10)
}
 0x113   :  { %s11724_s19 = sld [smem:[#allocation70_spill]]  ;;  %s10151_s18 = smov [#allocation35]  }
 0x114   :  { %s330_s30 = sshll.u32 %s10151_s18, 4  ;;  %s10152_s17 = smov [#allocation38]   ;;  %s331_s30 = int_to_ptr.vmem [resolvable:$true] %s330_s30 }
 0x115   :  { %s352_s0 = sshll.u32 %s10152_s17, 4  ;;  %s10014_s22 = scalar_lea.vmem %s331_s30, 1024  ;;  %s353_s0 = int_to_ptr.vmem [resolvable:$true] %s352_s0 }
 0x116   :  { %p10015_p11 = scmp.ne.s32.totalorder %s331_s30, %s10014_s22  ;;  %p10019_p12 = scmp.lt.s32.totalorder %s331_s30, %s331_s30 }
 0x117   :  { %p10020_p13 = scmp.lt.s32.totalorder %s10014_s22, %s10014_s22 }
 0x119   :  { %314 = dma.hbm_to_vmem [thread:$0]  %s11724_s19, 1024, %s309_s13, [#allocation31], %s10133_s7, %s10133_s7, %s10134_s10  }
 0x11a   :  { %p10021_p0 = por %p10020_p13, %p10019_p12 }
 0x11c   :  { %p10022_p1 = pnand %p10021_p0, %p10015_p11 }
 0x11e   :  { %10025 = shalt.err (!%p10022_p1)
}
 0x11f   :  { %s11725_s23 = sld [smem:[#allocation71_spill]]  ;;  %s10034_s6 = scalar_lea.vmem %s353_s0, 1024 }
 0x120   :  { %p10035_p2 = scmp.ne.s32.totalorder %s353_s0, %s10034_s6  ;;  %p10039_p3 = scmp.lt.s32.totalorder %s353_s0, %s353_s0 }
 0x121   :  { %p10040_p4 = scmp.lt.s32.totalorder %s10034_s6, %s10034_s6 }
 0x123   :  { %p10041_p5 = por %p10040_p4, %p10039_p3 }
 0x125   :  { %336 = dma.hbm_to_vmem [thread:$0]  %s11725_s23, 1024, %s331_s30, [#allocation34], %s10133_s7, %s10133_s7, %s10134_s10  }
 0x126   :  { %p10042_p6 = pnand %p10041_p5, %p10035_p2 }
 0x128   :  { %10045 = shalt.err (!%p10042_p6)
}
 0x129   :  { %s11726_s24 = sld [smem:[#allocation72_spill]]  ;;  %s10153_s20 = smov [#allocation39]  }
 0x12a   :  { %s365_s26 = sshll.u32 %s10153_s20, 4  ;;  %s366_s26 = int_to_ptr.vmem [resolvable:$true] %s365_s26 }
 0x12b   :  { %s10054_s28 = scalar_lea.vmem %s366_s26, 16  ;;  %s10058_s12 = scalar_lea.vmem %s366_s26, 32 }
 0x12c   :  { %p10055_p7 = scmp.ne.s32.totalorder %s366_s26, %s10054_s28  ;;  %p10059_p8 = scmp.lt.s32.totalorder %s366_s26, %s366_s26 }
 0x12d   :  { %p10060_p9 = scmp.lt.s32.totalorder %s10058_s12, %s10054_s28 }
 0x12f   :  { %358 = dma.hbm_to_vmem [thread:$0]  %s11726_s24, 1024, %s353_s0, [#allocation37], %s10133_s7, %s10133_s7, %s10134_s10  }
 0x130   :  { %p10061_p10 = por %p10060_p9, %p10059_p8 }
 0x132   :  { %p10062_p11 = pnand %p10061_p10, %p10055_p7 }
 0x134   :  { %10065 = shalt.err (!%p10062_p11)
}
 0x135   :  { %s11727_s4 = sld [smem:[#allocation73_spill]] }
 0x13b   :  { %368 = dma.hbm_to_vmem [thread:$0]  %s11727_s4, 16, %s366_s26, [#allocation40]  }
 0x13c   :  { %10066 = dma.done.wait [#allocation8], 5248  }
 0x13d   :  { %10067 = vsyncadd [#allocation8], 4294962048 }
 0x13e   :  { %10068 = dma.done.wait [#allocation10], 17408  }
 0x13f   :  { %10069 = vsyncadd [#allocation10], 4294949888 }
 0x140   :  { %10070 = dma.done.wait [#allocation13], 2048  }
 0x141   :  { %10071 = vsyncadd [#allocation13], 4294965248 }
 0x142   :  { %10072 = dma.done.wait [#allocation16], 5120  }
 0x143   :  { %10073 = vsyncadd [#allocation16], 4294962176 }
 0x144   :  { %10074 = dma.done.wait [#allocation19], 1040  }
 0x145   :  { %10075 = vsyncadd [#allocation19], 4294966256 }
 0x146   :  { %10076 = dma.done.wait [#allocation22], 2064  }
 0x147   :  { %10077 = vsyncadd [#allocation22], 4294965232 }
 0x148   :  { %10078 = dma.done.wait [#allocation25], 1040  }
 0x149   :  { %10079 = vsyncadd [#allocation25], 4294966256 }
 0x14a   :  { %10080 = dma.done.wait [#allocation28], 1040  }
 0x14b   :  { %10081 = vsyncadd [#allocation28], 4294966256 }
 0x14c   :  { %10082 = dma.done.wait [#allocation31], 1040  }
 0x14d   :  { %10083 = vsyncadd [#allocation31], 4294966256 }
 0x14e   :  { %10084 = dma.done.wait [#allocation34], 1040  }
 0x14f   :  { %10085 = vsyncadd [#allocation34], 4294966256 }
 0x150   :  { %10086 = dma.done.wait [#allocation37], 1040  }
 0x151   :  { %10087 = vsyncadd [#allocation37], 4294966256 }
 0x152   :  { %10088 = dma.done.wait [#allocation40], 16  }
 0x153   :  { %10089 = vsyncadd [#allocation40], 4294967280  ;;  %vm453_vm0 = vcmask 19456   ;;  %vm465_vm1 = vcmask 831256   ;;  %v10154_v0 = vmov 0   ;;  %s11728_s10 = sld [smem:[#allocation53_spill]] }
 0x154   :  { %455 = vst.msk [vmem:[#allocation2 + $0x4] sm:$0xf] %vm453_vm0, %v10154_v0  ;;  %456 = vst.msk [vmem:[#allocation2 + $0x8] sm:$0xf] %vm453_vm0, %v10154_v0  ;;  %1236 = vmatprep.mubr.bf16.mxu1 %v10154_v0  ;;  %vm11695_vm2 = vsmask.f32 256 }
 0x155   :  { %457 = vst.msk [vmem:[#allocation2 + $0xc] sm:$0xf] %vm453_vm0, %v10154_v0  ;;  %461 = vst.msk [vmem:[#allocation2 + $0x18] sm:$0xf] %vm453_vm0, %v10154_v0  ;;  %vm606_vm3 = vsmask.f32 4368 }
 0x156   :  { %462 = vst.msk [vmem:[#allocation2 + $0x1c] sm:$0xf] %vm453_vm0, %v10154_v0  ;;  %463 = vst.msk [vmem:[#allocation2 + $0x20] sm:$0xf] %vm453_vm0, %v10154_v0  ;;  %vm436_vm4 = vcmask 827392   ;;  %s10155_s25 = smov 3  }
 0x157   :  { %468 = vst.msk [vmem:[#allocation2 + $0x8] sm:$0xf] %vm465_vm1, %v10154_v0  ;;  %467 = vst.msk [vmem:[#allocation2 + $0x4] sm:$0xf] %vm465_vm1, %v10154_v0  ;;  %vm11694_vm6 = vsmask.f32 7938 }
 0x158   :  { %469 = vst.msk [vmem:[#allocation2 + $0xc] sm:$0xf] %vm465_vm1, %v10154_v0  ;;  %473 = vst.msk [vmem:[#allocation2 + $0x18] sm:$0xf] %vm465_vm1, %v10154_v0  ;;  %v439_v28 = vld [vmem:[#allocation2] sm:$0x1] }
 0x159   :  { %474 = vst.msk [vmem:[#allocation2 + $0x1c] sm:$0xf] %vm465_vm1, %v10154_v0  ;;  %475 = vst.msk [vmem:[#allocation2 + $0x20] sm:$0xf] %vm465_vm1, %v10154_v0  ;;  %v598_v1 = vld [vmem:[%s11728_s10] sm:$0xf] }
 0x15a   :  { %v599_v2 = vld [vmem:[%s11728_s10 + $0x4] sm:$0xf]  ;;  %v600_v3 = vld [vmem:[%s11728_s10 + $0x8] sm:$0xf]  ;;  %v609_v4 = vshrl.u32 %v598_v1, 16  ;;  %v612_v5 = vshll.u32 %v598_v1, 16  ;;  %vm10464_vm5 = vmor %vm11695_vm2, %vm606_vm3 }
 0x15b   :  { %v617_v6 = vshrl.u32 %v599_v2, 16  ;;  %v626_v7 = vshrl.u32 %v600_v3, 16  ;;  %v601_v8 = vld [vmem:[%s11728_s10 + $0xc] sm:$0xf]  ;;  %v629_v9 = vshll.u32 %v600_v3, 16  ;;  %v620_v10 = vshll.u32 %v599_v2, 16  ;;  %vm10472_vm7 = vmand %vm436_vm4, %vm11695_vm2 }
 0x15c   :  { %v635_v11 = vshrl.u32 %v601_v8, 16  ;;  %v638_v12 = vshll.u32 %v601_v8, 16  ;;  %v602_v13 = vld [vmem:[%s11728_s10 + $0x10] sm:$0xf]  ;;  %v611_v14 = vrot.slane %v609_v4, 7  ;;  %vm10481_vm8 = vmand %vm436_vm4, %vm11694_vm6  ;;  %vm458_vm9 = vcmask 16384  }
 0x15d   :  { %v619_v15 = vrot.slane %v617_v6, 7  ;;  %v628_v16 = vrot.slane %v626_v7, 7  ;;  %v644_v17 = vshrl.u32 %v602_v13, 16  ;;  %v603_v18 = vld [vmem:[%s11728_s10 + $0x14] sm:$0xf]  ;;  %v647_v37 = vshll.u32 %v602_v13, 16 }
 0x15e   :  { %v637_v20 = vrot.slane %v635_v11, 7  ;;  %v652_v21 = vshrl.u32 %v603_v18, 16  ;;  %v604_v22 = vld [vmem:[%s11728_s10 + $0x18] sm:$0xf]  ;;  %v614_v23 = vor.u32 %v612_v5, %v611_v14  ;;  %v615_v24 = vrot.slane %v611_v14, 4  ;;  %s11735_s14 = sld [smem:[#allocation54_spill]] }
 0x15f   :  { %v624_v25 = vrot.slane %v619_v15, 4  ;;  %v631_v26 = vor.u32 %v629_v9, %v628_v16  ;;  %v605_v27 = vld [vmem:[%s11728_s10 + $0x1c] sm:$0xf]  ;;  %v622_v29 = vor.u32 %v620_v10, %v619_v15  ;;  %v633_v30 = vrot.slane %v628_v16, 4  ;;  %v447_v33 = vld [vmem:[#allocation2 + $0x10] sm:$0x1] }
 0x160   :  { %v640_v31 = vor.u32 %v638_v12, %v637_v20  ;;  %v442_v34 = vld [vmem:[#allocation2 + $0x14] sm:$0x1]  ;;  %678 = vrot.lane.b32.xlu0 %v614_v23, %s10155_s25  ;;  %v646_v36 = vrot.slane %v644_v17, 7  ;;  %v661_v38 = vshrl.u32 %v604_v22, 16  ;;  %v450_v40 = vld [vmem:[#allocation2 + $0x24] sm:$0x1] }
 0x161   :  { %v632_v35 = vsel %vm10464_vm5, %v624_v25, %v631_v26  ;;  %v623_v41 = vsel %vm10464_vm5, %v615_v24, %v622_v29  ;;  %v654_v42 = vrot.slane %v652_v21, 7  ;;  %v655_v43 = vshll.u32 %v603_v18, 16  ;;  %v524_v13 = vld [vmem:[#allocation4 + $0x8] sm:$0x11]  ;;  %v527_v14 = vld [vmem:[#allocation4 + $0x18] sm:$0x11] }
 0x162   :  { %682 = vrot.lane.b32.xlu1 %v632_v35, %s10155_s25  ;;  %v670_v44 = vshrl.u32 %v605_v27, 16  ;;  %v641_v45 = vsel %vm10464_vm5, %v633_v30, %v640_v31  ;;  %v664_v46 = vshll.u32 %v604_v22, 16  ;;  %v642_v47 = vrot.slane %v637_v20, 4  ;;  %v573_v16 = vld [vmem:[#allocation6] sm:$0x5]  ;;  %s10156_s1 = smov 76  }
 0x163   :  { %v663_v48 = vrot.slane %v661_v38, 7  ;;  %v440_v49 = vsel %vm10472_vm7, 0, %v439_v28  ;;  %vm470_vm10 = vcmask 828184   ;;  %v649_v50 = vor.u32 %v647_v37, %v646_v36  ;;  %v576_v17 = vld [vmem:[#allocation6 + $0x4] sm:$0x5]  ;;  %s10157_s2 = smov 102  }
 0x164   :  { %680 = vrot.lane.b32.xlu0 %v623_v41, %s10155_s25  ;;  %441 = vst [vmem:[#allocation2] sm:$0x1] %v440_v49  ;;  %v448_v51 = vsel %vm10481_vm8, 0, %v447_v33  ;;  %v443_v52 = vsel %vm10472_vm7, 0, %v442_v34  ;;  %v451_v53 = vsel %vm10481_vm8, 0, %v450_v40  ;;  %v650_v54 = vrot.slane %v646_v36, 4 }
 0x165   :  { %v657_v55 = vor.u32 %v655_v43, %v654_v42  ;;  %v672_v56 = vrot.slane %v670_v44, 7  ;;  %v673_v57 = vshll.u32 %v605_v27, 16  ;;  %454 = vst.msk [vmem:[#allocation2] sm:$0xf] %vm453_vm0, %v10154_v0  ;;  %449 = vst [vmem:[#allocation2 + $0x10] sm:$0x1] %v448_v51  ;;  %v666_v59 = vor.u32 %v664_v46, %v663_v48 }
 0x166   :  { %684 = vrot.lane.b32.xlu1 %v641_v45, %s10155_s25  ;;  %444 = vst [vmem:[#allocation2 + $0x14] sm:$0x1] %v443_v52  ;;  %452 = vst [vmem:[#allocation2 + $0x24] sm:$0x1] %v451_v53  ;;  %v659_v58 = vrot.slane %v654_v42, 4  ;;  %v668_v61 = vrot.slane %v663_v48, 4 }
 0x167   :  { %466 = vst.msk [vmem:[#allocation2] sm:$0xf] %vm465_vm1, %v10154_v0  ;;  %v658_v60 = vsel %vm10464_vm5, %v650_v54, %v657_v55  ;;  %v675_v62 = vor.u32 %v673_v57, %v672_v56  ;;  %v677_v2 = vrot.slane %v672_v56, 4  ;;  %v8959_v3 = vld [vmem:[%s11735_s14 + $0x74] ss:$8 sps:$4 sm:$0xff]   ;;  %vm508_vm11 = vcmask 1040384  }
 0x168   :  { %459 = vst.msk [vmem:[#allocation2 + $0x10] sm:$0x1] %vm458_vm9, %v10154_v0  ;;  %464 = vst.msk [vmem:[#allocation2 + $0x24] sm:$0x1] %vm458_vm9, %v10154_v0  ;;  %686 = vrot.lane.b32.xlu0 %v642_v47, %s10155_s25  ;;  %v667_v63 = vsel %vm10464_vm5, %v659_v58, %v666_v59  ;;  %v8961_v4 = vld [vmem:[%s11735_s14 + $0x70] ss:$8 sps:$4 sm:$0xff]   ;;  %1131 = vmatprep.subr.bf16.mxu0 %v8959_v3 }
 0x169   :  { %460 = vst.msk [vmem:[#allocation2 + $0x14] sm:$0xf] %vm453_vm0, %v10154_v0  ;;  %v676_v1 = vsel %vm10464_vm5, %v668_v61, %v675_v62  ;;  %v8962_v5 = vld [vmem:[%s11735_s14 + $0x64] ss:$8 sps:$4 sm:$0xff]   ;;  %1132 = vmatpush1.bf16.msra.mxu0 %v8961_v4  ;;  %v8964_v6 = vld [vmem:[%s11735_s14 + $0x60] ss:$8 sps:$4 sm:$0xff]   ;;  %vm10537_vm14 = vmand %vm508_vm11, %vm11695_vm2 }
 0x16a   :  { %471 = vst.msk [vmem:[#allocation2 + $0x10] sm:$0x1] %vm470_vm10, %v10154_v0  ;;  %476 = vst.msk [vmem:[#allocation2 + $0x24] sm:$0x1] %vm470_vm10, %v10154_v0  ;;  %688 = vrot.lane.b32.xlu1 %v649_v50, %s10155_s25  ;;  %1133 = vmatprep.subr.bf16.mxu0 %v8962_v5  ;;  %v8965_v7 = vld [vmem:[%s11735_s14 + $0x54] ss:$8 sps:$4 sm:$0xff]  }
 0x16b   :  { %472 = vst.msk [vmem:[#allocation2 + $0x14] sm:$0xf] %vm465_vm1, %v10154_v0  ;;  %v8967_v8 = vld [vmem:[%s11735_s14 + $0x50] ss:$8 sps:$4 sm:$0xff]   ;;  %vm11691_vm12 = vcmask 258052   ;;  %vm10544_vm15 = vmand %vm508_vm11, %vm11694_vm6  ;;  %vm532_vm3 = vcmask 122880  }
 0x16c   :  { %690 = vrot.lane.b32.xlu0 %v658_v60, %s10155_s25  ;;  %vm11689_vm13 = vsmask.f32 7954  ;;  %v8968_v9 = vld [vmem:[%s11735_s14 + $0x44] ss:$8 sps:$4 sm:$0xff]   ;;  %v8970_v11 = vld [vmem:[%s11735_s14 + $0x40] ss:$8 sps:$4 sm:$0xff]  }
 0x16d   :  { %1134 = vmatpush1.bf16.msra.mxu0 %v8964_v6  ;;  %vm570_vm0 = vsmask.f32 2304  ;;  %v8971_v15 = vld [vmem:[%s11735_s14 + $0x34] ss:$8 sps:$4 sm:$0xff]   ;;  %vm522_vm1 = vmand %vm11691_vm12, %vm11689_vm13  ;;  %vm538_vm4 = vcmask 254080   ;;  %vm551_vm5 = vcmask 1042434  }
 0x16e   :  { %692 = vrot.lane.b32.xlu1 %v667_v63, %s10155_s25  ;;  %1135 = vmatprep.subr.bf16.mxu0 %v8965_v7  ;;  %vm523_vm7 = vmor %vm522_vm1, %vm10544_vm15  ;;  %vm580_vm8 = vsmask.f32 7942  ;;  %vm583_vm10 = vsmask.f32 7950  ;;  %v907_v21 = vld [vmem:[%s11735_s14 + $0x130] sm:$0x11] }
 0x16f   :  { %v525_v18 = vsel %vm523_vm7, 0, %v524_v13  ;;  %v528_v19 = vsel %vm523_vm7, 0, %v527_v14  ;;  %vm10554_vm9 = vmand %vm551_vm5, %vm570_vm0  ;;  %vm11693_vm1 = vcmask 1041409   ;;  %vm582_vm13 = vcmask 1043459   ;;  %v8997_v24 = vld [vmem:[%s11735_s14 + $0x124] ss:$8 sps:$4 sm:$0xff]  }
 0x170   :  { %694 = vrot.lane.b32.xlu0 %v676_v1, %s10155_s25  ;;  %526 = vst [vmem:[#allocation4 + $0x8] sm:$0x11] %v525_v18  ;;  %529 = vst [vmem:[#allocation4 + $0x18] sm:$0x11] %v528_v19  ;;  %v7818_v22 = vcombine.high %v907_v21, %v907_v21  ;;  %v7817_v23 = vcombine.low %v907_v21, %v907_v21  ;;  %v586_v28 = vld [vmem:[#allocation6] sm:$0xa] }
 0x171   :  { %1136 = vmatpush1.bf16.msra.mxu0 %v8967_v8  ;;  %vm572_vm15 = vmor %vm10554_vm9, %vm10537_vm14  ;;  %533 = vst.msk [vmem:[#allocation4 + $0x8] sm:$0x1] %vm532_vm3, %v10154_v0  ;;  %v589_v29 = vld [vmem:[#allocation6 + $0x4] sm:$0xa]  ;;  %v8973_v30 = vld [vmem:[%s11735_s14 + $0x30] ss:$8 sps:$4 sm:$0xff]  }
 0x172   :  { %696 = vrot.lane.b32.xlu1 %v677_v2, %s10155_s25  ;;  %1137 = vmatprep.subr.bf16.mxu0 %v8968_v9  ;;  %535 = vst.msk [vmem:[#allocation4 + $0x18] sm:$0x1] %vm532_vm3, %v10154_v0  ;;  %v574_v25 = vsel %vm572_vm15, 0, %v573_v16  ;;  %v577_v26 = vsel %vm572_vm15, 0, %v576_v17  ;;  %vm10574_vm0 = vmand %vm11693_vm1, %vm580_vm8  ;;  %v1126_v31 = vsel %vm508_vm11, %v7817_v23, 0  ;;  %vm592_vm7 = vcmask 517120  }
 0x173   :  { %539 = vst.msk [vmem:[#allocation4 + $0xc] sm:$0x1] %vm538_vm4, %v10154_v0  ;;  %541 = vst.msk [vmem:[#allocation4 + $0x1c] sm:$0x1] %vm538_vm4, %v10154_v0  ;;  %7819 = vmatprep.subr.msk.bf16.mxu1 %vm508_vm11, %v7818_v22  ;;  %v8974_v32 = vld [vmem:[%s11735_s14 + $0x24] ss:$8 sps:$4 sm:$0xff]  }
 0x174   :  { %575 = vst [vmem:[#allocation6] sm:$0x5] %v574_v25  ;;  %578 = vst [vmem:[#allocation6 + $0x4] sm:$0x5] %v577_v26  ;;  %1213 = vmatpush1.bf16.msra.mxu1 %v1126_v31  ;;  %v9001_v33 = vld [vmem:[%s11735_s14 + $0x120] ss:$8 sps:$4 sm:$0xff]  }
 0x175   :  { %1138 = vmatpush1.bf16.msra.mxu0 %v8970_v11  ;;  %vm584_vm3 = vmand %vm582_vm13, %vm583_vm10  ;;  %1214 = vmatprep.subr.bf16.mxu1 %v8997_v24  ;;  %v9003_v36 = vld [vmem:[%s11735_s14 + $0x114] ss:$8 sps:$4 sm:$0xff]   ;;  %v8976_v37 = vld [vmem:[%s11735_s14 + $0x20] ss:$8 sps:$4 sm:$0xff]   ;;  %vm708_vm11 = vcmask 805912   ;;  %vm717_vm9 = vcmask 802840  }
 0x176   :  { %1139 = vmatprep.subr.bf16.mxu0 %v8971_v15  ;;  %vm585_vm4 = vmor %vm584_vm3, %vm10574_vm0  ;;  %v8977_v38 = vld [vmem:[%s11735_s14 + $0x14] ss:$8 sps:$4 sm:$0xff]   ;;  %v9007_v39 = vld [vmem:[%s11735_s14 + $0x110] ss:$8 sps:$4 sm:$0xff]   ;;  %vm824_vm15 = vcmask 1046528   ;;  %vm1115_vm3 = vcmask 408576  }
 0x177   :  { %v587_v34 = vsel %vm585_vm4, 0, %v586_v28  ;;  %v590_v35 = vsel %vm585_vm4, 0, %v589_v29  ;;  %v9009_v40 = vld [vmem:[%s11735_s14 + $0x104] ss:$8 sps:$4 sm:$0xff]   ;;  %v8979_v41 = vld [vmem:[%s11735_s14 + $0x10] ss:$8 sps:$4 sm:$0xff]   ;;  %vm10614_vm8 = vmand %vm708_vm11, %vm11694_vm6 }
 0x178   :  { %588 = vst [vmem:[#allocation6] sm:$0xa] %v587_v34  ;;  %591 = vst [vmem:[#allocation6 + $0x4] sm:$0xa] %v590_v35  ;;  %1215 = vmatpush1.bf16.msra.mxu1 %v9001_v33  ;;  %v8980_v42 = vld [vmem:[%s11735_s14 + $0x4] ss:$8 sps:$4 sm:$0xff]  }
 0x179   :  { %1140 = vmatpush1.bf16.msra.mxu0 %v8973_v30  ;;  %593 = vst.msk [vmem:[#allocation6] sm:$0x3] %vm592_vm7, %v10154_v0  ;;  %594 = vst.msk [vmem:[#allocation6 + $0x4] sm:$0x3] %vm592_vm7, %v10154_v0  ;;  %1216 = vmatprep.subr.bf16.mxu1 %v9003_v36  ;;  %v9013_v43 = vld [vmem:[%s11735_s14 + $0x100] ss:$8 sps:$4 sm:$0xff]  }
 0x17a   :  { %1141 = vmatprep.subr.bf16.mxu0 %v8974_v32  ;;  %v8982_v44 = vld [vmem:[%s11735_s14] ss:$8 sps:$4 sm:$0xff]   ;;  %v8983_v45 = vld [vmem:[%s11735_s14 + $0xf4] ss:$8 sps:$4 sm:$0xff]   ;;  %v8985_v46 = vld [vmem:[%s11735_s14 + $0xf0] ss:$8 sps:$4 sm:$0xff]  }
 0x17b   :  { %v8986_v47 = vld [vmem:[%s11735_s14 + $0xe4] ss:$8 sps:$4 sm:$0xff]   ;;  %v8988_v48 = vld [vmem:[%s11735_s14 + $0xe0] ss:$8 sps:$4 sm:$0xff]   ;;  %v8989_v49 = vld [vmem:[%s11735_s14 + $0xd4] ss:$8 sps:$4 sm:$0xff]  }
 0x17c   :  { %1217 = vmatpush1.bf16.msra.mxu1 %v9007_v39  ;;  %v8991_v50 = vld [vmem:[%s11735_s14 + $0xd0] ss:$8 sps:$4 sm:$0xff]   ;;  %v8993_v51 = vld [vmem:[%s11735_s14 + $0xc4] ss:$8 sps:$4 sm:$0xff]   ;;  %v8996_v52 = vld [vmem:[%s11735_s14 + $0xc0] ss:$8 sps:$4 sm:$0xff]  }
 0x17d   :  { %1142 = vmatpush1.bf16.msra.mxu0 %v8976_v37  ;;  %1218 = vmatprep.subr.bf16.mxu1 %v9009_v40  ;;  %v8999_v53 = vld [vmem:[%s11735_s14 + $0xb4] ss:$8 sps:$4 sm:$0xff]   ;;  %v9002_v54 = vld [vmem:[%s11735_s14 + $0xb0] ss:$8 sps:$4 sm:$0xff]   ;;  %v9005_v55 = vld [vmem:[%s11735_s14 + $0xa4] ss:$8 sps:$4 sm:$0xff]  }
 0x17e   :  { %1143 = vmatprep.subr.bf16.mxu0 %v8977_v38  ;;  %v9008_v56 = vld [vmem:[%s11735_s14 + $0xa0] ss:$8 sps:$4 sm:$0xff]   ;;  %v9011_v57 = vld [vmem:[%s11735_s14 + $0x94] ss:$8 sps:$4 sm:$0xff]   ;;  %v9014_v58 = vld [vmem:[%s11735_s14 + $0x90] ss:$8 sps:$4 sm:$0xff]  }
 0x17f   :  { %v710_v60 = vld [vmem:[#allocation2] sm:$0xf]  ;;  %vm10619_vm10 = vmand %vm717_vm9, %vm11695_vm2  ;;  %v719_v3 = vld [vmem:[#allocation2 + $0x10] sm:$0x1]  ;;  %vm11692_vm0 = vsmask.f32 7424 }
 0x180   :  { %1219 = vmatpush1.bf16.msra.mxu1 %v9013_v43  ;;  %v722_v5 = vld [vmem:[#allocation2 + $0x14] sm:$0xf]  ;;  %v9015_v6 = vld [vmem:[%s11735_s14 + $0x84] ss:$8 sps:$4 sm:$0xff]   ;;  %v9017_v7 = vld [vmem:[%s11735_s14 + $0x80] ss:$8 sps:$4 sm:$0xff]  }
 0x181   :  { %1144 = vmatpush1.bf16.msra.mxu0 %v8979_v41  ;;  %v728_v18 = vld [vmem:[#allocation2 + $0x24] sm:$0x1]  ;;  %vm856_vm4 = vcmask 621568   ;;  %vm843_vm7 = vcmask 834560   ;;  %s11748_s3 = sld [smem:[#allocation55_spill]]  ;;  %s10158_s11 = smov 32  }
 0x182   :  { %1145 = vmatprep.subr.bf16.mxu0 %v8980_v42  ;;  %vm11697_vm12 = vcmask 1046534   ;;  %s10160_s16 = smov 6   ;;  %s10161_s13 = smov 88  }
 0x183   :  { %s10162_s5 = smov 108   ;;  %s11760_s8 = sld [smem:[#allocation56_spill]] }
 0x184   :  { %s10163_s15 = smov 16   ;;  %s11782_s19 = sld [smem:[#allocation57_spill]] }
 0x185   :  { %1146 = vmatpush1.bf16.msra.mxu0 %v8982_v44  ;;  %s11783_s18 = sld [smem:[#allocation62_spill]] }
 0x186   :  { %1147 = vmatprep.subr.bf16.mxu0 %v8983_v45  ;;  %s11788_s30 = sld [smem:[#allocation63_spill]] }
 0x187   :  { %s11789_s17 = sld [smem:[#allocation64_spill]] }
 0x188   :  { %s11790_s0 = sld [smem:[#allocation58_spill]] }
 0x189   :  { %1148 = vmatpush2.bf16.msra.mxu0 %v8985_v46  ;;  %v2126_v10 = vld [vmem:[%s11760_s8] sm:$0x3]  ;;  %s11798_s22 = sld [smem:[#allocation59_spill]] }
 0x18a   :  { %1149 = vmatprep.subr.bf16.mxu0 %v8986_v47 }
 0x18d   :  { %1150 = vmatpush2.bf16.msra.mxu0 %v8988_v48 }
 0x18e   :  { %1151 = vmatprep.subr.bf16.mxu0 %v8989_v49 }
 0x191   :  { %1152 = vmatpush2.bf16.msra.mxu0 %v8991_v50 }
 0x192   :  { %1153 = vmatprep.subr.bf16.mxu0 %v8993_v51 }
 0x195   :  { %1154 = vmatpush2.bf16.msra.mxu0 %v8996_v52 }
 0x196   :  { %1155 = vmatprep.subr.bf16.mxu0 %v8999_v53 }
 0x199   :  { %1156 = vmatpush2.bf16.msra.mxu0 %v9002_v54 }
 0x19a   :  { %1157 = vmatprep.subr.bf16.mxu0 %v9005_v55 }
 0x19d   :  { %1158 = vmatpush2.bf16.msra.mxu0 %v9008_v56 }
 0x19e   :  { %1159 = vmatprep.subr.bf16.mxu0 %v9011_v57 }
 0x1a1   :  { %1160 = vmatpush2.bf16.msra.mxu0 %v9014_v58 }
 0x1a2   :  { %1161 = vmatprep.subr.bf16.mxu0 %v9015_v6 }
 0x1a5   :  { %1162 = vmatpush2.bf16.msra.mxu0 %v9017_v7 }
 0x1d2   :  { %v679_v62 = vpop.permute.xlu0 %678 }
 0x1d3   :  { %v711_v63 = vsel %vm10614_vm8, %v679_v62, %v710_v60 }
 0x1d4   :  { %v683_v1 = vpop.permute.xlu1 %682  ;;  %712 = vst [vmem:[#allocation2] sm:$0xf] %v711_v63 }
 0x1d5   :  { %715 = vst.msk [vmem:[#allocation2 + $0x8] sm:$0xf] %vm708_vm11, %v683_v1 }
 0x1d6   :  { %v681_v2 = vpop.permute.xlu0 %680 }
 0x1d7   :  { %714 = vst.msk [vmem:[#allocation2 + $0x4] sm:$0xf] %vm708_vm11, %v681_v2 }
 0x1d8   :  { %v685_v4 = vpop.permute.xlu1 %684 }
 0x1d9   :  { %716 = vst.msk [vmem:[#allocation2 + $0xc] sm:$0xf] %vm708_vm11, %v685_v4 }
 0x1da   :  { %v687_v8 = vpop.permute.xlu0 %686 }
 0x1db   :  { %v720_v9 = vsel %vm10619_vm10, %v687_v8, %v719_v3  ;;  %v741_v13 = vld [vmem:[#allocation2] sm:$0xe] }
 0x1dc   :  { %v689_v11 = vpop.permute.xlu1 %688  ;;  %721 = vst [vmem:[#allocation2 + $0x10] sm:$0x1] %v720_v9  ;;  %v731_v14 = vld [vmem:[#allocation2] sm:$0xf] }
 0x1dd   :  { %v723_v12 = vsel %vm10614_vm8, %v689_v11, %v722_v5  ;;  %vm492_vm8 = vcmask 44032  }
 0x1de   :  { %724 = vst [vmem:[#allocation2 + $0x14] sm:$0xf] %v723_v12  ;;  %v691_v15 = vpop.permute.xlu0 %690  ;;  %v732_v16 = vld [vmem:[#allocation2 + $0x4] sm:$0xf]  ;;  %494 = vst.msk [vmem:[#allocation3 + $0x4] sm:$0xf] %vm492_vm8, %v10154_v0 }
 0x1df   :  { %725 = vst.msk [vmem:[#allocation2 + $0x18] sm:$0xf] %vm708_vm11, %v691_v15  ;;  %v7777_v20 = vcombine.low %v741_v13, %v732_v16  ;;  %v10637_v21 = vcombine.low %v731_v14, %v732_v16 }
 0x1e0   :  { %v693_v17 = vpop.permute.xlu1 %692  ;;  %v10635_v19 = vld [vmem:[#allocation2 + $0x8] sm:$0xff]   ;;  %498 = vst.msk [vmem:[#allocation3 + $0x10] sm:$0xf] %vm492_vm8, %v10154_v0 }
 0x1e1   :  { %726 = vst.msk [vmem:[#allocation2 + $0x1c] sm:$0xf] %vm708_vm11, %v693_v17  ;;  %v825_v22 = vrot.slane %v7777_v20, 1  ;;  %v826_v23 = vrot.slane %v10635_v19, 1  ;;  %v771_v24 = vshrl.u32 %v10637_v21, 16  ;;  %v773_v25 = vshll.u32 %v10637_v21, 16 }
 0x1e2   :  { %v695_v26 = vpop.permute.xlu0 %694  ;;  %v778_v27 = vshll.u32 %v10635_v19, 16  ;;  %v782_v28 = vshrl.u32 %v10635_v19, 16 }
 0x1e3   :  { %727 = vst.msk [vmem:[#allocation2 + $0x20] sm:$0xf] %vm708_vm11, %v695_v26  ;;  %v827_v30 = vsel %vm824_vm15, %v825_v22, %v826_v23  ;;  %v775_v31 = vrot.slane %v773_v25, 1  ;;  %v8954_v32 = vld [vmem:[#allocation2 + $0x10] ss:$0 sps:$4 sm:$0x11]  }
 0x1e4   :  { %v697_v29 = vpop.permute.xlu1 %696  ;;  %835 = vrot.lane.b32.xlu1 %v827_v30, %s10156_s1  ;;  %v780_v34 = vrot.slane %v778_v27, 1  ;;  %v828_v38 = vrot.slane %v8954_v32, 1  ;;  %v786_v39 = vshll.u32 %v8954_v32, 16  ;;  %v908_v25 = vld [vmem:[%s11748_s3] sm:$0x3]  ;;  %vm477_vm11 = vcmask 876544  }
 0x1e5   :  { %v729_v33 = vsel %vm10619_vm10, %v697_v29, %v728_v18  ;;  %v735_v35 = vld [vmem:[#allocation2 + $0x14] sm:$0xf]  ;;  %v776_v37 = vor.u32 %v775_v31, %v771_v24  ;;  %vm10767_vm9 = vmand %vm477_vm11, %vm11695_vm2  ;;  %vm500_vm10 = vcmask 880432  }
 0x1e6   :  { %v742_v36 = vld [vmem:[#allocation2 + $0x14] sm:$0xe]  ;;  %730 = vst [vmem:[#allocation2 + $0x24] sm:$0x1] %v729_v33  ;;  %v736_v40 = vld [vmem:[#allocation2 + $0x18] sm:$0xf]  ;;  %v829_v42 = vsel %vm824_vm15, %v826_v23, %v828_v38  ;;  %v784_v46 = vor.u32 %v782_v28, %v780_v34 }
 0x1e7   :  { %v781_v41 = vsel %vm11692_vm0, %v776_v37, %v780_v34  ;;  %v788_v43 = vrot.slane %v786_v39, 1  ;;  %v7773_v44 = vcombine.low %v735_v35, %v736_v40  ;;  %v7778_v45 = vcombine.low %v742_v36, %v736_v40  ;;  %502 = vst.msk [vmem:[#allocation3 + $0x4] sm:$0xf] %vm500_vm10, %v10154_v0  ;;  %506 = vst.msk [vmem:[#allocation3 + $0x10] sm:$0xf] %vm500_vm10, %v10154_v0 }
 0x1e8   :  { %810 = vrot.lane.b32.xlu0 %v781_v41, %s10157_s2  ;;  %837 = vrot.lane.b32.xlu1 %v829_v42, %s10156_s1 }
 0x1e9   :  { %v791_v47 = vshrl.u32 %v7773_v44, 16  ;;  %v793_v48 = vshll.u32 %v7773_v44, 16  ;;  %v830_v50 = vrot.slane %v7778_v45, 1  ;;  %v789_v51 = vsel %vm11692_vm0, %v784_v46, %v788_v43 }
 0x1ea   :  { %v8956_v49 = vld [vmem:[#allocation2 + $0x1c] sm:$0xff]  }
 0x1eb   :  { %v795_v52 = vrot.slane %v793_v48, 1  ;;  %v831_v53 = vrot.slane %v8956_v49, 1  ;;  %v798_v54 = vshll.u32 %v8956_v49, 16  ;;  %v802_v55 = vshrl.u32 %v8956_v49, 16 }
 0x1ec   :  { %812 = vrot.lane.b32.xlu0 %v789_v51, %s10157_s2 }
 0x1ed   :  { %v796_v56 = vor.u32 %v795_v52, %v791_v47  ;;  %v8958_v57 = vld [vmem:[#allocation2 + $0x24] ss:$0 sps:$4 sm:$0x11]   ;;  %v832_v58 = vsel %vm824_vm15, %v830_v50, %v831_v53  ;;  %v800_v59 = vrot.slane %v798_v54, 1 }
 0x1ee   :  { %839 = vrot.lane.b32.xlu1 %v832_v58, %s10156_s1  ;;  %v833_v60 = vrot.slane %v8958_v57, 1  ;;  %v806_v61 = vshll.u32 %v8958_v57, 16 }
 0x1ef   :  { %v801_v62 = vsel %vm11692_vm0, %v796_v56, %v800_v59  ;;  %v804_v63 = vor.u32 %v802_v55, %v800_v59 }
 0x1f0   :  { %814 = vrot.lane.b32.xlu0 %v801_v62, %s10157_s2  ;;  %v834_v1 = vsel %vm824_vm15, %v831_v53, %v833_v60  ;;  %v808_v2 = vrot.slane %v806_v61, 1 }
 0x1f2   :  { %841 = vrot.lane.b32.xlu1 %v834_v1, %s10156_s1  ;;  %v809_v3 = vsel %vm11692_vm0, %v804_v63, %v808_v2  ;;  %vm11696_vm0 = vcmask 1047559  }
 0x1f4   :  { %816 = vrot.lane.b32.xlu0 %v809_v3, %s10157_s2 }
 0x256   :  { %v836_v4 = vpop.permute.xlu1 %835 }
 0x257   :  { %7820 = vmatmul.mubr.msk.bf16.vlgmr.msra.gmra.mxu1 %vm1115_vm3, %v836_v4 }
 0x258   :  { %1246 = vmatprep.mubr.bf16.mxu1 %v10154_v0 }
 0x25a   :  { %v811_v5 = vpop.permute.xlu0 %810  ;;  %v838_v8 = vpop.permute.xlu1 %837 }
 0x25b   :  { %v858_v6 = vsel %vm856_vm4, %v811_v5, %v836_v4  ;;  %v845_v7 = vsel %vm843_vm7, %v10637_v21, %v811_v5  ;;  %v910_v21 = vlaneseq }
 0x25c   :  { %1163 = vmatprep.mubr.bf16.mxu0 %v858_v6 }
 0x25d   :  { %1164 = vmatmul.mubr.bf16.vlgmr.msra.gmra.mxu0 %v845_v7  ;;  %v10678_v22 = vshrl.u32 %v910_v21, 7 }
 0x25e   :  { %v813_v9 = vpop.permute.xlu0 %812 }
 0x25f   :  { %v861_v11 = vsel %vm856_vm4, %v813_v9, %v838_v8  ;;  %7821 = vmatmul.mubr.msk.bf16.gmra.mxu1 %vm1115_vm3, %v838_v8  ;;  %v848_v14 = vsel %vm843_vm7, %v10635_v19, %v813_v9  ;;  %v10681_v23 = vsub.s32 0, %v10678_v22  ;;  %v10685_v26 = vsub.s32 1, %v10678_v22 }
 0x260   :  { %1173 = vmatprep.mubr.bf16.mxu0 %v861_v11  ;;  %1256 = vmatprep.mubr.bf16.mxu1 %v10154_v0  ;;  %v840_v12 = vpop.permute.xlu1 %839 }
 0x261   :  { %v10688_v28 = vrot.slane %v908_v25, %v10681_v23  ;;  %v10691_v30 = vrot.slane %v908_v25, %v10685_v26 }
 0x262   :  { %v815_v13 = vpop.permute.xlu0 %814 }
 0x263   :  { %v864_v15 = vsel %vm856_vm4, %v815_v13, %v840_v12  ;;  %v851_v18 = vsel %vm843_vm7, %v7773_v44, %v815_v13 }
 0x264   :  { %v842_v16 = vpop.permute.xlu1 %841 }
 0x265   :  { %1174 = vmatmul.mubr.bf16.gmra.mxu0 %v848_v14 }
 0x266   :  { %1183 = vmatprep.mubr.bf16.mxu0 %v864_v15  ;;  %v817_v17 = vpop.permute.xlu0 %816 }
 0x267   :  { %7822 = vmatmul.mubr.msk.bf16.gmra.mxu1 %vm1115_vm3, %v840_v12  ;;  %v867_v20 = vsel %vm856_vm4, %v817_v17, %v842_v16  ;;  %v854_v19 = vsel %vm843_vm7, %v8956_v49, %v817_v17  ;;  %vm1542_vm4 = vcmask 779264   ;;  %vm1931_vm7 = vcmask 1044484  }
 0x268   :  { %1266 = vmatprep.mubr.bf16.mxu1 %v10154_v0 }
 0x26d   :  { %1184 = vmatmul.mubr.bf16.gmra.mxu0 %v851_v18 }
 0x26e   :  { %1193 = vmatprep.mubr.bf16.mxu0 %v867_v20 }
 0x26f   :  { %7823 = vmatmul.mubr.msk.bf16.gmra.mxu1 %vm1115_vm3, %v842_v16  ;;  %vm11690_vm3 = vcmask 261120  }
 0x275   :  { %1194 = vmatmul.mubr.bf16.gmra.mxu0 %v854_v19 }
 0x276   :  { %2440 = vmatprep.mubr.bf16.mxu0 %v10154_v0 }
 0x317   :  { %v1238_v24 = vpop.f32.mrf.mxu1 }
 0x319   :  { %v1240_v27 = vpop.f32.mrf.mxu1 }
 0x31b   :  { %v1242_v29 = vpop.f32.mrf.mxu1 }
 0x31d   :  { %v1165_v31 = vpop.f32.mrf.mxu0  ;;  %v1244_v32 = vpop.f32.mrf.mxu1 }
 0x31e   :  { %v1166_v33 = vadd.f32 %v1165_v31, %v10688_v28 }
 0x31f   :  { %v1167_v34 = vpop.f32.mrf.mxu0  ;;  %v1248_v35 = vpop.f32.mrf.mxu1 }
 0x320   :  { %v10694_v36 = vadd.f32 %v1238_v24, %v1166_v33  ;;  %v1168_v37 = vadd.f32 %v1167_v34, %v10691_v30 }
 0x321   :  { %v1169_v38 = vpop.f32.mrf.mxu0  ;;  %v1250_v39 = vpop.f32.mrf.mxu1 }
 0x322   :  { %v1277_v40 = vmax.f32 %v10694_v36, 0.0  ;;  %v1241_v41 = vadd.f32 %v1240_v27, %v1168_v37  ;;  %v1170_v42 = vadd.f32 %v1169_v38, %v10688_v28 }
 0x323   :  { %v1171_v43 = vpop.f32.mrf.mxu0  ;;  %v1252_v44 = vpop.f32.mrf.mxu1 }
 0x324   :  { %v1278_v45 = vmax.f32 %v1241_v41, 0.0  ;;  %v10699_v46 = vadd.f32 %v1242_v29, %v1170_v42  ;;  %v1172_v47 = vadd.f32 %v1171_v43, %v10691_v30  ;;  %1309 = vrot.lane.b32.xlu0 %v1277_v40, %s10158_s11 }
 0x325   :  { %v1175_v48 = vpop.f32.mrf.mxu0  ;;  %v1254_v49 = vpop.f32.mrf.mxu1 }
 0x326   :  { %v1279_v50 = vmax.f32 %v10699_v46, 0.0  ;;  %v1245_v51 = vadd.f32 %v1244_v32, %v1172_v47  ;;  %v1176_v52 = vadd.f32 %v1175_v48, %v10688_v28  ;;  %1311 = vrot.lane.b32.xlu1 %v1278_v45, %s10158_s11 }
 0x327   :  { %v1177_v53 = vpop.f32.mrf.mxu0  ;;  %v1258_v54 = vpop.f32.mrf.mxu1 }
 0x328   :  { %v1280_v55 = vmax.f32 %v1245_v51, 0.0  ;;  %v10708_v56 = vadd.f32 %v1248_v35, %v1176_v52  ;;  %v1178_v57 = vadd.f32 %v1177_v53, %v10691_v30  ;;  %1313 = vrot.lane.b32.xlu0 %v1279_v50, %s10158_s11 }
 0x329   :  { %v1179_v58 = vpop.f32.mrf.mxu0  ;;  %v1260_v59 = vpop.f32.mrf.mxu1 }
 0x32a   :  { %v1281_v60 = vmax.f32 %v10708_v56, 0.0  ;;  %v1251_v61 = vadd.f32 %v1250_v39, %v1178_v57  ;;  %v1180_v62 = vadd.f32 %v1179_v58, %v10688_v28  ;;  %1315 = vrot.lane.b32.xlu1 %v1280_v55, %s10158_s11  ;;  %v10159_v57 = vmov 1983009808  }
 0x32b   :  { %v1181_v63 = vpop.f32.mrf.mxu0  ;;  %v1262_v1 = vpop.f32.mrf.mxu1  ;;  %v1376_v58 = vunpack.c.l.s4 %v10159_v57 }
 0x32c   :  { %v1282_v2 = vmax.f32 %v1251_v61, 0.0  ;;  %v10717_v3 = vadd.f32 %v1252_v44, %v1180_v62  ;;  %v1182_v4 = vadd.f32 %v1181_v63, %v10691_v30  ;;  %1317 = vrot.lane.b32.xlu0 %v1281_v60, %s10158_s11 }
 0x32d   :  { %v1185_v5 = vpop.f32.mrf.mxu0  ;;  %v1264_v6 = vpop.f32.mrf.mxu1 }
 0x32e   :  { %v1283_v7 = vmax.f32 %v10717_v3, 0.0  ;;  %v1255_v8 = vadd.f32 %v1254_v49, %v1182_v4  ;;  %v1186_v9 = vadd.f32 %v1185_v5, %v10688_v28  ;;  %1319 = vrot.lane.b32.xlu1 %v1282_v2, %s10158_s11 }
 0x32f   :  { %v1187_v11 = vpop.f32.mrf.mxu0  ;;  %v1268_v15 = vpop.f32.mrf.mxu1 }
 0x330   :  { %v1284_v12 = vmax.f32 %v1255_v8, 0.0  ;;  %v10726_v13 = vadd.f32 %v1258_v54, %v1186_v9  ;;  %v1188_v14 = vadd.f32 %v1187_v11, %v10691_v30  ;;  %1321 = vrot.lane.b32.xlu0 %v1283_v7, %s10158_s11 }
 0x331   :  { %v1189_v16 = vpop.f32.mrf.mxu0  ;;  %v1270_v27 = vpop.f32.mrf.mxu1 }
 0x332   :  { %v1285_v17 = vmax.f32 %v10726_v13, 0.0  ;;  %v1261_v18 = vadd.f32 %v1260_v59, %v1188_v14  ;;  %v1190_v20 = vadd.f32 %v1189_v16, %v10688_v28  ;;  %1323 = vrot.lane.b32.xlu1 %v1284_v12, %s10158_s11  ;;  %v1377_v59 = vunpack.c.0.s8 %v1376_v58 }
 0x333   :  { %v1191_v19 = vpop.f32.mrf.mxu0  ;;  %v1272_v39 = vpop.f32.mrf.mxu1 }
 0x334   :  { %v1286_v21 = vmax.f32 %v1261_v18, 0.0  ;;  %v10735_v24 = vadd.f32 %v1262_v1, %v1190_v20  ;;  %v1192_v25 = vadd.f32 %v1191_v19, %v10691_v30  ;;  %1325 = vrot.lane.b32.xlu0 %v1285_v17, %s10158_s11  ;;  %v10786_v62 = vsub.s32 %v1377_v59, %v10678_v22 }
 0x335   :  { %v1195_v29 = vpop.f32.mrf.mxu0  ;;  %v1274_v51 = vpop.f32.mrf.mxu1 }
 0x336   :  { %v1287_v31 = vmax.f32 %v10735_v24, 0.0  ;;  %v1265_v32 = vadd.f32 %v1264_v6, %v1192_v25  ;;  %v1196_v33 = vadd.f32 %v1195_v29, %v10688_v28  ;;  %1327 = vrot.lane.b32.xlu1 %v1286_v21, %s10158_s11 }
 0x337   :  { %v1197_v34 = vpop.f32.mrf.mxu0 }
 0x338   :  { %v1288_v35 = vmax.f32 %v1265_v32, 0.0  ;;  %v10744_v37 = vadd.f32 %v1268_v15, %v1196_v33  ;;  %v1198_v38 = vadd.f32 %v1197_v34, %v10691_v30  ;;  %1329 = vrot.lane.b32.xlu0 %v1287_v31, %s10158_s11 }
 0x339   :  { %v1199_v41 = vpop.f32.mrf.mxu0 }
 0x33a   :  { %v1289_v42 = vmax.f32 %v10744_v37, 0.0  ;;  %v1271_v43 = vadd.f32 %v1270_v27, %v1198_v38  ;;  %v1200_v44 = vadd.f32 %v1199_v41, %v10688_v28  ;;  %1331 = vrot.lane.b32.xlu1 %v1288_v35, %s10158_s11  ;;  %v479_v28 = vld [vmem:[#allocation3] sm:$0x1] }
 0x33b   :  { %v1201_v45 = vpop.f32.mrf.mxu0  ;;  %v480_v55 = vsel %vm10767_vm9, 0, %v479_v28 }
 0x33c   :  { %v1290_v47 = vmax.f32 %v1271_v43, 0.0  ;;  %v10753_v48 = vadd.f32 %v1272_v39, %v1200_v44  ;;  %v1202_v49 = vadd.f32 %v1201_v45, %v10691_v30  ;;  %1333 = vrot.lane.b32.xlu0 %v1289_v42, %s10158_s11  ;;  %481 = vst [vmem:[#allocation3] sm:$0x1] %v480_v55 }
 0x33d   :  { %493 = vst.msk [vmem:[#allocation3] sm:$0xf] %vm492_vm8, %v10154_v0 }
 0x33e   :  { %v1291_v52 = vmax.f32 %v10753_v48, 0.0  ;;  %v1275_v53 = vadd.f32 %v1274_v51, %v1202_v49  ;;  %1335 = vrot.lane.b32.xlu1 %v1290_v47, %s10158_s11  ;;  %501 = vst.msk [vmem:[#allocation3] sm:$0xf] %vm500_vm10, %v10154_v0 }
 0x340   :  { %v1292_v54 = vmax.f32 %v1275_v53, 0.0  ;;  %1337 = vrot.lane.b32.xlu0 %v1291_v52, %s10158_s11 }
 0x342   :  { %1339 = vrot.lane.b32.xlu1 %v1292_v54, %s10158_s11 }
 0x396   :  { %v1310_v61 = vpop.permute.xlu0 %1309 }
 0x398   :  { %v1312_v63 = vpop.permute.xlu1 %1311 }
 0x399   :  { %v1342_v1 = vsel %vm11690_vm3, %v1310_v61, %v1312_v63 }
 0x39a   :  { %v1358_v2 = vmax.f32 %v1277_v40, %v1342_v1  ;;  %v1314_v4 = vpop.permute.xlu0 %1313 }
 0x39c   :  { %v1374_v5 = vcombine.high %v1358_v2, %v1358_v2  ;;  %v1381_v6 = vrot.slane %v1358_v2, %v10786_v62  ;;  %v1316_v8 = vpop.permute.xlu1 %1315 }
 0x39d   :  { %v1343_v9 = vsel %vm11690_vm3, %v1314_v4, %v1316_v8 }
 0x39e   :  { %v1388_v11 = vrot.slane %v1374_v5, %v10786_v62  ;;  %v1389_v12 = vcombine.high %v1381_v6, %v1381_v6  ;;  %v1543_v14 = vsel %vm1542_vm4, %v1381_v6, -inf  ;;  %v1359_v15 = vmax.f32 %v1279_v50, %v1343_v9  ;;  %v1318_v32 = vpop.permute.xlu0 %1317 }
 0x39f   :  { %v1544_v16 = vrot.slane %v1543_v14, 4 }
 0x3a0   :  { %v1390_v18 = vcombine.high %v1388_v11, %v1388_v11  ;;  %v1550_v36 = vsel %vm1542_vm4, %v1389_v12, -inf  ;;  %v1557_v40 = vsel %vm1542_vm4, %v1388_v11, -inf  ;;  %v1391_v20 = vcombine.high %v1359_v15, %v1359_v15  ;;  %v1320_v19 = vpop.permute.xlu1 %1319 }
 0x3a1   :  { %v1545_v21 = vmax.f32 %v1543_v14, %v1544_v16  ;;  %v1551_v25 = vrot.slane %v1550_v36, 4  ;;  %v1558_v27 = vrot.slane %v1557_v40, 4  ;;  %v1398_v29 = vrot.slane %v1359_v15, %v10786_v62 }
 0x3a2   :  { %v1564_v33 = vsel %vm1542_vm4, %v1390_v18, -inf  ;;  %v1405_v34 = vrot.slane %v1391_v20, %v10786_v62  ;;  %v1344_v46 = vsel %vm11690_vm3, %v1318_v32, %v1320_v19 }
 0x3a3   :  { %v1546_v50 = vrot.slane %v1545_v21, 2  ;;  %v1552_v35 = vmax.f32 %v1550_v36, %v1551_v25  ;;  %v1559_v38 = vmax.f32 %v1557_v40, %v1558_v27  ;;  %v1565_v39 = vrot.slane %v1564_v33, 4  ;;  %v1322_v36 = vpop.permute.xlu0 %1321 }
 0x3a4   :  { %v1406_v41 = vcombine.high %v1398_v29, %v1398_v29  ;;  %v1407_v43 = vcombine.high %v1405_v34, %v1405_v34  ;;  %v1571_v44 = vsel %vm1542_vm4, %v1398_v29, -inf  ;;  %v1585_v45 = vsel %vm1542_vm4, %v1405_v34, -inf  ;;  %v1324_v6 = vpop.permute.xlu1 %1323 }
 0x3a5   :  { %v1547_v47 = vmax.f32 %v1545_v21, %v1546_v50  ;;  %v1553_v49 = vrot.slane %v1552_v35, 2  ;;  %v1560_v51 = vrot.slane %v1559_v38, 2  ;;  %v1566_v53 = vmax.f32 %v1564_v33, %v1565_v39 }
 0x3a6   :  { %v1572_v54 = vrot.slane %v1571_v44, 4  ;;  %v1578_v28 = vsel %vm1542_vm4, %v1406_v41, -inf  ;;  %v1586_v55 = vrot.slane %v1585_v45, 4  ;;  %v1592_v57 = vsel %vm1542_vm4, %v1407_v43, -inf }
 0x3a7   :  { %v1548_v58 = vrot.slane %v1547_v47, 1  ;;  %v1554_v59 = vmax.f32 %v1552_v35, %v1553_v49  ;;  %v1561_v61 = vmax.f32 %v1559_v38, %v1560_v51  ;;  %v1567_v63 = vrot.slane %v1566_v53, 2 }
 0x3a8   :  { %v1573_v1 = vmax.f32 %v1571_v44, %v1572_v54  ;;  %v1579_v2 = vrot.slane %v1578_v28, 4  ;;  %v10807_v4 = vmax.f32 %v1585_v45, %v1586_v55  ;;  %v1593_v5 = vrot.slane %v1592_v57, 4  ;;  %v1328_v44 = vpop.permute.xlu1 %1327  ;;  %v1326_v54 = vpop.permute.xlu0 %1325 }
 0x3a9   :  { %v1549_v8 = vmax.f32 %v1547_v47, %v1548_v58  ;;  %v1555_v9 = vrot.slane %v1554_v59, 1  ;;  %v1562_v11 = vrot.slane %v1561_v61, 1  ;;  %v1568_v12 = vmax.f32 %v1566_v53, %v1567_v63 }
 0x3aa   :  { %v1574_v14 = vrot.slane %v1573_v1, 2  ;;  %v1580_v15 = vmax.f32 %v1578_v28, %v1579_v2  ;;  %v1588_v16 = vrot.slane %v10807_v4, 2  ;;  %v1594_v18 = vmax.f32 %v1592_v57, %v1593_v5 }
 0x3ab   :  { %v1556_v40 = vmax.f32 %v1554_v59, %v1555_v9  ;;  %v1563_v20 = vmax.f32 %v1561_v61, %v1562_v11  ;;  %v1569_v19 = vrot.slane %v1568_v12, 1  ;;  %v8399_v21 = vpack.c.bf16 %v1549_v8, %v1549_v8 }
 0x3ac   :  { %v1575_v25 = vmax.f32 %v1573_v1, %v1574_v14  ;;  %v1581_v27 = vrot.slane %v1580_v15, 2  ;;  %v1595_v29 = vrot.slane %v1594_v18, 2  ;;  %v1360_v32 = vmax.f32 %v1281_v60, %v1344_v46 }
 0x3ad   :  { %v10812_v33 = vmax.f32 %v1568_v12, %v1569_v19  ;;  %v8400_v34 = vpack.c.bf16 %v1556_v40, %v1556_v40  ;;  %v8401_v50 = vpack.c.bf16 %v1563_v20, %v1563_v20  ;;  %v10814_v35 = vunpack.c.l.b16 %v8399_v21 }
 0x3ae   :  { %v1576_v38 = vrot.slane %v1575_v25, 1  ;;  %v10816_v39 = vmax.f32 %v1580_v15, %v1581_v27  ;;  %v1596_v41 = vmax.f32 %v1594_v18, %v1595_v29  ;;  %v1408_v43 = vcombine.high %v1360_v32, %v1360_v32 }
 0x3af   :  { %v10818_v45 = vunpack.c.l.b16 %v8400_v34  ;;  %v10820_v47 = vunpack.c.l.b16 %v8401_v50  ;;  %v1415_v49 = vrot.slane %v1360_v32, %v10786_v62  ;;  %v1345_v56 = vsel %vm11690_vm3, %v1322_v36, %v1324_v6 }
 0x3b0   :  { %v1577_v60 = vmax.f32 %v1575_v25, %v1576_v38  ;;  %v1583_v46 = vrot.slane %v10816_v39, 1  ;;  %v1597_v51 = vrot.slane %v1596_v41, 1  ;;  %v1422_v53 = vrot.slane %v1408_v43, %v10786_v62 }
 0x3b1   :  { %v1423_v28 = vcombine.high %v1415_v49, %v1415_v49  ;;  %v1599_v55 = vsel %vm1542_vm4, %v1415_v49, -inf  ;;  %v1361_v57 = vmax.f32 %v1283_v7, %v1345_v56  ;;  %v1346_v58 = vsel %vm11690_vm3, %v1326_v54, %v1328_v44 }
 0x3b2   :  { %v1598_v59 = vmax.f32 %v1596_v41, %v1597_v51  ;;  %v8403_v61 = vpack.c.bf16 %v1577_v60, %v1577_v60  ;;  %v1424_v63 = vcombine.high %v1422_v53, %v1422_v53  ;;  %v1600_v1 = vrot.slane %v1599_v55, 4  ;;  %v1332_v41 = vpop.permute.xlu1 %1331 }
 0x3b3   :  { %v1606_v2 = vsel %vm1542_vm4, %v1423_v28, -inf  ;;  %v1613_v5 = vsel %vm1542_vm4, %v1422_v53, -inf  ;;  %v1425_v6 = vcombine.high %v1361_v57, %v1361_v57  ;;  %v1432_v8 = vrot.slane %v1361_v57, %v10786_v62  ;;  %v1330_v28 = vpop.permute.xlu0 %1329 }
 0x3b4   :  { %v8406_v9 = vpack.c.bf16 %v1598_v59, %v1598_v59  ;;  %v10833_v11 = vunpack.c.l.b16 %v8403_v61  ;;  %v1601_v12 = vmax.f32 %v1599_v55, %v1600_v1  ;;  %v1607_v14 = vrot.slane %v1606_v2, 4 }
 0x3b5   :  { %v1614_v3 = vrot.slane %v1613_v5, 4  ;;  %v1620_v7 = vsel %vm1542_vm4, %v1424_v63, -inf  ;;  %v10837_v15 = vrot.slane %v1425_v6, %v10786_v62  ;;  %v1440_v18 = vcombine.high %v1432_v8, %v1432_v8 }
 0x3b6   :  { %v1902_v36 = vunpack.c.l.b16 %v8406_v9  ;;  %v1602_v40 = vrot.slane %v1601_v12, 2  ;;  %v1608_v20 = vmax.f32 %v1606_v2, %v1607_v14  ;;  %v1621_v19 = vrot.slane %v1620_v7, 4 }
 0x3b7   :  { %v1615_v21 = vmax.f32 %v1613_v5, %v1614_v3  ;;  %v1441_v25 = vcombine.high %v10837_v15, %v10837_v15  ;;  %v1627_v27 = vsel %vm1542_vm4, %v1432_v8, -inf  ;;  %v1634_v29 = vsel %vm1542_vm4, %v1440_v18, -inf  ;;  %v1336_v3 = vpop.permute.xlu1 %1335 }
 0x3b8   :  { %v1603_v32 = vmax.f32 %v1601_v12, %v1602_v40  ;;  %v1609_v34 = vrot.slane %v1608_v20, 2  ;;  %v1622_v50 = vmax.f32 %v1620_v7, %v1621_v19  ;;  %v1628_v38 = vrot.slane %v1627_v27, 4 }
 0x3b9   :  { %v1616_v43 = vrot.slane %v1615_v21, 2  ;;  %v1635_v44 = vrot.slane %v1634_v29, 4  ;;  %v1641_v49 = vsel %vm1542_vm4, %v10837_v15, -inf  ;;  %v1362_v56 = vmax.f32 %v1285_v17, %v1346_v58 }
 0x3ba   :  { %v1604_v60 = vrot.slane %v1603_v32, 1  ;;  %v1610_v51 = vmax.f32 %v1608_v20, %v1609_v34  ;;  %v1623_v53 = vrot.slane %v1622_v50, 2  ;;  %v1629_v54 = vmax.f32 %v1627_v27, %v1628_v38 }
 0x3bb   :  { %v1617_v55 = vmax.f32 %v1615_v21, %v1616_v43  ;;  %v1636_v57 = vmax.f32 %v1634_v29, %v1635_v44  ;;  %v1642_v59 = vrot.slane %v1641_v49, 4  ;;  %v1442_v61 = vcombine.high %v1362_v56, %v1362_v56 }
 0x3bc   :  { %v1605_v63 = vmax.f32 %v1603_v32, %v1604_v60  ;;  %v1611_v1 = vrot.slane %v1610_v51, 1  ;;  %v1624_v2 = vmax.f32 %v1622_v50, %v1623_v53  ;;  %v1630_v5 = vrot.slane %v1629_v54, 2  ;;  %v1334_v32 = vpop.permute.xlu0 %1333 }
 0x3bd   :  { %v1618_v6 = vrot.slane %v1617_v55, 1  ;;  %v1637_v8 = vrot.slane %v1636_v57, 2  ;;  %v10847_v9 = vmax.f32 %v1641_v49, %v1642_v59  ;;  %v1449_v13 = vrot.slane %v1362_v56, %v10786_v62 }
 0x3be   :  { %v1612_v17 = vmax.f32 %v1610_v51, %v1611_v1  ;;  %v1625_v58 = vrot.slane %v1624_v2, 1  ;;  %v8407_v12 = vpack.c.bf16 %v1605_v63, %v1605_v63  ;;  %v1631_v14 = vmax.f32 %v1629_v54, %v1630_v5  ;;  %v1340_v1 = vpop.permute.xlu1 %1339 }
 0x3bf   :  { %v1619_v7 = vmax.f32 %v1617_v55, %v1618_v6  ;;  %v10850_v18 = vmax.f32 %v1636_v57, %v1637_v8  ;;  %v1644_v40 = vrot.slane %v10847_v9, 2  ;;  %v1456_v20 = vrot.slane %v1442_v61, %v10786_v62 }
 0x3c0   :  { %v10854_v19 = vmax.f32 %v1624_v2, %v1625_v58  ;;  %v8408_v21 = vpack.c.bf16 %v1612_v17, %v1612_v17  ;;  %v1903_v27 = vunpack.c.l.b16 %v8407_v12  ;;  %v1632_v29 = vrot.slane %v1631_v14, 1  ;;  %v1338_v12 = vpop.permute.xlu0 %1337 }
 0x3c1   :  { %v8409_v34 = vpack.c.bf16 %v1619_v7, %v1619_v7  ;;  %v1639_v50 = vrot.slane %v10850_v18, 1  ;;  %v1457_v38 = vcombine.high %v1449_v13, %v1449_v13  ;;  %v1458_v43 = vcombine.high %v1456_v20, %v1456_v20 }
 0x3c2   :  { %v10857_v44 = vunpack.c.l.b16 %v8408_v21  ;;  %v10860_v49 = vsel %vm11693_vm1, %v1903_v27, %v1902_v36  ;;  %v1633_v56 = vmax.f32 %v1631_v14, %v1632_v29  ;;  %v1655_v60 = vsel %vm1542_vm4, %v1449_v13, -inf }
 0x3c3   :  { %v10863_v51 = vunpack.c.l.b16 %v8409_v34  ;;  %v1656_v53 = vrot.slane %v1655_v60, 4  ;;  %v1662_v54 = vsel %vm1542_vm4, %v1457_v38, -inf  ;;  %v1669_v55 = vsel %vm1542_vm4, %v1456_v20, -inf }
 0x3c4   :  { %v8411_v57 = vpack.c.bf16 %v1633_v56, %v1633_v56  ;;  %v1663_v59 = vrot.slane %v1662_v54, 4  ;;  %v1670_v61 = vrot.slane %v1669_v55, 4  ;;  %v1676_v63 = vsel %vm1542_vm4, %v1458_v43, -inf }
 0x3c5   :  { %v1657_v2 = vmax.f32 %v1655_v60, %v1656_v53  ;;  %v1677_v5 = vrot.slane %v1676_v63, 4  ;;  %v1347_v36 = vsel %vm11690_vm3, %v1330_v28, %v1332_v41  ;;  %v1348_v6 = vsel %vm11690_vm3, %v1334_v32, %v1336_v3 }
 0x3c6   :  { %v10870_v8 = vunpack.c.l.b16 %v8411_v57  ;;  %v1664_v13 = vmax.f32 %v1662_v54, %v1663_v59  ;;  %v1671_v17 = vmax.f32 %v1669_v55, %v1670_v61  ;;  %v1363_v58 = vmax.f32 %v1287_v31, %v1347_v36 }
 0x3c7   :  { %v1658_v14 = vrot.slane %v1657_v2, 2  ;;  %v1678_v7 = vmax.f32 %v1676_v63, %v1677_v5  ;;  %v1364_v20 = vmax.f32 %v1289_v42, %v1348_v6  ;;  %v10877_v21 = vsel %vm11690_vm3, %v1338_v12, %v1340_v1 }
 0x3c8   :  { %v1665_v27 = vrot.slane %v1664_v13, 2  ;;  %v1672_v41 = vrot.slane %v1671_v17, 2  ;;  %v1459_v28 = vcombine.high %v1363_v58, %v1363_v58  ;;  %v1466_v3 = vrot.slane %v1363_v58, %v10786_v62 }
 0x3c9   :  { %v1659_v29 = vmax.f32 %v1657_v2, %v1658_v14  ;;  %v1679_v32 = vrot.slane %v1678_v7, 2  ;;  %v1476_v34 = vcombine.high %v1364_v20, %v1364_v20  ;;  %v1483_v24 = vrot.slane %v1364_v20, %v10786_v62 }
 0x3ca   :  { %v1666_v31 = vmax.f32 %v1664_v13, %v1665_v27  ;;  %v1673_v38 = vmax.f32 %v1671_v17, %v1672_v41  ;;  %v1473_v43 = vrot.slane %v1459_v28, %v10786_v62  ;;  %v1474_v56 = vcombine.high %v1466_v3, %v1466_v3 }
 0x3cb   :  { %v1660_v37 = vrot.slane %v1659_v29, 1  ;;  %v1680_v42 = vmax.f32 %v1678_v7, %v1679_v32  ;;  %v1683_v60 = vsel %vm1542_vm4, %v1466_v3, -inf  ;;  %v1490_v53 = vrot.slane %v1476_v34, %v10786_v62 }
 0x3cc   :  { %v1667_v54 = vrot.slane %v1666_v31, 1  ;;  %v1674_v55 = vrot.slane %v1673_v38, 1  ;;  %v1475_v57 = vcombine.high %v1473_v43, %v1473_v43  ;;  %v1684_v59 = vrot.slane %v1683_v60, 4 }
 0x3cd   :  { %v1661_v61 = vmax.f32 %v1659_v29, %v1660_v37  ;;  %v1681_v63 = vrot.slane %v1680_v42, 1  ;;  %v1690_v1 = vsel %vm1542_vm4, %v1474_v56, -inf  ;;  %v1697_v2 = vsel %vm1542_vm4, %v1473_v43, -inf }
 0x3ce   :  { %v1668_v5 = vmax.f32 %v1666_v31, %v1667_v54  ;;  %v1675_v36 = vmax.f32 %v1673_v38, %v1674_v55  ;;  %v1685_v6 = vmax.f32 %v1683_v60, %v1684_v59  ;;  %v1691_v13 = vrot.slane %v1690_v1, 4 }
 0x3cf   :  { %v10886_v17 = vmax.f32 %v1680_v42, %v1681_v63  ;;  %v8415_v58 = vpack.c.bf16 %v1661_v61, %v1661_v61  ;;  %v1698_v12 = vrot.slane %v1697_v2, 4  ;;  %v1704_v14 = vsel %vm1542_vm4, %v1475_v57, -inf }
 0x3d0   :  { %v8416_v7 = vpack.c.bf16 %v1668_v5, %v1668_v5  ;;  %v8417_v20 = vpack.c.bf16 %v1675_v36, %v1675_v36  ;;  %v1686_v27 = vrot.slane %v1685_v6, 2  ;;  %v1692_v41 = vmax.f32 %v1690_v1, %v1691_v13 }
 0x3d1   :  { %v10889_v28 = vunpack.c.l.b16 %v8415_v58  ;;  %v10891_v3 = vmax.f32 %v1697_v2, %v1698_v12  ;;  %v1705_v29 = vrot.slane %v1704_v14, 4  ;;  %v1491_v32 = vcombine.high %v1483_v24, %v1483_v24 }
 0x3d2   :  { %v10893_v34 = vunpack.c.l.b16 %v8416_v7  ;;  %v10895_v31 = vunpack.c.l.b16 %v8417_v20  ;;  %v1687_v38 = vmax.f32 %v1685_v6, %v1686_v27  ;;  %v1693_v43 = vrot.slane %v1692_v41, 2 }
 0x3d3   :  { %v1700_v56 = vrot.slane %v10891_v3, 2  ;;  %v1706_v37 = vmax.f32 %v1704_v14, %v1705_v29  ;;  %v1492_v42 = vcombine.high %v1490_v53, %v1490_v53  ;;  %v1711_v60 = vsel %vm1542_vm4, %v1483_v24, -inf }
 0x3d4   :  { %v1688_v54 = vrot.slane %v1687_v38, 1  ;;  %v10899_v55 = vmax.f32 %v1692_v41, %v1693_v43  ;;  %v1712_v57 = vrot.slane %v1711_v60, 4  ;;  %v1718_v59 = vsel %vm1542_vm4, %v1491_v32, -inf }
 0x3d5   :  { %v1707_v61 = vrot.slane %v1706_v37, 2  ;;  %v1719_v63 = vrot.slane %v1718_v59, 4  ;;  %v1725_v1 = vsel %vm1542_vm4, %v1490_v53, -inf  ;;  %v1732_v2 = vsel %vm1542_vm4, %v1492_v42, -inf }
 0x3d6   :  { %v1689_v5 = vmax.f32 %v1687_v38, %v1688_v54  ;;  %v1695_v36 = vrot.slane %v10899_v55, 1  ;;  %v1713_v6 = vmax.f32 %v1711_v60, %v1712_v57  ;;  %v1726_v13 = vrot.slane %v1725_v1, 4 }
 0x3d7   :  { %v1708_v58 = vmax.f32 %v1706_v37, %v1707_v61  ;;  %v1720_v12 = vmax.f32 %v1718_v59, %v1719_v63  ;;  %v1733_v24 = vrot.slane %v1732_v2, 4  ;;  %v1365_v14 = vmax.f32 %v1291_v52, %v10877_v21 }
 0x3d8   :  { %v8419_v7 = vpack.c.bf16 %v1689_v5, %v1689_v5  ;;  %v1714_v20 = vrot.slane %v1713_v6, 2  ;;  %v1727_v27 = vmax.f32 %v1725_v1, %v1726_v13  ;;  %v1584_v53 = vmax.f32 %v10816_v39, %v1583_v46 }
 0x3d9   :  { %v1709_v41 = vrot.slane %v1708_v58, 1  ;;  %v1721_v29 = vrot.slane %v1720_v12, 2  ;;  %v1734_v32 = vmax.f32 %v1732_v2, %v1733_v24  ;;  %v1493_v38 = vcombine.high %v1365_v14, %v1365_v14 }
 0x3da   :  { %v10911_v43 = vunpack.c.l.b16 %v8419_v7  ;;  %v1715_v37 = vmax.f32 %v1713_v6, %v1714_v20  ;;  %v1728_v42 = vrot.slane %v1727_v27, 2  ;;  %v1500_v60 = vrot.slane %v1365_v14, %v10786_v62 }
 0x3db   :  { %v1710_v54 = vmax.f32 %v1708_v58, %v1709_v41  ;;  %v1722_v48 = vmax.f32 %v1720_v12, %v1721_v29  ;;  %v1735_v52 = vrot.slane %v1734_v32, 2  ;;  %v10915_v21 = vrot.slane %v1493_v38, %v10786_v62 }
 0x3dc   :  { %v1716_v57 = vrot.slane %v1715_v37, 1  ;;  %v1729_v59 = vmax.f32 %v1727_v27, %v1728_v42  ;;  %v1508_v61 = vcombine.high %v1500_v60, %v1500_v60  ;;  %v1739_v39 = vsel %vm1542_vm4, %v1500_v60, -inf }
 0x3dd   :  { %v8422_v46 = vpack.c.bf16 %v1710_v54, %v1710_v54  ;;  %v1723_v63 = vrot.slane %v1722_v48, 1  ;;  %v1736_v1 = vmax.f32 %v1734_v32, %v1735_v52  ;;  %v1509_v2 = vcombine.high %v10915_v21, %v10915_v21 }
 0x3de   :  { %v1717_v5 = vmax.f32 %v1715_v37, %v1716_v57  ;;  %v1730_v6 = vrot.slane %v1729_v59, 1  ;;  %v1740_v13 = vrot.slane %v1739_v39, 4  ;;  %v1746_v58 = vsel %vm1542_vm4, %v1508_v61, -inf }
 0x3df   :  { %vm11698_vm3 = vcmask 1045509   ;;  %v1918_v12 = vunpack.c.l.b16 %v8422_v46  ;;  %v1724_v24 = vmax.f32 %v1722_v48, %v1723_v63  ;;  %v1737_v14 = vrot.slane %v1736_v1, 1 }
 0x3e0   :  { %v1747_v7 = vrot.slane %v1746_v58, 4  ;;  %v1731_v20 = vmax.f32 %v1729_v59, %v1730_v6  ;;  %v8423_v27 = vpack.c.bf16 %v1717_v5, %v1717_v5  ;;  %v1741_v41 = vmax.f32 %v1739_v39, %v1740_v13 }
 0x3e1   :  { %v1753_v29 = vsel %vm1542_vm4, %v10915_v21, -inf  ;;  %v10923_v32 = vmax.f32 %v1736_v1, %v1737_v14  ;;  %v8424_v38 = vpack.c.bf16 %v1724_v24, %v1724_v24  ;;  %v1589_v48 = vmax.f32 %v10807_v4, %v1588_v16  ;;  %v9042_v21 = vld [vmem:[#allocation7 + $0x10] ss:$8 sps:$4 sm:$0xff]  }
 0x3e2   :  { %v1748_v37 = vmax.f32 %v1746_v58, %v1747_v7  ;;  %v1754_v42 = vrot.slane %v1753_v29, 4  ;;  %v8425_v60 = vpack.c.bf16 %v1731_v20, %v1731_v20  ;;  %v1919_v54 = vunpack.c.l.b16 %v8423_v27 }
 0x3e3   :  { %v1742_v52 = vrot.slane %v1741_v41, 2  ;;  %v10928_v57 = vunpack.c.l.b16 %v8424_v38  ;;  %v8402_v39 = vpack.c.bf16 %v10812_v33, %v10812_v33  ;;  %v1590_v5 = vrot.slane %v1589_v48, 1 }
 0x3e4   :  { %v1749_v59 = vrot.slane %v1748_v37, 2  ;;  %v10930_v61 = vmax.f32 %v1753_v29, %v1754_v42  ;;  %v10934_v46 = vunpack.c.l.b16 %v8425_v60  ;;  %v10937_v63 = vsel %vm11693_vm1, %v1919_v54, %v1918_v12  ;;  %vm10998_vm1 = vmand %vm477_vm11, %vm11694_vm6 }
 0x3e5   :  { %v1743_v1 = vmax.f32 %v1741_v41, %v1742_v52  ;;  %v8404_v58 = vpack.c.bf16 %v1584_v53, %v1584_v53  ;;  %v1898_v4 = vunpack.c.l.b16 %v8402_v39  ;;  %v1591_v24 = vmax.f32 %v1589_v48, %v1590_v5 }
 0x3e6   :  { %v1750_v6 = vmax.f32 %v1748_v37, %v1749_v59  ;;  %v1756_v13 = vrot.slane %v10930_v61, 2  ;;  %v1928_v14 = vsel %vm551_vm5, %v10818_v45, %v10814_v35  ;;  %v1648_v33 = vsel %vm1542_vm4, %v1441_v25, -inf }
 0x3e7   :  { %v1744_v16 = vrot.slane %v1743_v1, 1  ;;  %v1900_v7 = vunpack.c.l.b16 %v8404_v58  ;;  %v1930_v20 = vsel %vm582_vm13, %v10820_v47, %v1928_v14  ;;  %v1649_v27 = vrot.slane %v1648_v33, 4 }
 0x3e8   :  { %v1751_v12 = vrot.slane %v1750_v6, 1  ;;  %v8405_v53 = vpack.c.bf16 %v1591_v24, %v1591_v24  ;;  %v1932_v29 = vsel %vm1931_vm7, %v1898_v4, %v1930_v20  ;;  %v1640_v38 = vmax.f32 %v10850_v18, %v1639_v50 }
 0x3e9   :  { %v1745_v41 = vmax.f32 %v1743_v1, %v1744_v16  ;;  %v1934_v35 = vsel %vm11698_vm3, %v10833_v11, %v1932_v29  ;;  %v1650_v45 = vmax.f32 %v1648_v33, %v1649_v27  ;;  %v1645_v15 = vmax.f32 %v10847_v9, %v1644_v40 }
 0x3ea   :  { %v8410_v47 = vpack.c.bf16 %v10854_v19, %v10854_v19  ;;  %v1901_v37 = vunpack.c.l.b16 %v8405_v53  ;;  %v1936_v42 = vsel %vm11697_vm12, %v1900_v7, %v1934_v35  ;;  %v8412_v60 = vpack.c.bf16 %v1640_v38, %v1640_v38 }
 0x3eb   :  { %v8427_v25 = vpack.c.bf16 %v1745_v41, %v1745_v41  ;;  %v1651_v54 = vrot.slane %v1650_v45, 2  ;;  %v1646_v52 = vrot.slane %v1645_v15, 1  ;;  %v1941_v11 = vsel %vm551_vm5, %v10857_v44, %v10860_v49 }
 0x3ec   :  { %v1906_v48 = vunpack.c.l.b16 %v8410_v47  ;;  %v1938_v50 = vsel %vm11696_vm0, %v1901_v37, %v1936_v42  ;;  %v1908_v9 = vunpack.c.l.b16 %v8412_v60  ;;  %v1942_v40 = vsel %vm582_vm13, %v10863_v51, %v1941_v11  ;;  %v482_v37 = vld [vmem:[#allocation3 + $0xc] sm:$0x1] }
 0x3ed   :  { %v10964_v18 = vunpack.c.l.b16 %v8427_v25  ;;  %v1960_v19 = vpack.c.b16 %v1938_v50, %v1938_v50  ;;  %v1652_v59 = vmax.f32 %v1650_v45, %v1651_v54  ;;  %v1647_v39 = vmax.f32 %v1645_v15, %v1646_v52 }
 0x3ee   :  { %v1943_v1 = vsel %vm1931_vm7, %v1906_v48, %v1942_v40  ;;  %v1696_v44 = vmax.f32 %v10899_v55, %v1695_v36  ;;  %v1701_v49 = vmax.f32 %v10891_v3, %v1700_v56  ;;  %v8418_v58 = vpack.c.bf16 %v10886_v17, %v10886_v17 }
 0x3ef   :  { %v1944_v5 = vsel %vm11698_vm3, %v10870_v8, %v1943_v1  ;;  %1966 = vrot.lane.b32.xlu0 %v1960_v19, %s10160_s16  ;;  %v1653_v51 = vrot.slane %v1652_v59, 1  ;;  %v8413_v4 = vpack.c.bf16 %v1647_v39, %v1647_v39  ;;  %v1947_v8 = vsel %vm551_vm5, %v10893_v34, %v10889_v28 }
 0x3f0   :  { %v1945_v16 = vsel %vm11697_vm12, %v1908_v9, %v1944_v5  ;;  %v1702_v24 = vrot.slane %v1701_v49, 1  ;;  %v8420_v55 = vpack.c.bf16 %v1696_v44, %v1696_v44  ;;  %v1914_v36 = vunpack.c.l.b16 %v8418_v58  ;;  %v9024_v5 = vld [vmem:[#allocation7 + $0x70] ss:$8 sps:$4 sm:$0xff]   ;;  %v9026_v44 = vld [vmem:[#allocation7 + $0x74] ss:$8 sps:$4 sm:$0xff]  }
 0x3f1   :  { %v1948_v3 = vsel %vm582_vm13, %v10895_v31, %v1947_v8  ;;  %v1654_v56 = vmax.f32 %v1652_v59, %v1653_v51  ;;  %v1909_v14 = vunpack.c.l.b16 %v8413_v4  ;;  %v1760_v17 = vsel %vm1542_vm4, %v1509_v2, -inf  ;;  %v486_v2 = vld [vmem:[#allocation3 + $0x8] sm:$0x1]  ;;  %2355 = vmatprep.subr.bf16.mxu1 %v9026_v44  ;;  %v9027_v58 = vld [vmem:[#allocation7 + $0x60] ss:$8 sps:$4 sm:$0xff]  }
 0x3f2   :  { %v1752_v33 = vmax.f32 %v1750_v6, %v1751_v12  ;;  %v1703_v7 = vmax.f32 %v1701_v49, %v1702_v24  ;;  %v1916_v20 = vunpack.c.l.b16 %v8420_v55  ;;  %v1949_v27 = vsel %vm1931_vm7, %v1914_v36, %v1948_v3  ;;  %v9029_v49 = vld [vmem:[#allocation7 + $0x64] ss:$8 sps:$4 sm:$0xff]   ;;  %2356 = vmatpush1.bf16.msra.mxu1 %v9024_v5  ;;  %v9032_v51 = vld [vmem:[#allocation7 + $0x54] ss:$8 sps:$4 sm:$0xff]   ;;  %v9030_v4 = vld [vmem:[#allocation7 + $0x50] ss:$8 sps:$4 sm:$0xff]  }
 0x3f3   :  { %v1761_v41 = vrot.slane %v1760_v17, 4  ;;  %v8431_v28 = vpack.c.bf16 %v1654_v56, %v1654_v56  ;;  %v1946_v34 = vsel %vm11696_vm0, %v1909_v14, %v1945_v16  ;;  %v1950_v53 = vsel %vm11698_vm3, %v10911_v43, %v1949_v27  ;;  %2357 = vmatprep.subr.bf16.mxu1 %v9029_v49  ;;  %v2125_v16 = vld [vmem:[#allocation7 + $0x140] sm:$0x33]  ;;  %v9061_v36 = vld [vmem:[#allocation7 + $0x134] ss:$8 sps:$4 sm:$0xff]  }
 0x3f4   :  { %v1757_v31 = vmax.f32 %v10930_v61, %v1756_v13  ;;  %v1961_v6 = vpack.c.b16 %v1946_v34, %v1946_v34  ;;  %v8421_v12 = vpack.c.bf16 %v1703_v7, %v1703_v7  ;;  %v1951_v29 = vsel %vm11697_vm12, %v1916_v20, %v1950_v53  ;;  %v9035_v8 = vld [vmem:[#allocation7 + $0x44] ss:$8 sps:$4 sm:$0xff]   ;;  %v9033_v56 = vld [vmem:[#allocation7 + $0x40] ss:$8 sps:$4 sm:$0xff]   ;;  %v9059_v14 = vld [vmem:[#allocation7 + $0x130] ss:$8 sps:$4 sm:$0xff]  }
 0x3f5   :  { %v1762_v38 = vmax.f32 %v1760_v17, %v1761_v41  ;;  %1970 = vrot.lane.b32.xlu0 %v8431_v28, %s10160_s16  ;;  %v8426_v43 = vpack.c.bf16 %v10923_v32, %v10923_v32  ;;  %v8428_v45 = vpack.c.bf16 %v1752_v33, %v1752_v33  ;;  %v1954_v61 = vsel %vm551_vm5, %v10928_v57, %v10937_v63  ;;  %v489_v32 = vld [vmem:[#allocation3 + $0x14] sm:$0x1]  ;;  %v9038_v17 = vld [vmem:[#allocation7 + $0x34] ss:$8 sps:$4 sm:$0xff]   ;;  %v9036_v7 = vld [vmem:[#allocation7 + $0x30] ss:$8 sps:$4 sm:$0xff]  }
 0x3f6   :  { %v1758_v35 = vrot.slane %v1757_v31, 1  ;;  %1968 = vrot.lane.b32.xlu1 %v1961_v6, %s10160_s16  ;;  %v1917_v13 = vunpack.c.l.b16 %v8421_v12  ;;  %v1955_v47 = vsel %vm582_vm13, %v10934_v46, %v1954_v61  ;;  %v487_v25 = vsel %vm10998_vm1, 0, %v486_v2  ;;  %2358 = vmatpush1.bf16.msra.mxu1 %v9027_v58  ;;  %v9067_v33 = vld [vmem:[#allocation7 + $0x124] ss:$8 sps:$4 sm:$0xff]   ;;  %v9065_v20 = vld [vmem:[#allocation7 + $0x120] ss:$8 sps:$4 sm:$0xff]  }
 0x3f7   :  { %v1763_v15 = vrot.slane %v1762_v38, 2  ;;  %v1922_v60 = vunpack.c.l.b16 %v8426_v43  ;;  %v1924_v54 = vunpack.c.l.b16 %v8428_v45  ;;  %488 = vst [vmem:[#allocation3 + $0x8] sm:$0x1] %v487_v25  ;;  %vm495_vm11 = vcmask 40960   ;;  %2359 = vmatprep.subr.bf16.mxu1 %v9032_v51  ;;  %v9041_v27 = vld [vmem:[#allocation7 + $0x24] ss:$8 sps:$4 sm:$0xff]  }
 0x3f8   :  { %v1759_v42 = vmax.f32 %v1757_v31, %v1758_v35  ;;  %v1952_v52 = vsel %vm11696_vm0, %v1917_v13, %v1951_v29  ;;  %496 = vst.msk [vmem:[#allocation3 + $0x8] sm:$0x1] %vm495_vm11, %v10154_v0  ;;  %vm503_vm4 = vcmask 877360   ;;  %v483_v11 = vsel %vm10767_vm9, 0, %v482_v37  ;;  %v9073_v41 = vld [vmem:[#allocation7 + $0x114] ss:$8 sps:$4 sm:$0xff]  }
 0x3f9   :  { %v1764_v57 = vmax.f32 %v1762_v38, %v1763_v15  ;;  %v1963_v63 = vpack.c.b16 %v1952_v52, %v1952_v52  ;;  %v1956_v46 = vsel %vm1931_vm7, %v1922_v60, %v1955_v47  ;;  %504 = vst.msk [vmem:[#allocation3 + $0x8] sm:$0x1] %vm503_vm4, %v10154_v0  ;;  %484 = vst [vmem:[#allocation3 + $0xc] sm:$0x1] %v483_v11  ;;  %v490_v40 = vsel %vm10998_vm1, 0, %v489_v32  ;;  %v9086_v32 = vld [vmem:[#allocation11 + $0x78] sm:$0xff]  }
 0x3fa   :  { %v8429_v48 = vpack.c.bf16 %v1759_v42, %v1759_v42  ;;  %v1957_v9 = vsel %vm11698_vm3, %v10964_v18, %v1956_v46  ;;  %497 = vst.msk [vmem:[#allocation3 + $0xc] sm:$0xf] %vm492_vm8, %v10154_v0  ;;  %491 = vst [vmem:[#allocation3 + $0x14] sm:$0x1] %v490_v40  ;;  %vm2348_vm1 = vcmask 1041408   ;;  %v7905_v24 = vcombine.high %v2125_v16, %v2125_v16  ;;  %2360 = vmatpush1.bf16.msra.mxu1 %v9030_v4 }
 0x3fb   :  { %v1765_v50 = vrot.slane %v1764_v57, 1  ;;  %1972 = vrot.lane.b32.xlu1 %v1963_v63, %s10160_s16  ;;  %v1958_v59 = vsel %vm11697_vm12, %v1924_v54, %v1957_v9  ;;  %505 = vst.msk [vmem:[#allocation3 + $0xc] sm:$0xf] %vm500_vm10, %v10154_v0  ;;  %v7904_v55 = vcombine.low %v2125_v16, %v2125_v16  ;;  %2361 = vmatprep.subr.bf16.mxu1 %v9035_v8  ;;  %v9039_v28 = vld [vmem:[#allocation7 + $0x20] ss:$8 sps:$4 sm:$0xff]   ;;  %vm1984_vm8 = vcmask 830512  }
 0x3fc   :  { %v1925_v19 = vunpack.c.l.b16 %v8429_v48  ;;  %499 = vst.msk [vmem:[#allocation3 + $0x14] sm:$0x1] %vm495_vm11, %v10154_v0  ;;  %7906 = vmatprep.subr.msk.bf16.mxu0 %vm2348_vm1, %v7905_v24  ;;  %v9071_v34 = vld [vmem:[#allocation7 + $0x110] ss:$8 sps:$4 sm:$0xff]   ;;  %v9044_v53 = vld [vmem:[#allocation7 + $0x14] ss:$8 sps:$4 sm:$0xff]   ;;  %vm11043_vm9 = vmand %vm1984_vm8, %vm11694_vm6 }
 0x3fd   :  { %v1766_v39 = vmax.f32 %v1764_v57, %v1765_v50  ;;  %507 = vst.msk [vmem:[#allocation3 + $0x14] sm:$0x1] %vm503_vm4, %v10154_v0  ;;  %v2350_v3 = vsel %vm2348_vm1, %v7904_v55, 0  ;;  %v9079_v31 = vld [vmem:[#allocation7 + $0x104] ss:$8 sps:$4 sm:$0xff]   ;;  %vm1991_vm10 = vcmask 827440  }
 0x3fe   :  { %v1959_v30 = vsel %vm11696_vm0, %v1925_v19, %v1958_v59  ;;  %2415 = vmatpush1.bf16.msra.mxu0 %v2350_v3  ;;  %2362 = vmatpush1.bf16.msra.mxu1 %v9033_v56  ;;  %v9077_v2 = vld [vmem:[#allocation7 + $0x100] ss:$8 sps:$4 sm:$0xff]   ;;  %v9047_v6 = vld [vmem:[#allocation7 + $0x4] ss:$8 sps:$4 sm:$0xff]   ;;  %v9050_v29 = vld [vmem:[#allocation7 + $0xf4] ss:$8 sps:$4 sm:$0xff]  }
 0x3ff   :  { %v8432_v18 = vpack.c.bf16 %v1766_v39, %v1766_v39  ;;  %v1964_v1 = vpack.c.b16 %v1959_v30, %v1959_v30  ;;  %2416 = vmatprep.subr.bf16.mxu0 %v9061_v36  ;;  %2363 = vmatprep.subr.bf16.mxu1 %v9038_v17  ;;  %v9045_v12 = vld [vmem:[#allocation7] ss:$8 sps:$4 sm:$0xff]   ;;  %v9048_v38 = vld [vmem:[#allocation7 + $0xf0] ss:$8 sps:$4 sm:$0xff]   ;;  %v9053_v35 = vld [vmem:[#allocation7 + $0xe4] ss:$8 sps:$4 sm:$0xff]  }
 0x400   :  { %v9051_v43 = vld [vmem:[#allocation7 + $0xe0] ss:$8 sps:$4 sm:$0xff]   ;;  %v9058_v45 = vld [vmem:[#allocation7 + $0xd4] ss:$8 sps:$4 sm:$0xff]   ;;  %v9056_v61 = vld [vmem:[#allocation7 + $0xd0] ss:$8 sps:$4 sm:$0xff]  }
 0x401   :  { %1976 = vrot.lane.b32.xlu1 %v8432_v18, %s10160_s16  ;;  %1974 = vrot.lane.b32.xlu0 %v1964_v1, %s10160_s16  ;;  %v9064_v13 = vld [vmem:[#allocation7 + $0xc4] ss:$8 sps:$4 sm:$0xff]   ;;  %v9062_v15 = vld [vmem:[#allocation7 + $0xc0] ss:$8 sps:$4 sm:$0xff]   ;;  %v9070_v47 = vld [vmem:[#allocation7 + $0xb4] ss:$8 sps:$4 sm:$0xff]  }
 0x402   :  { %2417 = vmatpush1.bf16.msra.mxu0 %v9059_v14  ;;  %2364 = vmatpush1.bf16.msra.mxu1 %v9036_v7  ;;  %v9068_v25 = vld [vmem:[#allocation7 + $0xb0] ss:$8 sps:$4 sm:$0xff]   ;;  %v9076_v37 = vld [vmem:[#allocation7 + $0xa4] ss:$8 sps:$4 sm:$0xff]   ;;  %v9074_v42 = vld [vmem:[#allocation7 + $0xa0] ss:$8 sps:$4 sm:$0xff]  }
 0x403   :  { %2418 = vmatprep.subr.bf16.mxu0 %v9067_v33  ;;  %2365 = vmatprep.subr.bf16.mxu1 %v9041_v27  ;;  %v9082_v60 = vld [vmem:[#allocation7 + $0x94] ss:$8 sps:$4 sm:$0xff]   ;;  %v9080_v54 = vld [vmem:[#allocation7 + $0x90] ss:$8 sps:$4 sm:$0xff]   ;;  %vm11050_vm11 = vmand %vm1991_vm10, %vm11695_vm2  ;;  %vm11757_vm4 = vsmask.f32 7424 }
 0x404   :  { %v1986_v52 = vld [vmem:[#allocation3] sm:$0xf]  ;;  %v1993_v46 = vld [vmem:[#allocation3 + $0x8] sm:$0x1]  ;;  %v9083_v40 = vld [vmem:[#allocation7 + $0x80] ss:$8 sps:$4 sm:$0xff]  }
 0x405   :  { %v9085_v19 = vld [vmem:[#allocation7 + $0x84] ss:$8 sps:$4 sm:$0xff]   ;;  %v1996_v59 = vld [vmem:[#allocation3 + $0xc] sm:$0xf]  ;;  %vm2071_vm10 = vcmask 883712   ;;  %vm554_vm2 = vcmask 522246  }
 0x406   :  { %2419 = vmatpush1.bf16.msra.mxu0 %v9065_v20  ;;  %2366 = vmatpush1.bf16.msra.mxu1 %v9039_v28  ;;  %v2000_v18 = vld [vmem:[#allocation3 + $0x14] sm:$0x1]  ;;  %v9090_v48 = vld [vmem:[#allocation11 + $0x70] sm:$0xff]   ;;  %vm555_vm0 = vsmask.f32 7962  ;;  %vm564_vm3 = vcmask 256000  }
 0x407   :  { %2420 = vmatprep.subr.bf16.mxu0 %v9073_v41  ;;  %2367 = vmatprep.subr.bf16.mxu1 %v9044_v53 }
 0x40a   :  { %2421 = vmatpush1.bf16.msra.mxu0 %v9071_v34  ;;  %2368 = vmatpush1.bf16.msra.mxu1 %v9042_v21 }
 0x40b   :  { %2422 = vmatprep.subr.bf16.mxu0 %v9079_v31  ;;  %2369 = vmatprep.subr.bf16.mxu1 %v9047_v6 }
 0x40e   :  { %2423 = vmatpush1.bf16.msra.mxu0 %v9077_v2  ;;  %2370 = vmatpush1.bf16.msra.mxu1 %v9045_v12 }
 0x40f   :  { %2371 = vmatprep.subr.bf16.mxu1 %v9050_v29 }
 0x412   :  { %2372 = vmatpush2.bf16.msra.mxu1 %v9048_v38 }
 0x413   :  { %2373 = vmatprep.subr.bf16.mxu1 %v9053_v35 }
 0x416   :  { %2374 = vmatpush2.bf16.msra.mxu1 %v9051_v43 }
 0x417   :  { %2375 = vmatprep.subr.bf16.mxu1 %v9058_v45 }
 0x41a   :  { %2376 = vmatpush2.bf16.msra.mxu1 %v9056_v61 }
 0x41b   :  { %2377 = vmatprep.subr.bf16.mxu1 %v9064_v13 }
 0x41e   :  { %2378 = vmatpush2.bf16.msra.mxu1 %v9062_v15 }
 0x41f   :  { %2379 = vmatprep.subr.bf16.mxu1 %v9070_v47 }
 0x422   :  { %2380 = vmatpush2.bf16.msra.mxu1 %v9068_v25 }
 0x423   :  { %2381 = vmatprep.subr.bf16.mxu1 %v9076_v37 }
 0x426   :  { %2382 = vmatpush2.bf16.msra.mxu1 %v9074_v42 }
 0x427   :  { %2383 = vmatprep.subr.bf16.mxu1 %v9082_v60 }
 0x42a   :  { %2384 = vmatpush2.bf16.msra.mxu1 %v9080_v54 }
 0x42b   :  { %2385 = vmatprep.subr.bf16.mxu1 %v9085_v19  ;;  %v9096_v19 = vld [vmem:[#allocation11 + $0xe8] sm:$0xff]  }
 0x42e   :  { %2386 = vmatpush2.bf16.msra.mxu1 %v9083_v40  ;;  %v9095_v40 = vld [vmem:[#allocation11 + $0x28] sm:$0xff]  }
 0x42f   :  { %8459 = vmatprep.subr.bf16.mxu1 %v9086_v32 }
 0x461   :  { %v1967_v57 = vpop.permute.xlu0 %1966 }
 0x462   :  { %v1987_v63 = vsel %vm11043_vm9, %v1967_v57, %v1986_v52  ;;  %v9087_v52 = vld [vmem:[#allocation11 + $0x38] sm:$0xff]  }
 0x463   :  { %1988 = vst [vmem:[#allocation3] sm:$0xf] %v1987_v63  ;;  %v9088_v57 = vld [vmem:[#allocation11 + $0xf8] sm:$0xff]  }
 0x464   :  { %8481 = vmatprep.subr.bf16.mxu0 %v9088_v57  ;;  %v9089_v63 = vld [vmem:[#allocation11 + $0xb8] sm:$0xff]  }
 0x467   :  { %v1971_v11 = vpop.permute.xlu0 %1970 }
 0x468   :  { %v1994_v50 = vsel %vm11050_vm11, %v1971_v11, %v1993_v46  ;;  %v1969_v9 = vpop.permute.xlu1 %1968  ;;  %v9091_v46 = vld [vmem:[#allocation11 + $0x30] sm:$0xff]  }
 0x469   :  { %1995 = vst [vmem:[#allocation3 + $0x8] sm:$0x1] %v1994_v50  ;;  %1990 = vst.msk [vmem:[#allocation3 + $0x4] sm:$0xf] %vm1984_vm8, %v1969_v9  ;;  %v9092_v11 = vld [vmem:[#allocation11 + $0xf0] sm:$0xff]   ;;  %v9094_v9 = vld [vmem:[#allocation11 + $0x68] sm:$0xff]  }
 0x46a   :  { %v2003_v1 = vld [vmem:[#allocation3] sm:$0xf]  ;;  %v9093_v50 = vld [vmem:[#allocation11 + $0xb0] sm:$0xff]  }
 0x46b   :  { %v2009_v44 = vld [vmem:[#allocation3] sm:$0xe] }
 0x46d   :  { %v1973_v39 = vpop.permute.xlu1 %1972 }
 0x46e   :  { %v1997_v30 = vsel %vm11043_vm9, %v1973_v39, %v1996_v59  ;;  %vm2343_vm9 = vcmask 556032   ;;  %v9097_v59 = vld [vmem:[#allocation11 + $0xa8] sm:$0xff]   ;;  %v9098_v39 = vld [vmem:[#allocation11 + $0x60] sm:$0xff]  }
 0x46f   :  { %1998 = vst [vmem:[#allocation3 + $0xc] sm:$0xf] %v1997_v30  ;;  %v9099_v30 = vld [vmem:[#allocation11 + $0x20] sm:$0xff]  }
 0x470   :  { %v2004_v5 = vld [vmem:[#allocation3 + $0x4] sm:$0xf]  ;;  %v9019_v58 = vld [vmem:[#allocation3 + $0x8] ss:$0 sps:$4 sm:$0x11]  }
 0x471   :  { %v7858_v49 = vcombine.low %v2003_v1, %v2004_v5  ;;  %v7862_v51 = vcombine.low %v2009_v44, %v2004_v5  ;;  %v2062_v55 = vrot.slane %v9019_v58, 1  ;;  %v2035_v3 = vshll.u32 %v9019_v58, 16  ;;  %v9101_v1 = vld [vmem:[#allocation11 + $0xa0] sm:$0xff]   ;;  %v9102_v5 = vld [vmem:[#allocation11 + $0x58] sm:$0xff]  }
 0x472   :  { %v9103_v44 = vld [vmem:[#allocation11 + $0x18] sm:$0xff]  }
 0x473   :  { %v1977_v4 = vpop.permute.xlu1 %1976  ;;  %v1975_v16 = vpop.permute.xlu0 %1974  ;;  %v2061_v24 = vrot.slane %v7862_v51, 1  ;;  %v2030_v36 = vshll.u32 %v7858_v49, 16  ;;  %v2028_v14 = vshrl.u32 %v7858_v49, 16  ;;  %v2037_v7 = vrot.slane %v2035_v3, 1  ;;  %v9105_v58 = vld [vmem:[#allocation11 + $0x98] sm:$0xff]   ;;  %v9106_v51 = vld [vmem:[#allocation11 + $0x50] sm:$0xff]  }
 0x474   :  { %v2001_v8 = vsel %vm11050_vm11, %v1977_v4, %v2000_v18  ;;  %1999 = vst.msk [vmem:[#allocation3 + $0x10] sm:$0xf] %vm1984_vm8, %v1975_v16  ;;  %vm11758_vm8 = vmmov %vm11757_vm4  ;;  %vm2078_vm11 = vcmask 719872   ;;  %v9100_v18 = vld [vmem:[#allocation11 + $0xe0] sm:$0xff]   ;;  %v9107_v4 = vld [vmem:[#allocation11 + $0x10] sm:$0xff]  }
 0x475   :  { %2002 = vst [vmem:[#allocation3 + $0x14] sm:$0x1] %v2001_v8  ;;  %v2063_v56 = vsel %vm824_vm15, %v2061_v24, %v2062_v55  ;;  %v2032_v17 = vrot.slane %v2030_v36, 1  ;;  %v9108_v16 = vld [vmem:[#allocation11 + $0xd0] sm:$0xff]   ;;  %v9110_v24 = vld [vmem:[#allocation11 + $0x48] sm:$0xff]   ;;  %v9114_v3 = vld [vmem:[#allocation11 + $0x40] sm:$0xff]  }
 0x476   :  { %2067 = vrot.lane.b32.xlu1 %v2063_v56, %s10161_s13  ;;  %v2005_v27 = vld [vmem:[#allocation3 + $0xc] sm:$0xf]  ;;  %v9111_v55 = vld [vmem:[#allocation11 + $0x8] sm:$0xff]  }
 0x477   :  { %v2033_v33 = vor.u32 %v2032_v17, %v2028_v14  ;;  %v2010_v28 = vld [vmem:[#allocation3 + $0xc] sm:$0xe]  ;;  %v9112_v36 = vld [vmem:[#allocation11 + $0xc8] sm:$0xff]   ;;  %v9116_v14 = vld [vmem:[#allocation11 + $0xc0] sm:$0xff]  }
 0x478   :  { %v9109_v8 = vld [vmem:[#allocation11 + $0x90] sm:$0xff]   ;;  %v9113_v56 = vld [vmem:[#allocation11 + $0x88] sm:$0xff]   ;;  %v9115_v17 = vld [vmem:[#allocation11] sm:$0xff]  }
 0x479   :  { %v2038_v20 = vsel %vm11757_vm4, %v2033_v33, %v2037_v7  ;;  %v9117_v33 = vld [vmem:[#allocation11 + $0x80] sm:$0xff]   ;;  %v9118_v7 = vld [vmem:[#allocation11 + $0x178] sm:$0xff]   ;;  %vm11759_vm4 = vcmask 258052  }
 0x47a   :  { %2051 = vrot.lane.b32.xlu0 %v2038_v20, %s10162_s5  ;;  %v9120_v20 = vld [vmem:[#allocation11 + $0x1f8] sm:$0xff]  }
 0x47b   :  { %v2006_v41 = vld [vmem:[#allocation3 + $0x10] sm:$0xf] }
 0x47c   :  { %v9021_v34 = vld [vmem:[#allocation3 + $0x14] ss:$0 sps:$4 sm:$0x11]   ;;  %v7863_v53 = vcombine.low %v2010_v28, %v2006_v41  ;;  %v7859_v31 = vcombine.low %v2005_v27, %v2006_v41  ;;  %v514_v27 = vld [vmem:[#allocation4] sm:$0x11] }
 0x47d   :  { %v2065_v2 = vrot.slane %v9021_v34, 1  ;;  %v2047_v12 = vshll.u32 %v9021_v34, 16  ;;  %v517_v41 = vld [vmem:[#allocation4 + $0x10] sm:$0x11]  ;;  %v545_v28 = vld [vmem:[#allocation5] sm:$0x11] }
 0x47e   :  { %v2064_v21 = vrot.slane %v7863_v53, 1  ;;  %v2042_v6 = vshll.u32 %v7859_v31, 16  ;;  %v2040_v38 = vshrl.u32 %v7859_v31, 16  ;;  %v548_v34 = vld [vmem:[#allocation5 + $0x8] sm:$0x11] }
 0x47f   :  { %v2049_v45 = vrot.slane %v2047_v12, 1  ;;  %v561_v12 = vld [vmem:[#allocation5 + $0x8] sm:$0x44] }
 0x480   :  { %v2066_v29 = vsel %vm824_vm15, %v2064_v21, %v2065_v2  ;;  %v2044_v35 = vrot.slane %v2042_v6, 1  ;;  %vm511_vm15 = vsmask.f32 4352  ;;  %v558_v6 = vld [vmem:[#allocation5] sm:$0x44] }
 0x481   :  { %2069 = vrot.lane.b32.xlu1 %v2066_v29, %s10161_s13 }
 0x482   :  { %v2045_v43 = vor.u32 %v2044_v35, %v2040_v38 }
 0x484   :  { %v2050_v61 = vsel %vm11758_vm8, %v2045_v43, %v2049_v45  ;;  %vm512_vm8 = vmand %vm11759_vm4, %vm511_vm15  ;;  %v2131_v43 = vrot.slane %v2126_v10, %v10681_v23 }
 0x485   :  { %2053 = vrot.lane.b32.xlu0 %v2050_v61, %s10162_s5  ;;  %v11082_v61 = vrot.slane %v2126_v10, %v10685_v26 }
 0x4e8   :  { %v2068_v13 = vpop.permute.xlu1 %2067 }
 0x4e9   :  { %7907 = vmatmul.mubr.msk.bf16.vlgmr.msra.gmra.mxu0 %vm2343_vm9, %v2068_v13 }
 0x4ea   :  { %2450 = vmatprep.mubr.bf16.mxu0 %v10154_v0  ;;  %8482 = vmatpush3.bf16.msra.mxu0 %v9089_v63 }
 0x4eb   :  { %8483 = vmatprep.subr.bf16.mxu0 %v9092_v11 }
 0x4ec   :  { %v2052_v15 = vpop.permute.xlu0 %2051 }
 0x4ed   :  { %v2073_v47 = vsel %vm2071_vm10, %v7858_v49, %v2052_v15  ;;  %v2080_v25 = vsel %vm2078_vm11, %v2052_v15, %v2068_v13  ;;  %v9104_v49 = vld [vmem:[#allocation11 + $0xd8] sm:$0xff]  }
 0x4ee   :  { %2387 = vmatprep.mubr.bf16.mxu1 %v2080_v25  ;;  %8484 = vmatpush3.bf16.msra.mxu0 %v9093_v50 }
 0x4ef   :  { %2388 = vmatmul.mubr.bf16.vlgmr.msra.gmra.mxu1 %v2073_v47  ;;  %8485 = vmatprep.subr.bf16.mxu0 %v9096_v19 }
 0x4f0   :  { %8460 = vmatpush3.bf16.msra.mxu1 %v9087_v52 }
 0x4f1   :  { %8461 = vmatprep.subr.bf16.mxu1 %v9090_v48 }
 0x4f2   :  { %8486 = vmatpush3.bf16.msra.mxu0 %v9097_v59 }
 0x4f3   :  { %v2070_v37 = vpop.permute.xlu1 %2069  ;;  %8487 = vmatprep.subr.bf16.mxu0 %v9100_v18 }
 0x4f4   :  { %7908 = vmatmul.mubr.msk.bf16.gmra.mxu0 %vm2343_vm9, %v2070_v37  ;;  %8462 = vmatpush3.bf16.msra.mxu1 %v9091_v46  ;;  %vm542_vm9 = vcmask 520196  }
 0x4f5   :  { %8463 = vmatprep.subr.bf16.mxu1 %v9094_v9  ;;  %vm543_vm6 = vmand %vm542_vm9, %vm511_vm15  ;;  %vm567_vm9 = vcmask 518400  }
 0x4f6   :  { %8488 = vmatpush3.bf16.msra.mxu0 %v9101_v1  ;;  %vm544_vm12 = vmor %vm543_vm6, %vm10537_vm14  ;;  %vm11762_vm6 = vcmask 1046534  }
 0x4f7   :  { %v2054_v42 = vpop.permute.xlu0 %2053  ;;  %8489 = vmatprep.subr.bf16.mxu0 %v9104_v49  ;;  %v546_v21 = vsel %vm544_vm12, 0, %v545_v28  ;;  %v549_v2 = vsel %vm544_vm12, 0, %v548_v34  ;;  %vm11763_vm12 = vcmask 1047559  }
 0x4f8   :  { %v2083_v60 = vsel %vm2078_vm11, %v2054_v42, %v2070_v37  ;;  %v2076_v54 = vsel %vm2071_vm10, %v7859_v31, %v2054_v42  ;;  %8464 = vmatpush3.bf16.msra.mxu1 %v9095_v40  ;;  %vm513_vm10 = vmor %vm512_vm8, %vm10537_vm14  ;;  %vm552_vm11 = vsmask.f32 7946  ;;  %547 = vst [vmem:[#allocation5] sm:$0x11] %v546_v21  ;;  %vm530_vm14 = vcmask 125952  }
 0x4f9   :  { %2397 = vmatprep.mubr.bf16.mxu1 %v2083_v60  ;;  %8465 = vmatprep.subr.bf16.mxu1 %v9098_v39  ;;  %v515_v53 = vsel %vm513_vm10, 0, %v514_v27  ;;  %v518_v31 = vsel %vm513_vm10, 0, %v517_v41  ;;  %vm553_vm4 = vmand %vm551_vm5, %vm552_vm11  ;;  %550 = vst [vmem:[#allocation5 + $0x8] sm:$0x11] %v549_v2 }
 0x4fa   :  { %2398 = vmatmul.mubr.bf16.gmra.mxu1 %v2076_v54  ;;  %8490 = vmatpush3.bf16.msra.mxu0 %v9105_v58  ;;  %516 = vst [vmem:[#allocation4] sm:$0x11] %v515_v53  ;;  %519 = vst [vmem:[#allocation4 + $0x10] sm:$0x11] %v518_v31 }
 0x4fb   :  { %8491 = vmatprep.subr.bf16.mxu0 %v9108_v16  ;;  %vm556_vm8 = vmand %vm554_vm2, %vm555_vm0  ;;  %vm11761_vm2 = vcmask 1045509   ;;  %531 = vst.msk [vmem:[#allocation4] sm:$0xf] %vm530_vm14, %v10154_v0  ;;  %vm11764_vm0 = vcmask 1041409  }
 0x4fc   :  { %8466 = vmatpush3.bf16.msra.mxu1 %v9099_v30  ;;  %vm557_vm10 = vmor %vm556_vm8, %vm553_vm4  ;;  %534 = vst.msk [vmem:[#allocation4 + $0x10] sm:$0xf] %vm530_vm14, %v10154_v0 }
 0x4fd   :  { %8467 = vmatprep.subr.bf16.mxu1 %v9102_v5  ;;  %v559_v29 = vsel %vm557_vm10, 0, %v558_v6  ;;  %v562_v38 = vsel %vm557_vm10, 0, %v561_v12  ;;  %vm11765_vm11 = vmmov %vm11764_vm0 }
 0x4fe   :  { %8492 = vmatpush3.bf16.msra.mxu0 %v9109_v8  ;;  %560 = vst [vmem:[#allocation5] sm:$0x44] %v559_v29  ;;  %563 = vst [vmem:[#allocation5 + $0x8] sm:$0x44] %v562_v38 }
 0x4ff   :  { %8493 = vmatprep.subr.bf16.mxu0 %v9112_v36  ;;  %565 = vst.msk [vmem:[#allocation5] sm:$0x7] %vm564_vm3, %v10154_v0  ;;  %566 = vst.msk [vmem:[#allocation5 + $0x8] sm:$0x7] %vm564_vm3, %v10154_v0  ;;  %vm536_vm3 = vcmask 257152  }
 0x500   :  { %8468 = vmatpush3.bf16.msra.mxu1 %v9103_v44  ;;  %568 = vst.msk [vmem:[#allocation5 + $0x4] sm:$0x7] %vm567_vm9, %v10154_v0  ;;  %569 = vst.msk [vmem:[#allocation5 + $0xc] sm:$0x7] %vm567_vm9, %v10154_v0 }
 0x501   :  { %8469 = vmatprep.subr.bf16.mxu1 %v9106_v51  ;;  %537 = vst.msk [vmem:[#allocation4 + $0x4] sm:$0xf] %vm536_vm3, %v10154_v0  ;;  %540 = vst.msk [vmem:[#allocation4 + $0x14] sm:$0xf] %vm536_vm3, %v10154_v0  ;;  %vm2798_vm3 = vcmask 1040512  }
 0x502   :  { %8494 = vmatpush3.bf16.msra.mxu0 %v9113_v56  ;;  %vm11766_vm4 = vmmov %vm11764_vm0 }
 0x503   :  { %8495 = vmatprep.subr.bf16.mxu0 %v9116_v14  ;;  %vm11767_vm8 = vmmov %vm11764_vm0 }
 0x504   :  { %8470 = vmatpush3.bf16.msra.mxu1 %v9107_v4  ;;  %vm11768_vm10 = vmmov %vm11764_vm0 }
 0x505   :  { %8471 = vmatprep.subr.bf16.mxu1 %v9110_v24  ;;  %vm11769_vm9 = vmmov %vm11764_vm0 }
 0x506   :  { %8496 = vmatpush3.bf16.msra.mxu0 %v9117_v33  ;;  %vm11770_vm14 = vmmov %vm11764_vm0 }
 0x507   :  { %8525 = vmatprep.subr.bf16.mxu0 %v9120_v20 }
 0x508   :  { %8472 = vmatpush3.bf16.msra.mxu1 %v9111_v55 }
 0x509   :  { %8473 = vmatprep.subr.bf16.mxu1 %v9114_v3 }
 0x50c   :  { %8474 = vmatpush3.bf16.msra.mxu1 %v9115_v17 }
 0x50d   :  { %8503 = vmatprep.subr.bf16.mxu1 %v9118_v7 }
 0x5a9   :  { %v2442_v35 = vpop.f32.mrf.mxu0 }
 0x5ab   :  { %v2444_v45 = vpop.f32.mrf.mxu0 }
 0x5ad   :  { %v2446_v25 = vpop.f32.mrf.mxu0 }
 0x5af   :  { %v2389_v13 = vpop.f32.mrf.mxu1  ;;  %v2448_v63 = vpop.f32.mrf.mxu0 }
 0x5b0   :  { %v2390_v15 = vadd.f32 %v2389_v13, %v2131_v43 }
 0x5b1   :  { %v2391_v47 = vpop.f32.mrf.mxu1 }
 0x5b2   :  { %v2443_v37 = vadd.f32 %v2442_v35, %v2390_v15  ;;  %v2392_v42 = vadd.f32 %v2391_v47, %v11082_v61 }
 0x5b3   :  { %v2393_v60 = vpop.f32.mrf.mxu1 }
 0x5b4   :  { %v2445_v54 = vadd.f32 %v2444_v45, %v2392_v42  ;;  %v2394_v32 = vadd.f32 %v2393_v60, %v2131_v43  ;;  %v2461_v57 = vmax.f32 %v2443_v37, 0.0  ;;  %v2452_v40 = vpop.f32.mrf.mxu0 }
 0x5b5   :  { %v2395_v52 = vpop.f32.mrf.mxu1 }
 0x5b6   :  { %v2462_v48 = vmax.f32 %v2445_v54, 0.0  ;;  %v2447_v46 = vadd.f32 %v2446_v25, %v2394_v32  ;;  %v2396_v11 = vadd.f32 %v2395_v52, %v11082_v61  ;;  %v2454_v16 = vpop.f32.mrf.mxu0 }
 0x5b8   :  { %v2469_v50 = vmax.f32 %v2461_v57, %v2462_v48  ;;  %v2449_v9 = vadd.f32 %v2448_v63, %v2396_v11  ;;  %v2463_v18 = vmax.f32 %v2447_v46, 0.0  ;;  %v2456_v12 = vpop.f32.mrf.mxu0 }
 0x5ba   :  { %v2399_v19 = vpop.f32.mrf.mxu1  ;;  %v2477_v39 = vcombine.high %v2469_v50, %v2469_v50  ;;  %v2484_v30 = vrot.slane %v2469_v50, %v10786_v62  ;;  %v2464_v1 = vmax.f32 %v2449_v9, 0.0 }
 0x5bb   :  { %v2400_v59 = vadd.f32 %v2399_v19, %v2131_v43 }
 0x5bc   :  { %v2401_v5 = vpop.f32.mrf.mxu1  ;;  %v2491_v49 = vrot.slane %v2477_v39, %v10786_v62  ;;  %v2492_v58 = vcombine.high %v2484_v30, %v2484_v30  ;;  %v2561_v51 = vsel %vm2348_vm1, %v2484_v30, -inf  ;;  %v2470_v4 = vmax.f32 %v2463_v18, %v2464_v1 }
 0x5bd   :  { %v2402_v44 = vadd.f32 %v2401_v5, %v11082_v61  ;;  %v2562_v24 = vrot.slane %v2561_v51, 4  ;;  %v2453_v55 = vadd.f32 %v2452_v40, %v2400_v59 }
 0x5be   :  { %v2403_v8 = vpop.f32.mrf.mxu1  ;;  %v2493_v56 = vcombine.high %v2491_v49, %v2491_v49  ;;  %v2568_v14 = vsel %vm2348_vm1, %v2492_v58, -inf  ;;  %v2575_v17 = vsel %vm2348_vm1, %v2491_v49, -inf  ;;  %v2494_v33 = vcombine.high %v2470_v4, %v2470_v4 }
 0x5bf   :  { %v2455_v36 = vadd.f32 %v2454_v16, %v2402_v44  ;;  %v2404_v3 = vadd.f32 %v2403_v8, %v2131_v43  ;;  %v2563_v7 = vmax.f32 %v2561_v51, %v2562_v24  ;;  %v2569_v20 = vrot.slane %v2568_v14, 4 }
 0x5c0   :  { %v2576_v27 = vrot.slane %v2575_v17, 4  ;;  %v2501_v41 = vrot.slane %v2470_v4, %v10786_v62  ;;  %v2582_v28 = vsel %vm2348_vm1, %v2493_v56, -inf  ;;  %v11095_v34 = vrot.slane %v2494_v33, %v10786_v62 }
 0x5c1   :  { %v2466_v53 = vmax.f32 %v2455_v36, 0.0  ;;  %v2564_v31 = vrot.slane %v2563_v7, 2  ;;  %v2570_v21 = vmax.f32 %v2568_v14, %v2569_v20  ;;  %v2583_v6 = vrot.slane %v2582_v28, 4 }
 0x5c2   :  { %v2577_v2 = vmax.f32 %v2575_v17, %v2576_v27  ;;  %v2509_v29 = vcombine.high %v2501_v41, %v2501_v41  ;;  %v2589_v38 = vsel %vm2348_vm1, %v2501_v41, -inf  ;;  %v2465_v10 = vmax.f32 %v2453_v55, 0.0  ;;  %v2405_v17 = vpop.f32.mrf.mxu1 }
 0x5c3   :  { %v11098_v35 = vadd.f32 %v2456_v12, %v2404_v3  ;;  %v2565_v43 = vmax.f32 %v2563_v7, %v2564_v31  ;;  %v2571_v45 = vrot.slane %v2570_v21, 2  ;;  %v2584_v15 = vmax.f32 %v2582_v28, %v2583_v6  ;;  %v2458_v12 = vpop.f32.mrf.mxu0 }
 0x5c4   :  { %v2578_v13 = vrot.slane %v2577_v2, 2  ;;  %v2510_v47 = vcombine.high %v11095_v34, %v11095_v34  ;;  %v2590_v25 = vrot.slane %v2589_v38, 4  ;;  %v2596_v37 = vsel %vm2348_vm1, %v2509_v29, -inf }
 0x5c5   :  { %v2471_v42 = vmax.f32 %v2465_v10, %v2466_v53  ;;  %v2566_v60 = vrot.slane %v2565_v43, 1  ;;  %v2572_v54 = vmax.f32 %v2570_v21, %v2571_v45  ;;  %v2585_v52 = vrot.slane %v2584_v15, 2 }
 0x5c6   :  { %v2579_v32 = vmax.f32 %v2577_v2, %v2578_v13  ;;  %v2591_v57 = vmax.f32 %v2589_v38, %v2590_v25  ;;  %v2597_v63 = vrot.slane %v2596_v37, 4  ;;  %v2603_v48 = vsel %vm2348_vm1, %v11095_v34, -inf }
 0x5c7   :  { %v2511_v46 = vcombine.high %v2471_v42, %v2471_v42  ;;  %v2567_v11 = vmax.f32 %v2565_v43, %v2566_v60  ;;  %v2573_v50 = vrot.slane %v2572_v54, 1  ;;  %v2586_v40 = vmax.f32 %v2584_v15, %v2585_v52 }
 0x5c8   :  { %v2580_v9 = vrot.slane %v2579_v32, 1  ;;  %v2592_v19 = vrot.slane %v2591_v57, 2  ;;  %v2598_v59 = vmax.f32 %v2596_v37, %v2597_v63  ;;  %v2518_v39 = vrot.slane %v2471_v42, %v10786_v62 }
 0x5c9   :  { %v2525_v30 = vrot.slane %v2511_v46, %v10786_v62  ;;  %v2574_v18 = vmax.f32 %v2572_v54, %v2573_v50  ;;  %v2673_v5 = vpack.c.bf16 %v2567_v11, %v2567_v11  ;;  %v2604_v44 = vrot.slane %v2603_v48, 4 }
 0x5ca   :  { %v2581_v1 = vmax.f32 %v2579_v32, %v2580_v9  ;;  %v2587_v49 = vrot.slane %v2586_v40, 1  ;;  %v2593_v58 = vmax.f32 %v2591_v57, %v2592_v19  ;;  %v2599_v51 = vrot.slane %v2598_v59, 2 }
 0x5cb   :  { %v2526_v4 = vcombine.high %v2518_v39, %v2518_v39  ;;  %v2674_v16 = vpack.c.bf16 %v2574_v18, %v2574_v18  ;;  %v2527_v24 = vcombine.high %v2525_v30, %v2525_v30  ;;  %v2617_v55 = vsel %vm2348_vm1, %v2518_v39, -inf }
 0x5cc   :  { %v2675_v8 = vpack.c.bf16 %v2581_v1, %v2581_v1  ;;  %v2594_v36 = vrot.slane %v2593_v58, 1  ;;  %v2618_v3 = vrot.slane %v2617_v55, 4  ;;  %v2631_v14 = vsel %vm2348_vm1, %v2525_v30, -inf }
 0x5cd   :  { %v2624_v56 = vsel %vm2348_vm1, %v2526_v4, -inf  ;;  %v11110_v33 = vunpack.c.l.b16 %v2673_v5  ;;  %v11112_v7 = vunpack.c.l.b16 %v2674_v16  ;;  %v2605_v20 = vmax.f32 %v2603_v48, %v2604_v44 }
 0x5ce   :  { %v2632_v27 = vrot.slane %v2631_v14, 4  ;;  %v11114_v41 = vunpack.c.l.b16 %v2675_v8  ;;  %v2595_v28 = vmax.f32 %v2593_v58, %v2594_v36  ;;  %v2619_v34 = vmax.f32 %v2617_v55, %v2618_v3 }
 0x5cf   :  { %v2625_v53 = vrot.slane %v2624_v56, 4  ;;  %v11117_v21 = vsel %vm2348_vm1, %v2527_v24, -inf  ;;  %v2467_v2 = vmax.f32 %v11098_v35, 0.0  ;;  %v2406_v6 = vadd.f32 %v2405_v17, %v11082_v61 }
 0x5d0   :  { %v2633_v31 = vmax.f32 %v2631_v14, %v2632_v27  ;;  %v2620_v29 = vrot.slane %v2619_v34, 2  ;;  %v2610_v38 = vsel %vm2348_vm1, %v2510_v47, -inf  ;;  %v2588_v10 = vmax.f32 %v2586_v40, %v2587_v49 }
 0x5d1   :  { %v2600_v43 = vmax.f32 %v2598_v59, %v2599_v51  ;;  %v2459_v13 = vadd.f32 %v2458_v12, %v2406_v6  ;;  %v2611_v15 = vrot.slane %v2610_v38, 4  ;;  %v2606_v25 = vrot.slane %v2605_v20, 2 }
 0x5d2   :  { %v2634_v45 = vrot.slane %v2633_v31, 2  ;;  %v2621_v37 = vmax.f32 %v2619_v34, %v2620_v29  ;;  %v2676_v60 = vpack.c.bf16 %v2588_v10, %v2588_v10  ;;  %v2677_v54 = vpack.c.bf16 %v2595_v28, %v2595_v28 }
 0x5d3   :  { %v2601_v42 = vrot.slane %v2600_v43, 1  ;;  %v2468_v52 = vmax.f32 %v2459_v13, 0.0  ;;  %v2612_v57 = vmax.f32 %v2610_v38, %v2611_v15  ;;  %v2607_v35 = vmax.f32 %v2605_v20, %v2606_v25 }
 0x5d4   :  { %v2635_v32 = vmax.f32 %v2633_v31, %v2634_v45  ;;  %v2622_v63 = vrot.slane %v2621_v37, 1  ;;  %v2626_v61 = vmax.f32 %v2624_v56, %v2625_v53  ;;  %v2639_v48 = vrot.slane %v11117_v21, 4 }
 0x5d5   :  { %v2602_v46 = vmax.f32 %v2600_v43, %v2601_v42  ;;  %v2472_v11 = vmax.f32 %v2467_v2, %v2468_v52  ;;  %v2613_v50 = vrot.slane %v2612_v57, 2  ;;  %v2608_v9 = vrot.slane %v2607_v35, 1 }
 0x5d6   :  { %v2636_v47 = vrot.slane %v2635_v32, 1  ;;  %v2623_v40 = vmax.f32 %v2621_v37, %v2622_v63  ;;  %v11123_v59 = vunpack.c.l.b16 %v2676_v60  ;;  %v2753_v39 = vsel %vm551_vm5, %v11112_v7, %v11110_v33 }
 0x5d7   :  { %v2678_v19 = vpack.c.bf16 %v2602_v46, %v2602_v46  ;;  %v2528_v30 = vcombine.high %v2472_v11, %v2472_v11  ;;  %v2535_v18 = vrot.slane %v2472_v11, %v10786_v62  ;;  %v2614_v1 = vmax.f32 %v2612_v57, %v2613_v50 }
 0x5d8   :  { %v11129_v5 = vunpack.c.l.b16 %v2677_v54  ;;  %v11131_v44 = vmax.f32 %v2635_v32, %v2636_v47  ;;  %v2609_v49 = vmax.f32 %v2607_v35, %v2608_v9  ;;  %v2754_v58 = vsel %vm582_vm13, %v11114_v41, %v2753_v39 }
 0x5d9   :  { %v2627_v51 = vrot.slane %v2626_v61, 2  ;;  %v2681_v4 = vpack.c.bf16 %v2623_v40, %v2623_v40  ;;  %v2542_v16 = vrot.slane %v2528_v30, %v10786_v62  ;;  %v2543_v8 = vcombine.high %v2535_v18, %v2535_v18 }
 0x5da   :  { %v2645_v24 = vsel %vm2348_vm1, %v2535_v18, -inf  ;;  %v2615_v36 = vrot.slane %v2614_v1, 1  ;;  %v2679_v3 = vpack.c.bf16 %v2609_v49, %v2609_v49  ;;  %v11137_v56 = vunpack.c.l.b16 %v2678_v19 }
 0x5db   :  { %v2646_v55 = vrot.slane %v2645_v24, 4  ;;  %v2544_v14 = vcombine.high %v2542_v16, %v2542_v16  ;;  %v2652_v17 = vsel %vm2348_vm1, %v2543_v8, -inf  ;;  %v2659_v20 = vsel %vm2348_vm1, %v2542_v16, -inf  ;;  %v9119_v16 = vld [vmem:[#allocation11 + $0x138] sm:$0xff]  }
 0x5dc   :  { %v2755_v27 = vsel %vm1931_vm7, %v11123_v59, %v2754_v58  ;;  %v2653_v34 = vrot.slane %v2652_v17, 4  ;;  %v2660_v53 = vrot.slane %v2659_v20, 4  ;;  %v2616_v31 = vmax.f32 %v2614_v1, %v2615_v36 }
 0x5dd   :  { %v2647_v28 = vmax.f32 %v2645_v24, %v2646_v55  ;;  %v11143_v2 = vunpack.c.l.b16 %v2679_v3  ;;  %v2756_v6 = vsel %vm11761_vm2, %v11129_v5, %v2755_v27  ;;  %v2628_v12 = vmax.f32 %v2626_v61, %v2627_v51 }
 0x5de   :  { %v2666_v29 = vsel %vm2348_vm1, %v2544_v14, -inf  ;;  %v2654_v10 = vmax.f32 %v2652_v17, %v2653_v34  ;;  %v2661_v43 = vmax.f32 %v2659_v20, %v2660_v53  ;;  %v11148_v45 = vpack.c.bf16 %v2616_v31, %v2616_v31  ;;  %v9122_v17 = vld [vmem:[#allocation11 + $0x170] sm:$0xff]  }
 0x5df   :  { %v2648_v38 = vrot.slane %v2647_v28, 2  ;;  %v2757_v13 = vsel %vm11762_vm6, %v11137_v56, %v2756_v6  ;;  %v2629_v15 = vrot.slane %v2628_v12, 1  ;;  %v2667_v25 = vrot.slane %v2666_v29, 4  ;;  %v9123_v53 = vld [vmem:[#allocation11 + $0x130] sm:$0xff]  }
 0x5e0   :  { %v2683_v37 = vpack.c.bf16 %v11131_v44, %v11131_v44  ;;  %2771 = vrot.lane.b32.xlu1 %v11148_v45, %s10163_s15  ;;  %v2758_v60 = vsel %vm11763_vm12, %v11143_v2, %v2757_v13  ;;  %v2640_v57 = vmax.f32 %v11117_v21, %v2639_v48  ;;  %v2713_v35 = vunpack.c.l.b16 %v2681_v4 }
 0x5e1   :  { %v2649_v42 = vmax.f32 %v2647_v28, %v2648_v38  ;;  %v2765_v54 = vpack.c.b16 %v2758_v60, %v2758_v60  ;;  %v2630_v32 = vmax.f32 %v2628_v12, %v2629_v15  ;;  %v2668_v52 = vmax.f32 %v2666_v29, %v2667_v25 }
 0x5e2   :  { %v2655_v61 = vrot.slane %v2654_v10, 2  ;;  %v2662_v46 = vrot.slane %v2661_v43, 2  ;;  %v2641_v50 = vrot.slane %v2640_v57, 2  ;;  %v2812_v48 = vsel %vm11764_vm0, %v2713_v35, %v11110_v33 }
 0x5e3   :  { %v2650_v63 = vrot.slane %v2649_v42, 1  ;;  %2769 = vrot.lane.b32.xlu0 %v2765_v54, %s10163_s15  ;;  %v2682_v47 = vpack.c.bf16 %v2630_v32, %v2630_v32  ;;  %v2669_v11 = vrot.slane %v2668_v52, 2  ;;  %v2715_v51 = vunpack.c.l.b16 %v2683_v37  ;;  %v9121_v54 = vld [vmem:[#allocation11 + $0x1b8] sm:$0xff]  }
 0x5e4   :  { %v2656_v40 = vmax.f32 %v2654_v10, %v2655_v61  ;;  %v2663_v19 = vmax.f32 %v2661_v43, %v2662_v46  ;;  %v2642_v21 = vmax.f32 %v2640_v57, %v2641_v50  ;;  %v2813_v3 = vpack.c.b16 %v2812_v48, %v2812_v48  ;;  %v9126_v10 = vld [vmem:[#allocation11 + $0x168] sm:$0xff]   ;;  %v9124_v57 = vld [vmem:[#allocation11 + $0x1f0] sm:$0xff]   ;;  %v9130_v61 = vld [vmem:[#allocation11 + $0x160] sm:$0xff]  }
 0x5e5   :  { %v2651_v9 = vmax.f32 %v2649_v42, %v2650_v63  ;;  %v2714_v39 = vunpack.c.l.b16 %v2682_v47  ;;  %v2670_v30 = vmax.f32 %v2668_v52, %v2669_v11  ;;  %v2712_v12 = vunpack.c.l.b16 %v11148_v45  ;;  %v9125_v46 = vld [vmem:[#allocation11 + $0x1b0] sm:$0xff]   ;;  %v9128_v47 = vld [vmem:[#allocation11 + $0x1e8] sm:$0xff]   ;;  %v9131_v11 = vld [vmem:[#allocation11 + $0x120] sm:$0xff]  }
 0x5e6   :  { %v2657_v18 = vrot.slane %v2656_v40, 1  ;;  %v2664_v1 = vrot.slane %v2663_v19, 1  ;;  %v2643_v58 = vrot.slane %v2642_v21, 1  ;;  %v2818_v43 = vsel %vm11766_vm4, %v2715_v51, %v11114_v41  ;;  %v9134_v50 = vld [vmem:[#allocation11 + $0x158] sm:$0xff]   ;;  %v9139_v48 = vld [vmem:[#allocation11 + $0x110] sm:$0xff]  }
 0x5e7   :  { %v2815_v44 = vsel %vm11765_vm11, %v2714_v39, %v11112_v7  ;;  %v2671_v49 = vrot.slane %v2670_v30, 1  ;;  %v2685_v55 = vpack.c.bf16 %v2651_v9, %v2651_v9  ;;  %v2759_v33 = vsel %vm551_vm5, %v2714_v39, %v2713_v35  ;;  %v9127_v35 = vld [vmem:[#allocation11 + $0x128] sm:$0xff]   ;;  %v9138_v39 = vld [vmem:[#allocation11 + $0x150] sm:$0xff]  }
 0x5e8   :  { %v2816_v4 = vpack.c.b16 %v2815_v44, %v2815_v44  ;;  %v2658_v8 = vmax.f32 %v2656_v40, %v2657_v18  ;;  %v2665_v24 = vmax.f32 %v2663_v19, %v2664_v1  ;;  %v2644_v14 = vmax.f32 %v2642_v21, %v2643_v58  ;;  %v9129_v9 = vld [vmem:[#allocation11 + $0x1a8] sm:$0xff]   ;;  %v9132_v40 = vld [vmem:[#allocation11 + $0x1e0] sm:$0xff]   ;;  %v9135_v19 = vld [vmem:[#allocation11 + $0x118] sm:$0xff]  }
 0x5e9   :  { %v2672_v36 = vmax.f32 %v2670_v30, %v2671_v49  ;;  %v11169_v31 = vunpack.c.l.b16 %v2685_v55  ;;  %v2760_v6 = vsel %vm582_vm13, %v2715_v51, %v2759_v33  ;;  %v2819_v52 = vpack.c.b16 %v2818_v43, %v2818_v43  ;;  %v9133_v30 = vld [vmem:[#allocation11 + $0x1a0] sm:$0xff]   ;;  %v9136_v21 = vld [vmem:[#allocation11 + $0x1d8] sm:$0xff]   ;;  %v9142_v18 = vld [vmem:[#allocation11 + $0x148] sm:$0xff]  }
 0x5ea   :  { %3387 = vmatprep.mubr.bf16.mxu1 %v2816_v4  ;;  %v2686_v7 = vpack.c.bf16 %v2658_v8, %v2658_v8  ;;  %v2687_v20 = vpack.c.bf16 %v2665_v24, %v2665_v24  ;;  %v2684_v28 = vpack.c.bf16 %v2644_v14, %v2644_v14  ;;  %v9137_v1 = vld [vmem:[#allocation11 + $0x198] sm:$0xff]   ;;  %v9140_v44 = vld [vmem:[#allocation11 + $0x1d0] sm:$0xff]   ;;  %v9143_v49 = vld [vmem:[#allocation11 + $0x108] sm:$0xff]   ;;  %vm2800_vm11 = vcmask 126980  }
 0x5eb   :  { %v2688_v27 = vpack.c.bf16 %v2672_v36, %v2672_v36  ;;  %3388 = vmatmul.mubr.bf16.vlgmr.msra.gmra.mxu1 %v2813_v3  ;;  %v9146_v58 = vld [vmem:[#allocation11 + $0x140] sm:$0xff]   ;;  %v9141_v51 = vld [vmem:[#allocation11 + $0x190] sm:$0xff]   ;;  %v9144_v4 = vld [vmem:[#allocation11 + $0x1c8] sm:$0xff]   ;;  %v2824_v24 = vsel %vm11770_vm14, %v11169_v31, %v11129_v5  ;;  %vm11771_vm4 = vsmask.f32 256 }
 0x5ec   :  { %8504 = vmatpush3.bf16.msra.mxu1 %v9119_v16  ;;  %v2718_v34 = vunpack.c.l.b16 %v2686_v7  ;;  %v2716_v38 = vunpack.c.l.b16 %v2684_v28  ;;  %v11178_v15 = vunpack.c.l.b16 %v2687_v20  ;;  %v9147_v16 = vld [vmem:[#allocation11 + $0x100] sm:$0xff]   ;;  %v9145_v8 = vld [vmem:[#allocation11 + $0x188] sm:$0xff]   ;;  %v2825_v33 = vpack.c.b16 %v2824_v24, %v2824_v24  ;;  %v9155_v5 = vld [vmem:[#allocation12 + $0x30] sm:$0xff]  }
 0x5ed   :  { %2775 = vrot.lane.b32.xlu1 %v2688_v27, %s10163_s15  ;;  %v2720_v29 = vunpack.c.l.b16 %v2688_v27  ;;  %8505 = vmatprep.subr.bf16.mxu1 %v9122_v17  ;;  %v9148_v55 = vld [vmem:[#allocation11 + $0x1c0] sm:$0xff]   ;;  %v9154_v17 = vld [vmem:[#allocation12 + $0x38] sm:$0xff]   ;;  %v10164_v7 = vmov 0.0   ;;  %v9156_v20 = vld [vmem:[#allocation12 + $0x28] sm:$0xff]   ;;  %vm11776_vm14 = vsmask.f32 7938 }
 0x5ee   :  { %v2827_v13 = vsel %vm11767_vm8, %v2718_v34, %v11137_v56  ;;  %v2821_v25 = vsel %vm11768_vm10, %v2716_v38, %v11123_v59  ;;  %v2761_v45 = vsel %vm1931_vm7, %v2716_v38, %v2760_v6  ;;  %v9149_v36 = vld [vmem:[#allocation11 + $0x180] sm:$0xff]   ;;  %v2830_v3 = vsel %vm11764_vm0, %v11178_v15, %v11143_v2  ;;  %v9158_v2 = vld [vmem:[#allocation12 + $0x18] sm:$0xff]   ;;  %vm11204_vm8 = vmand %vm2798_vm3, %vm11771_vm4 }
 0x5ef   :  { %v2828_v37 = vpack.c.b16 %v2827_v13, %v2827_v13  ;;  %v2833_v42 = vsel %vm11769_vm9, %v2720_v29, %v2712_v12  ;;  %v2822_v60 = vpack.c.b16 %v2821_v25, %v2821_v25  ;;  %v2762_v32 = vsel %vm11761_vm2, %v11169_v31, %v2761_v45  ;;  %v9157_v27 = vld [vmem:[#allocation12 + $0x20] sm:$0xff]   ;;  %vm11209_vm10 = vmand %vm2800_vm11, %vm511_vm15  ;;  %v2803_v12 = vld [vmem:[#allocation4 + $0x8] sm:$0x11] }
 0x5f0   :  { %8506 = vmatpush3.bf16.msra.mxu1 %v9123_v53  ;;  %v2834_v41 = vpack.c.b16 %v2833_v42, %v2833_v42  ;;  %v2763_v56 = vsel %vm11762_vm6, %v2718_v34, %v2762_v32  ;;  %v2831_v14 = vpack.c.b16 %v2830_v3, %v2830_v3  ;;  %v9159_v34 = vld [vmem:[#allocation12 + $0x10] sm:$0xff]   ;;  %vm2790_vm9 = vcmask 1043584   ;;  %vm2802_vm6 = vmor %vm11209_vm10, %vm11204_vm8  ;;  %v2795_v25 = vld [vmem:[#allocation4] sm:$0xff] }
 0x5f1   :  { %3467 = vmatprep.mubr.bf16.mxu1 %v2828_v37  ;;  %8507 = vmatprep.subr.bf16.mxu1 %v9126_v10  ;;  %v2764_v59 = vsel %vm11763_vm12, %v11178_v15, %v2763_v56  ;;  %vm2792_vm2 = vcmask 130052   ;;  %vm2781_vm12 = vcmask 130048   ;;  %vm11219_vm0 = vmand %vm2790_vm9, %vm11776_vm14  ;;  %vm11779_vm15 = vsmask.f32 7954  ;;  %v9160_v10 = vld [vmem:[#allocation12 + $0x8] sm:$0xff]   ;;  %v9161_v42 = vld [vmem:[#allocation12] sm:$0xff]  }
 0x5f2   :  { %3427 = vmatprep.mubr.bf16.mxu0 %v2822_v60  ;;  %v2767_v63 = vpack.c.b16 %v2764_v59, %v2764_v59  ;;  %vm11224_vm3 = vmand %vm2792_vm2, %vm11779_vm15  ;;  %vm10165_vm4 = vmmov 0   ;;  %v2809_v56 = vld [vmem:[#allocation4 + $0x18] sm:$0x11]  ;;  %v9211_v6 = vld [vmem:[#allocation14 + $0x30] sm:$0xff]   ;;  %vm3827_vm8 = vcmask 523264   ;;  %vm11784_vm10 = vcmask 261120  }
 0x5f3   :  { %3428 = vmatmul.mubr.bf16.vlgmr.msra.gmra.mxu0 %v2819_v52  ;;  %vm2794_vm11 = vmor %vm11224_vm3, %vm11219_vm0  ;;  %vm11791_vm14 = vcmask 1041409  }
 0x5f4   :  { %8526 = vmatpush3.bf16.msra.mxu0 %v9121_v54  ;;  %3507 = vmatprep.mubr.bf16.mxu0 %v2834_v41  ;;  %v9164_v54 = vld [vmem:[%s11782_s19 + $0x74] ss:$8 sps:$4 sm:$0xff]   ;;  %vm11785_vm9 = vmmov %vm11784_vm10 }
 0x5f5   :  { %2773 = vrot.lane.b32.xlu0 %v2767_v63, %s10163_s15  ;;  %8527 = vmatprep.subr.bf16.mxu0 %v9124_v57  ;;  %vm11786_vm2 = vmmov %vm11785_vm9 }
 0x5f6   :  { %8508 = vmatpush3.bf16.msra.mxu1 %v9127_v35  ;;  %vm11792_vm0 = vmmov %vm11791_vm14 }
 0x5f7   :  { %8509 = vmatprep.subr.bf16.mxu1 %v9130_v61  ;;  %vm11793_vm15 = vmmov %vm11792_vm0 }
 0x5f8   :  { %8528 = vmatpush3.bf16.msra.mxu0 %v9125_v46  ;;  %vm11794_vm3 = vmmov %vm11792_vm0 }
 0x5f9   :  { %8529 = vmatprep.subr.bf16.mxu0 %v9128_v47 }
 0x5fa   :  { %8510 = vmatpush3.bf16.msra.mxu1 %v9131_v11 }
 0x5fb   :  { %8511 = vmatprep.subr.bf16.mxu1 %v9134_v50 }
 0x5fc   :  { %8530 = vmatpush3.bf16.msra.mxu0 %v9129_v9 }
 0x5fd   :  { %8531 = vmatprep.subr.bf16.mxu0 %v9132_v40 }
 0x5fe   :  { %8512 = vmatpush3.bf16.msra.mxu1 %v9135_v19 }
 0x5ff   :  { %8513 = vmatprep.subr.bf16.mxu1 %v9138_v39 }
 0x600   :  { %8532 = vmatpush3.bf16.msra.mxu0 %v9133_v30 }
 0x601   :  { %8533 = vmatprep.subr.bf16.mxu0 %v9136_v21  ;;  %v2806_v21 = vld [vmem:[#allocation4 + $0x10] sm:$0xff] }
 0x602   :  { %8514 = vmatpush3.bf16.msra.mxu1 %v9139_v48 }
 0x603   :  { %8515 = vmatprep.subr.bf16.mxu1 %v9142_v18 }
 0x604   :  { %8534 = vmatpush3.bf16.msra.mxu0 %v9137_v1 }
 0x605   :  { %8535 = vmatprep.subr.bf16.mxu0 %v9140_v44 }
 0x606   :  { %8516 = vmatpush3.bf16.msra.mxu1 %v9143_v49 }
 0x607   :  { %8517 = vmatprep.subr.bf16.mxu1 %v9146_v58 }
 0x608   :  { %8536 = vmatpush3.bf16.msra.mxu0 %v9141_v51 }
 0x609   :  { %8537 = vmatprep.subr.bf16.mxu0 %v9144_v4 }
 0x60a   :  { %8518 = vmatpush3.bf16.msra.mxu1 %v9147_v16 }
 0x60b   :  { %8694 = vmatprep.subr.bf16.mxu1 %v10164_v7 }
 0x60c   :  { %8538 = vmatpush3.bf16.msra.mxu0 %v9145_v8 }
 0x60d   :  { %8539 = vmatprep.subr.bf16.mxu0 %v9148_v55  ;;  %3468 = vmatmul.mubr.bf16.vlgmr.msra.gmra.mxu1 %v2825_v33 }
 0x60e   :  { %8695 = vmatpush3.bf16.msra.mxu1 %v9154_v17  ;;  %8710 = vmatprep.mubr.msk.bf16.mxu1 %vm10165_vm4, %v10164_v7 }
 0x60f   :  { %8696 = vmatprep.subr.bf16.mxu1 %v10164_v7 }
 0x610   :  { %8540 = vmatpush3.bf16.msra.mxu0 %v9149_v36 }
 0x611   :  { %8714 = vmatprep.subr.bf16.mxu0 %v10164_v7 }
 0x612   :  { %8697 = vmatpush3.bf16.msra.mxu1 %v9155_v5 }
 0x613   :  { %3508 = vmatmul.mubr.bf16.vlgmr.msra.gmra.mxu0 %v2831_v14  ;;  %8698 = vmatprep.subr.bf16.mxu1 %v10164_v7 }
 0x614   :  { %8730 = vmatprep.mubr.msk.bf16.mxu0 %vm10165_vm4, %v10164_v7 }
 0x616   :  { %8699 = vmatpush3.bf16.msra.mxu1 %v9156_v20 }
 0x617   :  { %8700 = vmatprep.subr.bf16.mxu1 %v10164_v7 }
 0x61a   :  { %8701 = vmatpush3.bf16.msra.mxu1 %v9157_v27 }
 0x61b   :  { %8702 = vmatprep.subr.bf16.mxu1 %v10164_v7 }
 0x61e   :  { %8703 = vmatpush3.bf16.msra.mxu1 %v9158_v2 }
 0x61f   :  { %8704 = vmatprep.subr.bf16.mxu1 %v10164_v7 }
 0x622   :  { %8705 = vmatpush3.bf16.msra.mxu1 %v9159_v34 }
 0x623   :  { %8706 = vmatprep.subr.bf16.mxu1 %v10164_v7 }
 0x626   :  { %8707 = vmatpush3.bf16.msra.mxu1 %v9160_v10  ;;  %v9214_v10 = vld [vmem:[#allocation14 + $0x18] sm:$0xff]  }
 0x627   :  { %8708 = vmatprep.subr.bf16.mxu1 %v10164_v7 }
 0x62a   :  { %8709 = vmatpush3.bf16.msra.mxu1 %v9161_v42 }
 0x62b   :  { %4236 = vmatprep.subr.bf16.mxu1 %v9164_v54 }
 0x652   :  { %v2772_v31 = vpop.permute.xlu1 %2771 }
 0x653   :  { %v2778_v29 = vrot.slane %v2772_v31, 4 }
 0x655   :  { %v2783_v43 = vsel %vm2781_vm12, %v2778_v29, %v2772_v31  ;;  %v2770_v13 = vpop.permute.xlu0 %2769  ;;  %v9210_v31 = vld [vmem:[#allocation14 + $0x38] sm:$0xff]   ;;  %v9213_v29 = vld [vmem:[#allocation14 + $0x20] sm:$0xff]  }
 0x656   :  { %v2804_v15 = vsel %vm2802_vm6, %v2783_v43, %v2803_v12  ;;  %v2777_v37 = vrot.slane %v2770_v13, 4  ;;  %8715 = vmatpush3.bf16.msra.mxu0 %v9210_v31  ;;  %v9212_v12 = vld [vmem:[#allocation14 + $0x28] sm:$0xff]  }
 0x657   :  { %2805 = vst [vmem:[#allocation4 + $0x8] sm:$0x11] %v2804_v15  ;;  %8716 = vmatprep.subr.bf16.mxu0 %v10164_v7  ;;  %v9215_v15 = vld [vmem:[#allocation14 + $0x10] sm:$0xff]  }
 0x658   :  { %v2782_v45 = vsel %vm2781_vm12, %v2777_v37, %v2770_v13 }
 0x659   :  { %v11245_v60 = vsel %vm2794_vm11, %v2782_v45, %v2795_v25  ;;  %v9216_v45 = vld [vmem:[#allocation14 + $0x8] sm:$0xff]  }
 0x65a   :  { %2797 = vst [vmem:[#allocation4] sm:$0xff] %v11245_v60  ;;  %8717 = vmatpush3.bf16.msra.mxu0 %v9211_v6 }
 0x65b   :  { %8718 = vmatprep.subr.bf16.mxu0 %v10164_v7 }
 0x65e   :  { %v3744_v32 = vld [vmem:[#allocation4 + $0x8] sm:$0x11]  ;;  %8719 = vmatpush3.bf16.msra.mxu0 %v9212_v12  ;;  %v9174_v12 = vld [vmem:[%s11782_s19 + $0x30] ss:$8 sps:$4 sm:$0xff]  }
 0x65f   :  { %v2776_v41 = vpop.permute.xlu1 %2775  ;;  %v8012_v52 = vcombine.low %v11245_v60, %v3744_v32  ;;  %v8013_v59 = vcombine.high %v11245_v60, %v3744_v32  ;;  %8720 = vmatprep.subr.bf16.mxu0 %v10164_v7 }
 0x660   :  { %v2780_v57 = vrot.slane %v2776_v41, 4 }
 0x661   :  { %v3746_v35 = vld [vmem:[#allocation4] sm:$0xee]  ;;  %v3769_v63 = vshll.u32 %v8012_v52, 16  ;;  %v3776_v19 = vshll.u32 %v8013_v59, 16  ;;  %v3767_v39 = vshrl.u32 %v8012_v52, 16  ;;  %v3774_v49 = vshrl.u32 %v8013_v59, 16 }
 0x662   :  { %v2785_v61 = vsel %vm2781_vm12, %v2780_v57, %v2776_v41  ;;  %v8017_v46 = vcombine.high %v3746_v35, %v3744_v32  ;;  %v8016_v47 = vcombine.low %v3746_v35, %v3744_v32  ;;  %8721 = vmatpush3.bf16.msra.mxu0 %v9213_v29  ;;  %v7927_v52 = vld [vmem:[%s11783_s18] ss:$0 sm:$0xff] }
 0x663   :  { %v2810_v11 = vsel %vm2802_vm6, %v2785_v61, %v2809_v56  ;;  %v3771_v40 = vrot.slane %v3769_v63, 1  ;;  %v3778_v1 = vrot.slane %v3776_v19, 1  ;;  %8722 = vmatprep.subr.bf16.mxu0 %v10164_v7  ;;  %vm11787_vm6 = vmmov %vm11786_vm2 }
 0x664   :  { %2811 = vst [vmem:[#allocation4 + $0x18] sm:$0x11] %v2810_v11  ;;  %v3816_v50 = vrot.slane %v8017_v46, 1  ;;  %v3815_v9 = vrot.slane %v8016_v47, 1 }
 0x665   :  { %v3772_v18 = vor.u32 %v3771_v40, %v3767_v39  ;;  %v3779_v4 = vor.u32 %v3778_v1, %v3774_v49 }
 0x666   :  { %3821 = vrot.lane.b32.xlu1 %v3816_v50, %s10133_s7  ;;  %3819 = vrot.lane.b32.xlu0 %v3815_v9, %s10133_s7 }
 0x667   :  { %v2774_v30 = vpop.permute.xlu0 %2773  ;;  %8723 = vmatpush3.bf16.msra.mxu0 %v9214_v10 }
 0x668   :  { %v2779_v48 = vrot.slane %v2774_v30, 4  ;;  %8724 = vmatprep.subr.bf16.mxu0 %v10164_v7 }
 0x66a   :  { %v2784_v44 = vsel %vm2781_vm12, %v2779_v48, %v2774_v30  ;;  %3794 = vrot.lane.b32.xlu0 %v3772_v18, %s10158_s11  ;;  %vm4232_vm12 = vcmask 785408  }
 0x66b   :  { %v11270_v58 = vsel %vm2794_vm11, %v2784_v44, %v2806_v21  ;;  %v3745_v51 = vld [vmem:[#allocation4 + $0x18] sm:$0x11]  ;;  %8725 = vmatpush3.bf16.msra.mxu0 %v9215_v15  ;;  %vm4489_vm11 = vcmask 260100  }
 0x66c   :  { %2808 = vst [vmem:[#allocation4 + $0x10] sm:$0xff] %v11270_v58  ;;  %v8014_v16 = vcombine.low %v11270_v58, %v3745_v51  ;;  %v8015_v8 = vcombine.high %v11270_v58, %v3745_v51  ;;  %v8020_v24 = vcombine.low %v11245_v60, %v11270_v58  ;;  %8726 = vmatprep.subr.bf16.mxu0 %v10164_v7  ;;  %v9162_v44 = vld [vmem:[%s11782_s19 + $0x70] ss:$8 sps:$4 sm:$0xff]   ;;  %v9182_v15 = vld [vmem:[%s11782_s19 + $0x14] ss:$8 sps:$4 sm:$0xff]  }
 0x66e   :  { %3796 = vrot.lane.b32.xlu0 %v3779_v4, %s10158_s11  ;;  %v3783_v55 = vshll.u32 %v8014_v16, 16  ;;  %v3790_v33 = vshll.u32 %v8015_v8, 16  ;;  %v3781_v36 = vshrl.u32 %v8014_v16, 16  ;;  %v3788_v27 = vshrl.u32 %v8015_v8, 16  ;;  %v9167_v4 = vld [vmem:[%s11782_s19 + $0x64] ss:$8 sps:$4 sm:$0xff]  }
 0x66f   :  { %8727 = vmatpush3.bf16.msra.mxu0 %v9216_v45  ;;  %v9165_v16 = vld [vmem:[%s11782_s19 + $0x60] ss:$8 sps:$4 sm:$0xff]  }
 0x670   :  { %v3785_v3 = vrot.slane %v3783_v55, 1  ;;  %v3792_v17 = vrot.slane %v3790_v33, 1  ;;  %8728 = vmatprep.subr.bf16.mxu0 %v10164_v7  ;;  %v9170_v55 = vld [vmem:[%s11782_s19 + $0x54] ss:$8 sps:$4 sm:$0xff]   ;;  %v9183_v45 = vld [vmem:[%s11782_s19] ss:$8 sps:$4 sm:$0xff]  }
 0x672   :  { %v3786_v14 = vor.u32 %v3785_v3, %v3781_v36  ;;  %v3793_v28 = vor.u32 %v3792_v17, %v3788_v27  ;;  %v9168_v3 = vld [vmem:[%s11782_s19 + $0x50] ss:$8 sps:$4 sm:$0xff]   ;;  %v8010_v17 = vcombine.high %v11245_v60, %v11245_v60 }
 0x673   :  { %v3747_v5 = vld [vmem:[#allocation4 + $0x10] sm:$0xee] }
 0x674   :  { %v8018_v20 = vcombine.low %v3747_v5, %v3745_v51  ;;  %3798 = vrot.lane.b32.xlu1 %v3786_v14, %s10158_s11  ;;  %v8019_v34 = vcombine.high %v3747_v5, %v3745_v51  ;;  %v9173_v14 = vld [vmem:[%s11782_s19 + $0x44] ss:$8 sps:$4 sm:$0xff]   ;;  %v8011_v5 = vcombine.high %v11270_v58, %v11270_v58  ;;  %v9218_v60 = vld [vmem:[%s11782_s19 + $0x170] ss:$8 sps:$4 sm:$0xff]  }
 0x676   :  { %v3817_v2 = vrot.slane %v8018_v20, 1  ;;  %v3818_v53 = vrot.slane %v8019_v34, 1  ;;  %v9176_v34 = vld [vmem:[%s11782_s19 + $0x34] ss:$8 sps:$4 sm:$0xff]  }
 0x678   :  { %3823 = vrot.lane.b32.xlu0 %v3817_v2, %s10133_s7  ;;  %3800 = vrot.lane.b32.xlu1 %v3793_v28, %s10158_s11  ;;  %v9171_v2 = vld [vmem:[%s11782_s19 + $0x40] ss:$8 sps:$4 sm:$0xff]  }
 0x67c   :  { %3825 = vrot.lane.b32.xlu1 %v3818_v53, %s10133_s7 }
 0x6ab   :  { %v8475_v38 = vpop.f32.mrf.mxu1 }
 0x6ad   :  { %v8476_v43 = vpop.f32.mrf.mxu1 }
 0x6ae   :  { %v8477_v41 = vadd.f32 %v8476_v43, %v8475_v38  ;;  %v9179_v38 = vld [vmem:[%s11782_s19 + $0x24] ss:$8 sps:$4 sm:$0xff]  }
 0x6af   :  { %v8478_v13 = vpop.f32.mrf.mxu1 }
 0x6b0   :  { %v3390_v57 = vadd.f32 %v8477_v41, %v7927_v52  ;;  %v9177_v13 = vld [vmem:[%s11782_s19 + $0x20] ss:$8 sps:$4 sm:$0xff]   ;;  %v9194_v52 = vld [vmem:[%s11782_s19 + $0xd4] ss:$8 sps:$4 sm:$0xff]  }
 0x6b1   :  { %v8479_v25 = vpop.f32.mrf.mxu1  ;;  %v9189_v41 = vld [vmem:[%s11782_s19 + $0xe0] ss:$8 sps:$4 sm:$0xff]  }
 0x6b2   :  { %v9180_v25 = vld [vmem:[%s11782_s19 + $0x10] ss:$8 sps:$4 sm:$0xff]  }
 0x6b3   :  { %v8497_v37 = vpop.f32.mrf.mxu0 }
 0x6b5   :  { %v8498_v42 = vpop.f32.mrf.mxu0 }
 0x6b6   :  { %v8499_v59 = vadd.f32 %v8498_v42, %v8497_v37  ;;  %v9185_v37 = vld [vmem:[%s11782_s19 + $0x4] ss:$8 sps:$4 sm:$0xff]   ;;  %v9188_v42 = vld [vmem:[%s11782_s19 + $0xf4] ss:$8 sps:$4 sm:$0xff]  }
 0x6b7   :  { %v8500_v54 = vpop.f32.mrf.mxu0 }
 0x6b8   :  { %v3430_v46 = vadd.f32 %v8499_v59, %v3390_v57  ;;  %v9186_v54 = vld [vmem:[%s11782_s19 + $0xf0] ss:$8 sps:$4 sm:$0xff]   ;;  %v9197_v57 = vld [vmem:[%s11782_s19 + $0xc4] ss:$8 sps:$4 sm:$0xff]   ;;  %v9195_v59 = vld [vmem:[%s11782_s19 + $0xc0] ss:$8 sps:$4 sm:$0xff]  }
 0x6b9   :  { %v8501_v32 = vpop.f32.mrf.mxu0 }
 0x6ba   :  { %v9191_v32 = vld [vmem:[%s11782_s19 + $0xe4] ss:$8 sps:$4 sm:$0xff]  }
 0x6cd   :  { %v8519_v56 = vpop.f32.mrf.mxu1 }
 0x6cf   :  { %v8520_v35 = vpop.f32.mrf.mxu1 }
 0x6d0   :  { %v8521_v63 = vadd.f32 %v8520_v35, %v8519_v56  ;;  %v9192_v56 = vld [vmem:[%s11782_s19 + $0xd0] ss:$8 sps:$4 sm:$0xff]   ;;  %v9200_v35 = vld [vmem:[%s11782_s19 + $0xb4] ss:$8 sps:$4 sm:$0xff]  }
 0x6d1   :  { %v8522_v61 = vpop.f32.mrf.mxu1 }
 0x6d2   :  { %v3470_v50 = vadd.f32 %v8521_v63, %v3430_v46  ;;  %v9198_v63 = vld [vmem:[%s11782_s19 + $0xb0] ss:$8 sps:$4 sm:$0xff]   ;;  %v9203_v61 = vld [vmem:[%s11782_s19 + $0xa4] ss:$8 sps:$4 sm:$0xff]   ;;  %v9201_v46 = vld [vmem:[%s11782_s19 + $0xa0] ss:$8 sps:$4 sm:$0xff]  }
 0x6d3   :  { %v8541_v47 = vpop.f32.mrf.mxu0  ;;  %v8523_v11 = vpop.f32.mrf.mxu1 }
 0x6d4   :  { %v9204_v11 = vld [vmem:[%s11782_s19 + $0x90] ss:$8 sps:$4 sm:$0xff]  }
 0x6d5   :  { %v8542_v9 = vpop.f32.mrf.mxu0 }
 0x6d6   :  { %v8543_v40 = vadd.f32 %v8542_v9, %v8541_v47  ;;  %v9206_v47 = vld [vmem:[%s11782_s19 + $0x94] ss:$8 sps:$4 sm:$0xff]   ;;  %v9207_v9 = vld [vmem:[%s11782_s19 + $0x80] ss:$8 sps:$4 sm:$0xff]  }
 0x6d7   :  { %v8544_v19 = vpop.f32.mrf.mxu0 }
 0x6d8   :  { %v3510_v39 = vadd.f32 %v8543_v40, %v3470_v50  ;;  %v3822_v30 = vpop.permute.xlu1 %3821  ;;  %v3820_v21 = vpop.permute.xlu0 %3819  ;;  %v9209_v50 = vld [vmem:[%s11782_s19 + $0x84] ss:$8 sps:$4 sm:$0xff]   ;;  %v9220_v19 = vld [vmem:[%s11782_s19 + $0x174] ss:$8 sps:$4 sm:$0xff]  }
 0x6d9   :  { %v8545_v48 = vpop.f32.mrf.mxu0  ;;  %v11291_v18 = vsel %vm3827_vm8, %v3820_v21, %v3822_v30  ;;  %v9217_v40 = vld [vmem:[#allocation14] sm:$0xff]  }
 0x6da   :  { %v3515_v1 = vmax.f32 %v3510_v39, 0.0  ;;  %8729 = vmatpush3.bf16.msra.mxu0 %v9217_v40  ;;  %v7992_v39 = vld [vmem:[%s11788_s30] ss:$0 sm:$0xff]  ;;  %v9278_v40 = vld [vmem:[#allocation15 + $0xd8] sm:$0xff]  }
 0x6db   :  { %4279 = vmatprep.subr.bf16.mxu0 %v9220_v19  ;;  %v9279_v19 = vld [vmem:[#allocation15 + $0x98] sm:$0xff]  }
 0x6dc   :  { %v3516_v49 = vpack.c.bf16 %v3515_v1, %v3515_v1  ;;  %v3795_v51 = vpop.permute.xlu0 %3794 }
 0x6dd   :  { %v3832_v27 = vsel %vm11785_vm9, %v8010_v17, %v3795_v51  ;;  %v9230_v17 = vld [vmem:[%s11782_s19 + $0x130] ss:$8 sps:$4 sm:$0xff]  }
 0x6de   :  { %8711 = vmatmul.mubr.bf16.vlgmr.msra.gmra.mxu1 %v3516_v49 }
 0x6df   :  { %4237 = vmatpush1.bf16.msra.mxu1 %v9162_v44 }
 0x6e0   :  { %4238 = vmatprep.subr.bf16.mxu1 %v9167_v4  ;;  %v3797_v8 = vpop.permute.xlu0 %3796 }
 0x6e1   :  { %v3803_v33 = vsel %vm11784_vm10, %v3795_v51, %v3797_v8  ;;  %v9221_v8 = vld [vmem:[%s11782_s19 + $0x160] ss:$8 sps:$4 sm:$0xff]   ;;  %vm4490_vm10 = vsmask.f32 6418 }
 0x6e2   :  { %v11299_v36 = vsel %vm3827_vm8, %v3803_v33, %v3820_v21  ;;  %v9224_v33 = vld [vmem:[%s11782_s19 + $0x150] ss:$8 sps:$4 sm:$0xff]  }
 0x6e3   :  { %4239 = vmatpush1.bf16.msra.mxu1 %v9165_v16 }
 0x6e4   :  { %4240 = vmatprep.subr.bf16.mxu1 %v9170_v55  ;;  %v9226_v55 = vld [vmem:[%s11782_s19 + $0x154] ss:$8 sps:$4 sm:$0xff]  }
 0x6e6   :  { %v3799_v20 = vpop.permute.xlu1 %3798 }
 0x6e7   :  { %4241 = vmatpush1.bf16.msra.mxu1 %v9168_v3  ;;  %v3835_v28 = vsel %vm11786_vm2, %v8011_v5, %v3799_v20  ;;  %v9229_v3 = vld [vmem:[%s11782_s19 + $0x144] ss:$8 sps:$4 sm:$0xff]   ;;  %vm4491_vm2 = vmand %vm4489_vm11, %vm4490_vm10 }
 0x6e8   :  { %4242 = vmatprep.subr.bf16.mxu1 %v9173_v14  ;;  %v8021_v53 = vcombine.low %v3832_v27, %v3835_v28  ;;  %v9227_v14 = vld [vmem:[%s11782_s19 + $0x140] ss:$8 sps:$4 sm:$0xff]   ;;  %v9235_v5 = vld [vmem:[%s11782_s19 + $0x124] ss:$8 sps:$4 sm:$0xff]   ;;  %v9238_v27 = vld [vmem:[%s11782_s19 + $0x114] ss:$8 sps:$4 sm:$0xff]  }
 0x6e9   :  { %v9241_v28 = vld [vmem:[%s11782_s19 + $0x104] ss:$8 sps:$4 sm:$0xff]  }
 0x6ea   :  { %v3801_v31 = vpop.permute.xlu1 %3800  ;;  %4268 = vmatprep.mubr.bf16.mxu1 %v8021_v53  ;;  %v3824_v6 = vpop.permute.xlu0 %3823  ;;  %v9244_v53 = vld [vmem:[%s11782_s19 + $0x1d4] ss:$8 sps:$4 sm:$0xff]  }
 0x6eb   :  { %4243 = vmatpush1.bf16.msra.mxu1 %v9171_v2  ;;  %v3804_v29 = vsel %vm11787_vm6, %v3799_v20, %v3801_v31  ;;  %v9233_v20 = vld [vmem:[%s11782_s19 + $0x120] ss:$8 sps:$4 sm:$0xff]   ;;  %v9236_v2 = vld [vmem:[%s11782_s19 + $0x110] ss:$8 sps:$4 sm:$0xff]  }
 0x6ec   :  { %4244 = vmatprep.subr.bf16.mxu1 %v9176_v34  ;;  %v11315_v10 = vsel %vm3827_vm8, %v3804_v29, %v3824_v6  ;;  %v9239_v34 = vld [vmem:[%s11782_s19 + $0x100] ss:$8 sps:$4 sm:$0xff]   ;;  %v9242_v31 = vld [vmem:[%s11782_s19 + $0x1d0] ss:$8 sps:$4 sm:$0xff]   ;;  %v9250_v29 = vld [vmem:[%s11782_s19 + $0x1b4] ss:$8 sps:$4 sm:$0xff]  }
 0x6ed   :  { %v8022_v43 = vcombine.low %v11299_v36, %v11315_v10  ;;  %v9270_v36 = vld [vmem:[#allocation15 + $0xe8] sm:$0xff]  }
 0x6ee   :  { %v3826_v30 = vpop.permute.xlu1 %3825  ;;  %v9271_v10 = vld [vmem:[#allocation15 + $0xa8] sm:$0xff]  }
 0x6ef   :  { %4245 = vmatpush1.bf16.msra.mxu1 %v9174_v12  ;;  %v3829_v44 = vsel %vm3827_vm8, %v3824_v6, %v3826_v30  ;;  %v9247_v6 = vld [vmem:[%s11782_s19 + $0x1c4] ss:$8 sps:$4 sm:$0xff]   ;;  %v9245_v12 = vld [vmem:[%s11782_s19 + $0x1c0] ss:$8 sps:$4 sm:$0xff]   ;;  %v9281_v30 = vld [vmem:[#allocation15 + $0x10] sm:$0xff]  }
 0x6f0   :  { %4246 = vmatprep.subr.bf16.mxu1 %v9179_v38  ;;  %v8023_v4 = vcombine.low %v11291_v18, %v3829_v44  ;;  %v9232_v18 = vld [vmem:[%s11782_s19 + $0x134] ss:$8 sps:$4 sm:$0xff]   ;;  %v9248_v38 = vld [vmem:[%s11782_s19 + $0x1b0] ss:$8 sps:$4 sm:$0xff]   ;;  %v9285_v44 = vld [vmem:[#allocation15 + $0x8] sm:$0xff]  }
 0x6f3   :  { %4247 = vmatpush1.bf16.msra.mxu1 %v9177_v13  ;;  %v9253_v13 = vld [vmem:[%s11782_s19 + $0x1a4] ss:$8 sps:$4 sm:$0xff]  }
 0x6f4   :  { %4248 = vmatprep.subr.bf16.mxu1 %v9182_v15  ;;  %v9251_v15 = vld [vmem:[%s11782_s19 + $0x1a0] ss:$8 sps:$4 sm:$0xff]  }
 0x6f7   :  { %4249 = vmatpush1.bf16.msra.mxu1 %v9180_v25  ;;  %v9256_v25 = vld [vmem:[%s11782_s19 + $0x194] ss:$8 sps:$4 sm:$0xff]  }
 0x6f8   :  { %4250 = vmatprep.subr.bf16.mxu1 %v9185_v37  ;;  %v9254_v37 = vld [vmem:[%s11782_s19 + $0x190] ss:$8 sps:$4 sm:$0xff]  }
 0x6fb   :  { %4251 = vmatpush1.bf16.msra.mxu1 %v9183_v45  ;;  %v9259_v45 = vld [vmem:[%s11782_s19 + $0x184] ss:$8 sps:$4 sm:$0xff]  }
 0x6fc   :  { %4252 = vmatprep.subr.bf16.mxu1 %v9188_v42  ;;  %v9257_v42 = vld [vmem:[%s11782_s19 + $0x180] ss:$8 sps:$4 sm:$0xff]  }
 0x6ff   :  { %4253 = vmatpush2.bf16.msra.mxu1 %v9186_v54  ;;  %v9260_v54 = vld [vmem:[#allocation15 + $0x78] sm:$0xff]  }
 0x700   :  { %4254 = vmatprep.subr.bf16.mxu1 %v9191_v32  ;;  %v9261_v32 = vld [vmem:[#allocation15 + $0x38] sm:$0xff]  }
 0x703   :  { %4255 = vmatpush2.bf16.msra.mxu1 %v9189_v41  ;;  %v9262_v41 = vld [vmem:[#allocation15 + $0xf8] sm:$0xff]  }
 0x704   :  { %4256 = vmatprep.subr.bf16.mxu1 %v9194_v52  ;;  %v9263_v52 = vld [vmem:[#allocation15 + $0xb8] sm:$0xff]  }
 0x707   :  { %4257 = vmatpush2.bf16.msra.mxu1 %v9192_v56  ;;  %v9264_v56 = vld [vmem:[#allocation15 + $0x70] sm:$0xff]  }
 0x708   :  { %4258 = vmatprep.subr.bf16.mxu1 %v9197_v57  ;;  %v9265_v57 = vld [vmem:[#allocation15 + $0x30] sm:$0xff]  }
 0x70b   :  { %4259 = vmatpush2.bf16.msra.mxu1 %v9195_v59  ;;  %v9266_v59 = vld [vmem:[#allocation15 + $0xf0] sm:$0xff]  }
 0x70c   :  { %4260 = vmatprep.subr.bf16.mxu1 %v9200_v35  ;;  %v9267_v35 = vld [vmem:[#allocation15 + $0xb0] sm:$0xff]  }
 0x70f   :  { %4261 = vmatpush2.bf16.msra.mxu1 %v9198_v63  ;;  %v9268_v63 = vld [vmem:[#allocation15 + $0x68] sm:$0xff]  }
 0x710   :  { %4262 = vmatprep.subr.bf16.mxu1 %v9203_v61  ;;  %v9269_v61 = vld [vmem:[#allocation15 + $0x28] sm:$0xff]  }
 0x713   :  { %4263 = vmatpush2.bf16.msra.mxu1 %v9201_v46  ;;  %v9273_v46 = vld [vmem:[#allocation15 + $0x20] sm:$0xff]  }
 0x714   :  { %4264 = vmatprep.subr.bf16.mxu1 %v9206_v47  ;;  %v9274_v47 = vld [vmem:[#allocation15 + $0xe0] sm:$0xff]  }
 0x717   :  { %4265 = vmatpush2.bf16.msra.mxu1 %v9204_v11  ;;  %v9275_v11 = vld [vmem:[#allocation15 + $0xa0] sm:$0xff]  }
 0x718   :  { %4266 = vmatprep.subr.bf16.mxu1 %v9209_v50  ;;  %v9276_v50 = vld [vmem:[#allocation15 + $0x58] sm:$0xff]  }
 0x71b   :  { %4267 = vmatpush2.bf16.msra.mxu1 %v9207_v9  ;;  %v9277_v9 = vld [vmem:[#allocation15 + $0x18] sm:$0xff]  }
 0x71c   :  { %8565 = vmatprep.subr.bf16.mxu1 %v9260_v54 }
 0x71e   :  { %4269 = vmatmul.mubr.bf16.vlgmr.msra.gmra.mxu1 %v8020_v24  ;;  %v9223_v24 = vld [vmem:[%s11782_s19 + $0x164] ss:$8 sps:$4 sm:$0xff]  }
 0x71f   :  { %8566 = vmatpush3.bf16.msra.mxu1 %v9261_v32 }
 0x720   :  { %8567 = vmatprep.subr.bf16.mxu1 %v9264_v56 }
 0x723   :  { %8568 = vmatpush3.bf16.msra.mxu1 %v9265_v57 }
 0x724   :  { %8569 = vmatprep.subr.bf16.mxu1 %v9268_v63 }
 0x727   :  { %8570 = vmatpush3.bf16.msra.mxu1 %v9269_v61 }
 0x79e   :  { %v3622_v21 = vpop.f32.mrf.mxu1 }
 0x79f   :  { %v3623_v48 = vadd.f32 %v7992_v39, %v3622_v21  ;;  %v9280_v39 = vld [vmem:[#allocation15 + $0x50] sm:$0xff]  }
 0x7a0   :  { %v8712_v1 = vpop.f32.mrf.mxu1  ;;  %v9282_v21 = vld [vmem:[#allocation15 + $0xd0] sm:$0xff]  }
 0x7a1   :  { %v3628_v49 = vmax.f32 %v3623_v48, 0.0  ;;  %v9283_v48 = vld [vmem:[#allocation15 + $0x90] sm:$0xff]   ;;  %v9284_v1 = vld [vmem:[#allocation15 + $0x48] sm:$0xff]  }
 0x7a2   :  { %v3625_v51 = vpop.f32.mrf.mxu1 }
 0x7a3   :  { %v3629_v58 = vpack.c.bf16 %v3628_v49, %v3628_v49  ;;  %v9286_v49 = vld [vmem:[#allocation15 + $0xc8] sm:$0xff]  }
 0x7a4   :  { %v8713_v16 = vpop.f32.mrf.mxu1  ;;  %v9287_v51 = vld [vmem:[#allocation15 + $0x88] sm:$0xff]  }
 0x7a5   :  { %8731 = vmatmul.mubr.bf16.vlgmr.msra.gmra.mxu0 %v3629_v58  ;;  %v9289_v58 = vld [vmem:[#allocation15] sm:$0xff]  }
 0x7a6   :  { %4280 = vmatpush1.bf16.msra.mxu0 %v9218_v60  ;;  %8084 = vmatprep.mubr.msk.bf16.mxu0 %vm4232_vm12, %v8023_v4  ;;  %v9288_v60 = vld [vmem:[#allocation15 + $0x40] sm:$0xff]   ;;  %vm11795_vm12 = vcmask 261120  }
 0x7a7   :  { %4281 = vmatprep.subr.bf16.mxu0 %v9223_v24  ;;  %v9290_v24 = vld [vmem:[#allocation15 + $0xc0] sm:$0xff]  }
 0x7a8   :  { %v9291_v4 = vld [vmem:[#allocation15 + $0x80] sm:$0xff]  }
 0x7a9   :  { %v8001_v16 = vld [vmem:[%s11789_s17] ss:$0 sm:$0xff] }
 0x7aa   :  { %4282 = vmatpush1.bf16.msra.mxu0 %v9221_v8 }
 0x7ab   :  { %4283 = vmatprep.subr.bf16.mxu0 %v9226_v55 }
 0x7ae   :  { %4284 = vmatpush1.bf16.msra.mxu0 %v9224_v33 }
 0x7af   :  { %4285 = vmatprep.subr.bf16.mxu0 %v9229_v3 }
 0x7b2   :  { %4286 = vmatpush1.bf16.msra.mxu0 %v9227_v14 }
 0x7b3   :  { %4287 = vmatprep.subr.bf16.mxu0 %v9232_v18 }
 0x7b6   :  { %4288 = vmatpush1.bf16.msra.mxu0 %v9230_v17  ;;  %v3913_v17 = vld [vmem:[%s11790_s0] sm:$0x3] }
 0x7b7   :  { %4289 = vmatprep.subr.bf16.mxu0 %v9235_v5 }
 0x7ba   :  { %4290 = vmatpush1.bf16.msra.mxu0 %v9233_v20  ;;  %v3918_v20 = vrot.slane %v3913_v17, %v10681_v23 }
 0x7bb   :  { %4291 = vmatprep.subr.bf16.mxu0 %v9238_v27  ;;  %v3922_v27 = vrot.slane %v3913_v17, %v10685_v26 }
 0x7be   :  { %4292 = vmatpush1.bf16.msra.mxu0 %v9236_v2 }
 0x7bf   :  { %4293 = vmatprep.subr.bf16.mxu0 %v9241_v28 }
 0x7c2   :  { %4294 = vmatpush1.bf16.msra.mxu0 %v9239_v34 }
 0x7c3   :  { %4299 = vmatprep.subr.bf16.mxu0 %v9244_v53 }
 0x7c6   :  { %4300 = vmatpush2.bf16.msra.mxu0 %v9242_v31 }
 0x7c7   :  { %4301 = vmatprep.subr.bf16.mxu0 %v9247_v6 }
 0x7ca   :  { %4302 = vmatpush2.bf16.msra.mxu0 %v9245_v12 }
 0x7cb   :  { %4303 = vmatprep.subr.bf16.mxu0 %v9250_v29 }
 0x7ce   :  { %4304 = vmatpush2.bf16.msra.mxu0 %v9248_v38 }
 0x7cf   :  { %4305 = vmatprep.subr.bf16.mxu0 %v9253_v13 }
 0x7d2   :  { %4306 = vmatpush2.bf16.msra.mxu0 %v9251_v15 }
 0x7d3   :  { %4307 = vmatprep.subr.bf16.mxu0 %v9256_v25 }
 0x7d6   :  { %4308 = vmatpush2.bf16.msra.mxu0 %v9254_v37 }
 0x7d7   :  { %4309 = vmatprep.subr.bf16.mxu0 %v9259_v45 }
 0x7da   :  { %4310 = vmatpush2.bf16.msra.mxu0 %v9257_v42 }
 0x7db   :  { %8587 = vmatprep.subr.bf16.mxu0 %v9262_v41 }
 0x7dd   :  { %4312 = vmatmul.mubr.bf16.vlgmr.msra.gmra.mxu0 %v8022_v43  ;;  %v9272_v43 = vld [vmem:[#allocation15 + $0x60] sm:$0xff]  }
 0x7de   :  { %8588 = vmatpush3.bf16.msra.mxu0 %v9263_v52  ;;  %8571 = vmatprep.subr.bf16.mxu1 %v9272_v43  ;;  %v4270_v18 = vpop.f32.mrf.mxu1 }
 0x7df   :  { %8589 = vmatprep.subr.bf16.mxu0 %v9266_v59  ;;  %8572 = vmatpush3.bf16.msra.mxu1 %v9273_v46  ;;  %v4271_v28 = vadd.f32 %v4270_v18, %v3918_v20 }
 0x7e0   :  { %8573 = vmatprep.subr.bf16.mxu1 %v9276_v50  ;;  %v4272_v5 = vpop.f32.mrf.mxu1 }
 0x7e1   :  { %v4273_v53 = vadd.f32 %v4272_v5, %v3922_v27 }
 0x7e2   :  { %8590 = vmatpush3.bf16.msra.mxu0 %v9267_v35  ;;  %v4274_v2 = vpop.f32.mrf.mxu1 }
 0x7e3   :  { %8591 = vmatprep.subr.bf16.mxu0 %v9270_v36  ;;  %8574 = vmatpush3.bf16.msra.mxu1 %v9277_v9  ;;  %v4275_v29 = vadd.f32 %v4274_v2, %v3918_v20 }
 0x7e4   :  { %8575 = vmatprep.subr.bf16.mxu1 %v9280_v39  ;;  %v4276_v6 = vpop.f32.mrf.mxu1 }
 0x7e5   :  { %v4277_v15 = vadd.f32 %v4276_v6, %v3922_v27 }
 0x7e6   :  { %8592 = vmatpush3.bf16.msra.mxu0 %v9271_v10 }
 0x7e7   :  { %8593 = vmatprep.subr.bf16.mxu0 %v9274_v47  ;;  %8576 = vmatpush3.bf16.msra.mxu1 %v9281_v30 }
 0x7e8   :  { %8577 = vmatprep.subr.bf16.mxu1 %v9284_v1 }
 0x7ea   :  { %8594 = vmatpush3.bf16.msra.mxu0 %v9275_v11 }
 0x7eb   :  { %8595 = vmatprep.subr.bf16.mxu0 %v9278_v40  ;;  %8578 = vmatpush3.bf16.msra.mxu1 %v9285_v44 }
 0x7ec   :  { %8579 = vmatprep.subr.bf16.mxu1 %v9288_v60 }
 0x7ee   :  { %8596 = vmatpush3.bf16.msra.mxu0 %v9279_v19 }
 0x7ef   :  { %8597 = vmatprep.subr.bf16.mxu0 %v9282_v21  ;;  %8580 = vmatpush3.bf16.msra.mxu1 %v9289_v58 }
 0x7f0   :  { %8734 = vmatprep.subr.bf16.mxu1 %v10164_v7 }
 0x7f2   :  { %8598 = vmatpush3.bf16.msra.mxu0 %v9283_v48 }
 0x7f3   :  { %8599 = vmatprep.subr.bf16.mxu0 %v9286_v49 }
 0x7f6   :  { %8600 = vmatpush3.bf16.msra.mxu0 %v9287_v51 }
 0x7f7   :  { %8601 = vmatprep.subr.bf16.mxu0 %v9290_v24 }
 0x7fa   :  { %8602 = vmatpush3.bf16.msra.mxu0 %v9291_v4 }
 0x7fb   :  { %8754 = vmatprep.subr.bf16.mxu0 %v10164_v7 }
 0x865   :  { %v3735_v8 = vpop.f32.mrf.mxu0 }
 0x866   :  { %v3736_v55 = vadd.f32 %v8001_v16, %v3735_v8 }
 0x867   :  { %v8732_v33 = vpop.f32.mrf.mxu0 }
 0x868   :  { %3741 = vst [vmem:[%s10350_s21] sm:$0x3] %v3736_v55  ;;  %s11797_s21 = sld [smem:[#allocation65_spill]] }
 0x869   :  { %v3738_v3 = vpop.f32.mrf.mxu0 }
 0x86b   :  { %v8733_v14 = vpop.f32.mrf.mxu0 }
 0x89d   :  { %v4313_v34 = vpop.f32.mrf.mxu0 }
 0x89e   :  { %v4314_v31 = vadd.f32 %v4313_v34, %v4271_v28 }
 0x89f   :  { %v4315_v12 = vpop.f32.mrf.mxu0 }
 0x8a0   :  { %v4316_v38 = vadd.f32 %v4315_v12, %v4273_v53  ;;  %v4322_v25 = vmax.f32 %v4314_v31, 0.0 }
 0x8a1   :  { %v4317_v13 = vpop.f32.mrf.mxu0 }
 0x8a2   :  { %v4323_v37 = vmax.f32 %v4316_v38, 0.0  ;;  %v4318_v45 = vadd.f32 %v4317_v13, %v4275_v29 }
 0x8a3   :  { %v4319_v42 = vpop.f32.mrf.mxu0 }
 0x8a4   :  { %v4326_v54 = vmax.f32 %v4322_v25, %v4323_v37  ;;  %v4320_v32 = vadd.f32 %v4319_v42, %v4277_v15  ;;  %v4324_v56 = vmax.f32 %v4318_v45, 0.0 }
 0x8a6   :  { %v4330_v41 = vcombine.high %v4326_v54, %v4326_v54  ;;  %v4337_v52 = vrot.slane %v4326_v54, %v10786_v62  ;;  %v4325_v57 = vmax.f32 %v4320_v32, 0.0 }
 0x8a8   :  { %v4344_v59 = vrot.slane %v4330_v41, %v10786_v62  ;;  %v4345_v35 = vcombine.high %v4337_v52, %v4337_v52  ;;  %v4372_v63 = vsel %vm2348_vm1, %v4337_v52, -inf  ;;  %v4327_v61 = vmax.f32 %v4324_v56, %v4325_v57 }
 0x8a9   :  { %v4373_v36 = vrot.slane %v4372_v63, 4 }
 0x8aa   :  { %v4346_v10 = vcombine.high %v4344_v59, %v4344_v59  ;;  %v4379_v43 = vsel %vm2348_vm1, %v4345_v35, -inf  ;;  %v4386_v46 = vsel %vm2348_vm1, %v4344_v59, -inf  ;;  %v4347_v47 = vcombine.high %v4327_v61, %v4327_v61 }
 0x8ab   :  { %v4374_v11 = vmax.f32 %v4372_v63, %v4373_v36  ;;  %v4380_v50 = vrot.slane %v4379_v43, 4  ;;  %v4387_v9 = vrot.slane %v4386_v46, 4  ;;  %v4354_v40 = vrot.slane %v4327_v61, %v10786_v62 }
 0x8ac   :  { %v4393_v19 = vsel %vm2348_vm1, %v4346_v10, -inf  ;;  %v4361_v39 = vrot.slane %v4347_v47, %v10786_v62 }
 0x8ad   :  { %v4375_v30 = vrot.slane %v4374_v11, 2  ;;  %v4381_v21 = vmax.f32 %v4379_v43, %v4380_v50  ;;  %v4388_v48 = vmax.f32 %v4386_v46, %v4387_v9  ;;  %v4394_v1 = vrot.slane %v4393_v19, 4 }
 0x8ae   :  { %v4362_v44 = vcombine.high %v4354_v40, %v4354_v40  ;;  %v4363_v49 = vcombine.high %v4361_v39, %v4361_v39  ;;  %v4400_v51 = vsel %vm2348_vm1, %v4354_v40, -inf  ;;  %v4414_v60 = vsel %vm2348_vm1, %v4361_v39, -inf }
 0x8af   :  { %v4376_v58 = vmax.f32 %v4374_v11, %v4375_v30  ;;  %v4382_v24 = vrot.slane %v4381_v21, 2  ;;  %v4389_v4 = vrot.slane %v4388_v48, 2  ;;  %v4395_v16 = vmax.f32 %v4393_v19, %v4394_v1 }
 0x8b0   :  { %v4401_v8 = vrot.slane %v4400_v51, 4  ;;  %v4407_v55 = vsel %vm2348_vm1, %v4362_v44, -inf  ;;  %v4415_v33 = vrot.slane %v4414_v60, 4  ;;  %v4421_v3 = vsel %vm2348_vm1, %v4363_v49, -inf }
 0x8b1   :  { %v4377_v14 = vrot.slane %v4376_v58, 1  ;;  %v4383_v18 = vmax.f32 %v4381_v21, %v4382_v24  ;;  %v4390_v17 = vmax.f32 %v4388_v48, %v4389_v4  ;;  %v4408_v5 = vrot.slane %v4407_v55, 4 }
 0x8b2   :  { %v4402_v20 = vmax.f32 %v4400_v51, %v4401_v8  ;;  %v4416_v27 = vmax.f32 %v4414_v60, %v4415_v33  ;;  %v4422_v2 = vrot.slane %v4421_v3, 4  ;;  %v4396_v28 = vrot.slane %v4395_v16, 2 }
 0x8b3   :  { %v4378_v34 = vmax.f32 %v4376_v58, %v4377_v14  ;;  %v4384_v53 = vrot.slane %v4383_v18, 1  ;;  %v4409_v31 = vmax.f32 %v4407_v55, %v4408_v5  ;;  %v4391_v6 = vrot.slane %v4390_v17, 1 }
 0x8b4   :  { %v4403_v12 = vrot.slane %v4402_v20, 2  ;;  %v4417_v29 = vrot.slane %v4416_v27, 2  ;;  %v4423_v38 = vmax.f32 %v4421_v3, %v4422_v2  ;;  %v4397_v13 = vmax.f32 %v4395_v16, %v4396_v28 }
 0x8b5   :  { %v4385_v15 = vmax.f32 %v4383_v18, %v4384_v53  ;;  %v4428_v25 = vpack.c.bf16 %v4378_v34, %v4378_v34  ;;  %v4410_v37 = vrot.slane %v4409_v31, 2  ;;  %v4392_v45 = vmax.f32 %v4390_v17, %v4391_v6  ;;  %v9296_v34 = vld [vmem:[#allocation17 + $0x38] sm:$0xff]   ;;  %v9297_v53 = vld [vmem:[#allocation17 + $0x30] sm:$0xff]   ;;  %v9299_v6 = vld [vmem:[#allocation17 + $0x20] sm:$0xff]  }
 0x8b6   :  { %v4404_v42 = vmax.f32 %v4402_v20, %v4403_v12  ;;  %v4418_v54 = vmax.f32 %v4416_v27, %v4417_v29  ;;  %v4398_v32 = vrot.slane %v4397_v13, 1  ;;  %v4424_v41 = vrot.slane %v4423_v38, 2  ;;  %v9300_v12 = vld [vmem:[#allocation17 + $0x18] sm:$0xff]   ;;  %v9301_v29 = vld [vmem:[#allocation17 + $0x10] sm:$0xff]  }
 0x8b7   :  { %v4429_v52 = vpack.c.bf16 %v4385_v15, %v4385_v15  ;;  %v4430_v56 = vpack.c.bf16 %v4392_v45, %v4392_v45  ;;  %v4411_v57 = vmax.f32 %v4409_v31, %v4410_v37  ;;  %v4444_v36 = vunpack.c.l.b16 %v4428_v25  ;;  %v9298_v31 = vld [vmem:[#allocation17 + $0x28] sm:$0xff]   ;;  %v9306_v15 = vld [vmem:[#allocation9 + $0x74] ss:$8 sps:$4 sm:$0xff]   ;;  %v4493_v37 = vld [vmem:[#allocation5] sm:$0x77] }
 0x8b8   :  { %v4405_v59 = vrot.slane %v4404_v42, 1  ;;  %v4399_v35 = vmax.f32 %v4397_v13, %v4398_v32  ;;  %v4419_v63 = vrot.slane %v4418_v54, 1  ;;  %v4425_v61 = vmax.f32 %v4423_v38, %v4424_v41  ;;  %v9302_v38 = vld [vmem:[#allocation17 + $0x8] sm:$0xff]   ;;  %v9303_v13 = vld [vmem:[#allocation17] sm:$0xff]  }
 0x8b9   :  { %v4445_v10 = vunpack.c.l.b16 %v4429_v52  ;;  %v4446_v43 = vunpack.c.l.b16 %v4430_v56  ;;  %v4412_v46 = vrot.slane %v4411_v57, 1  ;;  %v4496_v41 = vld [vmem:[#allocation5 + $0x8] sm:$0x77] }
 0x8ba   :  { %v4406_v47 = vmax.f32 %v4404_v42, %v4405_v59  ;;  %v4431_v11 = vpack.c.bf16 %v4399_v35, %v4399_v35  ;;  %v4420_v50 = vmax.f32 %v4418_v54, %v4419_v63  ;;  %v4426_v9 = vrot.slane %v4425_v61, 1 }
 0x8bb   :  { %v4468_v40 = vsel %vm551_vm5, %v4445_v10, %v4444_v36  ;;  %v4413_v19 = vmax.f32 %v4411_v57, %v4412_v46 }
 0x8bc   :  { %v4432_v39 = vpack.c.bf16 %v4406_v47, %v4406_v47  ;;  %v4447_v30 = vunpack.c.l.b16 %v4431_v11  ;;  %v4469_v21 = vsel %vm582_vm13, %v4446_v43, %v4468_v40  ;;  %v4427_v48 = vmax.f32 %v4425_v61, %v4426_v9 }
 0x8bd   :  { %v4433_v1 = vpack.c.bf16 %v4413_v19, %v4413_v19  ;;  %v4434_v44 = vpack.c.bf16 %v4420_v50, %v4420_v50 }
 0x8be   :  { %v4470_v49 = vsel %vm1931_vm7, %v4447_v30, %v4469_v21  ;;  %v4448_v51 = vunpack.c.l.b16 %v4432_v39  ;;  %v4435_v60 = vpack.c.bf16 %v4427_v48, %v4427_v48 }
 0x8bf   :  { %v4474_v58 = vpack.c.b16 %v4470_v49, %v4470_v49  ;;  %v4449_v24 = vunpack.c.l.b16 %v4433_v1  ;;  %v4450_v4 = vunpack.c.l.b16 %v4434_v44 }
 0x8c0   :  { %v4499_v16 = vsel %vm11791_vm14, %v4448_v51, %v4444_v36  ;;  %v4451_v8 = vunpack.c.l.b16 %v4435_v60  ;;  %vm11796_vm14 = vmmov %vm11795_vm12  ;;  %v9370_v60 = vld [vmem:[#allocation20 + $0x38] sm:$0xff]  }
 0x8c1   :  { %4476 = vrot.lane.b32.xlu0 %v4474_v58, %s10158_s11  ;;  %v4502_v55 = vsel %vm11792_vm0, %v4449_v24, %v4445_v10  ;;  %v4471_v33 = vsel %vm551_vm5, %v4449_v24, %v4448_v51  ;;  %v4505_v3 = vsel %vm11793_vm15, %v4450_v4, %v4446_v43  ;;  %v4500_v5 = vpack.c.b16 %v4499_v16, %v4499_v16  ;;  %v9371_v58 = vld [vmem:[#allocation20 + $0x30] sm:$0xff]   ;;  %v9372_v24 = vld [vmem:[#allocation20 + $0x28] sm:$0xff]   ;;  %v9374_v16 = vld [vmem:[#allocation20 + $0x18] sm:$0xff]  }
 0x8c2   :  { %v4503_v14 = vpack.c.b16 %v4502_v55, %v4502_v55  ;;  %v4472_v18 = vsel %vm582_vm13, %v4450_v4, %v4471_v33  ;;  %v4508_v17 = vsel %vm11794_vm3, %v4451_v8, %v4447_v30  ;;  %v4506_v28 = vpack.c.b16 %v4505_v3, %v4505_v3  ;;  %v9373_v4 = vld [vmem:[#allocation20 + $0x20] sm:$0xff]   ;;  %v9376_v55 = vld [vmem:[#allocation20 + $0x8] sm:$0xff]   ;;  %vm11799_vm15 = vmmov %vm11794_vm3 }
 0x8c3   :  { %v4473_v20 = vsel %vm1931_vm7, %v4451_v8, %v4472_v18  ;;  %v4509_v27 = vpack.c.b16 %v4508_v17, %v4508_v17  ;;  %vm4486_vm13 = vcmask 1042688   ;;  %vm4487_vm7 = vsmask.f32 2306  ;;  %v9375_v8 = vld [vmem:[#allocation20 + $0x10] sm:$0xff]  }
 0x8c4   :  { %4806 = vmatprep.mubr.bf16.mxu1 %v4503_v14  ;;  %v4475_v2 = vpack.c.b16 %v4473_v20, %v4473_v20  ;;  %vm4488_vm9 = vmand %vm4486_vm13, %vm4487_vm7  ;;  %v8093_v14 = vld [vmem:[%s11797_s21] ss:$0 sm:$0xff]  ;;  %vm595_vm0 = vcmask 1041920   ;;  %vm5971_vm13 = vcmask 519170   ;;  %vm5972_vm7 = vsmask.f32 3338 }
 0x8c5   :  { %4807 = vmatmul.mubr.bf16.vlgmr.msra.gmra.mxu1 %v4500_v5  ;;  %4846 = vmatprep.mubr.bf16.mxu0 %v4509_v27  ;;  %vm4492_vm6 = vmor %vm4491_vm2, %vm4488_vm9  ;;  %596 = vst.msk [vmem:[#allocation6 + $0x2] sm:$0x3] %vm595_vm0, %v10154_v0 }
 0x8c6   :  { %4478 = vrot.lane.b32.xlu1 %v4475_v2, %s10158_s11  ;;  %4847 = vmatmul.mubr.bf16.vlgmr.msra.gmra.mxu0 %v4506_v28  ;;  %597 = vst.msk [vmem:[#allocation6 + $0x6] sm:$0x3] %vm595_vm0, %v10154_v0  ;;  %vm5973_vm10 = vmand %vm5971_vm13, %vm5972_vm7 }
 0x8c7   :  { %8750 = vmatprep.mubr.msk.bf16.mxu1 %vm10165_vm4, %v10164_v7  ;;  %8770 = vmatprep.mubr.msk.bf16.mxu0 %vm10165_vm4, %v10164_v7 }
 0x8c8   :  { %8735 = vmatpush3.bf16.msra.mxu1 %v9296_v34  ;;  %8755 = vmatpush3.bf16.msra.mxu0 %v9370_v60 }
 0x8c9   :  { %8736 = vmatprep.subr.bf16.mxu1 %v10164_v7  ;;  %8756 = vmatprep.subr.bf16.mxu0 %v10164_v7 }
 0x8cc   :  { %8737 = vmatpush3.bf16.msra.mxu1 %v9297_v53  ;;  %8757 = vmatpush3.bf16.msra.mxu0 %v9371_v58 }
 0x8cd   :  { %8738 = vmatprep.subr.bf16.mxu1 %v10164_v7  ;;  %8758 = vmatprep.subr.bf16.mxu0 %v10164_v7 }
 0x8d0   :  { %8739 = vmatpush3.bf16.msra.mxu1 %v9298_v31  ;;  %8759 = vmatpush3.bf16.msra.mxu0 %v9372_v24  ;;  %v9344_v24 = vld [vmem:[#allocation9 + $0xb0] ss:$8 sps:$4 sm:$0xff]  }
 0x8d1   :  { %8740 = vmatprep.subr.bf16.mxu1 %v10164_v7  ;;  %8760 = vmatprep.subr.bf16.mxu0 %v10164_v7 }
 0x8d4   :  { %8741 = vmatpush3.bf16.msra.mxu1 %v9299_v6  ;;  %8761 = vmatpush3.bf16.msra.mxu0 %v9373_v4 }
 0x8d5   :  { %8742 = vmatprep.subr.bf16.mxu1 %v10164_v7  ;;  %8762 = vmatprep.subr.bf16.mxu0 %v10164_v7 }
 0x8d8   :  { %8743 = vmatpush3.bf16.msra.mxu1 %v9300_v12  ;;  %8763 = vmatpush3.bf16.msra.mxu0 %v9374_v16  ;;  %v9304_v12 = vld [vmem:[#allocation9 + $0x70] ss:$8 sps:$4 sm:$0xff]  }
 0x8d9   :  { %8744 = vmatprep.subr.bf16.mxu1 %v10164_v7  ;;  %8764 = vmatprep.subr.bf16.mxu0 %v10164_v7 }
 0x8dc   :  { %8745 = vmatpush3.bf16.msra.mxu1 %v9301_v29  ;;  %8765 = vmatpush3.bf16.msra.mxu0 %v9375_v8 }
 0x8dd   :  { %8746 = vmatprep.subr.bf16.mxu1 %v10164_v7  ;;  %8766 = vmatprep.subr.bf16.mxu0 %v10164_v7 }
 0x8e0   :  { %8747 = vmatpush3.bf16.msra.mxu1 %v9302_v38  ;;  %8767 = vmatpush3.bf16.msra.mxu0 %v9376_v55  ;;  %v9309_v38 = vld [vmem:[#allocation9 + $0x64] ss:$8 sps:$4 sm:$0xff]  }
 0x8e1   :  { %8748 = vmatprep.subr.bf16.mxu1 %v10164_v7  ;;  %8768 = vmatprep.subr.bf16.mxu0 %v10164_v7  ;;  %v9351_v55 = vld [vmem:[#allocation9 + $0xa4] ss:$8 sps:$4 sm:$0xff]  }
 0x8e4   :  { %8749 = vmatpush3.bf16.msra.mxu1 %v9303_v13  ;;  %v9307_v13 = vld [vmem:[#allocation9 + $0x60] ss:$8 sps:$4 sm:$0xff]  }
 0x8e5   :  { %5692 = vmatprep.subr.bf16.mxu1 %v9306_v15  ;;  %v9312_v15 = vld [vmem:[#allocation9 + $0x54] ss:$8 sps:$4 sm:$0xff]  }
 0x933   :  { %v4477_v25 = vpop.permute.xlu0 %4476 }
 0x934   :  { %v4480_v45 = vrot.slane %v4477_v25, 4 }
 0x936   :  { %v4482_v42 = vsel %vm11795_vm12, %v4480_v45, %v4477_v25  ;;  %v9310_v25 = vld [vmem:[#allocation9 + $0x50] ss:$8 sps:$4 sm:$0xff]   ;;  %v9313_v45 = vld [vmem:[#allocation9 + $0x40] ss:$8 sps:$4 sm:$0xff]  }
 0x937   :  { %v4494_v54 = vsel %vm4492_vm6, %v4482_v42, %v4493_v37  ;;  %v9315_v37 = vld [vmem:[#allocation9 + $0x44] ss:$8 sps:$4 sm:$0xff]   ;;  %v9318_v42 = vld [vmem:[#allocation9 + $0x34] ss:$8 sps:$4 sm:$0xff]  }
 0x938   :  { %4495 = vst [vmem:[#allocation5] sm:$0x77] %v4494_v54  ;;  %v4479_v32 = vpop.permute.xlu1 %4478  ;;  %v9316_v54 = vld [vmem:[#allocation9 + $0x30] ss:$8 sps:$4 sm:$0xff]  }
 0x939   :  { %v4481_v52 = vrot.slane %v4479_v32, 4 }
 0x93b   :  { %v4483_v56 = vsel %vm11796_vm14, %v4481_v52, %v4479_v32  ;;  %v9321_v32 = vld [vmem:[#allocation9 + $0x24] ss:$8 sps:$4 sm:$0xff]   ;;  %v9324_v52 = vld [vmem:[#allocation9 + $0x14] ss:$8 sps:$4 sm:$0xff]  }
 0x93c   :  { %v4497_v57 = vsel %vm4492_vm6, %v4483_v56, %v4496_v41  ;;  %v9319_v41 = vld [vmem:[#allocation9 + $0x20] ss:$8 sps:$4 sm:$0xff]   ;;  %v9322_v56 = vld [vmem:[#allocation9 + $0x10] ss:$8 sps:$4 sm:$0xff]  }
 0x93d   :  { %4498 = vst [vmem:[#allocation5 + $0x8] sm:$0x77] %v4497_v57  ;;  %v9327_v57 = vld [vmem:[#allocation9 + $0x4] ss:$8 sps:$4 sm:$0xff]  }
 0x93f   :  { %v5083_v59 = vld [vmem:[#allocation5] sm:$0x77] }
 0x940   :  { %v8148_v35 = vcombine.low %v5083_v59, %v5083_v59  ;;  %v8149_v63 = vcombine.high %v5083_v59, %v5083_v59  ;;  %v9325_v59 = vld [vmem:[#allocation9] ss:$8 sps:$4 sm:$0xff]  }
 0x942   :  { %v5110_v61 = vshll.u32 %v8148_v35, 16  ;;  %v5117_v36 = vshll.u32 %v8149_v63, 16  ;;  %v5108_v10 = vshrl.u32 %v8148_v35, 16  ;;  %v5115_v39 = vshrl.u32 %v8149_v63, 16  ;;  %v9330_v35 = vld [vmem:[#allocation9 + $0xf4] ss:$8 sps:$4 sm:$0xff]  }
 0x943   :  { %v9328_v63 = vld [vmem:[#allocation9 + $0xf0] ss:$8 sps:$4 sm:$0xff]  }
 0x944   :  { %v5112_v43 = vrot.slane %v5110_v61, 1  ;;  %v5084_v46 = vld [vmem:[#allocation5 + $0x8] sm:$0x77]  ;;  %v5119_v9 = vrot.slane %v5117_v36, 1 }
 0x945   :  { %v8150_v47 = vcombine.low %v5084_v46, %v5084_v46  ;;  %v8151_v11 = vcombine.high %v5084_v46, %v5084_v46  ;;  %v9333_v61 = vld [vmem:[#allocation9 + $0xe4] ss:$8 sps:$4 sm:$0xff]   ;;  %v9331_v36 = vld [vmem:[#allocation9 + $0xe0] ss:$8 sps:$4 sm:$0xff]  }
 0x946   :  { %v5113_v50 = vor.u32 %v5112_v43, %v5108_v10  ;;  %v5120_v48 = vor.u32 %v5119_v9, %v5115_v39  ;;  %v9336_v10 = vld [vmem:[#allocation9 + $0xd4] ss:$8 sps:$4 sm:$0xff]   ;;  %v9334_v43 = vld [vmem:[#allocation9 + $0xd0] ss:$8 sps:$4 sm:$0xff]   ;;  %v5081_v46 = vld [vmem:[#allocation5] sm:$0x33] }
 0x947   :  { %v5124_v40 = vshll.u32 %v8150_v47, 16  ;;  %v5131_v19 = vshll.u32 %v8151_v11, 16  ;;  %v5122_v30 = vshrl.u32 %v8150_v47, 16  ;;  %v5129_v49 = vshrl.u32 %v8151_v11, 16  ;;  %v11433_v47 = vld [vmem:[#allocation5] sm:$0x66] }
 0x948   :  { %5135 = vrot.lane.b32.xlu0 %v5113_v50, %s10133_s7  ;;  %v9340_v11 = vld [vmem:[#allocation9 + $0xc4] ss:$8 sps:$4 sm:$0xff]   ;;  %v8145_v9 = vcombine.high %v5081_v46, %v5081_v46 }
 0x949   :  { %v5126_v21 = vrot.slane %v5124_v40, 1  ;;  %v5133_v44 = vrot.slane %v5131_v19, 1  ;;  %v8152_v40 = vcombine.low %v11433_v47, %v11433_v47  ;;  %v9338_v19 = vld [vmem:[#allocation9 + $0xc0] ss:$8 sps:$4 sm:$0xff]  }
 0x94a   :  { %v5082_v39 = vld [vmem:[#allocation5 + $0x8] sm:$0x33] }
 0x94b   :  { %v5127_v1 = vor.u32 %v5126_v21, %v5122_v30  ;;  %v5134_v51 = vor.u32 %v5133_v44, %v5129_v49  ;;  %v9346_v21 = vld [vmem:[#allocation9 + $0xb4] ss:$8 sps:$4 sm:$0xff]   ;;  %v5155_v44 = vrot.slane %v8152_v40, 1 }
 0x94c   :  { %5137 = vrot.lane.b32.xlu0 %v5120_v48, %s10133_s7  ;;  %v5086_v48 = vld [vmem:[#allocation5 + $0x8] sm:$0x66] }
 0x94d   :  { %5139 = vrot.lane.b32.xlu1 %v5127_v1, %s10133_s7  ;;  %v8147_v1 = vcombine.high %v5082_v39, %v5082_v39  ;;  %v8154_v4 = vcombine.low %v5086_v48, %v5086_v48 }
 0x951   :  { %5141 = vrot.lane.b32.xlu1 %v5134_v51, %s10133_s7 }
 0x985   :  { %v8581_v33 = vpop.f32.mrf.mxu1 }
 0x986   :  { %v8603_v3 = vpop.f32.mrf.mxu0 }
 0x987   :  { %v8582_v18 = vpop.f32.mrf.mxu1 }
 0x988   :  { %v8583_v17 = vadd.f32 %v8582_v18, %v8581_v33  ;;  %v8604_v5 = vpop.f32.mrf.mxu0  ;;  %v5157_v18 = vrot.slane %v8154_v4, 1  ;;  %v9390_v4 = vld [vmem:[#allocation9 + $0x130] ss:$8 sps:$4 sm:$0xff]  }
 0x989   :  { %v8584_v20 = vpop.f32.mrf.mxu1  ;;  %v8605_v27 = vadd.f32 %v8604_v5, %v8603_v3  ;;  %v9349_v5 = vld [vmem:[#allocation9 + $0xa0] ss:$8 sps:$4 sm:$0xff]  }
 0x98a   :  { %v4809_v2 = vadd.f32 %v8583_v17, %v8093_v14  ;;  %v8606_v28 = vpop.f32.mrf.mxu0 }
 0x98b   :  { %v8585_v34 = vpop.f32.mrf.mxu1 }
 0x98c   :  { %v4849_v53 = vadd.f32 %v8605_v27, %v4809_v2  ;;  %v8607_v31 = vpop.f32.mrf.mxu0  ;;  %v9354_v27 = vld [vmem:[#allocation9 + $0x94] ss:$8 sps:$4 sm:$0xff]  }
 0x98d   :  { %v9352_v31 = vld [vmem:[#allocation9 + $0x90] ss:$8 sps:$4 sm:$0xff]  }
 0x98e   :  { %v4854_v6 = vmax.f32 %v4849_v53, 0.0 }
 0x990   :  { %v4855_v29 = vpack.c.bf16 %v4854_v6, %v4854_v6 }
 0x992   :  { %8751 = vmatmul.mubr.bf16.vlgmr.msra.gmra.mxu1 %v4855_v29 }
 0x993   :  { %5693 = vmatpush1.bf16.msra.mxu1 %v9304_v12  ;;  %v9357_v12 = vld [vmem:[#allocation9 + $0x84] ss:$8 sps:$4 sm:$0xff]  }
 0x994   :  { %5694 = vmatprep.subr.bf16.mxu1 %v9309_v38 }
 0x997   :  { %5695 = vmatpush1.bf16.msra.mxu1 %v9307_v13  ;;  %v9355_v13 = vld [vmem:[#allocation9 + $0x80] ss:$8 sps:$4 sm:$0xff]  }
 0x998   :  { %5696 = vmatprep.subr.bf16.mxu1 %v9312_v15  ;;  %v9360_v15 = vld [vmem:[#allocation9 + $0x234] ss:$8 sps:$4 sm:$0xff]  }
 0x99b   :  { %5697 = vmatpush1.bf16.msra.mxu1 %v9310_v25  ;;  %v9358_v25 = vld [vmem:[#allocation9 + $0x230] ss:$8 sps:$4 sm:$0xff]  }
 0x99c   :  { %5698 = vmatprep.subr.bf16.mxu1 %v9315_v37  ;;  %v8155_v37 = vcombine.high %v5086_v48, %v5086_v48 }
 0x99f   :  { %5699 = vmatpush1.bf16.msra.mxu1 %v9313_v45  ;;  %v9363_v45 = vld [vmem:[#allocation9 + $0x224] ss:$8 sps:$4 sm:$0xff]  }
 0x9a0   :  { %5700 = vmatprep.subr.bf16.mxu1 %v9318_v42  ;;  %v8153_v42 = vcombine.high %v11433_v47, %v11433_v47 }
 0x9a3   :  { %5701 = vmatpush1.bf16.msra.mxu1 %v9316_v54  ;;  %v9361_v54 = vld [vmem:[#allocation9 + $0x220] ss:$8 sps:$4 sm:$0xff]  }
 0x9a4   :  { %5702 = vmatprep.subr.bf16.mxu1 %v9321_v32  ;;  %v5158_v32 = vrot.slane %v8155_v37, 1 }
 0x9a7   :  { %5703 = vmatpush1.bf16.msra.mxu1 %v9319_v41  ;;  %v9366_v41 = vld [vmem:[#allocation9 + $0x214] ss:$8 sps:$4 sm:$0xff]  }
 0x9a8   :  { %5704 = vmatprep.subr.bf16.mxu1 %v9324_v52  ;;  %v9377_v52 = vld [vmem:[#allocation20] sm:$0xff]  }
 0x9a9   :  { %8769 = vmatpush3.bf16.msra.mxu0 %v9377_v52 }
 0x9ab   :  { %5705 = vmatpush1.bf16.msra.mxu1 %v9322_v56  ;;  %v5156_v56 = vrot.slane %v8153_v42, 1 }
 0x9ac   :  { %5706 = vmatprep.subr.bf16.mxu1 %v9327_v57  ;;  %v9364_v57 = vld [vmem:[#allocation9 + $0x210] ss:$8 sps:$4 sm:$0xff]  }
 0x9af   :  { %5707 = vmatpush1.bf16.msra.mxu1 %v9325_v59  ;;  %v9380_v59 = vld [vmem:[#allocation9 + $0x174] ss:$8 sps:$4 sm:$0xff]  }
 0x9b0   :  { %5708 = vmatprep.subr.bf16.mxu1 %v9330_v35  ;;  %v5214_v35 = vrot.slane %v5158_v32, %v10786_v62  ;;  %5733 = vmatprep.subr.bf16.mxu0 %v9380_v59  ;;  %v9428_v59 = vld [vmem:[#allocation23 + $0x70] sm:$0xff]  }
 0x9b3   :  { %5709 = vmatpush2.bf16.msra.mxu1 %v9328_v63  ;;  %v9369_v63 = vld [vmem:[#allocation9 + $0x204] ss:$8 sps:$4 sm:$0xff]  }
 0x9b4   :  { %5710 = vmatprep.subr.bf16.mxu1 %v9333_v61  ;;  %v5190_v61 = vrot.slane %v5156_v56, %v10786_v62  ;;  %v9426_v56 = vld [vmem:[#allocation23 + $0x78] sm:$0xff]  }
 0x9b7   :  { %5711 = vmatpush2.bf16.msra.mxu1 %v9331_v36  ;;  %v9367_v36 = vld [vmem:[#allocation9 + $0x200] ss:$8 sps:$4 sm:$0xff]  }
 0x9b8   :  { %5712 = vmatprep.subr.bf16.mxu1 %v9336_v10  ;;  %v5317_v10 = vcombine.low %v5190_v61, %v5214_v35  ;;  %v9429_v35 = vld [vmem:[#allocation23 + $0x30] sm:$0xff]   ;;  %v9431_v61 = vld [vmem:[#allocation23 + $0x28] sm:$0xff]  }
 0x9ba   :  { %v5136_v50 = vpop.permute.xlu0 %5135 }
 0x9bb   :  { %5713 = vmatpush2.bf16.msra.mxu1 %v9334_v43  ;;  %v5161_v30 = vsel %vm3827_vm8, %v8145_v9, %v5136_v50  ;;  %v5324_v43 = vrot.slane %v5317_v10, %v10786_v62  ;;  %v9433_v10 = vld [vmem:[#allocation23 + $0x20] sm:$0xff]  }
 0x9bc   :  { %5714 = vmatprep.subr.bf16.mxu1 %v9340_v11  ;;  %v8156_v51 = vcombine.low %v5081_v46, %v5161_v30  ;;  %v8126_v46 = vld [vmem:[#allocation18] ss:$0 sm:$0xff] }
 0x9be   :  { %v5138_v49 = vpop.permute.xlu0 %5137  ;;  %v5175_v3 = vrot.slane %v8156_v51, %v10786_v62  ;;  %v9384_v51 = vld [vmem:[#allocation9 + $0x150] ss:$8 sps:$4 sm:$0xff]  }
 0x9bf   :  { %5715 = vmatpush2.bf16.msra.mxu1 %v9338_v19  ;;  %v5140_v60 = vpop.permute.xlu1 %5139  ;;  %v5143_v58 = vsel %vm3827_vm8, %v5136_v50, %v5138_v49  ;;  %v9386_v49 = vld [vmem:[#allocation9 + $0x154] ss:$8 sps:$4 sm:$0xff]  }
 0x9c0   :  { %v5164_v16 = vsel %vm3827_vm8, %v8147_v1, %v5140_v60  ;;  %v5168_v8 = vcombine.low %v5143_v58, %v5155_v44  ;;  %5716 = vmatprep.subr.bf16.mxu1 %v9346_v21  ;;  %v9383_v21 = vld [vmem:[#allocation9 + $0x164] ss:$8 sps:$4 sm:$0xff]   ;;  %v9381_v44 = vld [vmem:[#allocation9 + $0x160] ss:$8 sps:$4 sm:$0xff]  }
 0x9c1   :  { %v8157_v33 = vcombine.low %v5082_v39, %v5164_v16  ;;  %v9378_v39 = vld [vmem:[#allocation9 + $0x170] ss:$8 sps:$4 sm:$0xff]   ;;  %v9387_v58 = vld [vmem:[#allocation9 + $0x140] ss:$8 sps:$4 sm:$0xff]   ;;  %v9395_v16 = vld [vmem:[#allocation9 + $0x124] ss:$8 sps:$4 sm:$0xff]  }
 0x9c2   :  { %v5182_v34 = vrot.slane %v5168_v8, %v10786_v62  ;;  %v9393_v8 = vld [vmem:[#allocation9 + $0x120] ss:$8 sps:$4 sm:$0xff]  }
 0x9c3   :  { %v5199_v14 = vrot.slane %v8157_v33, %v10786_v62  ;;  %5717 = vmatpush2.bf16.msra.mxu1 %v9344_v24  ;;  %v5142_v17 = vpop.permute.xlu1 %5141  ;;  %v9392_v24 = vld [vmem:[#allocation9 + $0x134] ss:$8 sps:$4 sm:$0xff]   ;;  %v9396_v33 = vld [vmem:[#allocation9 + $0x110] ss:$8 sps:$4 sm:$0xff]  }
 0x9c4   :  { %v5144_v20 = vsel %vm3827_vm8, %v5140_v60, %v5142_v17  ;;  %5718 = vmatprep.subr.bf16.mxu1 %v9351_v55  ;;  %v9389_v60 = vld [vmem:[#allocation9 + $0x144] ss:$8 sps:$4 sm:$0xff]   ;;  %v9398_v55 = vld [vmem:[#allocation9 + $0x114] ss:$8 sps:$4 sm:$0xff]   ;;  %v9402_v17 = vld [vmem:[#allocation9 + $0x1f0] ss:$8 sps:$4 sm:$0xff]  }
 0x9c5   :  { %v8158_v2 = vcombine.low %v5175_v3, %v5199_v14  ;;  %v5192_v28 = vcombine.low %v5144_v20, %v5157_v18  ;;  %v9401_v3 = vld [vmem:[#allocation9 + $0x104] ss:$8 sps:$4 sm:$0xff]   ;;  %v9399_v14 = vld [vmem:[#allocation9 + $0x100] ss:$8 sps:$4 sm:$0xff]   ;;  %v9404_v18 = vld [vmem:[#allocation9 + $0x1f4] ss:$8 sps:$4 sm:$0xff]  }
 0x9c6   :  { %v9405_v20 = vld [vmem:[#allocation9 + $0x1e0] ss:$8 sps:$4 sm:$0xff]  }
 0x9c7   :  { %v5206_v53 = vrot.slane %v5192_v28, %v10786_v62  ;;  %5719 = vmatpush2.bf16.msra.mxu1 %v9349_v5  ;;  %v5307_v6 = vrot.slane %v8158_v2, %v10786_v62  ;;  %v9407_v5 = vld [vmem:[#allocation9 + $0x1e4] ss:$8 sps:$4 sm:$0xff]   ;;  %v9408_v2 = vld [vmem:[#allocation9 + $0x1d0] ss:$8 sps:$4 sm:$0xff]  }
 0x9c8   :  { %5720 = vmatprep.subr.bf16.mxu1 %v9354_v27  ;;  %v9410_v27 = vld [vmem:[#allocation9 + $0x1d4] ss:$8 sps:$4 sm:$0xff]   ;;  %v9413_v28 = vld [vmem:[#allocation9 + $0x1c4] ss:$8 sps:$4 sm:$0xff]  }
 0x9c9   :  { %v8159_v29 = vcombine.low %v5182_v34, %v5206_v53  ;;  %v5315_v38 = vcombine.high %v5307_v6, %v5307_v6  ;;  %v9411_v34 = vld [vmem:[#allocation9 + $0x1c0] ss:$8 sps:$4 sm:$0xff]   ;;  %v9416_v53 = vld [vmem:[#allocation9 + $0x1b4] ss:$8 sps:$4 sm:$0xff]  }
 0x9cb   :  { %5721 = vmatpush2.bf16.msra.mxu1 %v9352_v31  ;;  %5724 = vmatprep.mubr.bf16.mxu1 %v5315_v38  ;;  %v11457_v9 = vrot.slane %v8159_v29, %v10786_v62  ;;  %v9414_v31 = vld [vmem:[#allocation9 + $0x1b0] ss:$8 sps:$4 sm:$0xff]   ;;  %v9422_v29 = vld [vmem:[#allocation9 + $0x194] ss:$8 sps:$4 sm:$0xff]  }
 0x9cc   :  { %5722 = vmatprep.subr.bf16.mxu1 %v9357_v12  ;;  %v9417_v12 = vld [vmem:[#allocation9 + $0x1a0] ss:$8 sps:$4 sm:$0xff]   ;;  %v9420_v38 = vld [vmem:[#allocation9 + $0x190] ss:$8 sps:$4 sm:$0xff]  }
 0x9cd   :  { %v5316_v1 = vcombine.high %v11457_v9, %v11457_v9 }
 0x9cf   :  { %5723 = vmatpush2.bf16.msra.mxu1 %v9355_v13  ;;  %v9425_v13 = vld [vmem:[#allocation9 + $0x184] ss:$8 sps:$4 sm:$0xff]  }
 0x9d0   :  { %5782 = vmatprep.subr.bf16.mxu1 %v9360_v15 }
 0x9d2   :  { %5725 = vmatmul.mubr.bf16.vlgmr.msra.gmra.mxu1 %v5307_v6  ;;  %v9419_v6 = vld [vmem:[#allocation9 + $0x1a4] ss:$8 sps:$4 sm:$0xff]  }
 0x9d3   :  { %5783 = vmatpush1.bf16.msra.mxu1 %v9358_v25  ;;  %5806 = vmatprep.mubr.bf16.mxu1 %v10154_v0  ;;  %v9423_v25 = vld [vmem:[#allocation9 + $0x180] ss:$8 sps:$4 sm:$0xff]  }
 0x9d4   :  { %5784 = vmatprep.subr.bf16.mxu1 %v9363_v45 }
 0x9d7   :  { %5785 = vmatpush1.bf16.msra.mxu1 %v9361_v54 }
 0x9d8   :  { %5786 = vmatprep.subr.bf16.mxu1 %v9366_v41 }
 0x9db   :  { %5787 = vmatpush1.bf16.msra.mxu1 %v9364_v57  ;;  %v9427_v57 = vld [vmem:[#allocation23 + $0x38] sm:$0xff]  }
 0x9dc   :  { %5788 = vmatprep.subr.bf16.mxu1 %v9369_v63  ;;  %v9430_v63 = vld [vmem:[#allocation23 + $0x68] sm:$0xff]  }
 0x9df   :  { %5789 = vmatpush1.bf16.msra.mxu1 %v9367_v36  ;;  %v9432_v36 = vld [vmem:[#allocation23 + $0x60] sm:$0xff]  }
 0x9e0   :  { %8774 = vmatprep.subr.bf16.mxu1 %v10164_v7 }
 0x9e2   :  { %8232 = vmatmul.mubr.msk.bf16.vlgmr.msra.gmra.mxu1 %vm3827_vm8, %v5324_v43  ;;  %v9434_v43 = vld [vmem:[#allocation23 + $0x58] sm:$0xff]  }
 0x9e3   :  { %8790 = vmatprep.mubr.msk.bf16.mxu1 %vm10165_vm4, %v10164_v7 }
 0xa52   :  { %v4961_v47 = vpop.f32.mrf.mxu1 }
 0xa53   :  { %v4962_v11 = vadd.f32 %v8126_v46, %v4961_v47  ;;  %v9435_v46 = vld [vmem:[#allocation23 + $0x18] sm:$0xff]   ;;  %v9436_v47 = vld [vmem:[#allocation23 + $0x50] sm:$0xff]  }
 0xa54   :  { %v8752_v50 = vpop.f32.mrf.mxu1 }
 0xa55   :  { %v4967_v40 = vmax.f32 %v4962_v11, 0.0  ;;  %v9437_v11 = vld [vmem:[#allocation23 + $0x10] sm:$0xff]   ;;  %v9438_v50 = vld [vmem:[#allocation23 + $0x48] sm:$0xff]  }
 0xa56   :  { %v4964_v19 = vpop.f32.mrf.mxu1 }
 0xa57   :  { %v4968_v30 = vpack.c.bf16 %v4967_v40, %v4967_v40  ;;  %v9440_v40 = vld [vmem:[#allocation23 + $0x40] sm:$0xff]  }
 0xa58   :  { %v8753_v48 = vpop.f32.mrf.mxu1  ;;  %v9441_v19 = vld [vmem:[#allocation23] sm:$0xff]  }
 0xa59   :  { %8771 = vmatmul.mubr.bf16.vlgmr.msra.gmra.mxu0 %v4968_v30 }
 0xa5a   :  { %5734 = vmatpush1.bf16.msra.mxu0 %v9378_v39  ;;  %5765 = vmatprep.mubr.bf16.mxu0 %v5316_v1  ;;  %v8135_v39 = vld [vmem:[#allocation21] ss:$0 sm:$0xff] }
 0xa5b   :  { %5735 = vmatprep.subr.bf16.mxu0 %v9383_v21 }
 0xa5e   :  { %5736 = vmatpush1.bf16.msra.mxu0 %v9381_v44 }
 0xa5f   :  { %5737 = vmatprep.subr.bf16.mxu0 %v9386_v49  ;;  %v5287_v49 = vld [vmem:[%s11798_s22] sm:$0x3] }
 0xa62   :  { %5738 = vmatpush1.bf16.msra.mxu0 %v9384_v51  ;;  %v5292_v51 = vrot.slane %v5287_v49, %v10681_v23 }
 0xa63   :  { %5739 = vmatprep.subr.bf16.mxu0 %v9389_v60  ;;  %v5296_v60 = vrot.slane %v5287_v49, %v10685_v26 }
 0xa66   :  { %5740 = vmatpush1.bf16.msra.mxu0 %v9387_v58 }
 0xa67   :  { %5741 = vmatprep.subr.bf16.mxu0 %v9392_v24 }
 0xa6a   :  { %5742 = vmatpush1.bf16.msra.mxu0 %v9390_v4 }
 0xa6b   :  { %5743 = vmatprep.subr.bf16.mxu0 %v9395_v16 }
 0xa6e   :  { %5744 = vmatpush1.bf16.msra.mxu0 %v9393_v8 }
 0xa6f   :  { %5745 = vmatprep.subr.bf16.mxu0 %v9398_v55 }
 0xa72   :  { %5746 = vmatpush1.bf16.msra.mxu0 %v9396_v33 }
 0xa73   :  { %5747 = vmatprep.subr.bf16.mxu0 %v9401_v3 }
 0xa76   :  { %5748 = vmatpush1.bf16.msra.mxu0 %v9399_v14 }
 0xa77   :  { %5749 = vmatprep.subr.bf16.mxu0 %v9404_v18 }
 0xa7a   :  { %5750 = vmatpush2.bf16.msra.mxu0 %v9402_v17 }
 0xa7b   :  { %5751 = vmatprep.subr.bf16.mxu0 %v9407_v5 }
 0xa7e   :  { %5752 = vmatpush2.bf16.msra.mxu0 %v9405_v20 }
 0xa7f   :  { %5753 = vmatprep.subr.bf16.mxu0 %v9410_v27 }
 0xa82   :  { %5754 = vmatpush2.bf16.msra.mxu0 %v9408_v2 }
 0xa83   :  { %5755 = vmatprep.subr.bf16.mxu0 %v9413_v28 }
 0xa86   :  { %5756 = vmatpush2.bf16.msra.mxu0 %v9411_v34 }
 0xa87   :  { %5757 = vmatprep.subr.bf16.mxu0 %v9416_v53 }
 0xa8a   :  { %5758 = vmatpush2.bf16.msra.mxu0 %v9414_v31 }
 0xa8b   :  { %5759 = vmatprep.subr.bf16.mxu0 %v9419_v6 }
 0xa8e   :  { %5760 = vmatpush2.bf16.msra.mxu0 %v9417_v12 }
 0xa8f   :  { %5761 = vmatprep.subr.bf16.mxu0 %v9422_v29 }
 0xa92   :  { %v5726_v15 = vpop.f32.mrf.mxu1  ;;  %5762 = vmatpush2.bf16.msra.mxu0 %v9420_v38 }
 0xa93   :  { %5763 = vmatprep.subr.bf16.mxu0 %v9425_v13  ;;  %v5727_v58 = vadd.f32 %v5726_v15, %v5292_v51 }
 0xa94   :  { %v5728_v37 = vpop.f32.mrf.mxu1 }
 0xa95   :  { %v5729_v4 = vadd.f32 %v5728_v37, %v5296_v60 }
 0xa96   :  { %v5730_v45 = vpop.f32.mrf.mxu1  ;;  %5764 = vmatpush2.bf16.msra.mxu0 %v9423_v25 }
 0xa97   :  { %8627 = vmatprep.subr.bf16.mxu0 %v9426_v56 }
 0xa98   :  { %v5731_v42 = vpop.f32.mrf.mxu1 }
 0xa99   :  { %5766 = vmatmul.mubr.bf16.vlgmr.msra.gmra.mxu0 %v11457_v9  ;;  %v9439_v9 = vld [vmem:[#allocation23 + $0x8] sm:$0xff]  }
 0xa9a   :  { %8628 = vmatpush3.bf16.msra.mxu0 %v9427_v57 }
 0xa9b   :  { %8629 = vmatprep.subr.bf16.mxu0 %v9428_v59 }
 0xa9e   :  { %8630 = vmatpush3.bf16.msra.mxu0 %v9429_v35 }
 0xa9f   :  { %8631 = vmatprep.subr.bf16.mxu0 %v9430_v63 }
 0xaa2   :  { %v5808_v54 = vpop.f32.mrf.mxu1  ;;  %8632 = vmatpush3.bf16.msra.mxu0 %v9431_v61 }
 0xaa3   :  { %8633 = vmatprep.subr.bf16.mxu0 %v9432_v36 }
 0xaa4   :  { %v5810_v32 = vpop.f32.mrf.mxu1 }
 0xaa6   :  { %v5812_v41 = vpop.f32.mrf.mxu1  ;;  %8634 = vmatpush3.bf16.msra.mxu0 %v9433_v10 }
 0xaa7   :  { %8635 = vmatprep.subr.bf16.mxu0 %v9434_v43 }
 0xaa8   :  { %v5813_v52 = vpop.f32.mrf.mxu1 }
 0xaaa   :  { %8636 = vmatpush3.bf16.msra.mxu0 %v9435_v46 }
 0xaab   :  { %8637 = vmatprep.subr.bf16.mxu0 %v9436_v47 }
 0xaae   :  { %8638 = vmatpush3.bf16.msra.mxu0 %v9437_v11 }
 0xaaf   :  { %8639 = vmatprep.subr.bf16.mxu0 %v9438_v50 }
 0xab2   :  { %8640 = vmatpush3.bf16.msra.mxu0 %v9439_v9 }
 0xab3   :  { %8641 = vmatprep.subr.bf16.mxu0 %v9440_v40 }
 0xab6   :  { %8642 = vmatpush3.bf16.msra.mxu0 %v9441_v19 }
 0xab7   :  { %8794 = vmatprep.subr.bf16.mxu0 %v10164_v7 }
 0xb19   :  { %v5074_v30 = vpop.f32.mrf.mxu0 }
 0xb1a   :  { %v5075_v21 = vadd.f32 %v8135_v39, %v5074_v30 }
 0xb1b   :  { %v8772_v48 = vpop.f32.mrf.mxu0 }
 0xb1c   :  { %5080 = vst [vmem:[%s10355_s29] sm:$0x3] %v5075_v21  ;;  %s11800_s29 = sld [smem:[#allocation60_spill]] }
 0xb1d   :  { %v5077_v1 = vpop.f32.mrf.mxu0 }
 0xb1f   :  { %v8773_v44 = vpop.f32.mrf.mxu0 }
 0xb59   :  { %v5767_v24 = vpop.f32.mrf.mxu0 }
 0xb5a   :  { %v5768_v16 = vadd.f32 %v5767_v24, %v5727_v58 }
 0xb5b   :  { %v5769_v8 = vpop.f32.mrf.mxu0 }
 0xb5c   :  { %v5809_v55 = vadd.f32 %v5808_v54, %v5768_v16  ;;  %v5770_v33 = vadd.f32 %v5769_v8, %v5729_v4 }
 0xb5d   :  { %v5771_v0 = vpop.f32.mrf.mxu0 }
 0xb5e   :  { %v5811_v3 = vadd.f32 %v5810_v32, %v5770_v33  ;;  %v5815_v18 = vmax.f32 %v5809_v55, 0.0 }
 0xb5f   :  { %v5772_v14 = vpop.f32.mrf.mxu0 }
 0xb60   :  { %v5816_v17 = vmax.f32 %v5811_v3, 0.0 }
 0xb62   :  { %v5817_v5 = vmax.f32 %v5815_v18, %v5816_v17 }
 0xb64   :  { %v5819_v20 = vcombine.high %v5817_v5, %v5817_v5  ;;  %v5826_v27 = vrot.slane %v5817_v5, %v10786_v62 }
 0xb66   :  { %v5833_v2 = vrot.slane %v5819_v20, %v10786_v62  ;;  %v5834_v28 = vcombine.high %v5826_v27, %v5826_v27  ;;  %v5840_v34 = vsel %vm2348_vm1, %v5826_v27, -inf  ;;  %v9442_v20 = vld [vmem:[#allocation26 + $0x38] sm:$0xff]  }
 0xb67   :  { %v5841_v53 = vrot.slane %v5840_v34, 4  ;;  %8775 = vmatpush3.bf16.msra.mxu1 %v9442_v20 }
 0xb68   :  { %v5835_v31 = vcombine.high %v5833_v2, %v5833_v2  ;;  %v5847_v6 = vsel %vm2348_vm1, %v5834_v28, -inf  ;;  %v5854_v12 = vsel %vm2348_vm1, %v5833_v2, -inf  ;;  %8776 = vmatprep.subr.bf16.mxu1 %v10164_v7 }
 0xb69   :  { %v5842_v29 = vmax.f32 %v5840_v34, %v5841_v53  ;;  %v5848_v38 = vrot.slane %v5847_v6, 4  ;;  %v5855_v13 = vrot.slane %v5854_v12, 4  ;;  %v9443_v34 = vld [vmem:[#allocation26 + $0x30] sm:$0xff]  }
 0xb6a   :  { %v5861_v15 = vsel %vm2348_vm1, %v5835_v31, -inf }
 0xb6b   :  { %v5843_v25 = vrot.slane %v5842_v29, 2  ;;  %v5849_v37 = vmax.f32 %v5847_v6, %v5848_v38  ;;  %v5856_v45 = vmax.f32 %v5854_v12, %v5855_v13  ;;  %v5862_v42 = vrot.slane %v5861_v15, 4  ;;  %8777 = vmatpush3.bf16.msra.mxu1 %v9443_v34  ;;  %v9445_v13 = vld [vmem:[#allocation26 + $0x20] sm:$0xff]  }
 0xb6c   :  { %8778 = vmatprep.subr.bf16.mxu1 %v10164_v7 }
 0xb6d   :  { %v5844_v54 = vmax.f32 %v5842_v29, %v5843_v25  ;;  %v5850_v32 = vrot.slane %v5849_v37, 2  ;;  %v5857_v41 = vrot.slane %v5856_v45, 2  ;;  %v5863_v52 = vmax.f32 %v5861_v15, %v5862_v42  ;;  %v9444_v29 = vld [vmem:[#allocation26 + $0x28] sm:$0xff]   ;;  %v9446_v15 = vld [vmem:[#allocation26 + $0x18] sm:$0xff]   ;;  %v9447_v25 = vld [vmem:[#allocation26 + $0x10] sm:$0xff]  }
 0xb6e   :  { %v9452_v42 = vld [vmem:[%s11800_s29 + $0x74] ss:$8 sps:$4 sm:$0xff]  }
 0xb6f   :  { %v5845_v56 = vrot.slane %v5844_v54, 1  ;;  %v5858_v57 = vmax.f32 %v5856_v45, %v5857_v41  ;;  %v5851_v59 = vmax.f32 %v5849_v37, %v5850_v32  ;;  %v5864_v35 = vrot.slane %v5863_v52, 2  ;;  %8779 = vmatpush3.bf16.msra.mxu1 %v9444_v29  ;;  %v9448_v37 = vld [vmem:[#allocation26 + $0x8] sm:$0xff]   ;;  %v9449_v45 = vld [vmem:[#allocation26] sm:$0xff]  }
 0xb70   :  { %8780 = vmatprep.subr.bf16.mxu1 %v10164_v7  ;;  %v5975_v32 = vld [vmem:[#allocation6] sm:$0xf] }
 0xb71   :  { %v5846_v63 = vmax.f32 %v5844_v54, %v5845_v56  ;;  %v5859_v61 = vrot.slane %v5858_v57, 1  ;;  %v5852_v36 = vrot.slane %v5851_v59, 1  ;;  %v5865_v10 = vmax.f32 %v5863_v52, %v5864_v35 }
 0xb73   :  { %v5853_v43 = vmax.f32 %v5851_v59, %v5852_v36  ;;  %v5866_v46 = vrot.slane %v5865_v10, 1  ;;  %v5860_v47 = vmax.f32 %v5858_v57, %v5859_v61  ;;  %v5868_v11 = vpack.c.bf16 %v5846_v63, %v5846_v63  ;;  %8781 = vmatpush3.bf16.msra.mxu1 %v9445_v13  ;;  %v5978_v57 = vld [vmem:[#allocation6 + $0x4] sm:$0xf] }
 0xb74   :  { %8782 = vmatprep.subr.bf16.mxu1 %v10164_v7  ;;  %v10166_v36 = vmov 1966171168  }
 0xb75   :  { %v5867_v50 = vmax.f32 %v5865_v10, %v5866_v46  ;;  %v5869_v9 = vpack.c.bf16 %v5853_v43, %v5853_v43  ;;  %v5870_v40 = vpack.c.bf16 %v5860_v47, %v5860_v47  ;;  %v5882_v19 = vrot.slane %v5868_v11, %v10786_v62 }
 0xb76   :  { %v5981_v48 = vunpack.c.l.b16 %v5868_v11  ;;  %v6489_v10 = vunpack.c.l.s4 %v10166_v36 }
 0xb77   :  { %v5871_v39 = vpack.c.bf16 %v5867_v50, %v5867_v50  ;;  %v5982_v30 = vunpack.c.l.b16 %v5870_v40  ;;  %v5889_v21 = vrot.slane %v5869_v9, %v10786_v62  ;;  %v5910_v1 = vrot.slane %v5882_v19, %v10786_v62  ;;  %8783 = vmatpush3.bf16.msra.mxu1 %v9446_v15 }
 0xb78   :  { %v5896_v44 = vrot.slane %v5870_v40, %v10786_v62  ;;  %v5986_v49 = vunpack.c.l.b16 %v5869_v9  ;;  %8784 = vmatprep.subr.bf16.mxu1 %v10164_v7  ;;  %v6490_v46 = vunpack.c.0.s8 %v6489_v10  ;;  %v8233_v10 = vld [vmem:[#allocation24] ss:$0 sm:$0xff] }
 0xb79   :  { %v5987_v51 = vunpack.c.l.b16 %v5871_v39  ;;  %v5917_v60 = vrot.slane %v5889_v21, %v10786_v62  ;;  %v5903_v58 = vrot.slane %v5871_v39, %v10786_v62  ;;  %v5983_v24 = vsel %vm11799_vm15, %v5982_v30, %v5981_v48 }
 0xb7a   :  { %v5932_v4 = vunpack.c.l.b16 %v5910_v1  ;;  %v5924_v16 = vrot.slane %v5896_v44, %v10786_v62  ;;  %v5984_v14 = vpack.c.b16 %v5983_v24, %v5983_v24  ;;  %v11507_v48 = vsub.s32 %v6490_v46, %v10678_v22 }
 0xb7b   :  { %v5988_v8 = vsel %vm11794_vm3, %v5987_v51, %v5986_v49  ;;  %v5933_v55 = vunpack.c.l.b16 %v5917_v60  ;;  %v5931_v33 = vrot.slane %v5903_v58, %v10786_v62  ;;  %8785 = vmatpush3.bf16.msra.mxu1 %v9447_v25 }
 0xb7c   :  { %v5989_v0 = vpack.c.b16 %v5988_v8, %v5988_v8  ;;  %v5934_v3 = vunpack.c.l.b16 %v5924_v16  ;;  %v5936_v18 = vrot.slane %v5932_v4, 7  ;;  %8786 = vmatprep.subr.bf16.mxu1 %v10164_v7 }
 0xb7d   :  { %v5937_v17 = vrot.slane %v5933_v55, 6  ;;  %v5935_v5 = vunpack.c.l.b16 %v5931_v33 }
 0xb7e   :  { %6158 = vmatprep.mubr.bf16.mxu0 %v5989_v0  ;;  %v5939_v2 = vrot.slane %v5934_v3, 7 }
 0xb7f   :  { %6159 = vmatmul.mubr.bf16.vlgmr.msra.gmra.mxu0 %v5984_v14  ;;  %v5938_v27 = vsel %vm551_vm5, %v5937_v17, %v5936_v18  ;;  %v5940_v28 = vrot.slane %v5935_v5, 6  ;;  %8787 = vmatpush3.bf16.msra.mxu1 %v9448_v37 }
 0xb80   :  { %v5942_v53 = vpack.c.b16 %v5938_v27, %v5938_v27  ;;  %8810 = vmatprep.mubr.msk.bf16.mxu0 %vm10165_vm4, %v10164_v7  ;;  %8788 = vmatprep.subr.bf16.mxu1 %v10164_v7 }
 0xb81   :  { %v5941_v31 = vsel %vm551_vm5, %v5940_v28, %v5939_v2  ;;  %vm5969_vm5 = vsmask.f32 1282 }
 0xb82   :  { %v5950_v6 = vrot.slane %v5942_v53, %v10786_v62  ;;  %v5943_v12 = vpack.c.b16 %v5941_v31, %v5941_v31  ;;  %vm5970_vm11 = vmand %vm595_vm0, %vm5969_vm5 }
 0xb83   :  { %8789 = vmatpush3.bf16.msra.mxu1 %v9449_v45  ;;  %vm5974_vm9 = vmor %vm5973_vm10, %vm5970_vm11 }
 0xb84   :  { %5958 = vrot.lane.b32.xlu0 %v5950_v6, %s10133_s7  ;;  %v5957_v38 = vrot.slane %v5943_v12, %v10786_v62  ;;  %7207 = vmatprep.subr.bf16.mxu1 %v9452_v42 }
 0xb86   :  { %5960 = vrot.lane.b32.xlu1 %v5957_v38, %s10133_s7  ;;  %s11801_s7 = sld [smem:[#allocation61_spill]] }
 0xbf6   :  { %v5959_v54 = vpop.permute.xlu0 %5958 }
 0xbf7   :  { %v5962_v41 = vrot.slane %v5959_v54, 6 }
 0xbf8   :  { %v5961_v52 = vpop.permute.xlu1 %5960 }
 0xbf9   :  { %v5964_v56 = vsel %vm3827_vm8, %v5962_v41, %v5959_v54  ;;  %v5963_v59 = vrot.slane %v5961_v52, 6 }
 0xbfa   :  { %v5976_v35 = vsel %vm5974_vm9, %v5964_v56, %v5975_v32 }
 0xbfb   :  { %5977 = vst [vmem:[#allocation6] sm:$0xf] %v5976_v35  ;;  %v5965_v63 = vsel %vm3827_vm8, %v5963_v59, %v5961_v52  ;;  %vm11802_vm8 = vmmov %vm11794_vm3 }
 0xbfc   :  { %v5979_v61 = vsel %vm5974_vm9, %v5965_v63, %v5978_v57 }
 0xbfd   :  { %5980 = vst [vmem:[#allocation6 + $0x4] sm:$0xf] %v5979_v61 }
 0xc02   :  { %v8268_v43 = vld.sshfl [vmem:[#allocation6] sm:$0x11 pattern:$0x76325410] }
 0xc03   :  { %v8270_v47 = vld.sshfl [vmem:[#allocation6] sm:$0x33 pattern:$0x76325410]  ;;  %v6408_v19 = vcombine.high %v8268_v43, %v8268_v43 }
 0xc04   :  { %v8269_v11 = vld.sshfl [vmem:[#allocation6 + $0x4] sm:$0x11 pattern:$0x76325410]  ;;  %v6426_v50 = vcombine.high %v8270_v47, %v8270_v47  ;;  %v6438_v9 = vshll.u32 %v8270_v47, 16  ;;  %v6436_v51 = vshrl.u32 %v8270_v47, 16 }
 0xc05   :  { %v8271_v40 = vld.sshfl [vmem:[#allocation6 + $0x4] sm:$0x33 pattern:$0x76325410]  ;;  %v6416_v1 = vcombine.high %v8269_v11, %v8269_v11  ;;  %v6485_v8 = vcombine.low %v8268_v43, %v6408_v19  ;;  %v9450_v19 = vld [vmem:[%s11800_s29 + $0x70] ss:$8 sps:$4 sm:$0xff]  }
 0xc06   :  { %v6434_v39 = vcombine.high %v8271_v40, %v8271_v40  ;;  %v6440_v30 = vrot.slane %v6438_v9, 1  ;;  %v6445_v21 = vshll.u32 %v6426_v50, 16  ;;  %v6452_v44 = vshll.u32 %v8271_v40, 16 }
 0xc07   :  { %v8272_v49 = vld.sshfl [vmem:[#allocation6] sm:$0x22 pattern:$0x76325410]  ;;  %v6443_v60 = vshrl.u32 %v6426_v50, 16  ;;  %v6450_v4 = vshrl.u32 %v8271_v40, 16  ;;  %v6525_v18 = vcombine.low %v8269_v11, %v6416_v1  ;;  %v6494_v34 = vrot.slane %v6485_v8, %v11507_v48 }
 0xc08   :  { %v6447_v58 = vrot.slane %v6445_v21, 1  ;;  %v6459_v24 = vshll.u32 %v6434_v39, 16  ;;  %v6454_v16 = vrot.slane %v6452_v44, 1  ;;  %v6472_v55 = vcombine.high %v8272_v49, %v8272_v49  ;;  %v9546_v1 = vld [vmem:[#allocation29 + $0x38] sm:$0xff]   ;;  %v9549_v8 = vld [vmem:[#allocation29 + $0x20] sm:$0xff]  }
 0xc09   :  { %v6441_v33 = vor.u32 %v6440_v30, %v6436_v51  ;;  %v6457_v3 = vshrl.u32 %v6434_v39, 16  ;;  %v8273_v17 = vld.sshfl [vmem:[#allocation6 + $0x4] sm:$0x22 pattern:$0x76325410]  ;;  %v6481_v5 = vrot.slane %v8272_v49, 1  ;;  %v6534_v38 = vrot.slane %v6525_v18, %v11507_v48  ;;  %8795 = vmatpush3.bf16.msra.mxu0 %v9546_v1 }
 0xc0a   :  { %v6448_v0 = vor.u32 %v6447_v58, %v6443_v60  ;;  %v6461_v14 = vrot.slane %v6459_v24, 1  ;;  %v6482_v22 = vrot.slane %v6472_v55, 1  ;;  %v6455_v20 = vor.u32 %v6454_v16, %v6450_v4  ;;  %v9455_v30 = vld [vmem:[%s11800_s29 + $0x64] ss:$8 sps:$4 sm:$0xff]   ;;  %v9453_v44 = vld [vmem:[%s11800_s29 + $0x60] ss:$8 sps:$4 sm:$0xff]   ;;  %8796 = vmatprep.subr.bf16.mxu0 %v10164_v7 }
 0xc0b   :  { %v6480_v28 = vcombine.high %v8273_v17, %v8273_v17  ;;  %v6483_v12 = vrot.slane %v8273_v17, 1  ;;  %v9458_v49 = vld [vmem:[%s11800_s29 + $0x54] ss:$8 sps:$4 sm:$0xff]   ;;  %v9456_v60 = vld [vmem:[%s11800_s29 + $0x50] ss:$8 sps:$4 sm:$0xff]  }
 0xc0c   :  { %v6462_v27 = vor.u32 %v6461_v14, %v6457_v3  ;;  %v6486_v2 = vcombine.low %v6441_v33, %v6448_v0  ;;  %v6487_v53 = vcombine.low %v6481_v5, %v6482_v22  ;;  %v9547_v51 = vld [vmem:[#allocation29 + $0x30] sm:$0xff]   ;;  %v9461_v58 = vld [vmem:[%s11800_s29 + $0x44] ss:$8 sps:$4 sm:$0xff]   ;;  %v9548_v24 = vld [vmem:[#allocation29 + $0x28] sm:$0xff]  }
 0xc0d   :  { %v6484_v29 = vrot.slane %v6480_v28, 1  ;;  %8797 = vmatpush3.bf16.msra.mxu0 %v9547_v51  ;;  %v9459_v4 = vld [vmem:[%s11800_s29 + $0x40] ss:$8 sps:$4 sm:$0xff]   ;;  %v9464_v16 = vld [vmem:[%s11800_s29 + $0x34] ss:$8 sps:$4 sm:$0xff]  }
 0xc0e   :  { %v6501_v31 = vrot.slane %v6486_v2, %v11507_v48  ;;  %v6526_v6 = vcombine.low %v6455_v20, %v6462_v27  ;;  %v6508_v25 = vrot.slane %v6487_v53, %v11507_v48  ;;  %8798 = vmatprep.subr.bf16.mxu0 %v10164_v7  ;;  %v9462_v55 = vld [vmem:[%s11800_s29 + $0x30] ss:$8 sps:$4 sm:$0xff]   ;;  %v9467_v33 = vld [vmem:[%s11800_s29 + $0x24] ss:$8 sps:$4 sm:$0xff]   ;;  %v9465_v3 = vld [vmem:[%s11800_s29 + $0x20] ss:$8 sps:$4 sm:$0xff]  }
 0xc0f   :  { %v6527_v37 = vcombine.low %v6483_v12, %v6484_v29  ;;  %v9550_v0 = vld [vmem:[#allocation29 + $0x18] sm:$0xff]   ;;  %v9470_v14 = vld [vmem:[%s11800_s29 + $0x14] ss:$8 sps:$4 sm:$0xff]   ;;  %v9468_v17 = vld [vmem:[%s11800_s29 + $0x10] ss:$8 sps:$4 sm:$0xff]  }
 0xc10   :  { %v6509_v13 = vcombine.low %v6494_v34, %v6501_v31  ;;  %v6541_v15 = vrot.slane %v6526_v6, %v11507_v48  ;;  %v6523_v41 = vrot.slane %v6508_v25, %v11507_v48  ;;  %v9551_v18 = vld [vmem:[#allocation29 + $0x10] sm:$0xff]   ;;  %v9473_v5 = vld [vmem:[%s11800_s29 + $0x4] ss:$8 sps:$4 sm:$0xff]   ;;  %v9552_v22 = vld [vmem:[#allocation29 + $0x8] sm:$0xff]  }
 0xc11   :  { %v6548_v42 = vrot.slane %v6527_v37, %v11507_v48  ;;  %8799 = vmatpush3.bf16.msra.mxu0 %v9548_v24  ;;  %v9471_v20 = vld [vmem:[%s11800_s29] ss:$8 sps:$4 sm:$0xff]   ;;  %v9476_v27 = vld [vmem:[%s11800_s29 + $0xf4] ss:$8 sps:$4 sm:$0xff]   ;;  %v9474_v2 = vld [vmem:[%s11800_s29 + $0xf0] ss:$8 sps:$4 sm:$0xff]  }
 0xc12   :  { %v6549_v45 = vcombine.low %v6534_v38, %v6541_v15  ;;  %v6516_v54 = vrot.slane %v6509_v13, %v11507_v48  ;;  %8800 = vmatprep.subr.bf16.mxu0 %v10164_v7  ;;  %v9479_v28 = vld [vmem:[%s11800_s29 + $0xe4] ss:$8 sps:$4 sm:$0xff]   ;;  %v9477_v34 = vld [vmem:[%s11800_s29 + $0xe0] ss:$8 sps:$4 sm:$0xff]   ;;  %v9482_v53 = vld [vmem:[%s11800_s29 + $0xd4] ss:$8 sps:$4 sm:$0xff]  }
 0xc13   :  { %v6563_v52 = vrot.slane %v6548_v42, %v11507_v48  ;;  %v9480_v31 = vld [vmem:[%s11800_s29 + $0xd0] ss:$8 sps:$4 sm:$0xff]   ;;  %v9485_v6 = vld [vmem:[%s11800_s29 + $0xc4] ss:$8 sps:$4 sm:$0xff]   ;;  %v9483_v12 = vld [vmem:[%s11800_s29 + $0xc0] ss:$8 sps:$4 sm:$0xff]  }
 0xc14   :  { %v6556_v32 = vrot.slane %v6549_v45, %v11507_v48  ;;  %v9488_v29 = vld [vmem:[%s11800_s29 + $0xb4] ss:$8 sps:$4 sm:$0xff]   ;;  %v9486_v38 = vld [vmem:[%s11800_s29 + $0xb0] ss:$8 sps:$4 sm:$0xff]   ;;  %v9491_v13 = vld [vmem:[%s11800_s29 + $0xa4] ss:$8 sps:$4 sm:$0xff]  }
 0xc15   :  { %v8275_v57 = vcombine.low %v6523_v41, %v6563_v52  ;;  %8801 = vmatpush3.bf16.msra.mxu0 %v9549_v8  ;;  %v9489_v15 = vld [vmem:[%s11800_s29 + $0xa0] ss:$8 sps:$4 sm:$0xff]   ;;  %v9494_v25 = vld [vmem:[%s11800_s29 + $0x94] ss:$8 sps:$4 sm:$0xff]   ;;  %v9492_v37 = vld [vmem:[%s11800_s29 + $0x90] ss:$8 sps:$4 sm:$0xff]  }
 0xc16   :  { %v8274_v56 = vcombine.low %v6516_v54, %v6556_v32  ;;  %8802 = vmatprep.subr.bf16.mxu0 %v10164_v7  ;;  %v9497_v45 = vld [vmem:[%s11800_s29 + $0x84] ss:$8 sps:$4 sm:$0xff]   ;;  %v9495_v42 = vld [vmem:[%s11800_s29 + $0x80] ss:$8 sps:$4 sm:$0xff]   ;;  %v9500_v54 = vld [vmem:[%s11800_s29 + $0x274] ss:$8 sps:$4 sm:$0xff]  }
 0xc17   :  { %v11521_v35 = vrot.slane %v8275_v57, %v11507_v48  ;;  %v9498_v41 = vld [vmem:[%s11800_s29 + $0x270] ss:$8 sps:$4 sm:$0xff]   ;;  %v9503_v52 = vld [vmem:[%s11800_s29 + $0x264] ss:$8 sps:$4 sm:$0xff]   ;;  %v9501_v57 = vld [vmem:[%s11800_s29 + $0x260] ss:$8 sps:$4 sm:$0xff]  }
 0xc18   :  { %v6681_v59 = vrot.slane %v8274_v56, %v11507_v48  ;;  %v9519_v1 = vld [vmem:[%s11800_s29 + $0x200] ss:$8 sps:$4 sm:$0xff]   ;;  %v9527_v51 = vld [vmem:[%s11800_s29 + $0x2e4] ss:$8 sps:$4 sm:$0xff]   ;;  %v9528_v24 = vld [vmem:[%s11800_s29 + $0x2d0] ss:$8 sps:$4 sm:$0xff]  }
 0xc19   :  { %v6704_v61 = vrot.slane %v11521_v35, %v11507_v48  ;;  %8803 = vmatpush3.bf16.msra.mxu0 %v9550_v0  ;;  %v6690_v32 = vcombine.high %v11521_v35, %v11521_v35  ;;  %v9536_v8 = vld [vmem:[%s11800_s29 + $0x2b4] ss:$8 sps:$4 sm:$0xff]   ;;  %v9537_v0 = vld [vmem:[%s11800_s29 + $0x2a0] ss:$8 sps:$4 sm:$0xff]  }
 0xc1a   :  { %v11524_v63 = vrot.slane %v6681_v59, %v11507_v48  ;;  %v6689_v9 = vcombine.high %v6681_v59, %v6681_v59  ;;  %8804 = vmatprep.subr.bf16.mxu0 %v10164_v7  ;;  %v9506_v59 = vld [vmem:[%s11800_s29 + $0x254] ss:$8 sps:$4 sm:$0xff]  }
 0xc1b   :  { %v6718_v56 = vrot.slane %v6690_v32, %v11507_v48  ;;  %v9580_v32 = vld [vmem:[%s11800_s29 + $0x1f4] ss:$8 sps:$4 sm:$0xff]  }
 0xc1c   :  { %v11531_v21 = vrot.slane %v6689_v9, %v11507_v48  ;;  %v9515_v9 = vld [vmem:[%s11800_s29 + $0x224] ss:$8 sps:$4 sm:$0xff]  }
 0xc1d   :  { %8805 = vmatpush3.bf16.msra.mxu0 %v9551_v18  ;;  %v9545_v18 = vld [vmem:[%s11800_s29 + $0x284] ss:$8 sps:$4 sm:$0xff]  }
 0xc1e   :  { %8806 = vmatprep.subr.bf16.mxu0 %v10164_v7  ;;  %v6720_v35 = vcombine.high %v11531_v21, %v11531_v21 }
 0xc21   :  { %8807 = vmatpush3.bf16.msra.mxu0 %v9552_v22 }
 0xc22   :  { %8808 = vmatprep.subr.bf16.mxu0 %v10164_v7 }
 0xc3f   :  { %v8643_v36 = vpop.f32.mrf.mxu0 }
 0xc41   :  { %v8644_v43 = vpop.f32.mrf.mxu0 }
 0xc42   :  { %v8645_v46 = vadd.f32 %v8644_v43, %v8643_v36  ;;  %v9504_v36 = vld [vmem:[%s11800_s29 + $0x250] ss:$8 sps:$4 sm:$0xff]   ;;  %v9509_v43 = vld [vmem:[%s11800_s29 + $0x244] ss:$8 sps:$4 sm:$0xff]  }
 0xc43   :  { %v8646_v47 = vpop.f32.mrf.mxu0 }
 0xc44   :  { %v6161_v11 = vadd.f32 %v8645_v46, %v8233_v10  ;;  %v9553_v10 = vld [vmem:[#allocation29] sm:$0xff]   ;;  %v9556_v46 = vld [vmem:[%s11800_s29 + $0x174] ss:$8 sps:$4 sm:$0xff]  }
 0xc45   :  { %v8647_v50 = vpop.f32.mrf.mxu0  ;;  %8809 = vmatpush3.bf16.msra.mxu0 %v9553_v10  ;;  %v9507_v47 = vld [vmem:[%s11800_s29 + $0x240] ss:$8 sps:$4 sm:$0xff]  }
 0xc46   :  { %v6166_v40 = vmax.f32 %v6161_v11, 0.0  ;;  %7248 = vmatprep.subr.bf16.mxu0 %v9556_v46  ;;  %v9512_v11 = vld [vmem:[%s11800_s29 + $0x234] ss:$8 sps:$4 sm:$0xff]   ;;  %v9510_v50 = vld [vmem:[%s11800_s29 + $0x230] ss:$8 sps:$4 sm:$0xff]  }
 0xc47   :  { %v9587_v10 = vld [vmem:[%s11800_s29 + $0x1c0] ss:$8 sps:$4 sm:$0xff]   ;;  %v9590_v46 = vld [vmem:[%s11800_s29 + $0x1b0] ss:$8 sps:$4 sm:$0xff]  }
 0xc48   :  { %v6167_v39 = vpack.c.bf16 %v6166_v40, %v6166_v40  ;;  %v9513_v40 = vld [vmem:[%s11800_s29 + $0x220] ss:$8 sps:$4 sm:$0xff]  }
 0xc4a   :  { %8791 = vmatmul.mubr.bf16.vlgmr.msra.gmra.mxu1 %v6167_v39  ;;  %v9516_v39 = vld [vmem:[%s11800_s29 + $0x210] ss:$8 sps:$4 sm:$0xff]  }
 0xc4b   :  { %7208 = vmatpush1.bf16.msra.mxu1 %v9450_v19  ;;  %7239 = vmatprep.mubr.bf16.mxu1 %v11531_v21  ;;  %v9518_v19 = vld [vmem:[%s11800_s29 + $0x214] ss:$8 sps:$4 sm:$0xff]  }
 0xc4c   :  { %7209 = vmatprep.subr.bf16.mxu1 %v9455_v30  ;;  %v9521_v30 = vld [vmem:[%s11800_s29 + $0x204] ss:$8 sps:$4 sm:$0xff]   ;;  %v9568_v21 = vld [vmem:[%s11800_s29 + $0x134] ss:$8 sps:$4 sm:$0xff]  }
 0xc4f   :  { %7210 = vmatpush1.bf16.msra.mxu1 %v9453_v44  ;;  %v9524_v44 = vld [vmem:[%s11800_s29 + $0x2f4] ss:$8 sps:$4 sm:$0xff]  }
 0xc50   :  { %7211 = vmatprep.subr.bf16.mxu1 %v9458_v49  ;;  %v9522_v49 = vld [vmem:[%s11800_s29 + $0x2f0] ss:$8 sps:$4 sm:$0xff]  }
 0xc53   :  { %7212 = vmatpush1.bf16.msra.mxu1 %v9456_v60  ;;  %v9525_v60 = vld [vmem:[%s11800_s29 + $0x2e0] ss:$8 sps:$4 sm:$0xff]  }
 0xc54   :  { %7213 = vmatprep.subr.bf16.mxu1 %v9461_v58  ;;  %v9530_v58 = vld [vmem:[%s11800_s29 + $0x2d4] ss:$8 sps:$4 sm:$0xff]  }
 0xc57   :  { %7214 = vmatpush1.bf16.msra.mxu1 %v9459_v4  ;;  %v9533_v4 = vld [vmem:[%s11800_s29 + $0x2c4] ss:$8 sps:$4 sm:$0xff]  }
 0xc58   :  { %7215 = vmatprep.subr.bf16.mxu1 %v9464_v16  ;;  %v9531_v16 = vld [vmem:[%s11800_s29 + $0x2c0] ss:$8 sps:$4 sm:$0xff]  }
 0xc5b   :  { %7216 = vmatpush1.bf16.msra.mxu1 %v9462_v55  ;;  %v9534_v55 = vld [vmem:[%s11800_s29 + $0x2b0] ss:$8 sps:$4 sm:$0xff]  }
 0xc5c   :  { %7217 = vmatprep.subr.bf16.mxu1 %v9467_v33  ;;  %v9539_v33 = vld [vmem:[%s11800_s29 + $0x2a4] ss:$8 sps:$4 sm:$0xff]  }
 0xc5f   :  { %7218 = vmatpush1.bf16.msra.mxu1 %v9465_v3  ;;  %v9542_v3 = vld [vmem:[%s11800_s29 + $0x294] ss:$8 sps:$4 sm:$0xff]  }
 0xc60   :  { %7219 = vmatprep.subr.bf16.mxu1 %v9470_v14  ;;  %v9540_v14 = vld [vmem:[%s11800_s29 + $0x290] ss:$8 sps:$4 sm:$0xff]  }
 0xc63   :  { %7220 = vmatpush1.bf16.msra.mxu1 %v9468_v17  ;;  %v9543_v17 = vld [vmem:[%s11800_s29 + $0x280] ss:$8 sps:$4 sm:$0xff]  }
 0xc64   :  { %7221 = vmatprep.subr.bf16.mxu1 %v9473_v5  ;;  %v8250_v5 = vld [vmem:[#allocation27] ss:$0 sm:$0xff] }
 0xc67   :  { %7222 = vmatpush1.bf16.msra.mxu1 %v9471_v20 }
 0xc68   :  { %7223 = vmatprep.subr.bf16.mxu1 %v9476_v27 }
 0xc6b   :  { %7224 = vmatpush2.bf16.msra.mxu1 %v9474_v2 }
 0xc6c   :  { %7225 = vmatprep.subr.bf16.mxu1 %v9479_v28 }
 0xc6f   :  { %7226 = vmatpush2.bf16.msra.mxu1 %v9477_v34  ;;  %v9554_v34 = vld [vmem:[%s11800_s29 + $0x170] ss:$8 sps:$4 sm:$0xff]  }
 0xc70   :  { %7227 = vmatprep.subr.bf16.mxu1 %v9482_v53 }
 0xc73   :  { %7228 = vmatpush2.bf16.msra.mxu1 %v9480_v31  ;;  %v9559_v31 = vld [vmem:[%s11800_s29 + $0x164] ss:$8 sps:$4 sm:$0xff]  }
 0xc74   :  { %7229 = vmatprep.subr.bf16.mxu1 %v9485_v6  ;;  %v9562_v6 = vld [vmem:[%s11800_s29 + $0x154] ss:$8 sps:$4 sm:$0xff]  }
 0xc77   :  { %7230 = vmatpush2.bf16.msra.mxu1 %v9483_v12  ;;  %v9560_v12 = vld [vmem:[%s11800_s29 + $0x150] ss:$8 sps:$4 sm:$0xff]  }
 0xc78   :  { %7231 = vmatprep.subr.bf16.mxu1 %v9488_v29  ;;  %v9565_v29 = vld [vmem:[%s11800_s29 + $0x144] ss:$8 sps:$4 sm:$0xff]  }
 0xc7b   :  { %7232 = vmatpush2.bf16.msra.mxu1 %v9486_v38  ;;  %v9563_v38 = vld [vmem:[%s11800_s29 + $0x140] ss:$8 sps:$4 sm:$0xff]  }
 0xc7c   :  { %7233 = vmatprep.subr.bf16.mxu1 %v9491_v13  ;;  %v9566_v13 = vld [vmem:[%s11800_s29 + $0x130] ss:$8 sps:$4 sm:$0xff]  }
 0xc7f   :  { %7234 = vmatpush2.bf16.msra.mxu1 %v9489_v15  ;;  %v9571_v15 = vld [vmem:[%s11800_s29 + $0x124] ss:$8 sps:$4 sm:$0xff]  }
 0xc80   :  { %7235 = vmatprep.subr.bf16.mxu1 %v9494_v25  ;;  %v9569_v25 = vld [vmem:[%s11800_s29 + $0x120] ss:$8 sps:$4 sm:$0xff]  }
 0xc83   :  { %7236 = vmatpush2.bf16.msra.mxu1 %v9492_v37  ;;  %v9574_v37 = vld [vmem:[%s11800_s29 + $0x114] ss:$8 sps:$4 sm:$0xff]  }
 0xc84   :  { %7237 = vmatprep.subr.bf16.mxu1 %v9497_v45  ;;  %v9572_v45 = vld [vmem:[%s11800_s29 + $0x110] ss:$8 sps:$4 sm:$0xff]  }
 0xc87   :  { %7238 = vmatpush2.bf16.msra.mxu1 %v9495_v42  ;;  %v9577_v42 = vld [vmem:[%s11800_s29 + $0x104] ss:$8 sps:$4 sm:$0xff]  }
 0xc88   :  { %7289 = vmatprep.subr.bf16.mxu1 %v9500_v54  ;;  %v9575_v54 = vld [vmem:[%s11800_s29 + $0x100] ss:$8 sps:$4 sm:$0xff]  }
 0xc8a   :  { %7240 = vmatmul.mubr.bf16.vlgmr.msra.gmra.mxu1 %v11524_v63 }
 0xc8b   :  { %7290 = vmatpush1.bf16.msra.mxu1 %v9498_v41  ;;  %7321 = vmatprep.mubr.bf16.mxu1 %v6718_v56  ;;  %v9578_v41 = vld [vmem:[%s11800_s29 + $0x1f0] ss:$8 sps:$4 sm:$0xff]   ;;  %v9581_v56 = vld [vmem:[%s11800_s29 + $0x1e0] ss:$8 sps:$4 sm:$0xff]  }
 0xc8c   :  { %7291 = vmatprep.subr.bf16.mxu1 %v9503_v52  ;;  %v9583_v52 = vld [vmem:[%s11800_s29 + $0x1e4] ss:$8 sps:$4 sm:$0xff]  }
 0xc8f   :  { %7292 = vmatpush1.bf16.msra.mxu1 %v9501_v57  ;;  %v9586_v57 = vld [vmem:[%s11800_s29 + $0x1d4] ss:$8 sps:$4 sm:$0xff]  }
 0xc90   :  { %7293 = vmatprep.subr.bf16.mxu1 %v9506_v59  ;;  %v9584_v59 = vld [vmem:[%s11800_s29 + $0x1d0] ss:$8 sps:$4 sm:$0xff]  }
 0xc93   :  { %7294 = vmatpush1.bf16.msra.mxu1 %v9504_v36  ;;  %v9589_v36 = vld [vmem:[%s11800_s29 + $0x1c4] ss:$8 sps:$4 sm:$0xff]  }
 0xc94   :  { %7295 = vmatprep.subr.bf16.mxu1 %v9509_v43  ;;  %v9592_v43 = vld [vmem:[%s11800_s29 + $0x1b4] ss:$8 sps:$4 sm:$0xff]  }
 0xc97   :  { %7296 = vmatpush1.bf16.msra.mxu1 %v9507_v47  ;;  %v9595_v47 = vld [vmem:[%s11800_s29 + $0x1a4] ss:$8 sps:$4 sm:$0xff]  }
 0xc98   :  { %7297 = vmatprep.subr.bf16.mxu1 %v9512_v11  ;;  %v9593_v11 = vld [vmem:[%s11800_s29 + $0x1a0] ss:$8 sps:$4 sm:$0xff]  }
 0xc9b   :  { %7298 = vmatpush1.bf16.msra.mxu1 %v9510_v50  ;;  %v9598_v50 = vld [vmem:[%s11800_s29 + $0x194] ss:$8 sps:$4 sm:$0xff]  }
 0xc9c   :  { %7299 = vmatprep.subr.bf16.mxu1 %v9515_v9  ;;  %v9596_v9 = vld [vmem:[%s11800_s29 + $0x190] ss:$8 sps:$4 sm:$0xff]  }
 0xc9f   :  { %7300 = vmatpush1.bf16.msra.mxu1 %v9513_v40  ;;  %v9601_v40 = vld [vmem:[%s11800_s29 + $0x184] ss:$8 sps:$4 sm:$0xff]  }
 0xca0   :  { %7301 = vmatprep.subr.bf16.mxu1 %v9518_v19 }
 0xca3   :  { %7302 = vmatpush1.bf16.msra.mxu1 %v9516_v39  ;;  %v9599_v39 = vld [vmem:[%s11800_s29 + $0x180] ss:$8 sps:$4 sm:$0xff]  }
 0xca4   :  { %7303 = vmatprep.subr.bf16.mxu1 %v9521_v30 }
 0xca7   :  { %7304 = vmatpush1.bf16.msra.mxu1 %v9519_v1 }
 0xca8   :  { %7305 = vmatprep.subr.bf16.mxu1 %v9524_v44  ;;  %v6719_v44 = vcombine.high %v11524_v63, %v11524_v63  ;;  %v9604_v63 = vld [vmem:[#allocation32 + $0x28] sm:$0xff]  }
 0xcab   :  { %7306 = vmatpush2.bf16.msra.mxu1 %v9522_v49 }
 0xcac   :  { %7307 = vmatprep.subr.bf16.mxu1 %v9527_v51 }
 0xcaf   :  { %7308 = vmatpush2.bf16.msra.mxu1 %v9525_v60 }
 0xcb0   :  { %7309 = vmatprep.subr.bf16.mxu1 %v9530_v58 }
 0xcb3   :  { %7310 = vmatpush2.bf16.msra.mxu1 %v9528_v24 }
 0xcb4   :  { %7311 = vmatprep.subr.bf16.mxu1 %v9533_v4  ;;  %v9602_v4 = vld [vmem:[#allocation32 + $0x38] sm:$0xff]  }
 0xcb7   :  { %7312 = vmatpush2.bf16.msra.mxu1 %v9531_v16  ;;  %v9603_v16 = vld [vmem:[#allocation32 + $0x30] sm:$0xff]  }
 0xcb8   :  { %7313 = vmatprep.subr.bf16.mxu1 %v9536_v8  ;;  %v9605_v8 = vld [vmem:[#allocation32 + $0x20] sm:$0xff]  }
 0xcbb   :  { %7314 = vmatpush2.bf16.msra.mxu1 %v9534_v55  ;;  %v9606_v55 = vld [vmem:[#allocation32 + $0x18] sm:$0xff]  }
 0xcbc   :  { %7315 = vmatprep.subr.bf16.mxu1 %v9539_v33  ;;  %v9607_v33 = vld [vmem:[#allocation32 + $0x10] sm:$0xff]  }
 0xcbf   :  { %7316 = vmatpush2.bf16.msra.mxu1 %v9537_v0  ;;  %v9608_v0 = vld [vmem:[#allocation32 + $0x8] sm:$0xff]  }
 0xcc0   :  { %7317 = vmatprep.subr.bf16.mxu1 %v9542_v3  ;;  %v9609_v3 = vld [vmem:[#allocation32] sm:$0xff]  }
 0xcc3   :  { %7318 = vmatpush2.bf16.msra.mxu1 %v9540_v14  ;;  %v8259_v14 = vld [vmem:[#allocation30] ss:$0 sm:$0xff] }
 0xcc4   :  { %7319 = vmatprep.subr.bf16.mxu1 %v9545_v18 }
 0xcc7   :  { %7320 = vmatpush2.bf16.msra.mxu1 %v9543_v17 }
 0xcc8   :  { %8854 = vmatprep.subr.bf16.mxu1 %v10164_v7 }
 0xcca   :  { %7322 = vmatmul.mubr.bf16.vlgmr.msra.gmra.mxu1 %v6704_v61  ;;  %v9557_v61 = vld [vmem:[%s11800_s29 + $0x160] ss:$8 sps:$4 sm:$0xff]  }
 0xccb   :  { %8870 = vmatprep.mubr.msk.bf16.mxu1 %vm10165_vm4, %v10164_v7 }
 0xd0a   :  { %v6273_v22 = vpop.f32.mrf.mxu1 }
 0xd0b   :  { %v6274_v20 = vadd.f32 %v8250_v5, %v6273_v22 }
 0xd0c   :  { %v8792_v27 = vpop.f32.mrf.mxu1 }
 0xd0d   :  { %v6279_v2 = vmax.f32 %v6274_v20, 0.0  ;;  %v6661_v27 = vld [vmem:[%s11801_s7] sm:$0x3] }
 0xd0e   :  { %v6276_v28 = vpop.f32.mrf.mxu1 }
 0xd0f   :  { %v6280_v53 = vpack.c.bf16 %v6279_v2, %v6279_v2  ;;  %v6666_v2 = vrot.slane %v6661_v27, %v10681_v23  ;;  %v6670_v28 = vrot.slane %v6661_v27, %v10685_v26 }
 0xd10   :  { %v8793_v48 = vpop.f32.mrf.mxu1 }
 0xd11   :  { %8811 = vmatmul.mubr.bf16.vlgmr.msra.gmra.mxu0 %v6280_v53 }
 0xd12   :  { %7249 = vmatpush1.bf16.msra.mxu0 %v9554_v34  ;;  %7280 = vmatprep.mubr.bf16.mxu0 %v6720_v35 }
 0xd13   :  { %7250 = vmatprep.subr.bf16.mxu0 %v9559_v31 }
 0xd16   :  { %7251 = vmatpush1.bf16.msra.mxu0 %v9557_v61 }
 0xd17   :  { %7252 = vmatprep.subr.bf16.mxu0 %v9562_v6 }
 0xd1a   :  { %7253 = vmatpush1.bf16.msra.mxu0 %v9560_v12 }
 0xd1b   :  { %7254 = vmatprep.subr.bf16.mxu0 %v9565_v29 }
 0xd1e   :  { %7255 = vmatpush1.bf16.msra.mxu0 %v9563_v38 }
 0xd1f   :  { %7256 = vmatprep.subr.bf16.mxu0 %v9568_v21 }
 0xd22   :  { %7257 = vmatpush1.bf16.msra.mxu0 %v9566_v13 }
 0xd23   :  { %7258 = vmatprep.subr.bf16.mxu0 %v9571_v15 }
 0xd26   :  { %7259 = vmatpush1.bf16.msra.mxu0 %v9569_v25 }
 0xd27   :  { %7260 = vmatprep.subr.bf16.mxu0 %v9574_v37 }
 0xd2a   :  { %7261 = vmatpush1.bf16.msra.mxu0 %v9572_v45 }
 0xd2b   :  { %7262 = vmatprep.subr.bf16.mxu0 %v9577_v42 }
 0xd2e   :  { %7263 = vmatpush1.bf16.msra.mxu0 %v9575_v54 }
 0xd2f   :  { %7264 = vmatprep.subr.bf16.mxu0 %v9580_v32 }
 0xd32   :  { %7265 = vmatpush2.bf16.msra.mxu0 %v9578_v41 }
 0xd33   :  { %7266 = vmatprep.subr.bf16.mxu0 %v9583_v52 }
 0xd36   :  { %7267 = vmatpush2.bf16.msra.mxu0 %v9581_v56 }
 0xd37   :  { %7268 = vmatprep.subr.bf16.mxu0 %v9586_v57 }
 0xd3a   :  { %7269 = vmatpush2.bf16.msra.mxu0 %v9584_v59 }
 0xd3b   :  { %7270 = vmatprep.subr.bf16.mxu0 %v9589_v36 }
 0xd3e   :  { %7271 = vmatpush2.bf16.msra.mxu0 %v9587_v10 }
 0xd3f   :  { %7272 = vmatprep.subr.bf16.mxu0 %v9592_v43 }
 0xd42   :  { %7273 = vmatpush2.bf16.msra.mxu0 %v9590_v46 }
 0xd43   :  { %7274 = vmatprep.subr.bf16.mxu0 %v9595_v47 }
 0xd46   :  { %7275 = vmatpush2.bf16.msra.mxu0 %v9593_v11 }
 0xd47   :  { %7276 = vmatprep.subr.bf16.mxu0 %v9598_v50 }
 0xd4a   :  { %v7241_v19 = vpop.f32.mrf.mxu1  ;;  %7277 = vmatpush2.bf16.msra.mxu0 %v9596_v9  ;;  %v9610_v9 = vld [vmem:[#allocation35 + $0x38] sm:$0xff]  }
 0xd4b   :  { %7278 = vmatprep.subr.bf16.mxu0 %v9601_v40  ;;  %v7242_v34 = vadd.f32 %v7241_v19, %v6666_v2  ;;  %v9611_v19 = vld [vmem:[#allocation35 + $0x30] sm:$0xff]  }
 0xd4c   :  { %v7243_v30 = vpop.f32.mrf.mxu1 }
 0xd4d   :  { %v7244_v31 = vadd.f32 %v7243_v30, %v6670_v28  ;;  %v9613_v30 = vld [vmem:[#allocation35 + $0x20] sm:$0xff]  }
 0xd4e   :  { %v7245_v1 = vpop.f32.mrf.mxu1  ;;  %7279 = vmatpush2.bf16.msra.mxu0 %v9599_v39  ;;  %v9612_v39 = vld [vmem:[#allocation35 + $0x28] sm:$0xff]  }
 0xd4f   :  { %8814 = vmatprep.subr.bf16.mxu0 %v10164_v7  ;;  %v9614_v1 = vld [vmem:[#allocation35 + $0x18] sm:$0xff]  }
 0xd50   :  { %v7246_v49 = vpop.f32.mrf.mxu1 }
 0xd51   :  { %7281 = vmatmul.mubr.bf16.vlgmr.msra.gmra.mxu0 %v6719_v44  ;;  %v9615_v44 = vld [vmem:[#allocation35 + $0x10] sm:$0xff]   ;;  %v9616_v49 = vld [vmem:[#allocation35 + $0x8] sm:$0xff]  }
 0xd52   :  { %8830 = vmatprep.mubr.msk.bf16.mxu0 %vm10165_vm4, %v10164_v7  ;;  %8815 = vmatpush3.bf16.msra.mxu0 %v9602_v4  ;;  %v9621_v4 = vld [vmem:[#allocation38 + $0x20] sm:$0xff]  }
 0xd53   :  { %8816 = vmatprep.subr.bf16.mxu0 %v10164_v7 }
 0xd56   :  { %8817 = vmatpush3.bf16.msra.mxu0 %v9603_v16  ;;  %v9622_v16 = vld [vmem:[#allocation38 + $0x18] sm:$0xff]  }
 0xd57   :  { %8818 = vmatprep.subr.bf16.mxu0 %v10164_v7 }
 0xd5a   :  { %8819 = vmatpush3.bf16.msra.mxu0 %v9604_v63  ;;  %v9623_v63 = vld [vmem:[#allocation38 + $0x10] sm:$0xff]  }
 0xd5b   :  { %8820 = vmatprep.subr.bf16.mxu0 %v10164_v7 }
 0xd5e   :  { %8821 = vmatpush3.bf16.msra.mxu0 %v9605_v8  ;;  %v8372_v8 = vld [vmem:[#allocation33] ss:$0 sm:$0xff] }
 0xd5f   :  { %8822 = vmatprep.subr.bf16.mxu0 %v10164_v7 }
 0xd62   :  { %8823 = vmatpush3.bf16.msra.mxu0 %v9606_v55 }
 0xd63   :  { %8824 = vmatprep.subr.bf16.mxu0 %v10164_v7 }
 0xd66   :  { %8825 = vmatpush3.bf16.msra.mxu0 %v9607_v33 }
 0xd67   :  { %8826 = vmatprep.subr.bf16.mxu0 %v10164_v7 }
 0xd6a   :  { %8827 = vmatpush3.bf16.msra.mxu0 %v9608_v0 }
 0xd6b   :  { %8828 = vmatprep.subr.bf16.mxu0 %v10164_v7 }
 0xd6e   :  { %8829 = vmatpush3.bf16.msra.mxu0 %v9609_v3 }
 0xd6f   :  { %8834 = vmatprep.subr.bf16.mxu0 %v10164_v7 }
 0xd8a   :  { %v7323_v51 = vpop.f32.mrf.mxu1 }
 0xd8c   :  { %v7325_v60 = vpop.f32.mrf.mxu1 }
 0xd8e   :  { %v7327_v58 = vpop.f32.mrf.mxu1 }
 0xd8f   :  { %v9619_v58 = vld [vmem:[#allocation38 + $0x30] sm:$0xff]  }
 0xd90   :  { %v7328_v24 = vpop.f32.mrf.mxu1 }
 0xd91   :  { %v9620_v24 = vld [vmem:[#allocation38 + $0x28] sm:$0xff]  }
 0xdd1   :  { %v6386_v18 = vpop.f32.mrf.mxu0 }
 0xdd2   :  { %v6387_v17 = vadd.f32 %v8259_v14, %v6386_v18 }
 0xdd3   :  { %v8812_v5 = vpop.f32.mrf.mxu0 }
 0xdd4   :  { %6392 = vst [vmem:[%s10360_s9] sm:$0x3] %v6387_v17  ;;  %v9624_v5 = vld [vmem:[#allocation38 + $0x8] sm:$0xff]  }
 0xdd5   :  { %v6389_v22 = vpop.f32.mrf.mxu0 }
 0xdd6   :  { %v9625_v22 = vld [vmem:[#allocation38] sm:$0xff]  }
 0xdd7   :  { %v8813_v20 = vpop.f32.mrf.mxu0 }
 0xdd8   :  { %v8381_v20 = vld [vmem:[#allocation36] ss:$0 sm:$0xff] }
 0xe11   :  { %v7282_v53 = vpop.f32.mrf.mxu0 }
 0xe12   :  { %v7283_v48 = vadd.f32 %v7282_v53, %v7242_v34 }
 0xe13   :  { %v7284_v35 = vpop.f32.mrf.mxu0 }
 0xe14   :  { %v7324_v61 = vadd.f32 %v7323_v51, %v7283_v48  ;;  %v7285_v6 = vadd.f32 %v7284_v35, %v7244_v31  ;;  %v9617_v51 = vld [vmem:[#allocation35] sm:$0xff]  }
 0xe15   :  { %v7286_v12 = vpop.f32.mrf.mxu0  ;;  %v8390_v35 = vld [vmem:[#allocation39] ss:$0 sm:$0xff] }
 0xe16   :  { %v7326_v29 = vadd.f32 %v7325_v60, %v7285_v6  ;;  %v7330_v21 = vmax.f32 %v7324_v61, 0.0  ;;  %v9618_v60 = vld [vmem:[#allocation38 + $0x38] sm:$0xff]  }
 0xe17   :  { %v7287_v38 = vpop.f32.mrf.mxu0  ;;  %8855 = vmatpush3.bf16.msra.mxu1 %v9618_v60 }
 0xe18   :  { %v7331_v13 = vmax.f32 %v7326_v29, 0.0  ;;  %8856 = vmatprep.subr.bf16.mxu1 %v10164_v7 }
 0xe1a   :  { %v7332_v15 = vmax.f32 %v7330_v21, %v7331_v13 }
 0xe1b   :  { %8857 = vmatpush3.bf16.msra.mxu1 %v9619_v58 }
 0xe1c   :  { %v7340_v25 = vrot.slane %v7332_v15, %v10786_v62  ;;  %8858 = vmatprep.subr.bf16.mxu1 %v10164_v7 }
 0xe1e   :  { %v7341_v37 = vcombine.high %v7340_v25, %v7340_v25  ;;  %v7344_v23 = vsel %vm2348_vm1, %v7340_v25, -inf }
 0xe1f   :  { %v7345_v45 = vrot.slane %v7344_v23, 4  ;;  %8859 = vmatpush3.bf16.msra.mxu1 %v9620_v24 }
 0xe20   :  { %v7351_v26 = vsel %vm2348_vm1, %v7341_v37, -inf  ;;  %8860 = vmatprep.subr.bf16.mxu1 %v10164_v7 }
 0xe21   :  { %v7346_v42 = vmax.f32 %v7344_v23, %v7345_v45  ;;  %v7352_v54 = vrot.slane %v7351_v26, 4 }
 0xe23   :  { %v7347_v32 = vrot.slane %v7346_v42, 2  ;;  %v7353_v41 = vmax.f32 %v7351_v26, %v7352_v54  ;;  %8861 = vmatpush3.bf16.msra.mxu1 %v9621_v4 }
 0xe24   :  { %8862 = vmatprep.subr.bf16.mxu1 %v10164_v7 }
 0xe25   :  { %v7348_v52 = vmax.f32 %v7346_v42, %v7347_v32  ;;  %v7354_v56 = vrot.slane %v7353_v41, 2 }
 0xe27   :  { %v7349_v57 = vrot.slane %v7348_v52, 1  ;;  %v7355_v59 = vmax.f32 %v7353_v41, %v7354_v56  ;;  %8863 = vmatpush3.bf16.msra.mxu1 %v9622_v16 }
 0xe28   :  { %8864 = vmatprep.subr.bf16.mxu1 %v10164_v7 }
 0xe29   :  { %v7350_v36 = vmax.f32 %v7348_v52, %v7349_v57  ;;  %v7356_v10 = vrot.slane %v7355_v59, 1 }
 0xe2b   :  { %v7357_v43 = vmax.f32 %v7355_v59, %v7356_v10  ;;  %v7358_v46 = vpack.c.bf16 %v7350_v36, %v7350_v36  ;;  %8865 = vmatpush3.bf16.msra.mxu1 %v9623_v63 }
 0xe2c   :  { %8866 = vmatprep.subr.bf16.mxu1 %v10164_v7 }
 0xe2d   :  { %v7359_v47 = vpack.c.bf16 %v7357_v43, %v7357_v43  ;;  %v7385_v62 = vunpack.c.l.b16 %v7358_v46 }
 0xe2f   :  { %v7386_v11 = vunpack.c.l.b16 %v7359_v47  ;;  %8867 = vmatpush3.bf16.msra.mxu1 %v9624_v5 }
 0xe30   :  { %8868 = vmatprep.subr.bf16.mxu1 %v10164_v7 }
 0xe31   :  { %v7387_v50 = vsel %vm11802_vm8, %v7386_v11, %v7385_v62 }
 0xe32   :  { %v7388_v40 = vpack.c.b16 %v7387_v50, %v7387_v50 }
 0xe33   :  { %8869 = vmatpush3.bf16.msra.mxu1 %v9625_v22 }
 0xe34   :  { %8831 = vmatmul.mubr.bf16.vlgmr.msra.gmra.mxu0 %v7388_v40 }
 0xe35   :  { %8835 = vmatpush3.bf16.msra.mxu0 %v9610_v9  ;;  %8850 = vmatprep.mubr.msk.bf16.mxu0 %vm10165_vm4, %v10164_v7 }
 0xe36   :  { %8836 = vmatprep.subr.bf16.mxu0 %v10164_v7 }
 0xe39   :  { %8837 = vmatpush3.bf16.msra.mxu0 %v9611_v19 }
 0xe3a   :  { %8838 = vmatprep.subr.bf16.mxu0 %v10164_v7 }
 0xe3d   :  { %8839 = vmatpush3.bf16.msra.mxu0 %v9612_v39 }
 0xe3e   :  { %8840 = vmatprep.subr.bf16.mxu0 %v10164_v7 }
 0xe41   :  { %8841 = vmatpush3.bf16.msra.mxu0 %v9613_v30 }
 0xe42   :  { %8842 = vmatprep.subr.bf16.mxu0 %v10164_v7 }
 0xe45   :  { %8843 = vmatpush3.bf16.msra.mxu0 %v9614_v1 }
 0xe46   :  { %8844 = vmatprep.subr.bf16.mxu0 %v10164_v7 }
 0xe49   :  { %8845 = vmatpush3.bf16.msra.mxu0 %v9615_v44 }
 0xe4a   :  { %8846 = vmatprep.subr.bf16.mxu0 %v10164_v7 }
 0xe4d   :  { %8847 = vmatpush3.bf16.msra.mxu0 %v9616_v49 }
 0xe4e   :  { %8848 = vmatprep.subr.bf16.mxu0 %v10164_v7 }
 0xe51   :  { %8849 = vmatpush3.bf16.msra.mxu0 %v9617_v51 }
 0xef4   :  { %v7472_v55 = vpop.f32.mrf.mxu0 }
 0xef5   :  { %v7473_v33 = vadd.f32 %v8372_v8, %v7472_v55 }
 0xef6   :  { %v8832_v0 = vpop.f32.mrf.mxu0 }
 0xef7   :  { %v7478_v3 = vmax.f32 %v7473_v33, 0.0 }
 0xef8   :  { %v7475_v14 = vpop.f32.mrf.mxu0 }
 0xef9   :  { %v7479_v18 = vpack.c.bf16 %v7478_v3, %v7478_v3 }
 0xefa   :  { %v8833_v17 = vpop.f32.mrf.mxu0 }
 0xefb   :  { %8851 = vmatmul.mubr.bf16.vlgmr.msra.gmra.mxu0 %v7479_v18 }
 0xfbb   :  { %v7585_v27 = vpop.f32.mrf.mxu0 }
 0xfbc   :  { %v7586_v2 = vadd.f32 %v8381_v20, %v7585_v27 }
 0xfbd   :  { %v8852_v28 = vpop.f32.mrf.mxu0 }
 0xfbe   :  { %v7591_v34 = vmax.f32 %v7586_v2, 0.0 }
 0xfbf   :  { %v7588_v53 = vpop.f32.mrf.mxu0 }
 0xfc0   :  { %v7592_v31 = vpack.c.bf16 %v7591_v34, %v7591_v34 }
 0xfc1   :  { %v8853_v48 = vpop.f32.mrf.mxu0 }
 0xfc2   :  { %8871 = vmatmul.mubr.bf16.vlgmr.msra.gmra.mxu1 %v7592_v31 }
0x1082   :  { %v7698_v61 = vpop.f32.mrf.mxu1 }
0x1083   :  { %v7699_v6 = vadd.f32 %v8390_v35, %v7698_v61 }
0x1084   :  { %v8872_v12 = vpop.f32.mrf.mxu1 }
0x1085   :  { %7704 = vst [vmem:[%s10365_s27] sm:$0x3] %v7699_v6 }
0x1086   :  { %v7701_v29 = vpop.f32.mrf.mxu1 }
0x1088   :  { %v8873_v38 = vpop.f32.mrf.mxu1 }
0x1089   :  { %7721 = vsyncpa [#allocation8], 1 }
0x108a   :  { %7722 = vsyncpa [#allocation10], 1 }
0x108b   :  { %7723 = vsyncpa [#allocation13], 1 }
0x108c   :  { %7724 = vsyncpa [#allocation16], 1 }
0x108d   :  { %7725 = vsyncpa [#allocation19], 1 }
0x108e   :  { %7726 = vsyncpa [#allocation22], 1 }
0x108f   :  { %7727 = vsyncpa [#allocation25], 1 }
0x1090   :  { %7728 = vsyncpa [#allocation28], 1 }
0x1091   :  { %7729 = vsyncpa [#allocation31], 1 }
0x1092   :  { %7730 = vsyncpa [#allocation34], 1 }
0x1093   :  { %7731 = vsyncpa [#allocation37], 1 }
0x1094   :  { %7732 = vsyncpa [#allocation40], 1 }

</bundles_post_ra>
